<compile_context>
chip_gen: v5e
topology: v5e:2x2
jax: 0.10.0
libtpu: 0.0.40
codegen_flags: <defaults>
</compile_context>

<pallas_src>
import jax
import jax.numpy as jnp
from jax.experimental import pallas as pl
from jax.experimental.pallas import tpu as pltpu

# ---- module dimensions (from Prosody.__init__) -------------------------------
D_IN = 512          # transformer_linear_pre.in_features
D_PRE = 1024 + 300  # transformer_linear_pre.out_features = 1324
D_TRANS = 1024      # transformer_linear_post.in_features
D_POST = 106        # transformer_linear_post.out_features
D_OUT = 5           # linear.out_features
LANE = 128          # TPU lane width; padded feature width for the 106/5 dims


def prosody_kernel(x_ref, wpre_ref, bpre_ref, wpost_ref, bpost_ref,
                   wlin_ref, blin_ref, out_ref):
    x = x_ref[...]                                           # (ts, 512) bf16

    # transformer_linear_pre restricted to its first 1024 output features:
    # (ts, 512) @ (512, 1024) -> f32 accumulate, then f32 bias add.
    h = jnp.dot(x, wpre_ref[...], preferred_element_type=jnp.float32)
    h = h + bpre_ref[...]                                    # (ts, 1024) f32

    # TODO(synk): Poly_Phoneme_Classifier.forward_train_polyphonic is an
    # external, undefined module (1324 -> 1024 features); stand-in keeps the
    # first 1024 features (the column slice is folded into the pre-sliced
    # w_pre/b_pre in the wrapper, so no compute is wasted on the extra 300).

    # transformer_linear_post: (ts, 1024) @ (1024, 128) + (1, 128)
    # (106 real output features, zero-padded to 128 lanes)
    h = jnp.dot(h.astype(jnp.bfloat16), wpost_ref[...],
                preferred_element_type=jnp.float32) + bpost_ref[...]

    # linear: (ts, 128) @ (128, 128) + (1, 128)
    # (5 real classes; padded bias columns are -1e30 so they drop out of softmax)
    logits = jnp.dot(h.astype(jnp.bfloat16), wlin_ref[...],
                     preferred_element_type=jnp.float32) + blin_ref[...]

    # numerically stable softmax over the last dim; divide via EUP reciprocal
    m = jnp.max(logits, axis=-1, keepdims=True)
    e = jnp.exp(logits - m)
    s = jnp.sum(e, axis=-1, keepdims=True)
    out_ref[...] = e * pl.reciprocal(s, approx=True)


def prosody_forward(x, params, *, seq_tile=256):
    """x: (S, 512) float32 post-BERT hidden states.  Returns (S, 5) softmax probs.

    `params` must come from prepare_params() (sliced / padded / bf16 weights).
    """
    S, _ = x.shape
    w_pre, b_pre, w_post, b_post, w_lin, b_lin = params

    # Pad ragged sequence lengths up to a multiple of the sequence tile.
    S_pad = int(pl.cdiv(S, seq_tile)) * seq_tile
    if S_pad != S:
        x = jnp.pad(x, ((0, S_pad - S), (0, 0)))
    x = x.astype(jnp.bfloat16)

    grid = (S_pad // seq_tile,)

    def resident(arr):
        # whole-array block, same block for every grid step (constant weights)
        return pl.BlockSpec(arr.shape, lambda i: (0,) * arr.ndim)

    out = pl.pallas_call(
        prosody_kernel,
        out_shape=jax.ShapeDtypeStruct((S_pad, LANE), jnp.float32),
        grid_spec=pltpu.PrefetchScalarGridSpec(
            num_scalar_prefetch=0,
            grid=grid,
            in_specs=[
                pl.BlockSpec((seq_tile, D_IN), lambda i: (i, 0)),
                resident(w_pre), resident(b_pre),
                resident(w_post), resident(b_post),
                resident(w_lin), resident(b_lin),
            ],
            out_specs=pl.BlockSpec((seq_tile, LANE), lambda i: (i, 0)),
        ),
        compiler_params=pltpu.CompilerParams(
            dimension_semantics=("parallel",),
        ),
    )(x, w_pre, b_pre, w_post, b_post, w_lin, b_lin)

    return out[:S, :D_OUT]


def init_params(key):
    """Deterministic synthetic parameters in PyTorch Linear shapes, pre-transposed to (in, out)."""
    k1, k2, k3, k4, k5, k6 = jax.random.split(key, 6)
    scale = 0.02
    w_pre = scale * jax.random.normal(k1, (D_IN, D_PRE), jnp.float32)
    b_pre = scale * jax.random.normal(k2, (1, D_PRE), jnp.float32)
    w_post = scale * jax.random.normal(k3, (D_TRANS, D_POST), jnp.float32)
    b_post = scale * jax.random.normal(k4, (1, D_POST), jnp.float32)
    w_lin = scale * jax.random.normal(k5, (D_POST, D_OUT), jnp.float32)
    b_lin = scale * jax.random.normal(k6, (1, D_OUT), jnp.float32)
    return (w_pre, b_pre, w_post, b_post, w_lin, b_lin)


def prepare_params(raw):
    """Slice / pad / cast the raw PyTorch-shaped params into kernel-ready form."""
    w_pre, b_pre, w_post, b_post, w_lin, b_lin = raw
    # Fold the classifier stand-in's column slice into linear_pre: keep only
    # the first 1024 output features (drops ~23% of the dominant matmul FLOPs).
    w_pre = w_pre[:, :D_TRANS].astype(jnp.bfloat16)           # (512, 1024)
    b_pre = b_pre[:, :D_TRANS].astype(jnp.float32)            # (1, 1024)
    # Zero-pad the 106-wide feature dim to 128 lanes.
    w_post = jnp.pad(w_post, ((0, 0), (0, LANE - D_POST))).astype(jnp.bfloat16)
    b_post = jnp.pad(b_post, ((0, 0), (0, LANE - D_POST))).astype(jnp.float32)
    # Final linear: pad K 106->128 with zero rows, N 5->128 with zero columns;
    # padded bias columns get -1e30 so exp(logit - max) == 0 for padded classes.
    w_lin = jnp.pad(w_lin, ((0, LANE - D_POST), (0, LANE - D_OUT))).astype(jnp.bfloat16)
    b_lin = jnp.pad(b_lin, ((0, 0), (0, LANE - D_OUT)),
                    constant_values=-1e30).astype(jnp.float32)
    return (w_pre, b_pre, w_post, b_post, w_lin, b_lin)


def prosody_ref(x, raw_params):
    """Pure-JAX reference (same bf16 matmul / f32 accumulate recipe)."""
    w_pre, b_pre, w_post, b_post, w_lin, b_lin = raw_params
    bf16, f32 = jnp.bfloat16, jnp.float32
    h = jnp.dot(x.astype(bf16), w_pre.astype(bf16), preferred_element_type=f32) + b_pre
    h = h[:, :D_TRANS]   # classifier stand-in: keep first 1024 features
    h = jnp.dot(h.astype(bf16), w_post.astype(bf16), preferred_element_type=f32) + b_post
    logits = jnp.dot(h.astype(bf16), w_lin.astype(bf16), preferred_element_type=f32) + b_lin
    return jax.nn.softmax(logits, axis=-1)


if __name__ == "__main__":
    key = jax.random.PRNGKey(0)
    kx, kp = jax.random.split(key)

    # TODO(synk): BertModel.from_pretrained is an external pretrained encoder;
    # the kernel takes its (seq, 512) hidden-state output directly as input.
    SEQ = 8
    x = jax.random.normal(kx, (SEQ, D_IN), jnp.float32)
    raw = init_params(kp)
    params = prepare_params(raw)

    p = jax.block_until_ready(prosody_forward(x, params))
    p_ref = prosody_ref(x, raw)
    assert p.shape == (SEQ, D_OUT)
    assert jnp.allclose(p, p_ref, atol=1e-2, rtol=1e-2), "mismatch vs JAX reference"
    assert jnp.allclose(jnp.sum(p, axis=-1), 1.0, atol=1e-2), "softmax rows must sum to 1"

    # Ragged, multi-tile case (exercises seq padding + grid > 1 across cores).
    SEQ2 = 300
    x2 = jax.random.normal(kx, (SEQ2, D_IN), jnp.float32)
    p2 = jax.block_until_ready(prosody_forward(x2, params))
    p2_ref = prosody_ref(x2, raw)
    assert p2.shape == (SEQ2, D_OUT)
    assert jnp.allclose(p2, p2_ref, atol=1e-2, rtol=1e-2), "mismatch vs JAX reference (ragged)"

    print("KERNEL_OK")
</pallas_src>

<mosaic_0001>
module attributes {stable_mosaic.version = 11 : i64} {
  func.func @prosody_kernel(%arg0: i32, %arg1: memref<256x512xbf16, #tpu.memory_space<vmem>>, %arg2: memref<512x1024xbf16, #tpu.memory_space<vmem>>, %arg3: memref<1x1024xf32, #tpu.memory_space<vmem>>, %arg4: memref<1024x128xbf16, #tpu.memory_space<vmem>>, %arg5: memref<1x128xf32, #tpu.memory_space<vmem>>, %arg6: memref<128x128xbf16, #tpu.memory_space<vmem>>, %arg7: memref<1x128xf32, #tpu.memory_space<vmem>>, %arg8: memref<256x128xf32, #tpu.memory_space<vmem>>) attributes {dimension_semantics = [#tpu.dimension_semantics<parallel>], iteration_bounds = array<i64: 1>, scalar_prefetch = 0 : i64, scratch_operands = 0 : i64, tpu.core_type = #tpu.core_type<tc>, window_params = [{transform_indices = @transform_0, window_bounds = array<i64: 256, 512>}, {pipeline_mode = #tpu.pipeline_mode<synchronous>, transform_indices = @transform_1, window_bounds = array<i64: 512, 1024>}, {pipeline_mode = #tpu.pipeline_mode<synchronous>, transform_indices = @transform_2, window_bounds = array<i64: 1, 1024>}, {pipeline_mode = #tpu.pipeline_mode<synchronous>, transform_indices = @transform_3, window_bounds = array<i64: 1024, 128>}, {pipeline_mode = #tpu.pipeline_mode<synchronous>, transform_indices = @transform_4, window_bounds = array<i64: 1, 128>}, {pipeline_mode = #tpu.pipeline_mode<synchronous>, transform_indices = @transform_5, window_bounds = array<i64: 128, 128>}, {pipeline_mode = #tpu.pipeline_mode<synchronous>, transform_indices = @transform_6, window_bounds = array<i64: 1, 128>}, {transform_indices = @transform_7, window_bounds = array<i64: 256, 128>}]} {
    %c0 = arith.constant 0 : index
    %c0_0 = arith.constant 0 : index
    %0 = vector.load %arg1[%c0, %c0_0] : memref<256x512xbf16, #tpu.memory_space<vmem>>, vector<256x512xbf16>
    %c0_1 = arith.constant 0 : index
    %c0_2 = arith.constant 0 : index
    %1 = vector.load %arg2[%c0_1, %c0_2] : memref<512x1024xbf16, #tpu.memory_space<vmem>>, vector<512x1024xbf16>
    %cst = arith.constant dense<0.000000e+00> : vector<256x1024xf32>
    %2 = tpu.matmul %0, %1, %cst {dimension_numbers = #tpu.dot_dimension_numbers<[1], [0], [0], [1], [0, 0, 1, 1], [], []>} : vector<256x512xbf16>, vector<512x1024xbf16>, vector<256x1024xf32> -> vector<256x1024xf32>
    %c0_3 = arith.constant 0 : index
    %c0_4 = arith.constant 0 : index
    %3 = vector.load %arg3[%c0_3, %c0_4] : memref<1x1024xf32, #tpu.memory_space<vmem>>, vector<1x1024xf32>
    %4 = vector.broadcast %3 : vector<1x1024xf32> to vector<256x1024xf32>
    %5 = arith.addf %2, %4 : vector<256x1024xf32>
    %6 = arith.truncf %5 : vector<256x1024xf32> to vector<256x1024xbf16>
    %c0_5 = arith.constant 0 : index
    %c0_6 = arith.constant 0 : index
    %7 = vector.load %arg4[%c0_5, %c0_6] : memref<1024x128xbf16, #tpu.memory_space<vmem>>, vector<1024x128xbf16>
    %cst_7 = arith.constant dense<0.000000e+00> : vector<256x128xf32>
    %8 = tpu.matmul %6, %7, %cst_7 {dimension_numbers = #tpu.dot_dimension_numbers<[1], [0], [0], [1], [0, 0, 1, 1], [], []>} : vector<256x1024xbf16>, vector<1024x128xbf16>, vector<256x128xf32> -> vector<256x128xf32>
    %c0_8 = arith.constant 0 : index
    %c0_9 = arith.constant 0 : index
    %9 = vector.load %arg5[%c0_8, %c0_9] : memref<1x128xf32, #tpu.memory_space<vmem>>, vector<1x128xf32>
    %10 = vector.broadcast %9 : vector<1x128xf32> to vector<256x128xf32>
    %11 = arith.addf %8, %10 : vector<256x128xf32>
    %12 = arith.truncf %11 : vector<256x128xf32> to vector<256x128xbf16>
    %c0_10 = arith.constant 0 : index
    %c0_11 = arith.constant 0 : index
    %13 = vector.load %arg6[%c0_10, %c0_11] : memref<128x128xbf16, #tpu.memory_space<vmem>>, vector<128x128xbf16>
    %cst_12 = arith.constant dense<0.000000e+00> : vector<256x128xf32>
    %14 = tpu.matmul %12, %13, %cst_12 {dimension_numbers = #tpu.dot_dimension_numbers<[1], [0], [0], [1], [0, 0, 1, 1], [], []>} : vector<256x128xbf16>, vector<128x128xbf16>, vector<256x128xf32> -> vector<256x128xf32>
    %c0_13 = arith.constant 0 : index
    %c0_14 = arith.constant 0 : index
    %15 = vector.load %arg7[%c0_13, %c0_14] : memref<1x128xf32, #tpu.memory_space<vmem>>, vector<1x128xf32>
    %16 = vector.broadcast %15 : vector<1x128xf32> to vector<256x128xf32>
    %17 = arith.addf %14, %16 : vector<256x128xf32>
    %cst_15 = arith.constant dense<0xFF800000> : vector<256xf32>
    %18 = vector.multi_reduction <maximumf>, %17, %cst_15 [1] : vector<256x128xf32> to vector<256xf32>
    %19 = vector.shape_cast %18 : vector<256xf32> to vector<256x1xf32>
    %20 = vector.broadcast %19 : vector<256x1xf32> to vector<256x128xf32>
    %21 = arith.subf %17, %20 : vector<256x128xf32>
    %22 = math.exp %21 : vector<256x128xf32>
    %cst_16 = arith.constant dense<0.000000e+00> : vector<256xf32>
    %23 = vector.multi_reduction <add>, %22, %cst_16 [1] : vector<256x128xf32> to vector<256xf32>
    %24 = vector.shape_cast %23 : vector<256xf32> to vector<256x1xf32>
    %25 = tpu.reciprocal %24 {approx = true} : vector<256x1xf32> -> vector<256x1xf32>
    %26 = vector.broadcast %25 : vector<256x1xf32> to vector<256x128xf32>
    %27 = arith.mulf %22, %26 : vector<256x128xf32>
    %c0_17 = arith.constant 0 : index
    %c0_18 = arith.constant 0 : index
    %28 = vector.load %arg8[%c0_17, %c0_18] : memref<256x128xf32, #tpu.memory_space<vmem>>, vector<256x128xf32>
    tpu.vector_store %arg8[%c0_17, %c0_18], %27 {strides = array<i32>} : memref<256x128xf32, #tpu.memory_space<vmem>>, vector<256x128xf32>,
    return
  }
  func.func @transform_0(%arg0: i32) -> (i32, i32) {
    %c0_i32 = arith.constant 0 : i32
    %c0_i32_0 = arith.constant 0 : i32
    return %arg0, %c0_i32 : i32, i32
  }
  func.func @transform_1(%arg0: i32) -> (i32, i32) {
    %c0_i32 = arith.constant 0 : i32
    %c0_i32_0 = arith.constant 0 : i32
    %c0_i32_1 = arith.constant 0 : i32
    return %c0_i32, %c0_i32_0 : i32, i32
  }
  func.func @transform_2(%arg0: i32) -> (i32, i32) {
    %c0_i32 = arith.constant 0 : i32
    %c0_i32_0 = arith.constant 0 : i32
    %c0_i32_1 = arith.constant 0 : i32
    return %c0_i32, %c0_i32_0 : i32, i32
  }
  func.func @transform_3(%arg0: i32) -> (i32, i32) {
    %c0_i32 = arith.constant 0 : i32
    %c0_i32_0 = arith.constant 0 : i32
    %c0_i32_1 = arith.constant 0 : i32
    return %c0_i32, %c0_i32_0 : i32, i32
  }
  func.func @transform_4(%arg0: i32) -> (i32, i32) {
    %c0_i32 = arith.constant 0 : i32
    %c0_i32_0 = arith.constant 0 : i32
    %c0_i32_1 = arith.constant 0 : i32
    return %c0_i32, %c0_i32_0 : i32, i32
  }
  func.func @transform_5(%arg0: i32) -> (i32, i32) {
    %c0_i32 = arith.constant 0 : i32
    %c0_i32_0 = arith.constant 0 : i32
    %c0_i32_1 = arith.constant 0 : i32
    return %c0_i32, %c0_i32_0 : i32, i32
  }
  func.func @transform_6(%arg0: i32) -> (i32, i32) {
    %c0_i32 = arith.constant 0 : i32
    %c0_i32_0 = arith.constant 0 : i32
    %c0_i32_1 = arith.constant 0 : i32
    return %c0_i32, %c0_i32_0 : i32, i32
  }
  func.func @transform_7(%arg0: i32) -> (i32, i32) {
    %c0_i32 = arith.constant 0 : i32
    %c0_i32_0 = arith.constant 0 : i32
    return %arg0, %c0_i32 : i32, i32
  }
}

</mosaic_0001>

<bundles_post_ra>
// kernel: tpu_custom_call.1
= control target key start
LH: loop header
LB: loop body
LE: loop exit
PB: predicated region body
PF: predicated region fallthrough
CT: control target
= control target key end

     0   :  { %12 = vsyncpa [#allocation3], 0  ;;  %s12517_s0 = inlined_call_operand.hbm [shape: bf16[256,512], index: 0, kind: input, shape index: {}]   ;;  %s12518_s1 = inlined_call_operand.hbm [shape: bf16[512,1024], index: 1, kind: input, shape index: {}]   ;;  %s12519_s2 = inlined_call_operand.hbm [shape: f32[1,1024], index: 2, kind: input, shape index: {}]   ;;  %s12520_s3 = inlined_call_operand.hbm [shape: bf16[1024,128], index: 3, kind: input, shape index: {}]   ;;  %s12521_s4 = inlined_call_operand.vmem [shape: f32[1,128], index: 4, kind: input, shape index: {}]   ;;  %s12522_s5 = inlined_call_operand.hbm [shape: bf16[128,128], index: 5, kind: input, shape index: {}]   ;;  %s12523_s6 = inlined_call_operand.vmem [shape: f32[1,128], index: 6, kind: input, shape index: {}]   ;;  %s12524_s7 = inlined_call_operand.hbm [shape: f32[256,128], index: 7, kind: output, shape index: {}]  }
   0x1   :  { %13 = vsyncpa [#allocation6], 0 }
   0x2   :  { %14 = vsyncpa [#allocation9], 0  ;;  %s33_s26 = sshll.u32 %s12518_s1, 4  ;;  %s34_s26 = int_to_ptr.hbm [resolvable:$true] %s33_s26 }
   0x3   :  { %15 = vsyncpa [#allocation4], 0  ;;  %s9043_s27 = smov [#allocation5]   ;;  %s57_s8 = sshll.u32 %s12520_s3, 4  ;;  %s58_s8 = int_to_ptr.hbm [resolvable:$true] %s57_s8 }
   0x4   :  { %s35_s28 = sshll.u32 %s9043_s27, 4  ;;  %s9044_s9 = smov 512   ;;  %s36_s28 = int_to_ptr.vmem [resolvable:$true] %s35_s28 }
   0x5   :  { %s9045_s10 = smov 32   ;;  %s9046_s11 = smov [#allocation8]  }
   0x6   :  { %41 = dma.hbm_to_vmem [thread:$0]  %s34_s26, 32768, %s36_s28, [#allocation6], %s9044_s9, %s9044_s9, %s9045_s10  }
   0x7   :  { %s59_s12 = sshll.u32 %s9046_s11, 4  ;;  %s9047_s13 = smov 64   ;;  %s60_s12 = int_to_ptr.vmem [resolvable:$true] %s59_s12 }
   0x8   :  { %s9048_s14 = smov 4   ;;  %s20_s16 = sshll.u32 %s12517_s0, 4  ;;  %s21_s16 = int_to_ptr.hbm [resolvable:$true] %s20_s16 }
   0x9   :  { %65 = dma.hbm_to_vmem [thread:$0]  %s58_s8, 8192, %s60_s12, [#allocation9], %s9047_s13, %s9047_s13, %s9048_s14  }
   0xa   :  { %s9049_s17 = smov [#allocation2]   ;;  %s47_s20 = sshll.u32 %s12519_s2, 4  ;;  %s48_s20 = int_to_ptr.hbm [resolvable:$true] %s47_s20 }
   0xb   :  { %s22_s18 = sshll.u32 %s9049_s17, 4  ;;  %s9050_s21 = smov 256   ;;  %s23_s18 = int_to_ptr.vmem [resolvable:$true] %s22_s18 }
   0xc   :  { %s9051_s22 = smov 16   ;;  %s9052_s23 = smov [#allocation7]  }
   0xd   :  { %28 = dma.hbm_to_vmem [thread:$0]  %s21_s16, 8192, %s23_s18, [#allocation3], %s9050_s21, %s9050_s21, %s9051_s22  }
   0xe   :  { %s49_s24 = sshll.u32 %s9052_s23, 4  ;;  %s72_s27 = sshll.u32 %s12522_s5, 4  ;;  %s50_s24 = int_to_ptr.vmem [resolvable:$true] %s49_s24  ;;  %s73_s27 = int_to_ptr.hbm [resolvable:$true] %s72_s27 }
   0xf   :  { %52 = dma.hbm_to_vmem [thread:$0]  %s48_s20, 128, %s50_s24, [#allocation6]  }
  0x10   :  { %s9053_s0 = smov [#allocation10]  }
  0x11   :  { %s74_s28 = sshll.u32 %s9053_s0, 4  ;;  %s75_s28 = int_to_ptr.vmem [resolvable:$true] %s74_s28 }
  0x12   :  { %80 = dma.hbm_to_vmem [thread:$0]  %s73_s27, 1024, %s75_s28, [#allocation9], %s9047_s13, %s9047_s13, %s9048_s14  }
  0x13   :  { %9035 = dma.done.wait [#allocation3], 8192  }
  0x14   :  { %9036 = vsyncadd [#allocation3], 4294959104 }
  0x15   :  { %9037 = dma.done.wait [#allocation6], 32896  }
  0x16   :  { %9038 = vsyncadd [#allocation6], 4294934400 }
  0x17   :  { %9039 = dma.done.wait [#allocation9], 9216  }
  0x18   :  { %9040 = vsyncadd [#allocation9], 4294958080  ;;  %v7241_v0 = vld [vmem:[#allocation5 + $0x1c0] sm:$0xf]  ;;  %v8329_v24 = vld [vmem:[#allocation2 + $0xc] sm:$0xf0] }
  0x19   :  { %v8451_v1 = vld [vmem:[#allocation5 + $0x1dc] sm:$0xf0]  ;;  %v8345_v31 = vld [vmem:[#allocation2 + $0x8c] sm:$0xf0]  ;;  %v8447_v57 = vld [vmem:[#allocation5 + $0x1c4] sm:$0xf] }
  0x1a   :  { %v7209_v2 = vld [vmem:[#allocation5 + $0x180] sm:$0xf]  ;;  %v7242_v3 = vor.u32 %v8451_v1, %v7241_v0  ;;  %v8361_v33 = vld [vmem:[#allocation2 + $0x10c] sm:$0xf0]  ;;  %v7243_v58 = vld [vmem:[#allocation5 + $0x1e0] sm:$0xf0] }
  0x1b   :  { %v8443_v4 = vld [vmem:[#allocation5 + $0x19c] sm:$0xf0]  ;;  %v8377_v35 = vld [vmem:[#allocation2 + $0x18c] sm:$0xf0]  ;;  %v7246_v59 = vor.u32 %v8447_v57, %v7243_v58  ;;  %s6744_s10 = sshll.u32 %s12524_s7, 4  ;;  %s9055_s11 = smov 128   ;;  %s6745_s10 = int_to_ptr.hbm [resolvable:$true] %s6744_s10 }
  0x1c   :  { %2041 = vmatpush.bf16.msra.mxu0 %v7242_v3  ;;  %8719 = vmatpush.bf16.msra.mxu1 %v7242_v3  ;;  %v7210_v5 = vor.u32 %v8443_v4, %v7209_v2  ;;  %v7177_v6 = vld [vmem:[#allocation5 + $0x140] sm:$0xf]  ;;  %v8439_v2 = vld [vmem:[#allocation5 + $0x184] sm:$0xf]  ;;  %s9056_s12 = smov 8  }
  0x1d   :  { %8720 = vmatpush.bf16.msra.mxu2 %v7242_v3  ;;  %8721 = vmatpush.bf16.msra.mxu3 %v7242_v3  ;;  %v8435_v7 = vld [vmem:[#allocation5 + $0x15c] sm:$0xf0]  ;;  %v7211_v3 = vld [vmem:[#allocation5 + $0x1a0] sm:$0xf0] }
  0x1e   :  { %v7178_v8 = vor.u32 %v8435_v7, %v7177_v6  ;;  %v7145_v9 = vld [vmem:[#allocation5 + $0x100] sm:$0xf]  ;;  %v7214_v7 = vor.u32 %v8439_v2, %v7211_v3  ;;  %v7083_v2 = vld [vmem:[#allocation5 + $0xa0] sm:$0xf0] }
  0x1f   :  { %v8427_v10 = vld [vmem:[#allocation5 + $0x11c] sm:$0xf0] }
  0x20   :  { %2042 = vmatpush.bf16.msra.mxu0 %v7210_v5  ;;  %8722 = vmatpush.bf16.msra.mxu1 %v7210_v5  ;;  %v7146_v11 = vor.u32 %v8427_v10, %v7145_v9  ;;  %v7113_v12 = vld [vmem:[#allocation5 + $0xc0] sm:$0xf]  ;;  %v7179_v9 = vld [vmem:[#allocation5 + $0x160] sm:$0xf0] }
  0x21   :  { %8723 = vmatpush.bf16.msra.mxu2 %v7210_v5  ;;  %8724 = vmatpush.bf16.msra.mxu3 %v7210_v5  ;;  %v8419_v13 = vld [vmem:[#allocation5 + $0xdc] sm:$0xf0] }
  0x22   :  { %v7114_v14 = vor.u32 %v8419_v13, %v7113_v12  ;;  %v7081_v15 = vld [vmem:[#allocation5 + $0x80] sm:$0xf]  ;;  %v8333_v12 = vld [vmem:[#allocation2 + $0x2c] sm:$0xf0] }
  0x23   :  { %v8411_v16 = vld [vmem:[#allocation5 + $0x9c] sm:$0xf0] }
  0x24   :  { %2043 = vmatpush.bf16.msra.mxu0 %v7178_v8  ;;  %8725 = vmatpush.bf16.msra.mxu1 %v7178_v8  ;;  %v7082_v17 = vor.u32 %v8411_v16, %v7081_v15  ;;  %v7049_v18 = vld [vmem:[#allocation5 + $0x40] sm:$0xf] }
  0x25   :  { %8726 = vmatpush.bf16.msra.mxu2 %v7178_v8  ;;  %8727 = vmatpush.bf16.msra.mxu3 %v7178_v8  ;;  %v8403_v19 = vld [vmem:[#allocation5 + $0x5c] sm:$0xf0]  ;;  %v8431_v8 = vld [vmem:[#allocation5 + $0x144] sm:$0xf] }
  0x26   :  { %v7050_v20 = vor.u32 %v8403_v19, %v7049_v18  ;;  %v7017_v21 = vld [vmem:[#allocation5] sm:$0xf] }
  0x27   :  { %v8395_v22 = vld [vmem:[#allocation5 + $0x1c] sm:$0xf0] }
  0x28   :  { %2044 = vmatpush.bf16.msra.mxu0 %v7146_v11  ;;  %8728 = vmatpush.bf16.msra.mxu1 %v7146_v11  ;;  %v6761_v23 = vld [vmem:[#allocation2] sm:$0xf]  ;;  %v7018_v29 = vor.u32 %v8395_v22, %v7017_v21 }
  0x29   :  { %8729 = vmatpush.bf16.msra.mxu2 %v7146_v11  ;;  %8730 = vmatpush.bf16.msra.mxu3 %v7146_v11  ;;  %v7753_v25 = vld [vmem:[#allocation5 + $0x5c0] sm:$0xf]  ;;  %v9112_v41 = vor.u32 %v8329_v24, %v6761_v23  ;;  %v7182_v23 = vor.u32 %v8431_v8, %v7179_v9  ;;  %v8399_v9 = vld [vmem:[#allocation5 + $0x44] sm:$0xf] }
  0x2a   :  { %v8579_v26 = vld [vmem:[#allocation5 + $0x5dc] sm:$0xf0] }
  0x2b   :  { %v8009_v27 = vld [vmem:[#allocation5 + $0x7c0] sm:$0xf]  ;;  %v7754_v36 = vor.u32 %v8579_v26, %v7753_v25  ;;  %v8365_v25 = vld [vmem:[#allocation2 + $0x12c] sm:$0xf0] }
  0x2c   :  { %2045 = vmatpush.bf16.msra.mxu0 %v7114_v14  ;;  %8731 = vmatpush.bf16.msra.mxu1 %v7114_v14  ;;  %v8643_v28 = vld [vmem:[#allocation5 + $0x7dc] sm:$0xf0] }
  0x2d   :  { %8732 = vmatpush.bf16.msra.mxu2 %v7114_v14  ;;  %8733 = vmatpush.bf16.msra.mxu3 %v7114_v14  ;;  %v6825_v30 = vld [vmem:[#allocation2 + $0x80] sm:$0xf]  ;;  %v8010_v37 = vor.u32 %v8643_v28, %v8009_v27  ;;  %v8349_v14 = vld [vmem:[#allocation2 + $0xac] sm:$0xf0] }
  0x2e   :  { %v6889_v32 = vld [vmem:[#allocation2 + $0x100] sm:$0xf]  ;;  %v9114_v42 = vor.u32 %v8345_v31, %v6825_v30  ;;  %v8381_v27 = vld [vmem:[#allocation2 + $0x1ac] sm:$0xf0] }
  0x2f   :  { %v6953_v34 = vld [vmem:[#allocation2 + $0x180] sm:$0xf]  ;;  %v9116_v46 = vor.u32 %v8361_v33, %v6889_v32 }
  0x30   :  { %2046 = vmatpush.bf16.msra.mxu0 %v7082_v17  ;;  %8734 = vmatpush.bf16.msra.mxu1 %v7082_v17  ;;  %v7497_v38 = vld [vmem:[#allocation5 + $0x3c0] sm:$0xf]  ;;  %12861 = vst [vmem:[#allocation16_spill] sm:$0xff] %v9114_v42  ;;  %v9118_v47 = vor.u32 %v8377_v35, %v6953_v34  ;;  %v8423_v34 = vld [vmem:[#allocation5 + $0x104] sm:$0xf] }
  0x31   :  { %8735 = vmatpush.bf16.msra.mxu2 %v7082_v17  ;;  %8736 = vmatpush.bf16.msra.mxu3 %v7082_v17  ;;  %v8515_v39 = vld [vmem:[#allocation5 + $0x3dc] sm:$0xf0]  ;;  %12862 = vst [vmem:[#allocation17_spill] sm:$0xff] %v9116_v46  ;;  %v7147_v35 = vld [vmem:[#allocation5 + $0x120] sm:$0xf0] }
  0x32   :  { %v7721_v40 = vld [vmem:[#allocation5 + $0x580] sm:$0xf]  ;;  %12863 = vst [vmem:[#allocation18_spill] sm:$0xff] %v9118_v47  ;;  %v7498_v48 = vor.u32 %v8515_v39, %v7497_v38 }
  0x33   :  { %v8571_v43 = vld [vmem:[#allocation5 + $0x59c] sm:$0xf0] }
  0x34   :  { %2047 = vmatpush.bf16.msra.mxu0 %v7050_v20  ;;  %8737 = vmatpush.bf16.msra.mxu1 %v7050_v20  ;;  %v7977_v44 = vld [vmem:[#allocation5 + $0x780] sm:$0xf]  ;;  %v7722_v51 = vor.u32 %v8571_v43, %v7721_v40 }
  0x35   :  { %8738 = vmatpush.bf16.msra.mxu2 %v7050_v20  ;;  %8739 = vmatpush.bf16.msra.mxu3 %v7050_v20  ;;  %v8635_v45 = vld [vmem:[#allocation5 + $0x79c] sm:$0xf0] }
  0x36   :  { %v7465_v49 = vld [vmem:[#allocation5 + $0x380] sm:$0xf]  ;;  %v7978_v52 = vor.u32 %v8635_v45, %v7977_v44 }
  0x37   :  { %v8507_v50 = vld [vmem:[#allocation5 + $0x39c] sm:$0xf0] }
  0x38   :  { %2048 = vmatpush.bf16.msra.mxu0 %v7018_v29  ;;  %8740 = vmatpush.bf16.msra.mxu1 %v7018_v29  ;;  %v7689_v53 = vld [vmem:[#allocation5 + $0x540] sm:$0xf]  ;;  %v7466_v60 = vor.u32 %v8507_v50, %v7465_v49 }
  0x39   :  { %8741 = vmatpush.bf16.msra.mxu2 %v7018_v29  ;;  %8742 = vmatpush.bf16.msra.mxu3 %v7018_v29  ;;  %v8563_v54 = vld [vmem:[#allocation5 + $0x55c] sm:$0xf0] }
  0x3a   :  { %v7945_v55 = vld [vmem:[#allocation5 + $0x740] sm:$0xf]  ;;  %v7690_v63 = vor.u32 %v8563_v54, %v7689_v53  ;;  %v8415_v53 = vld [vmem:[#allocation5 + $0xc4] sm:$0xf] }
  0x3b   :  { %2049 = vmatmul.bf16.vlgmr.msra.gmra.mxu0 %v9112_v41  ;;  %2069 = vmatmul.bf16.vlgmr.msra.gmra.mxu1 %v9114_v42  ;;  %v8627_v56 = vld [vmem:[#allocation5 + $0x75c] sm:$0xf0]  ;;  %v7115_v54 = vld [vmem:[#allocation5 + $0xe0] sm:$0xf0] }
  0x3c   :  { %2089 = vmatmul.bf16.vlgmr.msra.gmra.mxu2 %v9116_v46  ;;  %2109 = vmatmul.bf16.vlgmr.msra.gmra.mxu3 %v9118_v47  ;;  %v7433_v61 = vld [vmem:[#allocation5 + $0x340] sm:$0xf]  ;;  %v7946_v0 = vor.u32 %v8627_v56, %v7945_v55 }
  0x3d   :  { %2219 = vmatpush.bf16.msrb.mxu2 %v7754_v36  ;;  %2308 = vmatpush.bf16.msrb.mxu3 %v8010_v37  ;;  %v8499_v62 = vld [vmem:[#allocation5 + $0x35c] sm:$0xf0] }
  0x3e   :  { %2130 = vmatpush.bf16.msrb.mxu1 %v7498_v48  ;;  %v7657_v1 = vld [vmem:[#allocation5 + $0x500] sm:$0xf]  ;;  %2397 = vmatpush.bf16.msrb.mxu0 %v7246_v59  ;;  %v7434_v10 = vor.u32 %v8499_v62, %v7433_v61  ;;  %v7150_v48 = vor.u32 %v8423_v34, %v7147_v35  ;;  %v7118_v59 = vor.u32 %v8415_v53, %v7115_v54  ;;  %v8639_v34 = vld [vmem:[#allocation5 + $0x7c4] sm:$0xf]  ;;  %v8373_v54 = vld [vmem:[#allocation2 + $0x16c] sm:$0xf0] }
  0x3f   :  { %v8555_v4 = vld [vmem:[#allocation5 + $0x51c] sm:$0xf0] }
  0x40   :  { %v7913_v5 = vld [vmem:[#allocation5 + $0x700] sm:$0xf]  ;;  %v7658_v15 = vor.u32 %v8555_v4, %v7657_v1  ;;  %v8407_v1 = vld [vmem:[#allocation5 + $0x84] sm:$0xf] }
  0x41   :  { %2220 = vmatpush.bf16.msrb.mxu2 %v7722_v51  ;;  %2309 = vmatpush.bf16.msrb.mxu3 %v7978_v52  ;;  %v8619_v6 = vld [vmem:[#allocation5 + $0x71c] sm:$0xf0]  ;;  %v7086_v8 = vor.u32 %v8407_v1, %v7083_v2  ;;  %v8328_v1 = vld [vmem:[#allocation2 + $0xc] sm:$0xf]  ;;  %v6771_v2 = vld [vmem:[#allocation2 + $0x18] sm:$0xf0] }
  0x42   :  { %2131 = vmatpush.bf16.msrb.mxu1 %v7466_v60  ;;  %v6777_v11 = vld [vmem:[#allocation2 + $0x20] sm:$0xf]  ;;  %v7914_v16 = vor.u32 %v8619_v6, %v7913_v5  ;;  %2398 = vmatpush.bf16.msrb.mxu0 %v7214_v7 }
  0x43   :  { %v6841_v13 = vld [vmem:[#allocation2 + $0xa0] sm:$0xf]  ;;  %v9124_v36 = vor.u32 %v8333_v12, %v6777_v11  ;;  %v7051_v11 = vld [vmem:[#allocation5 + $0x60] sm:$0xf0] }
  0x44   :  { %v7401_v17 = vld [vmem:[#allocation5 + $0x300] sm:$0xf]  ;;  %v9126_v37 = vor.u32 %v8349_v14, %v6841_v13 }
  0x45   :  { %2221 = vmatpush.bf16.msrb.mxu2 %v7690_v63  ;;  %2310 = vmatpush.bf16.msrb.mxu3 %v7946_v0  ;;  %v8491_v18 = vld [vmem:[#allocation5 + $0x31c] sm:$0xf0] }
  0x46   :  { %v7625_v19 = vld [vmem:[#allocation5 + $0x4c0] sm:$0xf]  ;;  %2132 = vmatpush.bf16.msrb.mxu1 %v7434_v10  ;;  %v7402_v28 = vor.u32 %v8491_v18, %v7401_v17  ;;  %12864 = vst [vmem:[#allocation19_spill] sm:$0xff] %v9126_v37  ;;  %2399 = vmatpush.bf16.msrb.mxu0 %v7182_v23  ;;  %v8353_v18 = vld [vmem:[#allocation2 + $0xcc] sm:$0xf0]  ;;  %v7054_v23 = vor.u32 %v8399_v9, %v7051_v11 }
  0x47   :  { %v8547_v20 = vld [vmem:[#allocation5 + $0x4dc] sm:$0xf0]  ;;  %v8503_v11 = vld [vmem:[#allocation5 + $0x384] sm:$0xf] }
  0x48   :  { %v7881_v21 = vld [vmem:[#allocation5 + $0x6c0] sm:$0xf]  ;;  %v7626_v31 = vor.u32 %v8547_v20, %v7625_v19  ;;  %v8369_v20 = vld [vmem:[#allocation2 + $0x14c] sm:$0xf0] }
  0x49   :  { %v8611_v22 = vld [vmem:[#allocation5 + $0x6dc] sm:$0xf0]  ;;  %2222 = vmatpush.bf16.msrb.mxu2 %v7658_v15  ;;  %2311 = vmatpush.bf16.msrb.mxu3 %v7914_v16  ;;  %v8337_v16 = vld [vmem:[#allocation2 + $0x4c] sm:$0xf0] }
  0x4a   :  { %v6905_v24 = vld [vmem:[#allocation2 + $0x120] sm:$0xf]  ;;  %v7882_v32 = vor.u32 %v8611_v22, %v7881_v21  ;;  %2133 = vmatpush.bf16.msrb.mxu1 %v7402_v28  ;;  %2400 = vmatpush.bf16.msrb.mxu0 %v7150_v48  ;;  %v8385_v22 = vld [vmem:[#allocation2 + $0x1cc] sm:$0xf0] }
  0x4b   :  { %v6969_v26 = vld [vmem:[#allocation2 + $0x1a0] sm:$0xf]  ;;  %v9128_v43 = vor.u32 %v8365_v25, %v6905_v24  ;;  %2054 = vmatmul.bf16.gmra.mxu0 %v9124_v36  ;;  %2074 = vmatmul.bf16.gmra.mxu1 %v9126_v37  ;;  %v8391_v25 = vld [vmem:[#allocation5 + $0x4] sm:$0xf] }
  0x4c   :  { %v7369_v29 = vld [vmem:[#allocation5 + $0x2c0] sm:$0xf]  ;;  %v9130_v44 = vor.u32 %v8381_v27, %v6969_v26  ;;  %v7019_v26 = vld [vmem:[#allocation5 + $0x20] sm:$0xf0] }
  0x4d   :  { %v8483_v30 = vld [vmem:[#allocation5 + $0x2dc] sm:$0xf0]  ;;  %2223 = vmatpush.bf16.msrb.mxu2 %v7626_v31  ;;  %2312 = vmatpush.bf16.msrb.mxu3 %v7882_v32  ;;  %v7022_v31 = vor.u32 %v8391_v25, %v7019_v26  ;;  %v8575_v32 = vld [vmem:[#allocation5 + $0x5c4] sm:$0xf]  ;;  %v6795_v25 = vld [vmem:[#allocation2 + $0x50] sm:$0xf0] }
  0x4e   :  { %v7593_v33 = vld [vmem:[#allocation5 + $0x480] sm:$0xf]  ;;  %12865 = vst [vmem:[#allocation20_spill] sm:$0xff] %v9130_v44  ;;  %v7370_v45 = vor.u32 %v8483_v30, %v7369_v29  ;;  %2094 = vmatmul.bf16.gmra.mxu2 %v9128_v43  ;;  %2114 = vmatmul.bf16.gmra.mxu3 %v9130_v44  ;;  %v6801_v26 = vld [vmem:[#allocation2 + $0x48] sm:$0xf] }
  0x4f   :  { %v8539_v38 = vld [vmem:[#allocation5 + $0x49c] sm:$0xf0]  ;;  %2401 = vmatpush.bf16.msrb.mxu0 %v7118_v59 }
  0x50   :  { %v7849_v39 = vld [vmem:[#allocation5 + $0x680] sm:$0xf]  ;;  %v7594_v49 = vor.u32 %v8539_v38, %v7593_v33  ;;  %2134 = vmatpush.bf16.msrb.mxu1 %v7370_v45  ;;  %v7755_v33 = vld [vmem:[#allocation5 + $0x5e0] sm:$0xf0] }
  0x51   :  { %v8603_v40 = vld [vmem:[#allocation5 + $0x69c] sm:$0xf0]  ;;  %v7758_v35 = vor.u32 %v8575_v32, %v7755_v33  ;;  %v8011_v38 = vld [vmem:[#allocation5 + $0x7e0] sm:$0xf0]  ;;  %v8336_v32 = vld [vmem:[#allocation2 + $0x4c] sm:$0xf] }
  0x52   :  { %v7850_v50 = vor.u32 %v8603_v40, %v7849_v39  ;;  %v7337_v51 = vld [vmem:[#allocation5 + $0x280] sm:$0xf]  ;;  %2224 = vmatpush.bf16.msrb.mxu2 %v7594_v49  ;;  %v8511_v39 = vld [vmem:[#allocation5 + $0x3c4] sm:$0xf]  ;;  %v8014_v45 = vor.u32 %v8639_v34, %v8011_v38  ;;  %v6803_v33 = vld [vmem:[#allocation2 + $0x58] sm:$0xf0] }
  0x53   :  { %v8475_v52 = vld [vmem:[#allocation5 + $0x29c] sm:$0xf0]  ;;  %2402 = vmatpush.bf16.msrb.mxu0 %v7086_v8  ;;  %v7499_v40 = vld [vmem:[#allocation5 + $0x3e0] sm:$0xf0]  ;;  %v9184_v38 = vor.u32 %v8336_v32, %v6803_v33 }
  0x54   :  { %v7561_v55 = vld [vmem:[#allocation5 + $0x440] sm:$0xf]  ;;  %v7338_v58 = vor.u32 %v8475_v52, %v7337_v51  ;;  %2313 = vmatpush.bf16.msrb.mxu3 %v7850_v50  ;;  %v7502_v48 = vor.u32 %v8511_v39, %v7499_v40  ;;  %v8341_v50 = vld [vmem:[#allocation2 + $0x6c] sm:$0xf0]  ;;  %v8631_v8 = vld [vmem:[#allocation5 + $0x784] sm:$0xf] }
  0x55   :  { %v8531_v56 = vld [vmem:[#allocation5 + $0x45c] sm:$0xf0]  ;;  %v8357_v52 = vld [vmem:[#allocation2 + $0xec] sm:$0xf0]  ;;  %12872 = vst [vmem:[#allocation27_spill] sm:$0xff] %v9184_v38 }
  0x56   :  { %v7817_v57 = vld [vmem:[#allocation5 + $0x640] sm:$0xf]  ;;  %v7562_v62 = vor.u32 %v8531_v56, %v7561_v55  ;;  %2135 = vmatpush.bf16.msrb.mxu1 %v7338_v58  ;;  %v8389_v56 = vld [vmem:[#allocation2 + $0x1ec] sm:$0xf0]  ;;  %v8559_v39 = vld [vmem:[#allocation5 + $0x544] sm:$0xf] }
  0x57   :  { %v8595_v60 = vld [vmem:[#allocation5 + $0x65c] sm:$0xf0]  ;;  %2403 = vmatpush.bf16.msrb.mxu0 %v7054_v23  ;;  %v7691_v40 = vld [vmem:[#allocation5 + $0x560] sm:$0xf0] }
  0x58   :  { %v7305_v61 = vld [vmem:[#allocation5 + $0x240] sm:$0xf]  ;;  %v7818_v63 = vor.u32 %v8595_v60, %v7817_v57  ;;  %2225 = vmatpush.bf16.msrb.mxu2 %v7562_v62  ;;  %v6763_v62 = vld [vmem:[#allocation2 + $0x10] sm:$0xf0] }
  0x59   :  { %v8467_v0 = vld [vmem:[#allocation5 + $0x25c] sm:$0xf0] }
  0x5a   :  { %v7529_v3 = vld [vmem:[#allocation5 + $0x400] sm:$0xf]  ;;  %v7306_v7 = vor.u32 %v8467_v0, %v7305_v61  ;;  %2314 = vmatpush.bf16.msrb.mxu3 %v7818_v63  ;;  %v8327_v61 = vld [vmem:[#allocation2 + $0x4] sm:$0xf]  ;;  %v6769_v63 = vld [vmem:[#allocation2 + $0x8] sm:$0xf] }
  0x5b   :  { %v8523_v4 = vld [vmem:[#allocation5 + $0x41c] sm:$0xf0]  ;;  %2404 = vmatpush.bf16.msrb.mxu0 %v7022_v31  ;;  %v8330_v0 = vld [vmem:[#allocation2 + $0x14] sm:$0xf0] }
  0x5c   :  { %v7785_v5 = vld [vmem:[#allocation5 + $0x600] sm:$0xf]  ;;  %v7530_v10 = vor.u32 %v8523_v4, %v7529_v3  ;;  %2136 = vmatpush.bf16.msrb.mxu1 %v7306_v7  ;;  %v9160_v3 = vor.u32 %v8327_v61, %v6763_v62  ;;  %v9162_v4 = vor.u32 %v8330_v0, %v6769_v63  ;;  %v7723_v7 = vld [vmem:[#allocation5 + $0x5a0] sm:$0xf0]  ;;  %v8338_v31 = vld [vmem:[#allocation2 + $0x54] sm:$0xf0] }
  0x5d   :  { %v8587_v6 = vld [vmem:[#allocation5 + $0x61c] sm:$0xf0]  ;;  %v8342_v61 = vld [vmem:[#allocation2 + $0x74] sm:$0xf0]  ;;  %v8340_v62 = vld [vmem:[#allocation2 + $0x6c] sm:$0xf] }
  0x5e   :  { %v7786_v12 = vor.u32 %v8587_v6, %v7785_v5  ;;  %v7273_v13 = vld [vmem:[#allocation5 + $0x200] sm:$0xf]  ;;  %2226 = vmatpush.bf16.msrb.mxu2 %v7530_v10  ;;  %v9164_v5 = vor.u32 %v8328_v1, %v6771_v2  ;;  %v8567_v6 = vld [vmem:[#allocation5 + $0x584] sm:$0xf]  ;;  %v6819_v63 = vld [vmem:[#allocation2 + $0x78] sm:$0xf0] }
  0x5f   :  { %v8459_v14 = vld [vmem:[#allocation5 + $0x21c] sm:$0xf0]  ;;  %v7726_v9 = vor.u32 %v8567_v6, %v7723_v7  ;;  %v7979_v10 = vld [vmem:[#allocation5 + $0x7a0] sm:$0xf0]  ;;  %v9194_v2 = vor.u32 %v8340_v62, %v6819_v63  ;;  %v8348_v62 = vld [vmem:[#allocation2 + $0xac] sm:$0xf] }
  0x60   :  { %v6793_v15 = vld [vmem:[#allocation2 + $0x40] sm:$0xf]  ;;  %v7274_v24 = vor.u32 %v8459_v14, %v7273_v13  ;;  %2315 = vmatpush.bf16.msrb.mxu3 %v7786_v12  ;;  %v7467_v12 = vld [vmem:[#allocation5 + $0x3a0] sm:$0xf0]  ;;  %v7982_v13 = vor.u32 %v8631_v8, %v7979_v10  ;;  %v6833_v10 = vld [vmem:[#allocation2 + $0x88] sm:$0xf] }
  0x61   :  { %v6857_v17 = vld [vmem:[#allocation2 + $0xc0] sm:$0xf]  ;;  %v9136_v27 = vor.u32 %v8337_v16, %v6793_v15  ;;  %v7470_v14 = vor.u32 %v8503_v11, %v7467_v12  ;;  %v8331_v15 = vld [vmem:[#allocation2 + $0x24] sm:$0xf]  ;;  %v6779_v16 = vld [vmem:[#allocation2 + $0x30] sm:$0xf0] }
  0x62   :  { %v6921_v19 = vld [vmem:[#allocation2 + $0x140] sm:$0xf]  ;;  %v9138_v28 = vor.u32 %v8353_v18, %v6857_v17  ;;  %2137 = vmatpush.bf16.msrb.mxu1 %v7274_v24  ;;  %2575 = vmatpush.bf16.msra.mxu2 %v7758_v35  ;;  %v6785_v17 = vld [vmem:[#allocation2 + $0x28] sm:$0xf]  ;;  %v8334_v18 = vld [vmem:[#allocation2 + $0x34] sm:$0xf0]  ;;  %v9182_v35 = vor.u32 %v8338_v31, %v6801_v26 }
  0x63   :  { %v6985_v21 = vld [vmem:[#allocation2 + $0x1c0] sm:$0xf]  ;;  %v9140_v29 = vor.u32 %v8369_v20, %v6921_v19  ;;  %2059 = vmatmul.bf16.gmra.mxu0 %v9136_v27  ;;  %v8332_v19 = vld [vmem:[#allocation2 + $0x2c] sm:$0xf]  ;;  %v6787_v20 = vld [vmem:[#allocation2 + $0x38] sm:$0xf0] }
  0x64   :  { %12866 = vst [vmem:[#allocation21_spill] sm:$0xff] %v9138_v28  ;;  %v9142_v30 = vor.u32 %v8385_v22, %v6985_v21  ;;  %2079 = vmatmul.bf16.gmra.mxu1 %v9138_v28  ;;  %2664 = vmatpush.bf16.msra.mxu3 %v8014_v45  ;;  %v6809_v49 = vld [vmem:[#allocation2 + $0x60] sm:$0xf]  ;;  %v9170_v21 = vor.u32 %v8331_v15, %v6779_v16  ;;  %v8335_v24 = vld [vmem:[#allocation2 + $0x44] sm:$0xf] }
  0x65   :  { %12867 = vst [vmem:[#allocation22_spill] sm:$0xff] %v9140_v29  ;;  %2099 = vmatmul.bf16.gmra.mxu2 %v9140_v29  ;;  %v6873_v51 = vld [vmem:[#allocation2 + $0xe0] sm:$0xf]  ;;  %v9148_v57 = vor.u32 %v8341_v50, %v6809_v49  ;;  %v9172_v22 = vor.u32 %v8334_v18, %v6785_v17  ;;  %v9174_v23 = vor.u32 %v8332_v19, %v6787_v20  ;;  %v8623_v45 = vld [vmem:[#allocation5 + $0x744] sm:$0xf] }
  0x66   :  { %2119 = vmatmul.bf16.gmra.mxu3 %v9142_v30  ;;  %2486 = vmatpush.bf16.msra.mxu1 %v7502_v48  ;;  %v6937_v53 = vld [vmem:[#allocation2 + $0x160] sm:$0xf]  ;;  %v9150_v58 = vor.u32 %v8357_v52, %v6873_v51  ;;  %v9180_v34 = vor.u32 %v8335_v24, %v6795_v25  ;;  %12871 = vst [vmem:[#allocation26_spill] sm:$0xff] %v9182_v35  ;;  %v7947_v49 = vld [vmem:[#allocation5 + $0x760] sm:$0xf0] }
  0x67   :  { %v7001_v55 = vld [vmem:[#allocation2 + $0x1e0] sm:$0xf]  ;;  %12868 = vst [vmem:[#allocation23_spill] sm:$0xff] %v9148_v57  ;;  %v9152_v59 = vor.u32 %v8373_v54, %v6937_v53  ;;  %2576 = vmatpush.bf16.msra.mxu2 %v7726_v9  ;;  %v7694_v48 = vor.u32 %v8559_v39, %v7691_v40  ;;  %v7950_v50 = vor.u32 %v8623_v45, %v7947_v49  ;;  %v8495_v51 = vld [vmem:[#allocation5 + $0x344] sm:$0xf] }
  0x68   :  { %12869 = vst [vmem:[#allocation24_spill] sm:$0xff] %v9150_v58  ;;  %v9154_v60 = vor.u32 %v8389_v56, %v7001_v55  ;;  %2665 = vmatpush.bf16.msra.mxu3 %v7982_v13  ;;  %v7435_v52 = vld [vmem:[#allocation5 + $0x360] sm:$0xf0]  ;;  %v6811_v55 = vld [vmem:[#allocation2 + $0x70] sm:$0xf0] }
  0x69   :  { %12870 = vst [vmem:[#allocation25_spill] sm:$0xff] %v9152_v59  ;;  %v7438_v53 = vor.u32 %v8495_v51, %v7435_v52  ;;  %v8339_v54 = vld [vmem:[#allocation2 + $0x64] sm:$0xf]  ;;  %v6817_v56 = vld [vmem:[#allocation2 + $0x68] sm:$0xf] }
  0x6a   :  { %2487 = vmatpush.bf16.msra.mxu1 %v7470_v14  ;;  %v9190_v0 = vor.u32 %v8339_v54, %v6811_v55  ;;  %v9192_v1 = vor.u32 %v8342_v61, %v6817_v56  ;;  %12875 = vst [vmem:[#allocation30_spill] sm:$0xff] %v9194_v2  ;;  %v423_v6 = vld [vmem:[#allocation7] sm:$0xff]  ;;  %v6827_v9 = vld [vmem:[#allocation2 + $0x90] sm:$0xf0]  ;;  %v8346_v11 = vld [vmem:[#allocation2 + $0x94] sm:$0xf0] }
  0x6b   :  { %2577 = vmatpush.bf16.msra.mxu2 %v7694_v48  ;;  %v9200_v7 = vperm.slane %v423_v6, 0  ;;  %v8343_v8 = vld [vmem:[#allocation2 + $0x84] sm:$0xf]  ;;  %v8344_v12 = vld [vmem:[#allocation2 + $0x8c] sm:$0xf]  ;;  %v9206_v17 = vor.u32 %v8346_v11, %v6833_v10 }
  0x6c   :  { %2666 = vmatpush.bf16.msra.mxu3 %v7950_v50  ;;  %12873 = vst [vmem:[#allocation28_spill] sm:$0xff] %v9190_v0  ;;  %v6835_v13 = vld [vmem:[#allocation2 + $0x98] sm:$0xf0]  ;;  %v9202_v14 = vor.u32 %v8343_v8, %v6827_v9  ;;  %v8551_v20 = vld [vmem:[#allocation5 + $0x504] sm:$0xf] }
  0x6d   :  { %12874 = vst [vmem:[#allocation29_spill] sm:$0xff] %v9192_v1  ;;  %v9208_v18 = vor.u32 %v8344_v12, %v6835_v13  ;;  %v7659_v24 = vld [vmem:[#allocation5 + $0x520] sm:$0xf0]  ;;  %v6843_v55 = vld [vmem:[#allocation2 + $0xb0] sm:$0xf0] }
  0x6e   :  { %2488 = vmatpush.bf16.msra.mxu1 %v7438_v53  ;;  %12876 = vst [vmem:[#allocation31_spill] sm:$0xff] %v9202_v14  ;;  %v8615_v25 = vld [vmem:[#allocation5 + $0x704] sm:$0xf]  ;;  %v7662_v26 = vor.u32 %v8551_v20, %v7659_v24  ;;  %v6849_v56 = vld [vmem:[#allocation2 + $0xa8] sm:$0xf] }
  0x6f   :  { %12877 = vst [vmem:[#allocation32_spill] sm:$0xff] %v9206_v17  ;;  %v7915_v31 = vld [vmem:[#allocation5 + $0x720] sm:$0xf0]  ;;  %v8350_v61 = vld [vmem:[#allocation2 + $0xb4] sm:$0xf0] }
  0x70   :  { %12878 = vst [vmem:[#allocation33_spill] sm:$0xff] %v9208_v18  ;;  %v7918_v32 = vor.u32 %v8615_v25, %v7915_v31  ;;  %2578 = vmatpush.bf16.msra.mxu2 %v7662_v26  ;;  %v8487_v50 = vld [vmem:[#allocation5 + $0x304] sm:$0xf]  ;;  %v6851_v63 = vld [vmem:[#allocation2 + $0xb8] sm:$0xf0] }
  0x71   :  { %v7403_v51 = vld [vmem:[#allocation5 + $0x320] sm:$0xf0]  ;;  %v9240_v20 = vor.u32 %v8348_v62, %v6851_v63 }
  0x72   :  { %2667 = vmatpush.bf16.msra.mxu3 %v7918_v32  ;;  %v7406_v53 = vor.u32 %v8487_v50, %v7403_v51  ;;  %v8347_v54 = vld [vmem:[#allocation2 + $0xa4] sm:$0xf]  ;;  %v6859_v51 = vld [vmem:[#allocation2 + $0xd0] sm:$0xf0] }
  0x73   :  { %2064 = vmatmul.bf16.gmra.mxu0 %v9148_v57  ;;  %v9228_v9 = vor.u32 %v8347_v54, %v6843_v55  ;;  %12883 = vst [vmem:[#allocation38_spill] sm:$0xff] %v9240_v20  ;;  %v8351_v50 = vld [vmem:[#allocation2 + $0xc4] sm:$0xf]  ;;  %v8354_v54 = vld [vmem:[#allocation2 + $0xd4] sm:$0xf0] }
  0x74   :  { %2084 = vmatmul.bf16.gmra.mxu1 %v9150_v58  ;;  %v8352_v55 = vld [vmem:[#allocation2 + $0xcc] sm:$0xf]  ;;  %v9260_v63 = vor.u32 %v8351_v50, %v6859_v51  ;;  %v8543_v50 = vld [vmem:[#allocation5 + $0x4c4] sm:$0xf] }
  0x75   :  { %2104 = vmatmul.bf16.gmra.mxu2 %v9152_v59  ;;  %2489 = vmatpush.bf16.msra.mxu1 %v7406_v53  ;;  %12880 = vst [vmem:[#allocation35_spill] sm:$0xff] %v9228_v9  ;;  %v6865_v53 = vld [vmem:[#allocation2 + $0xc8] sm:$0xf]  ;;  %v7627_v51 = vld [vmem:[#allocation5 + $0x4e0] sm:$0xf0] }
  0x76   :  { %2124 = vmatmul.bf16.gmra.mxu3 %v9154_v60  ;;  %12885 = vst [vmem:[#allocation40_spill] sm:$0xff] %v9260_v63 }
  0x83   :  { %2405 = vmatmul.bf16.vlgmr.msrb.gmra.mxu0 %v9112_v41 }
  0x84   :  { %2138 = vmatmul.bf16.vlgmr.msrb.gmra.mxu1 %v9160_v3 }
  0x85   :  { %2227 = vmatmul.bf16.vlgmr.msrb.gmra.mxu2 %v9162_v4 }
  0x86   :  { %2316 = vmatmul.bf16.vlgmr.msrb.gmra.mxu3 %v9164_v5 }
  0x93   :  { %2410 = vmatmul.bf16.gmra.mxu0 %v9124_v36 }
  0x94   :  { %2143 = vmatmul.bf16.gmra.mxu1 %v9170_v21 }
  0x95   :  { %2232 = vmatmul.bf16.gmra.mxu2 %v9172_v22 }
  0x96   :  { %2321 = vmatmul.bf16.gmra.mxu3 %v9174_v23 }
  0xa3   :  { %2415 = vmatmul.bf16.gmra.mxu0 %v9136_v27 }
  0xa4   :  { %2148 = vmatmul.bf16.gmra.mxu1 %v9180_v34 }
  0xa5   :  { %2237 = vmatmul.bf16.gmra.mxu2 %v9182_v35 }
  0xa6   :  { %2326 = vmatmul.bf16.gmra.mxu3 %v9184_v38 }
  0xb3   :  { %2420 = vmatmul.bf16.gmra.mxu0 %v9148_v57 }
  0xb4   :  { %2153 = vmatmul.bf16.gmra.mxu1 %v9190_v0 }
  0xb5   :  { %2242 = vmatmul.bf16.gmra.mxu2 %v9192_v1  ;;  %v6907_v1 = vld [vmem:[#allocation2 + $0x130] sm:$0xf0] }
  0xb6   :  { %2331 = vmatmul.bf16.gmra.mxu3 %v9194_v2  ;;  %v8363_v2 = vld [vmem:[#allocation2 + $0x124] sm:$0xf] }
  0xb8   :  { %v9204_v15 = vpop.f32.mrf.mxu0  ;;  %v2070_v16 = vpop.f32.mrf.mxu1 }
  0xb9   :  { %v9211_v19 = vadd.f32 %v2070_v16, %v9200_v7  ;;  %v9238_v16 = vor.u32 %v8350_v61, %v6849_v56  ;;  %v6867_v56 = vld [vmem:[#allocation2 + $0xd8] sm:$0xf0] }
  0xbb   :  { %12882 = vst [vmem:[#allocation37_spill] sm:$0xff] %v9238_v16 }
  0xbf   :  { %v2090_v33 = vpop.f32.mrf.mxu2  ;;  %v2110_v39 = vpop.f32.mrf.mxu3 }
  0xc0   :  { %v9218_v40 = vadd.f32 %v2090_v33, %v9200_v7  ;;  %v9221_v45 = vadd.f32 %v2110_v39, %v9200_v7  ;;  %v9223_v48 = vpop.f32.mrf.mxu0  ;;  %v2072_v49 = vpop.f32.mrf.mxu1 }
  0xc1   :  { %v9226_v52 = vadd.f32 %v2072_v49, %v9200_v7 }
  0xc2   :  { %12879 = vst [vmem:[#allocation34_spill] sm:$0xff] %v9221_v45 }
  0xc3   :  { %2425 = vmatmul.bf16.gmra.mxu0 %v9114_v42 }
  0xc4   :  { %2158 = vmatmul.bf16.gmra.mxu1 %v9202_v14 }
  0xc5   :  { %2247 = vmatmul.bf16.gmra.mxu2 %v9206_v17 }
  0xc6   :  { %2336 = vmatmul.bf16.gmra.mxu3 %v9208_v18 }
  0xc7   :  { %v2092_v6 = vpop.f32.mrf.mxu2  ;;  %v2112_v8 = vpop.f32.mrf.mxu3 }
  0xc8   :  { %v9231_v10 = vadd.f32 %v2092_v6, %v9200_v7  ;;  %v9234_v11 = vadd.f32 %v2112_v8, %v9200_v7  ;;  %v9236_v12 = vpop.f32.mrf.mxu0  ;;  %v2075_v13 = vpop.f32.mrf.mxu1 }
  0xc9   :  { %v9243_v24 = vadd.f32 %v2075_v13, %v9200_v7 }
  0xca   :  { %12881 = vst [vmem:[#allocation36_spill] sm:$0xff] %v9234_v11 }
  0xd0   :  { %v9255_v33 = vpop.f32.mrf.mxu0  ;;  %v2077_v39 = vpop.f32.mrf.mxu1 }
  0xd1   :  { %v2095_v25 = vpop.f32.mrf.mxu2  ;;  %v2115_v26 = vpop.f32.mrf.mxu3  ;;  %v9258_v49 = vadd.f32 %v2077_v39, %v9200_v7  ;;  %v9272_v39 = vor.u32 %v8352_v55, %v6867_v56 }
  0xd2   :  { %v9250_v31 = vadd.f32 %v2095_v25, %v9200_v7  ;;  %v9253_v32 = vadd.f32 %v2115_v26, %v9200_v7  ;;  %v9270_v26 = vor.u32 %v8354_v54, %v6865_v53 }
  0xd3   :  { %2430 = vmatmul.bf16.gmra.mxu0 %v9126_v37  ;;  %12888 = vst [vmem:[#allocation43_spill] sm:$0xff] %v9272_v39  ;;  %v8356_v37 = vld [vmem:[#allocation2 + $0xec] sm:$0xf] }
  0xd4   :  { %2163 = vmatmul.bf16.gmra.mxu1 %v9228_v9  ;;  %12884 = vst [vmem:[#allocation39_spill] sm:$0xff] %v9253_v32 }
  0xd5   :  { %2252 = vmatmul.bf16.gmra.mxu2 %v9238_v16  ;;  %12887 = vst [vmem:[#allocation42_spill] sm:$0xff] %v9270_v26  ;;  %v6881_v16 = vld [vmem:[#allocation2 + $0xe8] sm:$0xf] }
  0xd6   :  { %2341 = vmatmul.bf16.gmra.mxu3 %v9240_v20 }
  0xd9   :  { %v2097_v61 = vpop.f32.mrf.mxu2  ;;  %v2117_v62 = vpop.f32.mrf.mxu3 }
  0xda   :  { %v9263_v6 = vadd.f32 %v2097_v61, %v9200_v7  ;;  %v9266_v8 = vadd.f32 %v2117_v62, %v9200_v7  ;;  %v8607_v61 = vld [vmem:[#allocation5 + $0x6c4] sm:$0xf]  ;;  %v7630_v62 = vor.u32 %v8543_v50, %v7627_v51 }
  0xdb   :  { %v7371_v50 = vld [vmem:[#allocation5 + $0x2e0] sm:$0xf0] }
  0xdc   :  { %12886 = vst [vmem:[#allocation41_spill] sm:$0xff] %v9266_v8  ;;  %v7883_v8 = vld [vmem:[#allocation5 + $0x6e0] sm:$0xf0]  ;;  %2579 = vmatpush.bf16.msra.mxu2 %v7630_v62  ;;  %v8358_v62 = vld [vmem:[#allocation2 + $0xf4] sm:$0xf0] }
  0xdd   :  { %v7886_v53 = vor.u32 %v8607_v61, %v7883_v8  ;;  %v8355_v8 = vld [vmem:[#allocation2 + $0xe4] sm:$0xf]  ;;  %v6875_v61 = vld [vmem:[#allocation2 + $0xf0] sm:$0xf0] }
  0xdf   :  { %2668 = vmatpush.bf16.msra.mxu3 %v7886_v53 }
  0xe0   :  { %v9268_v13 = vpop.f32.mrf.mxu0 }
  0xe1   :  { %v2080_v25 = vpop.f32.mrf.mxu1 }
  0xe2   :  { %v9275_v20 = vadd.f32 %v2080_v25, %v9200_v7 }
  0xe3   :  { %2435 = vmatmul.bf16.gmra.mxu0 %v9138_v28 }
  0xe4   :  { %2168 = vmatmul.bf16.gmra.mxu1 %v9260_v63  ;;  %v8479_v63 = vld [vmem:[#allocation5 + $0x2c4] sm:$0xf] }
  0xe5   :  { %2257 = vmatmul.bf16.gmra.mxu2 %v9270_v26  ;;  %v7374_v51 = vor.u32 %v8479_v63, %v7371_v50  ;;  %v9302_v50 = vor.u32 %v8358_v62, %v6881_v16 }
  0xe6   :  { %2346 = vmatmul.bf16.gmra.mxu3 %v9272_v39 }
  0xe7   :  { %2490 = vmatpush.bf16.msra.mxu1 %v7374_v51  ;;  %12892 = vst [vmem:[#allocation47_spill] sm:$0xff] %v9302_v50  ;;  %v8452_v51 = vld [vmem:[#allocation5 + $0x1e4] sm:$0xf0] }
  0xe8   :  { %v2100_v54 = vpop.f32.mrf.mxu2  ;;  %v9287_v28 = vpop.f32.mrf.mxu0 }
  0xe9   :  { %v2120_v55 = vpop.f32.mrf.mxu3  ;;  %v9282_v56 = vadd.f32 %v2100_v54, %v9200_v7  ;;  %v2082_v26 = vpop.f32.mrf.mxu1  ;;  %v6883_v54 = vld [vmem:[#allocation2 + $0xf8] sm:$0xf0] }
  0xea   :  { %v9285_v25 = vadd.f32 %v2120_v55, %v9200_v7  ;;  %v9290_v39 = vadd.f32 %v2082_v26, %v9200_v7  ;;  %v9304_v11 = vor.u32 %v8356_v37, %v6883_v54 }
  0xec   :  { %12889 = vst [vmem:[#allocation44_spill] sm:$0xff] %v9285_v25  ;;  %v9292_v25 = vor.u32 %v8355_v8, %v6875_v61 }
  0xed   :  { %12893 = vst [vmem:[#allocation48_spill] sm:$0xff] %v9304_v11 }
  0xee   :  { %12890 = vst [vmem:[#allocation45_spill] sm:$0xff] %v9292_v25 }
  0xf0   :  { %v2102_v9 = vpop.f32.mrf.mxu2  ;;  %v9300_v53 = vpop.f32.mrf.mxu0 }
  0xf1   :  { %v2122_v55 = vpop.f32.mrf.mxu3  ;;  %v9295_v32 = vadd.f32 %v2102_v9, %v9200_v7  ;;  %v2085_v63 = vpop.f32.mrf.mxu1  ;;  %v7249_v9 = vld [vmem:[#allocation5 + $0x1c8] sm:$0xf] }
  0xf2   :  { %v9298_v26 = vadd.f32 %v2122_v55, %v9200_v7  ;;  %v9307_v18 = vadd.f32 %v2085_v63, %v9200_v7  ;;  %v7250_v8 = vor.u32 %v8452_v51, %v7249_v9  ;;  %v2051_v9 = vadd.f32 %v9204_v15, %v9200_v7  ;;  %v8362_v51 = vld [vmem:[#allocation2 + $0x114] sm:$0xf0] }
  0xf3   :  { %2440 = vmatmul.bf16.gmra.mxu0 %v9150_v58  ;;  %v6897_v58 = vld [vmem:[#allocation2 + $0x108] sm:$0xf] }
  0xf4   :  { %12891 = vst [vmem:[#allocation46_spill] sm:$0xff] %v9298_v26  ;;  %2173 = vmatmul.bf16.gmra.mxu1 %v9292_v25  ;;  %2753 = vmatpush.bf16.msra.mxu0 %v7250_v8  ;;  %v8360_v8 = vld [vmem:[#allocation2 + $0x10c] sm:$0xf]  ;;  %v6899_v25 = vld [vmem:[#allocation2 + $0x118] sm:$0xf0]  ;;  %v9336_v14 = vor.u32 %v8362_v51, %v6897_v58 }
  0xf5   :  { %2262 = vmatmul.bf16.gmra.mxu2 %v9302_v50  ;;  %v8359_v50 = vld [vmem:[#allocation2 + $0x104] sm:$0xf]  ;;  %v9338_v45 = vor.u32 %v8360_v8, %v6899_v25 }
  0xf6   :  { %2351 = vmatmul.bf16.gmra.mxu3 %v9304_v11  ;;  %v6891_v11 = vld [vmem:[#allocation2 + $0x110] sm:$0xf0]  ;;  %12899 = vst [vmem:[#allocation54_spill] sm:$0xff] %v9336_v14  ;;  %v7851_v58 = vld [vmem:[#allocation5 + $0x6a0] sm:$0xf0] }
  0xf7   :  { %v9326_v17 = vor.u32 %v8359_v50, %v6891_v11  ;;  %12900 = vst [vmem:[#allocation55_spill] sm:$0xff] %v9338_v45  ;;  %v8535_v11 = vld [vmem:[#allocation5 + $0x484] sm:$0xf] }
  0xf8   :  { %v2105_v61 = vpop.f32.mrf.mxu2  ;;  %v9319_v62 = vpop.f32.mrf.mxu0  ;;  %v7595_v50 = vld [vmem:[#allocation5 + $0x4a0] sm:$0xf0] }
  0xf9   :  { %v2125_v55 = vpop.f32.mrf.mxu3  ;;  %v9314_v37 = vadd.f32 %v2105_v61, %v9200_v7  ;;  %v2087_v54 = vpop.f32.mrf.mxu1  ;;  %12895 = vst [vmem:[#allocation50_spill] sm:$0xff] %v9326_v17 }
  0xfa   :  { %v9317_v16 = vadd.f32 %v2125_v55, %v9200_v7  ;;  %v9322_v63 = vadd.f32 %v2087_v54, %v9200_v7 }
  0xfc   :  { %12894 = vst [vmem:[#allocation49_spill] sm:$0xff] %v9317_v16 }
 0x100   :  { %v2107_v61 = vpop.f32.mrf.mxu2  ;;  %v9334_v42 = vpop.f32.mrf.mxu0 }
 0x101   :  { %v2127_v26 = vpop.f32.mrf.mxu3  ;;  %v9329_v55 = vadd.f32 %v2107_v61, %v9200_v7  ;;  %v2139_v54 = vpop.f32.mrf.mxu1  ;;  %12898 = vst [vmem:[#allocation53_spill] sm:$0xff] %v9334_v42  ;;  %v2053_v61 = vadd.f32 %v9223_v48, %v9200_v7  ;;  %v7598_v42 = vor.u32 %v8535_v11, %v7595_v50  ;;  %v6913_v48 = vld [vmem:[#allocation2 + $0x128] sm:$0xf]  ;;  %v2056_v11 = vadd.f32 %v9236_v12, %v9200_v7  ;;  %v8366_v50 = vld [vmem:[#allocation2 + $0x134] sm:$0xf0] }
 0x102   :  { %v9332_v16 = vadd.f32 %v2127_v26, %v9200_v7  ;;  %v2140_v15 = vadd.f32 %v2139_v54, %v2051_v9  ;;  %v8599_v26 = vld [vmem:[#allocation5 + $0x684] sm:$0xf]  ;;  %v6929_v12 = vld [vmem:[#allocation2 + $0x148] sm:$0xf] }
 0x103   :  { %12896 = vst [vmem:[#allocation51_spill] sm:$0xff] %v9329_v55  ;;  %2445 = vmatmul.bf16.gmra.mxu0 %v9116_v46  ;;  %v7854_v51 = vor.u32 %v8599_v26, %v7851_v58  ;;  %2580 = vmatpush.bf16.msra.mxu2 %v7598_v42  ;;  %v8364_v26 = vld [vmem:[#allocation2 + $0x12c] sm:$0xf]  ;;  %v6915_v42 = vld [vmem:[#allocation2 + $0x138] sm:$0xf0] }
 0x104   :  { %12897 = vst [vmem:[#allocation52_spill] sm:$0xff] %v9332_v16  ;;  %2178 = vmatmul.bf16.gmra.mxu1 %v9326_v17  ;;  %v7339_v16 = vld [vmem:[#allocation5 + $0x2a0] sm:$0xf0] }
 0x105   :  { %2267 = vmatmul.bf16.gmra.mxu2 %v9336_v14  ;;  %2669 = vmatpush.bf16.msra.mxu3 %v7854_v51 }
 0x106   :  { %2356 = vmatmul.bf16.gmra.mxu3 %v9338_v45  ;;  %v8471_v45 = vld [vmem:[#allocation5 + $0x284] sm:$0xf] }
 0x107   :  { %v7342_v55 = vor.u32 %v8471_v45, %v7339_v16  ;;  %v9358_v45 = vor.u32 %v8364_v26, %v6915_v42 }
 0x108   :  { %v2228_v25 = vpop.f32.mrf.mxu2  ;;  %v9346_v17 = vpop.f32.mrf.mxu0 }
 0x109   :  { %v2317_v8 = vpop.f32.mrf.mxu3  ;;  %v2229_v9 = vadd.f32 %v2228_v25, %v2140_v15  ;;  %v2141_v54 = vpop.f32.mrf.mxu1  ;;  %2491 = vmatpush.bf16.msra.mxu1 %v7342_v55  ;;  %v9352_v25 = vor.u32 %v8363_v2, %v6907_v1  ;;  %12903 = vst [vmem:[#allocation58_spill] sm:$0xff] %v9358_v45  ;;  %v7217_v1 = vld [vmem:[#allocation5 + $0x188] sm:$0xf] }
 0x10a   :  { %v2142_v14 = vadd.f32 %v2141_v54, %v2053_v61  ;;  %v8444_v2 = vld [vmem:[#allocation5 + $0x1a4] sm:$0xf0] }
 0x10b   :  { %v9348_v46 = vadd.f32 %v2317_v8, %v2229_v9  ;;  %v9356_v9 = vor.u32 %v8366_v50, %v6913_v48  ;;  %v7218_v55 = vor.u32 %v8444_v2, %v7217_v1 }
 0x10d   :  { %12901 = vst [vmem:[#allocation56_spill] sm:$0xff] %v9348_v46  ;;  %2754 = vmatpush.bf16.msra.mxu0 %v7218_v55  ;;  %v2061_v46 = vadd.f32 %v9268_v13, %v9200_v7 }
 0x10e   :  { %12902 = vst [vmem:[#allocation57_spill] sm:$0xff] %v9356_v9 }
 0x110   :  { %v2230_v15 = vpop.f32.mrf.mxu2  ;;  %v9354_v8 = vpop.f32.mrf.mxu0 }
 0x111   :  { %v2319_v58 = vpop.f32.mrf.mxu3  ;;  %v2231_v61 = vadd.f32 %v2230_v15, %v2142_v14  ;;  %v2144_v51 = vpop.f32.mrf.mxu1  ;;  %v2058_v14 = vadd.f32 %v9255_v33, %v9200_v7  ;;  %v6931_v33 = vld [vmem:[#allocation2 + $0x158] sm:$0xf0] }
 0x112   :  { %v2145_v16 = vadd.f32 %v2144_v51, %v2056_v11  ;;  %v6923_v51 = vld [vmem:[#allocation2 + $0x150] sm:$0xf0] }
 0x113   :  { %v9360_v54 = vadd.f32 %v2319_v58, %v2231_v61  ;;  %2450 = vmatmul.bf16.gmra.mxu0 %v9128_v43  ;;  %v8367_v61 = vld [vmem:[#allocation2 + $0x144] sm:$0xf] }
 0x114   :  { %2183 = vmatmul.bf16.gmra.mxu1 %v9352_v25 }
 0x115   :  { %12904 = vst [vmem:[#allocation59_spill] sm:$0xff] %v9360_v54  ;;  %2272 = vmatmul.bf16.gmra.mxu2 %v9356_v9  ;;  %v8370_v54 = vld [vmem:[#allocation2 + $0x154] sm:$0xf0]  ;;  %v9376_v9 = vor.u32 %v8367_v61, %v6923_v51  ;;  %v7563_v61 = vld [vmem:[#allocation5 + $0x460] sm:$0xf0] }
 0x116   :  { %2361 = vmatmul.bf16.gmra.mxu3 %v9358_v45  ;;  %v8368_v45 = vld [vmem:[#allocation2 + $0x14c] sm:$0xf] }
 0x117   :  { %12906 = vst [vmem:[#allocation61_spill] sm:$0xff] %v9376_v9 }
 0x118   :  { %v2233_v48 = vpop.f32.mrf.mxu2  ;;  %v9370_v42 = vpop.f32.mrf.mxu0 }
 0x119   :  { %v2322_v11 = vpop.f32.mrf.mxu3  ;;  %v2234_v50 = vadd.f32 %v2233_v48, %v2145_v16  ;;  %v2146_v26 = vpop.f32.mrf.mxu1 }
 0x11a   :  { %v2147_v15 = vadd.f32 %v2146_v26, %v2058_v14  ;;  %v9380_v14 = vor.u32 %v8370_v54, %v6929_v12  ;;  %v8591_v54 = vld [vmem:[#allocation5 + $0x644] sm:$0xf] }
 0x11b   :  { %v9372_v58 = vadd.f32 %v2322_v11, %v2234_v50  ;;  %v9382_v11 = vor.u32 %v8368_v45, %v6931_v33  ;;  %v2063_v45 = vadd.f32 %v9287_v28, %v9200_v7  ;;  %v7819_v12 = vld [vmem:[#allocation5 + $0x660] sm:$0xf0]  ;;  %v6945_v28 = vld [vmem:[#allocation2 + $0x168] sm:$0xf] }
 0x11c   :  { %12907 = vst [vmem:[#allocation62_spill] sm:$0xff] %v9380_v14  ;;  %v7822_v51 = vor.u32 %v8591_v54, %v7819_v12  ;;  %v8372_v54 = vld [vmem:[#allocation2 + $0x16c] sm:$0xf] }
 0x11d   :  { %12905 = vst [vmem:[#allocation60_spill] sm:$0xff] %v9372_v58 }
 0x11e   :  { %12908 = vst [vmem:[#allocation63_spill] sm:$0xff] %v9382_v11  ;;  %2670 = vmatpush.bf16.msra.mxu3 %v7822_v51 }
 0x120   :  { %v2235_v1 = vpop.f32.mrf.mxu2  ;;  %v9378_v48 = vpop.f32.mrf.mxu0 }
 0x121   :  { %v2324_v2 = vpop.f32.mrf.mxu3  ;;  %v2236_v16 = vadd.f32 %v2235_v1, %v2147_v15  ;;  %v2149_v55 = vpop.f32.mrf.mxu1  ;;  %v8527_v15 = vld [vmem:[#allocation5 + $0x444] sm:$0xf] }
 0x122   :  { %v2150_v50 = vadd.f32 %v2149_v55, %v2061_v46  ;;  %v7566_v46 = vor.u32 %v8527_v15, %v7563_v61  ;;  %v2066_v15 = vadd.f32 %v9300_v53, %v9200_v7  ;;  %v8374_v61 = vld [vmem:[#allocation2 + $0x174] sm:$0xf0]  ;;  %v6961_v53 = vld [vmem:[#allocation2 + $0x188] sm:$0xf] }
 0x123   :  { %v9384_v26 = vadd.f32 %v2324_v2, %v2236_v16  ;;  %2455 = vmatmul.bf16.gmra.mxu0 %v9140_v29  ;;  %v8371_v29 = vld [vmem:[#allocation2 + $0x164] sm:$0xf] }
 0x124   :  { %2188 = vmatmul.bf16.gmra.mxu1 %v9376_v9  ;;  %2581 = vmatpush.bf16.msra.mxu2 %v7566_v46  ;;  %v6939_v9 = vld [vmem:[#allocation2 + $0x170] sm:$0xf0]  ;;  %v6947_v46 = vld [vmem:[#allocation2 + $0x178] sm:$0xf0] }
 0x125   :  { %12909 = vst [vmem:[#allocation64_spill] sm:$0xff] %v9384_v26  ;;  %2277 = vmatmul.bf16.gmra.mxu2 %v9380_v14  ;;  %v8463_v26 = vld [vmem:[#allocation5 + $0x244] sm:$0xf] }
 0x126   :  { %2366 = vmatmul.bf16.gmra.mxu3 %v9382_v11  ;;  %v7307_v11 = vld [vmem:[#allocation5 + $0x260] sm:$0xf0] }
 0x127   :  { %v7310_v14 = vor.u32 %v8463_v26, %v7307_v11  ;;  %v9406_v11 = vor.u32 %v8372_v54, %v6947_v46 }
 0x128   :  { %v2238_v33 = vpop.f32.mrf.mxu2  ;;  %v9394_v55 = vpop.f32.mrf.mxu0 }
 0x129   :  { %v2327_v1 = vpop.f32.mrf.mxu3  ;;  %v2239_v2 = vadd.f32 %v2238_v33, %v2150_v50  ;;  %v2151_v16 = vpop.f32.mrf.mxu1  ;;  %2492 = vmatpush.bf16.msra.mxu1 %v7310_v14  ;;  %v9400_v33 = vor.u32 %v8371_v29, %v6939_v9  ;;  %12913 = vst [vmem:[#allocation68_spill] sm:$0xff] %v9406_v11  ;;  %v7185_v29 = vld [vmem:[#allocation5 + $0x148] sm:$0xf]  ;;  %v2068_v14 = vadd.f32 %v9319_v62, %v9200_v7 }
 0x12a   :  { %v2152_v13 = vadd.f32 %v2151_v16, %v2063_v45  ;;  %v8436_v9 = vld [vmem:[#allocation5 + $0x164] sm:$0xf0] }
 0x12b   :  { %v9396_v58 = vadd.f32 %v2327_v1, %v2239_v2  ;;  %12911 = vst [vmem:[#allocation66_spill] sm:$0xff] %v9400_v33  ;;  %v9404_v2 = vor.u32 %v8374_v61, %v6945_v28 }
 0x12d   :  { %12910 = vst [vmem:[#allocation65_spill] sm:$0xff] %v9396_v58  ;;  %v8378_v58 = vld [vmem:[#allocation2 + $0x194] sm:$0xf0] }
 0x12e   :  { %12912 = vst [vmem:[#allocation67_spill] sm:$0xff] %v9404_v2 }
 0x130   :  { %v2240_v50 = vpop.f32.mrf.mxu2  ;;  %v9402_v1 = vpop.f32.mrf.mxu0 }
 0x131   :  { %v2329_v12 = vpop.f32.mrf.mxu3  ;;  %v2241_v45 = vadd.f32 %v2240_v50, %v2152_v13  ;;  %v2154_v51 = vpop.f32.mrf.mxu1  ;;  %v7186_v13 = vor.u32 %v8436_v9, %v7185_v29 }
 0x132   :  { %v2155_v26 = vadd.f32 %v2154_v51, %v2066_v15  ;;  %v6955_v51 = vld [vmem:[#allocation2 + $0x190] sm:$0xf0] }
 0x133   :  { %v9408_v16 = vadd.f32 %v2329_v12, %v2241_v45  ;;  %2460 = vmatmul.bf16.gmra.mxu0 %v9152_v59  ;;  %v8375_v45 = vld [vmem:[#allocation2 + $0x184] sm:$0xf] }
 0x134   :  { %2193 = vmatmul.bf16.gmra.mxu1 %v9400_v33  ;;  %2755 = vmatpush.bf16.msra.mxu0 %v7186_v13  ;;  %v9422_v7 = vor.u32 %v8375_v45, %v6955_v51 }
 0x135   :  { %12914 = vst [vmem:[#allocation69_spill] sm:$0xff] %v9408_v16  ;;  %2282 = vmatmul.bf16.gmra.mxu2 %v9404_v2  ;;  %v8376_v16 = vld [vmem:[#allocation2 + $0x18c] sm:$0xf] }
 0x136   :  { %2371 = vmatmul.bf16.gmra.mxu3 %v9406_v11  ;;  %v6963_v11 = vld [vmem:[#allocation2 + $0x198] sm:$0xf0]  ;;  %12916 = vst [vmem:[#allocation71_spill] sm:$0xff] %v9422_v7 }
 0x137   :  { %v9428_v13 = vor.u32 %v8376_v16, %v6963_v11  ;;  %v7787_v16 = vld [vmem:[#allocation5 + $0x620] sm:$0xf0] }
 0x138   :  { %v2243_v28 = vpop.f32.mrf.mxu2  ;;  %v9418_v46 = vpop.f32.mrf.mxu0 }
 0x139   :  { %v2332_v15 = vpop.f32.mrf.mxu3  ;;  %v2244_v61 = vadd.f32 %v2243_v28, %v2155_v26  ;;  %v2156_v54 = vpop.f32.mrf.mxu1  ;;  %v9426_v26 = vor.u32 %v8378_v58, %v6961_v53  ;;  %12918 = vst [vmem:[#allocation73_spill] sm:$0xff] %v9428_v13  ;;  %v7531_v58 = vld [vmem:[#allocation5 + $0x420] sm:$0xf0] }
 0x13a   :  { %v2157_v50 = vadd.f32 %v2156_v54, %v2068_v14  ;;  %v8583_v53 = vld [vmem:[#allocation5 + $0x604] sm:$0xf] }
 0x13b   :  { %v9420_v12 = vadd.f32 %v2332_v15, %v2244_v61  ;;  %12917 = vst [vmem:[#allocation72_spill] sm:$0xff] %v9426_v26  ;;  %v7790_v61 = vor.u32 %v8583_v53, %v7787_v16  ;;  %v7275_v15 = vld [vmem:[#allocation5 + $0x220] sm:$0xf0]  ;;  %v8380_v53 = vld [vmem:[#allocation2 + $0x1ac] sm:$0xf] }
 0x13c   :  { %v6979_v16 = vld [vmem:[#allocation2 + $0x1b8] sm:$0xf0] }
 0x13d   :  { %12915 = vst [vmem:[#allocation70_spill] sm:$0xff] %v9420_v12  ;;  %2671 = vmatpush.bf16.msra.mxu3 %v7790_v61 }
 0x140   :  { %v2245_v2 = vpop.f32.mrf.mxu2  ;;  %v9424_v9 = vpop.f32.mrf.mxu0 }
 0x141   :  { %v2334_v59 = vpop.f32.mrf.mxu3  ;;  %v2246_v62 = vadd.f32 %v2245_v2, %v2157_v50  ;;  %v2159_v29 = vpop.f32.mrf.mxu1  ;;  %v8519_v2 = vld [vmem:[#allocation5 + $0x404] sm:$0xf] }
 0x142   :  { %v2160_v14 = vadd.f32 %v2159_v29, %v9211_v19  ;;  %v7534_v11 = vor.u32 %v8519_v2, %v7531_v58  ;;  %v8455_v29 = vld [vmem:[#allocation5 + $0x204] sm:$0xf]  ;;  %v6977_v2 = vld [vmem:[#allocation2 + $0x1a8] sm:$0xf]  ;;  %v8382_v58 = vld [vmem:[#allocation2 + $0x1b4] sm:$0xf0] }
 0x143   :  { %v9431_v28 = vadd.f32 %v2334_v59, %v2246_v62  ;;  %2465 = vmatmul.bf16.gmra.mxu0 %v9118_v47  ;;  %v7278_v12 = vor.u32 %v8455_v29, %v7275_v15  ;;  %v9450_v15 = vor.u32 %v8380_v53, %v6979_v16 }
 0x144   :  { %2198 = vmatmul.bf16.gmra.mxu1 %v9422_v7  ;;  %2582 = vmatpush.bf16.msra.mxu2 %v7534_v11  ;;  %v7153_v11 = vld [vmem:[#allocation5 + $0x108] sm:$0xf] }
 0x145   :  { %12919 = vst [vmem:[#allocation74_spill] sm:$0xff] %v9431_v28  ;;  %2287 = vmatmul.bf16.gmra.mxu2 %v9426_v26  ;;  %v8379_v28 = vld [vmem:[#allocation2 + $0x1a4] sm:$0xf]  ;;  %2493 = vmatpush.bf16.msra.mxu1 %v7278_v12  ;;  %v7121_v12 = vld [vmem:[#allocation5 + $0xc8] sm:$0xf] }
 0x146   :  { %2376 = vmatmul.bf16.gmra.mxu3 %v9428_v13  ;;  %v6971_v13 = vld [vmem:[#allocation2 + $0x1b0] sm:$0xf0]  ;;  %12923 = vst [vmem:[#allocation78_spill] sm:$0xff] %v9450_v15 }
 0x148   :  { %v2248_v19 = vpop.f32.mrf.mxu2  ;;  %v9439_v45 = vpop.f32.mrf.mxu0 }
 0x149   :  { %v2337_v59 = vpop.f32.mrf.mxu3  ;;  %v2249_v54 = vadd.f32 %v2248_v19, %v2160_v14  ;;  %v2161_v50 = vpop.f32.mrf.mxu1  ;;  %12920 = vst [vmem:[#allocation75_spill] sm:$0xff] %v9439_v45  ;;  %v8428_v14 = vld [vmem:[#allocation5 + $0x124] sm:$0xf0]  ;;  %v9444_v45 = vor.u32 %v8379_v28, %v6971_v13 }
 0x14a   :  { %v2162_v51 = vadd.f32 %v2161_v50, %v9226_v52  ;;  %v7154_v61 = vor.u32 %v8428_v14, %v7153_v11  ;;  %v9448_v50 = vor.u32 %v8382_v58, %v6977_v2  ;;  %v8420_v13 = vld [vmem:[#allocation5 + $0xe4] sm:$0xf0] }
 0x14b   :  { %v9442_v62 = vadd.f32 %v2337_v59, %v2249_v54  ;;  %v7089_v2 = vld [vmem:[#allocation5 + $0x88] sm:$0xf] }
 0x14c   :  { %12922 = vst [vmem:[#allocation77_spill] sm:$0xff] %v9448_v50  ;;  %2756 = vmatpush.bf16.msra.mxu0 %v7154_v61 }
 0x14d   :  { %12921 = vst [vmem:[#allocation76_spill] sm:$0xff] %v9442_v62  ;;  %v8383_v62 = vld [vmem:[#allocation2 + $0x1c4] sm:$0xf] }
 0x150   :  { %v2250_v19 = vpop.f32.mrf.mxu2  ;;  %v9446_v54 = vpop.f32.mrf.mxu0 }
 0x151   :  { %v2339_v26 = vpop.f32.mrf.mxu3  ;;  %v2251_v52 = vadd.f32 %v2250_v19, %v2162_v51  ;;  %v2164_v59 = vpop.f32.mrf.mxu1  ;;  %v7122_v51 = vor.u32 %v8420_v13, %v7121_v12  ;;  %v6987_v12 = vld [vmem:[#allocation2 + $0x1d0] sm:$0xf0]  ;;  %v6993_v13 = vld [vmem:[#allocation2 + $0x1c8] sm:$0xf] }
 0x152   :  { %v2165_v29 = vadd.f32 %v2164_v59, %v9243_v24  ;;  %v8412_v24 = vld [vmem:[#allocation5 + $0xa4] sm:$0xf0] }
 0x153   :  { %v9453_v47 = vadd.f32 %v2339_v26, %v2251_v52  ;;  %2470 = vmatmul.bf16.gmra.mxu0 %v9130_v44  ;;  %v7090_v53 = vor.u32 %v8412_v24, %v7089_v2  ;;  %v7057_v52 = vld [vmem:[#allocation5 + $0x48] sm:$0xf] }
 0x154   :  { %2203 = vmatmul.bf16.gmra.mxu1 %v9444_v45  ;;  %2757 = vmatpush.bf16.msra.mxu0 %v7122_v51  ;;  %v8404_v59 = vld [vmem:[#allocation5 + $0x64] sm:$0xf0]  ;;  %v8386_v51 = vld [vmem:[#allocation2 + $0x1d4] sm:$0xf0] }
 0x155   :  { %12924 = vst [vmem:[#allocation79_spill] sm:$0xff] %v9453_v47  ;;  %2292 = vmatmul.bf16.gmra.mxu2 %v9448_v50  ;;  %v7058_v28 = vor.u32 %v8404_v59, %v7057_v52  ;;  %v8384_v47 = vld [vmem:[#allocation2 + $0x1cc] sm:$0xf]  ;;  %v7025_v2 = vld [vmem:[#allocation5 + $0x8] sm:$0xf] }
 0x156   :  { %2381 = vmatmul.bf16.gmra.mxu3 %v9450_v15  ;;  %v6995_v15 = vld [vmem:[#allocation2 + $0x1d8] sm:$0xf0] }
 0x157   :  { %v9472_v52 = vor.u32 %v8384_v47, %v6995_v15  ;;  %v8017_v47 = vld [vmem:[#allocation5 + $0x7c8] sm:$0xf] }
 0x158   :  { %v2253_v58 = vpop.f32.mrf.mxu2  ;;  %v9461_v14 = vpop.f32.mrf.mxu0  ;;  %2758 = vmatpush.bf16.msra.mxu0 %v7090_v53 }
 0x159   :  { %v2342_v26 = vpop.f32.mrf.mxu3  ;;  %v2254_v16 = vadd.f32 %v2253_v58, %v2165_v29  ;;  %v2166_v11 = vpop.f32.mrf.mxu1  ;;  %12925 = vst [vmem:[#allocation80_spill] sm:$0xff] %v9461_v14  ;;  %v8396_v29 = vld [vmem:[#allocation5 + $0x24] sm:$0xf0]  ;;  %v9466_v14 = vor.u32 %v8383_v62, %v6987_v12 }
 0x15a   :  { %v2167_v19 = vadd.f32 %v2166_v11, %v9258_v49  ;;  %v7026_v49 = vor.u32 %v8396_v29, %v7025_v2  ;;  %v9470_v11 = vor.u32 %v8386_v51, %v6993_v13  ;;  %12927 = vst [vmem:[#allocation82_spill] sm:$0xff] %v9472_v52  ;;  %v8644_v12 = vld [vmem:[#allocation5 + $0x7e4] sm:$0xf0] }
 0x15b   :  { %v9464_v61 = vadd.f32 %v2342_v26, %v2254_v16 }
 0x15c   :  { %2759 = vmatpush.bf16.msra.mxu0 %v7058_v28  ;;  %v7761_v28 = vld [vmem:[#allocation5 + $0x5c8] sm:$0xf] }
 0x15d   :  { %12926 = vst [vmem:[#allocation81_spill] sm:$0xff] %v9464_v61  ;;  %v8387_v61 = vld [vmem:[#allocation2 + $0x1e4] sm:$0xf] }
 0x160   :  { %v2255_v24 = vpop.f32.mrf.mxu2  ;;  %v9468_v53 = vpop.f32.mrf.mxu0  ;;  %2760 = vmatpush.bf16.msra.mxu0 %v7026_v49 }
 0x161   :  { %v2344_v58 = vpop.f32.mrf.mxu3  ;;  %v2256_v26 = vadd.f32 %v2255_v24, %v2167_v19  ;;  %v2169_v16 = vpop.f32.mrf.mxu1  ;;  %v8580_v19 = vld [vmem:[#allocation5 + $0x5e4] sm:$0xf0] }
 0x162   :  { %v2170_v59 = vadd.f32 %v2169_v16, %v9275_v20  ;;  %v7762_v15 = vor.u32 %v8580_v19, %v7761_v28  ;;  %v8018_v20 = vor.u32 %v8644_v12, %v8017_v47  ;;  %v8516_v16 = vld [vmem:[#allocation5 + $0x3e4] sm:$0xf0]  ;;  %v8390_v19 = vld [vmem:[#allocation2 + $0x1f4] sm:$0xf0]  ;;  %v8388_v47 = vld [vmem:[#allocation2 + $0x1ec] sm:$0xf] }
 0x163   :  { %v9475_v50 = vadd.f32 %v2344_v58, %v2256_v26  ;;  %2475 = vmatmul.bf16.gmra.mxu0 %v9142_v30  ;;  %v7505_v26 = vld [vmem:[#allocation5 + $0x3c8] sm:$0xf]  ;;  %v7011_v12 = vld [vmem:[#allocation2 + $0x1f8] sm:$0xf0] }
 0x164   :  { %2208 = vmatmul.bf16.gmra.mxu1 %v9466_v14  ;;  %2931 = vmatpush.bf16.msrb.mxu2 %v7762_v15  ;;  %v7506_v62 = vor.u32 %v8516_v16, %v7505_v26  ;;  %v7009_v28 = vld [vmem:[#allocation2 + $0x1e8] sm:$0xf] }
 0x165   :  { %12928 = vst [vmem:[#allocation83_spill] sm:$0xff] %v9475_v50  ;;  %2297 = vmatmul.bf16.gmra.mxu2 %v9470_v11  ;;  %3020 = vmatpush.bf16.msrb.mxu3 %v8018_v20  ;;  %v7003_v50 = vld [vmem:[#allocation2 + $0x1f0] sm:$0xf0] }
 0x166   :  { %2386 = vmatmul.bf16.gmra.mxu3 %v9472_v52  ;;  %2842 = vmatpush.bf16.msrb.mxu1 %v7506_v62 }
 0x168   :  { %v2258_v13 = vpop.f32.mrf.mxu2  ;;  %v9483_v24 = vpop.f32.mrf.mxu0 }
 0x169   :  { %v2347_v51 = vpop.f32.mrf.mxu3  ;;  %v2259_v2 = vadd.f32 %v2258_v13, %v2170_v59  ;;  %v2171_v29 = vpop.f32.mrf.mxu1  ;;  %12929 = vst [vmem:[#allocation84_spill] sm:$0xff] %v9483_v24  ;;  %v9488_v13 = vor.u32 %v8387_v61, %v7003_v50 }
 0x16a   :  { %v2172_v58 = vadd.f32 %v2171_v29, %v9290_v39  ;;  %v9492_v39 = vor.u32 %v8390_v19, %v7009_v28 }
 0x16b   :  { %v9486_v49 = vadd.f32 %v2347_v51, %v2259_v2  ;;  %v9494_v51 = vor.u32 %v8388_v47, %v7011_v12 }
 0x16d   :  { %12930 = vst [vmem:[#allocation85_spill] sm:$0xff] %v9486_v49 }
 0x170   :  { %v2260_v15 = vpop.f32.mrf.mxu2  ;;  %v9490_v52 = vpop.f32.mrf.mxu0 }
 0x171   :  { %v2349_v59 = vpop.f32.mrf.mxu3  ;;  %v2261_v24 = vadd.f32 %v2260_v15, %v2172_v58  ;;  %v2174_v20 = vpop.f32.mrf.mxu1 }
 0x172   :  { %v2175_v2 = vadd.f32 %v2174_v20, %v9307_v18 }
 0x173   :  { %v9497_v29 = vadd.f32 %v2349_v59, %v2261_v24  ;;  %2480 = vmatmul.bf16.gmra.mxu0 %v9154_v60 }
 0x174   :  { %2213 = vmatmul.bf16.gmra.mxu1 %v9488_v13 }
 0x175   :  { %12931 = vst [vmem:[#allocation86_spill] sm:$0xff] %v9497_v29  ;;  %2302 = vmatmul.bf16.gmra.mxu2 %v9492_v39 }
 0x176   :  { %2391 = vmatmul.bf16.gmra.mxu3 %v9494_v51 }
 0x178   :  { %v2263_v61 = vpop.f32.mrf.mxu2  ;;  %v9505_v16 = vpop.f32.mrf.mxu0 }
 0x179   :  { %v2352_v62 = vpop.f32.mrf.mxu3  ;;  %v2264_v58 = vadd.f32 %v2263_v61, %v2175_v2  ;;  %v2176_v26 = vpop.f32.mrf.mxu1  ;;  %v8572_v61 = vld [vmem:[#allocation5 + $0x5a4] sm:$0xf0] }
 0x17a   :  { %v2177_v18 = vadd.f32 %v2176_v26, %v9322_v63  ;;  %v7729_v63 = vld [vmem:[#allocation5 + $0x588] sm:$0xf] }
 0x17b   :  { %v9508_v24 = vadd.f32 %v2352_v62, %v2264_v58  ;;  %v7985_v62 = vld [vmem:[#allocation5 + $0x788] sm:$0xf]  ;;  %v7730_v58 = vor.u32 %v8572_v61, %v7729_v63 }
 0x17c   :  { %v8636_v26 = vld [vmem:[#allocation5 + $0x7a4] sm:$0xf0] }
 0x17d   :  { %12932 = vst [vmem:[#allocation87_spill] sm:$0xff] %v9508_v24  ;;  %2932 = vmatpush.bf16.msrb.mxu2 %v7730_v58  ;;  %v7473_v24 = vld [vmem:[#allocation5 + $0x388] sm:$0xf] }
 0x180   :  { %v2265_v28 = vpop.f32.mrf.mxu2  ;;  %v9510_v15 = vpop.f32.mrf.mxu0 }
 0x181   :  { %v2354_v19 = vpop.f32.mrf.mxu3  ;;  %v2266_v47 = vadd.f32 %v2265_v28, %v2177_v18  ;;  %v2179_v12 = vpop.f32.mrf.mxu1  ;;  %v7986_v18 = vor.u32 %v8636_v26, %v7985_v62 }
 0x182   :  { %v2180_v59 = vadd.f32 %v2179_v12, %v9218_v40 }
 0x183   :  { %v9513_v20 = vadd.f32 %v2354_v19, %v2266_v47  ;;  %2761 = vmatmul.bf16.vlgmr.msra.gmra.mxu0 %v9112_v41  ;;  %3021 = vmatpush.bf16.msrb.mxu3 %v7986_v18 }
 0x184   :  { %2494 = vmatmul.bf16.vlgmr.msra.gmra.mxu1 %v9160_v3 }
 0x185   :  { %12933 = vst [vmem:[#allocation88_spill] sm:$0xff] %v9513_v20  ;;  %2583 = vmatmul.bf16.vlgmr.msra.gmra.mxu2 %v9162_v4  ;;  %v8508_v20 = vld [vmem:[#allocation5 + $0x3a4] sm:$0xf0] }
 0x186   :  { %2672 = vmatmul.bf16.vlgmr.msra.gmra.mxu3 %v9164_v5  ;;  %v7474_v49 = vor.u32 %v8508_v20, %v7473_v24 }
 0x188   :  { %v2268_v40 = vpop.f32.mrf.mxu2  ;;  %v9521_v12 = vpop.f32.mrf.mxu0  ;;  %2843 = vmatpush.bf16.msrb.mxu1 %v7474_v49 }
 0x189   :  { %v2357_v28 = vpop.f32.mrf.mxu3  ;;  %v2269_v19 = vadd.f32 %v2268_v40, %v2180_v59  ;;  %v2181_v47 = vpop.f32.mrf.mxu1 }
 0x18a   :  { %v2182_v2 = vadd.f32 %v2181_v47, %v9231_v10 }
 0x18b   :  { %v9524_v50 = vadd.f32 %v2357_v28, %v2269_v19 }
 0x18d   :  { %12934 = vst [vmem:[#allocation89_spill] sm:$0xff] %v9524_v50 }
 0x190   :  { %v2270_v29 = vpop.f32.mrf.mxu2  ;;  %v9526_v26 = vpop.f32.mrf.mxu0 }
 0x191   :  { %v2359_v63 = vpop.f32.mrf.mxu3  ;;  %v2271_v61 = vadd.f32 %v2270_v29, %v2182_v2  ;;  %v2184_v62 = vpop.f32.mrf.mxu1 }
 0x192   :  { %v2185_v59 = vadd.f32 %v2184_v62, %v9250_v31 }
 0x193   :  { %v9529_v58 = vadd.f32 %v2359_v63, %v2271_v61  ;;  %2766 = vmatmul.bf16.gmra.mxu0 %v9124_v36 }
 0x194   :  { %2499 = vmatmul.bf16.gmra.mxu1 %v9170_v21 }
 0x195   :  { %12935 = vst [vmem:[#allocation90_spill] sm:$0xff] %v9529_v58  ;;  %2588 = vmatmul.bf16.gmra.mxu2 %v9172_v22 }
 0x196   :  { %2677 = vmatmul.bf16.gmra.mxu3 %v9174_v23 }
 0x198   :  { %v2273_v49 = vpop.f32.mrf.mxu2  ;;  %v9537_v2 = vpop.f32.mrf.mxu0 }
 0x199   :  { %v2362_v29 = vpop.f32.mrf.mxu3  ;;  %v2274_v24 = vadd.f32 %v2273_v49, %v2185_v59  ;;  %v2186_v20 = vpop.f32.mrf.mxu1  ;;  %v8564_v49 = vld [vmem:[#allocation5 + $0x564] sm:$0xf0] }
 0x19a   :  { %v2187_v31 = vadd.f32 %v2186_v20, %v9263_v6  ;;  %v7697_v6 = vld [vmem:[#allocation5 + $0x548] sm:$0xf] }
 0x19b   :  { %v9540_v18 = vadd.f32 %v2362_v29, %v2274_v24  ;;  %v7953_v29 = vld [vmem:[#allocation5 + $0x748] sm:$0xf]  ;;  %v7698_v24 = vor.u32 %v8564_v49, %v7697_v6 }
 0x19c   :  { %v8628_v20 = vld [vmem:[#allocation5 + $0x764] sm:$0xf0] }
 0x19d   :  { %12936 = vst [vmem:[#allocation91_spill] sm:$0xff] %v9540_v18  ;;  %2933 = vmatpush.bf16.msrb.mxu2 %v7698_v24  ;;  %v7441_v18 = vld [vmem:[#allocation5 + $0x348] sm:$0xf] }
 0x1a0   :  { %v2275_v40 = vpop.f32.mrf.mxu2  ;;  %v9542_v63 = vpop.f32.mrf.mxu0 }
 0x1a1   :  { %v2364_v28 = vpop.f32.mrf.mxu3  ;;  %v2276_v19 = vadd.f32 %v2275_v40, %v2187_v31  ;;  %v2189_v47 = vpop.f32.mrf.mxu1  ;;  %v7954_v31 = vor.u32 %v8628_v20, %v7953_v29 }
 0x1a2   :  { %v2190_v61 = vadd.f32 %v2189_v47, %v9282_v56 }
 0x1a3   :  { %v9545_v62 = vadd.f32 %v2364_v28, %v2276_v19  ;;  %2771 = vmatmul.bf16.gmra.mxu0 %v9136_v27  ;;  %3022 = vmatpush.bf16.msrb.mxu3 %v7954_v31  ;;  %v12940_v31 = vld [vmem:[#allocation29_spill] sm:$0xff] }
 0x1a4   :  { %2504 = vmatmul.bf16.gmra.mxu1 %v9180_v34 }
 0x1a5   :  { %12937 = vst [vmem:[#allocation92_spill] sm:$0xff] %v9545_v62  ;;  %2593 = vmatmul.bf16.gmra.mxu2 %v9182_v35  ;;  %v8500_v62 = vld [vmem:[#allocation5 + $0x364] sm:$0xf0] }
 0x1a6   :  { %2682 = vmatmul.bf16.gmra.mxu3 %v9184_v38  ;;  %v7442_v50 = vor.u32 %v8500_v62, %v7441_v18 }
 0x1a8   :  { %v2278_v56 = vpop.f32.mrf.mxu2  ;;  %v9553_v47 = vpop.f32.mrf.mxu0  ;;  %2844 = vmatpush.bf16.msrb.mxu1 %v7442_v50  ;;  %v12941_v50 = vld [vmem:[#allocation30_spill] sm:$0xff] }
 0x1a9   :  { %v2367_v40 = vpop.f32.mrf.mxu3  ;;  %v2279_v28 = vadd.f32 %v2278_v56, %v2190_v61  ;;  %v2191_v19 = vpop.f32.mrf.mxu1 }
 0x1aa   :  { %v2192_v59 = vadd.f32 %v2191_v19, %v9295_v32  ;;  %v12946_v32 = vld [vmem:[#allocation34_spill] sm:$0xff] }
 0x1ab   :  { %v9556_v10 = vadd.f32 %v2367_v40, %v2279_v28 }
 0x1ad   :  { %12938 = vst [vmem:[#allocation93_spill] sm:$0xff] %v9556_v10 }
 0x1b0   :  { %v2280_v58 = vpop.f32.mrf.mxu2  ;;  %v9558_v20 = vpop.f32.mrf.mxu0 }
 0x1b1   :  { %v2369_v6 = vpop.f32.mrf.mxu3  ;;  %v2281_v49 = vadd.f32 %v2280_v58, %v2192_v59  ;;  %v2194_v29 = vpop.f32.mrf.mxu1 }
 0x1b2   :  { %v2195_v61 = vadd.f32 %v2194_v29, %v9314_v37  ;;  %v12943_v37 = vld [vmem:[#allocation51_spill] sm:$0xff] }
 0x1b3   :  { %v9561_v24 = vadd.f32 %v2369_v6, %v2281_v49  ;;  %2776 = vmatmul.bf16.gmra.mxu0 %v9148_v57 }
 0x1b4   :  { %2509 = vmatmul.bf16.gmra.mxu1 %v9190_v0 }
 0x1b5   :  { %12939 = vst [vmem:[#allocation94_spill] sm:$0xff] %v9561_v24  ;;  %2598 = vmatmul.bf16.gmra.mxu2 %v12940_v31 }
 0x1b6   :  { %2687 = vmatmul.bf16.gmra.mxu3 %v12941_v50  ;;  %v12948_v50 = vld [vmem:[#allocation31_spill] sm:$0xff] }
 0x1b8   :  { %v2283_v18 = vpop.f32.mrf.mxu2  ;;  %v9569_v56 = vpop.f32.mrf.mxu0 }
 0x1b9   :  { %v2372_v58 = vpop.f32.mrf.mxu3  ;;  %v2284_v62 = vadd.f32 %v2283_v18, %v2195_v61  ;;  %v2196_v59 = vpop.f32.mrf.mxu1  ;;  %12942 = vst [vmem:[#allocation95_spill] sm:$0xff] %v9569_v56  ;;  %v12949_v61 = vld [vmem:[#allocation16_spill] sm:$0xff] }
 0x1ba   :  { %v2197_v40 = vadd.f32 %v2196_v59, %v12943_v37  ;;  %v12950_v59 = vld [vmem:[#allocation32_spill] sm:$0xff] }
 0x1bb   :  { %v9572_v28 = vadd.f32 %v2372_v58, %v2284_v62  ;;  %v12951_v58 = vld [vmem:[#allocation33_spill] sm:$0xff]  ;;  %v7665_v62 = vld [vmem:[#allocation5 + $0x508] sm:$0xf] }
 0x1bc   :  { %v8556_v37 = vld [vmem:[#allocation5 + $0x524] sm:$0xf0] }
 0x1bd   :  { %12944 = vst [vmem:[#allocation51_spill] sm:$0xff] %v9572_v28 }
 0x1c0   :  { %v2285_v19 = vpop.f32.mrf.mxu2  ;;  %v9574_v57 = vpop.f32.mrf.mxu0 }
 0x1c1   :  { %v2374_v6 = vpop.f32.mrf.mxu3  ;;  %v2286_v49 = vadd.f32 %v2285_v19, %v2197_v40  ;;  %v2199_v29 = vpop.f32.mrf.mxu1  ;;  %12945 = vst [vmem:[#allocation96_spill] sm:$0xff] %v9574_v57  ;;  %v7921_v40 = vld [vmem:[#allocation5 + $0x708] sm:$0xf]  ;;  %v7666_v19 = vor.u32 %v8556_v37, %v7665_v62 }
 0x1c2   :  { %v2200_v10 = vadd.f32 %v2199_v29, %v12946_v32  ;;  %v8620_v57 = vld [vmem:[#allocation5 + $0x724] sm:$0xf0] }
 0x1c3   :  { %v9577_v24 = vadd.f32 %v2374_v6, %v2286_v49  ;;  %2781 = vmatmul.bf16.gmra.mxu0 %v12949_v61  ;;  %v7922_v56 = vor.u32 %v8620_v57, %v7921_v40  ;;  %2934 = vmatpush.bf16.msrb.mxu2 %v7666_v19  ;;  %v12953_v61 = vld [vmem:[#allocation36_spill] sm:$0xff]  ;;  %v12956_v19 = vld [vmem:[#allocation39_spill] sm:$0xff] }
 0x1c4   :  { %2514 = vmatmul.bf16.gmra.mxu1 %v12948_v50 }
 0x1c5   :  { %12947 = vst [vmem:[#allocation34_spill] sm:$0xff] %v9577_v24  ;;  %2603 = vmatmul.bf16.gmra.mxu2 %v12950_v59  ;;  %3023 = vmatpush.bf16.msrb.mxu3 %v7922_v56  ;;  %v7409_v24 = vld [vmem:[#allocation5 + $0x308] sm:$0xf]  ;;  %v12959_v56 = vld [vmem:[#allocation19_spill] sm:$0xff] }
 0x1c6   :  { %2692 = vmatmul.bf16.gmra.mxu3 %v12951_v58  ;;  %v8492_v58 = vld [vmem:[#allocation5 + $0x324] sm:$0xf0] }
 0x1c7   :  { %v7410_v59 = vor.u32 %v8492_v58, %v7409_v24  ;;  %v12961_v24 = vld [vmem:[#allocation38_spill] sm:$0xff] }
 0x1c8   :  { %v2288_v32 = vpop.f32.mrf.mxu2  ;;  %v9585_v50 = vpop.f32.mrf.mxu0 }
 0x1c9   :  { %v2377_v6 = vpop.f32.mrf.mxu3  ;;  %v2289_v49 = vadd.f32 %v2288_v32, %v2200_v10  ;;  %v2201_v29 = vpop.f32.mrf.mxu1  ;;  %12952 = vst [vmem:[#allocation97_spill] sm:$0xff] %v9585_v50  ;;  %2845 = vmatpush.bf16.msrb.mxu1 %v7410_v59  ;;  %v12958_v50 = vld [vmem:[#allocation35_spill] sm:$0xff] }
 0x1ca   :  { %v2202_v18 = vadd.f32 %v2201_v29, %v12953_v61  ;;  %v12963_v29 = vld [vmem:[#allocation41_spill] sm:$0xff]  ;;  %v12966_v61 = vld [vmem:[#allocation44_spill] sm:$0xff] }
 0x1cb   :  { %v9588_v28 = vadd.f32 %v2377_v6, %v2289_v49  ;;  %v12960_v6 = vld [vmem:[#allocation37_spill] sm:$0xff] }
 0x1cd   :  { %12954 = vst [vmem:[#allocation36_spill] sm:$0xff] %v9588_v28 }
 0x1d0   :  { %v2290_v31 = vpop.f32.mrf.mxu2  ;;  %v9590_v40 = vpop.f32.mrf.mxu0 }
 0x1d1   :  { %v2379_v62 = vpop.f32.mrf.mxu3  ;;  %v2291_v37 = vadd.f32 %v2290_v31, %v2202_v18  ;;  %v2204_v57 = vpop.f32.mrf.mxu1  ;;  %12955 = vst [vmem:[#allocation98_spill] sm:$0xff] %v9590_v40 }
 0x1d2   :  { %v2205_v10 = vadd.f32 %v2204_v57, %v12956_v19 }
 0x1d3   :  { %v9593_v32 = vadd.f32 %v2379_v62, %v2291_v37  ;;  %2786 = vmatmul.bf16.gmra.mxu0 %v12959_v56 }
 0x1d4   :  { %2519 = vmatmul.bf16.gmra.mxu1 %v12958_v50 }
 0x1d5   :  { %12957 = vst [vmem:[#allocation39_spill] sm:$0xff] %v9593_v32  ;;  %2608 = vmatmul.bf16.gmra.mxu2 %v12960_v6 }
 0x1d6   :  { %2697 = vmatmul.bf16.gmra.mxu3 %v12961_v24  ;;  %v12968_v24 = vld [vmem:[#allocation40_spill] sm:$0xff] }
 0x1d8   :  { %v2293_v59 = vpop.f32.mrf.mxu2  ;;  %v9601_v49 = vpop.f32.mrf.mxu0 }
 0x1d9   :  { %v2382_v31 = vpop.f32.mrf.mxu3  ;;  %v2294_v18 = vadd.f32 %v2293_v59, %v2205_v10  ;;  %v2206_v58 = vpop.f32.mrf.mxu1  ;;  %12962 = vst [vmem:[#allocation99_spill] sm:$0xff] %v9601_v49  ;;  %v12969_v10 = vld [vmem:[#allocation21_spill] sm:$0xff] }
 0x1da   :  { %v2207_v62 = vadd.f32 %v2206_v58, %v12963_v29  ;;  %v12970_v58 = vld [vmem:[#allocation42_spill] sm:$0xff]  ;;  %v8548_v29 = vld [vmem:[#allocation5 + $0x4e4] sm:$0xf0] }
 0x1db   :  { %v9604_v37 = vadd.f32 %v2382_v31, %v2294_v18  ;;  %v12971_v31 = vld [vmem:[#allocation43_spill] sm:$0xff]  ;;  %v7633_v18 = vld [vmem:[#allocation5 + $0x4c8] sm:$0xf] }
 0x1dd   :  { %12964 = vst [vmem:[#allocation41_spill] sm:$0xff] %v9604_v37 }
 0x1e0   :  { %v2295_v57 = vpop.f32.mrf.mxu2  ;;  %v9606_v40 = vpop.f32.mrf.mxu0 }
 0x1e1   :  { %v2384_v19 = vpop.f32.mrf.mxu3  ;;  %v2296_v56 = vadd.f32 %v2295_v57, %v2207_v62  ;;  %v2209_v50 = vpop.f32.mrf.mxu1  ;;  %12965 = vst [vmem:[#allocation100_spill] sm:$0xff] %v9606_v40  ;;  %v7634_v62 = vor.u32 %v8548_v29, %v7633_v18  ;;  %v7889_v57 = vld [vmem:[#allocation5 + $0x6c8] sm:$0xf] }
 0x1e2   :  { %v2210_v28 = vadd.f32 %v2209_v50, %v12966_v61  ;;  %v8612_v40 = vld [vmem:[#allocation5 + $0x6e4] sm:$0xf0] }
 0x1e3   :  { %v9609_v32 = vadd.f32 %v2384_v19, %v2296_v56  ;;  %2791 = vmatmul.bf16.gmra.mxu0 %v12969_v10  ;;  %v7890_v49 = vor.u32 %v8612_v40, %v7889_v57  ;;  %2935 = vmatpush.bf16.msrb.mxu2 %v7634_v62  ;;  %v12973_v10 = vld [vmem:[#allocation46_spill] sm:$0xff]  ;;  %v12976_v62 = vld [vmem:[#allocation49_spill] sm:$0xff] }
 0x1e4   :  { %2524 = vmatmul.bf16.gmra.mxu1 %v12968_v24 }
 0x1e5   :  { %12967 = vst [vmem:[#allocation44_spill] sm:$0xff] %v9609_v32  ;;  %2613 = vmatmul.bf16.gmra.mxu2 %v12970_v58  ;;  %3024 = vmatpush.bf16.msrb.mxu3 %v7890_v49  ;;  %v7377_v32 = vld [vmem:[#allocation5 + $0x2c8] sm:$0xf] }
 0x1e6   :  { %2702 = vmatmul.bf16.gmra.mxu3 %v12971_v31  ;;  %v8484_v31 = vld [vmem:[#allocation5 + $0x2e4] sm:$0xf0] }
 0x1e7   :  { %v7378_v58 = vor.u32 %v8484_v31, %v7377_v32  ;;  %v12979_v49 = vld [vmem:[#allocation24_spill] sm:$0xff] }
 0x1e8   :  { %v2298_v50 = vpop.f32.mrf.mxu2  ;;  %v9617_v24 = vpop.f32.mrf.mxu0  ;;  %v12981_v32 = vld [vmem:[#allocation48_spill] sm:$0xff] }
 0x1e9   :  { %v2387_v56 = vpop.f32.mrf.mxu3  ;;  %v2299_v61 = vadd.f32 %v2298_v50, %v2210_v28  ;;  %v2211_v19 = vpop.f32.mrf.mxu1  ;;  %12972 = vst [vmem:[#allocation101_spill] sm:$0xff] %v9617_v24  ;;  %2846 = vmatpush.bf16.msrb.mxu1 %v7378_v58  ;;  %v12978_v24 = vld [vmem:[#allocation45_spill] sm:$0xff]  ;;  %v8448_v58 = vld [vmem:[#allocation5 + $0x1cc] sm:$0xf] }
 0x1ea   :  { %v2212_v59 = vadd.f32 %v2211_v19, %v12973_v10 }
 0x1eb   :  { %v9620_v37 = vadd.f32 %v2387_v56, %v2299_v61  ;;  %v12980_v56 = vld [vmem:[#allocation47_spill] sm:$0xff] }
 0x1ed   :  { %12974 = vst [vmem:[#allocation46_spill] sm:$0xff] %v9620_v37  ;;  %v12986_v37 = vld [vmem:[#allocation53_spill] sm:$0xff] }
 0x1f0   :  { %v2300_v18 = vpop.f32.mrf.mxu2  ;;  %v9622_v57 = vpop.f32.mrf.mxu0 }
 0x1f1   :  { %v2389_v29 = vpop.f32.mrf.mxu3  ;;  %v2301_v6 = vadd.f32 %v2300_v18, %v2212_v59  ;;  %v2214_v40 = vpop.f32.mrf.mxu1  ;;  %12975 = vst [vmem:[#allocation102_spill] sm:$0xff] %v9622_v57  ;;  %v7251_v59 = vld [vmem:[#allocation5 + $0x1e8] sm:$0xf0]  ;;  %v8604_v57 = vld [vmem:[#allocation5 + $0x6a4] sm:$0xf0] }
 0x1f2   :  { %v2215_v28 = vadd.f32 %v2214_v40, %v12976_v62  ;;  %v7254_v31 = vor.u32 %v8448_v58, %v7251_v59  ;;  %v12983_v40 = vld [vmem:[#allocation52_spill] sm:$0xff] }
 0x1f3   :  { %v9625_v50 = vadd.f32 %v2389_v29, %v2301_v6  ;;  %2796 = vmatmul.bf16.gmra.mxu0 %v12979_v49 }
 0x1f4   :  { %2529 = vmatmul.bf16.gmra.mxu1 %v12978_v24  ;;  %3109 = vmatpush.bf16.msrb.mxu0 %v7254_v31  ;;  %v9638_v24 = vld [vmem:[#allocation7] sm:$0xff] }
 0x1f5   :  { %12977 = vst [vmem:[#allocation49_spill] sm:$0xff] %v9625_v50  ;;  %2618 = vmatmul.bf16.gmra.mxu2 %v12980_v56  ;;  %v9641_v10 = vperm.slane %v9638_v24, 1  ;;  %v8540_v56 = vld [vmem:[#allocation5 + $0x4a4] sm:$0xf0] }
 0x1f6   :  { %2707 = vmatmul.bf16.gmra.mxu3 %v12981_v32  ;;  %12985 = vst [vmem:[#allocation104_spill] sm:$0xff] %v9638_v24  ;;  %v12992_v24 = vld [vmem:[#allocation55_spill] sm:$0xff] }
 0x1f7   :  { %v2407_v50 = vadd.f32 %v12986_v37, %v9641_v10  ;;  %v7601_v37 = vld [vmem:[#allocation5 + $0x488] sm:$0xf] }
 0x1f8   :  { %v2303_v61 = vpop.f32.mrf.mxu2  ;;  %v9633_v29 = vpop.f32.mrf.mxu0 }
 0x1f9   :  { %v2392_v19 = vpop.f32.mrf.mxu3  ;;  %v2304_v18 = vadd.f32 %v2303_v61, %v2215_v28  ;;  %v2216_v6 = vpop.f32.mrf.mxu1  ;;  %12982 = vst [vmem:[#allocation103_spill] sm:$0xff] %v9633_v29 }
 0x1fa   :  { %v2217_v62 = vadd.f32 %v2216_v6, %v12983_v40  ;;  %v12989_v6 = vld [vmem:[#allocation50_spill] sm:$0xff] }
 0x1fb   :  { %v9636_v49 = vadd.f32 %v2392_v19, %v2304_v18  ;;  %v12990_v19 = vld [vmem:[#allocation17_spill] sm:$0xff]  ;;  %v12991_v40 = vld [vmem:[#allocation54_spill] sm:$0xff] }
 0x1fd   :  { %12984 = vst [vmem:[#allocation52_spill] sm:$0xff] %v9636_v49 }
 0x200   :  { %v2305_v58 = vpop.f32.mrf.mxu2  ;;  %v9645_v28 = vpop.f32.mrf.mxu0 }
 0x201   :  { %v2394_v59 = vpop.f32.mrf.mxu3  ;;  %v2306_v32 = vadd.f32 %v2305_v58, %v2217_v62  ;;  %v2495_v31 = vpop.f32.mrf.mxu1  ;;  %12987 = vst [vmem:[#allocation53_spill] sm:$0xff] %v9645_v28  ;;  %v7857_v62 = vld [vmem:[#allocation5 + $0x688] sm:$0xf]  ;;  %v7602_v58 = vor.u32 %v8540_v56, %v7601_v37 }
 0x202   :  { %v2496_v61 = vadd.f32 %v2495_v31, %v2407_v50  ;;  %v7858_v28 = vor.u32 %v8604_v57, %v7857_v62  ;;  %v2409_v50 = vadd.f32 %v9346_v17, %v9641_v10  ;;  %v2412_v57 = vadd.f32 %v9354_v8, %v9641_v10  ;;  %v8440_v8 = vld [vmem:[#allocation5 + $0x18c] sm:$0xf] }
 0x203   :  { %v9647_v29 = vadd.f32 %v2394_v59, %v2306_v32  ;;  %2801 = vmatmul.bf16.gmra.mxu0 %v12990_v19  ;;  %2936 = vmatpush.bf16.msrb.mxu2 %v7602_v58 }
 0x204   :  { %2534 = vmatmul.bf16.gmra.mxu1 %v12989_v6  ;;  %3025 = vmatpush.bf16.msrb.mxu3 %v7858_v28  ;;  %v12996_v28 = vld [vmem:[#allocation58_spill] sm:$0xff] }
 0x205   :  { %12988 = vst [vmem:[#allocation105_spill] sm:$0xff] %v9647_v29  ;;  %2623 = vmatmul.bf16.gmra.mxu2 %v12991_v40  ;;  %v7345_v29 = vld [vmem:[#allocation5 + $0x288] sm:$0xf] }
 0x206   :  { %2712 = vmatmul.bf16.gmra.mxu3 %v12992_v24  ;;  %v8476_v24 = vld [vmem:[#allocation5 + $0x2a4] sm:$0xf0] }
 0x207   :  { %v7346_v40 = vor.u32 %v8476_v24, %v7345_v29  ;;  %v12995_v29 = vld [vmem:[#allocation57_spill] sm:$0xff] }
 0x208   :  { %v2584_v32 = vpop.f32.mrf.mxu2  ;;  %v9657_v6 = vpop.f32.mrf.mxu0 }
 0x209   :  { %v2673_v59 = vpop.f32.mrf.mxu3  ;;  %v2585_v31 = vadd.f32 %v2584_v32, %v2496_v61  ;;  %v2497_v19 = vpop.f32.mrf.mxu1  ;;  %2847 = vmatpush.bf16.msrb.mxu1 %v7346_v40  ;;  %v2414_v40 = vadd.f32 %v9370_v42, %v9641_v10 }
 0x20a   :  { %v2498_v18 = vadd.f32 %v2497_v19, %v2409_v50  ;;  %v7219_v19 = vld [vmem:[#allocation5 + $0x1a8] sm:$0xf0] }
 0x20b   :  { %v9659_v49 = vadd.f32 %v2673_v59, %v2585_v31 }
 0x20d   :  { %12993 = vst [vmem:[#allocation106_spill] sm:$0xff] %v9659_v49 }
 0x210   :  { %v2586_v56 = vpop.f32.mrf.mxu2  ;;  %v9663_v58 = vpop.f32.mrf.mxu0 }
 0x211   :  { %v2675_v17 = vpop.f32.mrf.mxu3  ;;  %v2587_v37 = vadd.f32 %v2586_v56, %v2498_v18  ;;  %v2500_v62 = vpop.f32.mrf.mxu1  ;;  %v7222_v18 = vor.u32 %v8440_v8, %v7219_v19 }
 0x212   :  { %v2501_v61 = vadd.f32 %v2500_v62, %v2412_v57  ;;  %v2417_v62 = vadd.f32 %v9378_v48, %v9641_v10  ;;  %v7569_v48 = vld [vmem:[#allocation5 + $0x448] sm:$0xf] }
 0x213   :  { %v9665_v32 = vadd.f32 %v2675_v17, %v2587_v37  ;;  %2806 = vmatmul.bf16.gmra.mxu0 %v9128_v43 }
 0x214   :  { %2539 = vmatmul.bf16.gmra.mxu1 %v9352_v25  ;;  %3110 = vmatpush.bf16.msrb.mxu0 %v7222_v18  ;;  %v13000_v18 = vld [vmem:[#allocation61_spill] sm:$0xff] }
 0x215   :  { %12994 = vst [vmem:[#allocation107_spill] sm:$0xff] %v9665_v32  ;;  %2628 = vmatmul.bf16.gmra.mxu2 %v12995_v29 }
 0x216   :  { %2717 = vmatmul.bf16.gmra.mxu3 %v12996_v28 }
 0x218   :  { %v2589_v50 = vpop.f32.mrf.mxu2  ;;  %v9675_v56 = vpop.f32.mrf.mxu0 }
 0x219   :  { %v2678_v59 = vpop.f32.mrf.mxu3  ;;  %v2590_v31 = vadd.f32 %v2589_v50, %v2501_v61  ;;  %v2502_v57 = vpop.f32.mrf.mxu1  ;;  %v13001_v61 = vld [vmem:[#allocation22_spill] sm:$0xff] }
 0x21a   :  { %v2503_v17 = vadd.f32 %v2502_v57, %v2414_v40  ;;  %v13002_v50 = vld [vmem:[#allocation62_spill] sm:$0xff] }
 0x21b   :  { %v9677_v37 = vadd.f32 %v2678_v59, %v2590_v31  ;;  %v13003_v59 = vld [vmem:[#allocation63_spill] sm:$0xff]  ;;  %v8532_v31 = vld [vmem:[#allocation5 + $0x464] sm:$0xf0] }
 0x21c   :  { %v7570_v57 = vor.u32 %v8532_v31, %v7569_v48  ;;  %v2422_v48 = vadd.f32 %v9402_v1, %v9641_v10  ;;  %v8432_v1 = vld [vmem:[#allocation5 + $0x14c] sm:$0xf] }
 0x21d   :  { %12997 = vst [vmem:[#allocation57_spill] sm:$0xff] %v9677_v37 }
 0x21e   :  { %2937 = vmatpush.bf16.msrb.mxu2 %v7570_v57 }
 0x220   :  { %v2591_v24 = vpop.f32.mrf.mxu2  ;;  %v9681_v19 = vpop.f32.mrf.mxu0 }
 0x221   :  { %v2680_v49 = vpop.f32.mrf.mxu3  ;;  %v2592_v32 = vadd.f32 %v2591_v24, %v2503_v17  ;;  %v2505_v8 = vpop.f32.mrf.mxu1  ;;  %12998 = vst [vmem:[#allocation108_spill] sm:$0xff] %v9681_v19  ;;  %v7825_v24 = vld [vmem:[#allocation5 + $0x648] sm:$0xf] }
 0x222   :  { %v2506_v42 = vadd.f32 %v2505_v8, %v2417_v62  ;;  %v8596_v17 = vld [vmem:[#allocation5 + $0x664] sm:$0xf0] }
 0x223   :  { %v9683_v28 = vadd.f32 %v2680_v49, %v2592_v32  ;;  %2811 = vmatmul.bf16.gmra.mxu0 %v13001_v61  ;;  %v7826_v19 = vor.u32 %v8596_v17, %v7825_v24  ;;  %v2419_v49 = vadd.f32 %v9394_v55, %v9641_v10 }
 0x224   :  { %2544 = vmatmul.bf16.gmra.mxu1 %v13000_v18 }
 0x225   :  { %12999 = vst [vmem:[#allocation109_spill] sm:$0xff] %v9683_v28  ;;  %2633 = vmatmul.bf16.gmra.mxu2 %v13002_v50  ;;  %3026 = vmatpush.bf16.msrb.mxu3 %v7826_v19  ;;  %v7313_v28 = vld [vmem:[#allocation5 + $0x248] sm:$0xf]  ;;  %v13006_v19 = vld [vmem:[#allocation25_spill] sm:$0xff] }
 0x226   :  { %2722 = vmatmul.bf16.gmra.mxu3 %v13003_v59  ;;  %v8468_v59 = vld [vmem:[#allocation5 + $0x264] sm:$0xf0] }
 0x227   :  { %v7314_v50 = vor.u32 %v8468_v59, %v7313_v28  ;;  %v7187_v59 = vld [vmem:[#allocation5 + $0x168] sm:$0xf0]  ;;  %v2427_v28 = vadd.f32 %v9424_v9, %v9641_v10  ;;  %v7537_v9 = vld [vmem:[#allocation5 + $0x408] sm:$0xf] }
 0x228   :  { %v2594_v32 = vpop.f32.mrf.mxu2  ;;  %v9693_v18 = vpop.f32.mrf.mxu0 }
 0x229   :  { %v2683_v62 = vpop.f32.mrf.mxu3  ;;  %v2595_v8 = vadd.f32 %v2594_v32, %v2506_v42  ;;  %v2507_v61 = vpop.f32.mrf.mxu1  ;;  %2848 = vmatpush.bf16.msrb.mxu1 %v7314_v50  ;;  %v13008_v50 = vld [vmem:[#allocation68_spill] sm:$0xff] }
 0x22a   :  { %v2508_v40 = vadd.f32 %v2507_v61, %v2419_v49  ;;  %v13007_v61 = vld [vmem:[#allocation67_spill] sm:$0xff]  ;;  %v2424_v49 = vadd.f32 %v9418_v46, %v9641_v10 }
 0x22b   :  { %v9695_v37 = vadd.f32 %v2683_v62, %v2595_v8 }
 0x22d   :  { %13004 = vst [vmem:[#allocation110_spill] sm:$0xff] %v9695_v37 }
 0x230   :  { %v2596_v31 = vpop.f32.mrf.mxu2  ;;  %v9699_v57 = vpop.f32.mrf.mxu0 }
 0x231   :  { %v2685_v55 = vpop.f32.mrf.mxu3  ;;  %v2597_v24 = vadd.f32 %v2596_v31, %v2508_v40  ;;  %v2510_v17 = vpop.f32.mrf.mxu1  ;;  %v7190_v40 = vor.u32 %v8432_v1, %v7187_v59 }
 0x232   :  { %v2511_v42 = vadd.f32 %v2510_v17, %v2422_v48 }
 0x233   :  { %v9701_v32 = vadd.f32 %v2685_v55, %v2597_v24  ;;  %2816 = vmatmul.bf16.gmra.mxu0 %v13006_v19 }
 0x234   :  { %2549 = vmatmul.bf16.gmra.mxu1 %v9400_v33  ;;  %3111 = vmatpush.bf16.msrb.mxu0 %v7190_v40 }
 0x235   :  { %13005 = vst [vmem:[#allocation111_spill] sm:$0xff] %v9701_v32  ;;  %2638 = vmatmul.bf16.gmra.mxu2 %v13007_v61 }
 0x236   :  { %2727 = vmatmul.bf16.gmra.mxu3 %v13008_v50 }
 0x238   :  { %v2599_v62 = vpop.f32.mrf.mxu2  ;;  %v9711_v55 = vpop.f32.mrf.mxu0 }
 0x239   :  { %v2688_v8 = vpop.f32.mrf.mxu3  ;;  %v2600_v48 = vadd.f32 %v2599_v62, %v2511_v42  ;;  %v2512_v31 = vpop.f32.mrf.mxu1  ;;  %13009 = vst [vmem:[#allocation112_spill] sm:$0xff] %v9711_v55  ;;  %v13013_v42 = vld [vmem:[#allocation18_spill] sm:$0xff]  ;;  %v13015_v62 = vld [vmem:[#allocation73_spill] sm:$0xff] }
 0x23a   :  { %v2513_v24 = vadd.f32 %v2512_v31, %v2424_v49  ;;  %v13014_v49 = vld [vmem:[#allocation72_spill] sm:$0xff] }
 0x23b   :  { %v9713_v17 = vadd.f32 %v2688_v8, %v2600_v48  ;;  %v8524_v8 = vld [vmem:[#allocation5 + $0x424] sm:$0xf0] }
 0x23c   :  { %v7538_v48 = vor.u32 %v8524_v8, %v7537_v9  ;;  %v8588_v31 = vld [vmem:[#allocation5 + $0x624] sm:$0xf0]  ;;  %v8424_v9 = vld [vmem:[#allocation5 + $0x10c] sm:$0xf] }
 0x23d   :  { %13010 = vst [vmem:[#allocation113_spill] sm:$0xff] %v9713_v17  ;;  %v7155_v8 = vld [vmem:[#allocation5 + $0x128] sm:$0xf0] }
 0x23e   :  { %2938 = vmatpush.bf16.msrb.mxu2 %v7538_v48  ;;  %v7158_v48 = vor.u32 %v8424_v9, %v7155_v8  ;;  %v13021_v9 = vld [vmem:[#allocation80_spill] sm:$0xff] }
 0x23f   :  { %v2434_v8 = vadd.f32 %v13021_v9, %v9641_v10  ;;  %v2437_v9 = vadd.f32 %v9468_v53, %v9641_v10  ;;  %v13024_v53 = vld [vmem:[#allocation82_spill] sm:$0xff] }
 0x240   :  { %v2601_v37 = vpop.f32.mrf.mxu2  ;;  %v9717_v59 = vpop.f32.mrf.mxu0  ;;  %3112 = vmatpush.bf16.msrb.mxu0 %v7158_v48 }
 0x241   :  { %v2690_v32 = vpop.f32.mrf.mxu3  ;;  %v2602_v50 = vadd.f32 %v2601_v37, %v2513_v24  ;;  %v2515_v1 = vpop.f32.mrf.mxu1  ;;  %13011 = vst [vmem:[#allocation114_spill] sm:$0xff] %v9717_v59  ;;  %v7793_v37 = vld [vmem:[#allocation5 + $0x608] sm:$0xf] }
 0x242   :  { %v2516_v46 = vadd.f32 %v2515_v1, %v2427_v28  ;;  %v7794_v24 = vor.u32 %v8588_v31, %v7793_v37  ;;  %v2432_v37 = vadd.f32 %v9446_v54, %v9641_v10  ;;  %v8400_v54 = vld [vmem:[#allocation5 + $0x4c] sm:$0xf] }
 0x243   :  { %v9719_v61 = vadd.f32 %v2690_v32, %v2602_v50  ;;  %2821 = vmatmul.bf16.gmra.mxu0 %v13013_v42  ;;  %v13016_v32 = vld [vmem:[#allocation75_spill] sm:$0xff] }
 0x244   :  { %2554 = vmatmul.bf16.gmra.mxu1 %v9422_v7  ;;  %v2429_v28 = vadd.f32 %v13016_v32, %v9641_v10  ;;  %3027 = vmatpush.bf16.msrb.mxu3 %v7794_v24 }
 0x245   :  { %13012 = vst [vmem:[#allocation115_spill] sm:$0xff] %v9719_v61  ;;  %2643 = vmatmul.bf16.gmra.mxu2 %v13014_v49  ;;  %v7281_v61 = vld [vmem:[#allocation5 + $0x208] sm:$0xf] }
 0x246   :  { %2732 = vmatmul.bf16.gmra.mxu3 %v13015_v62  ;;  %v8460_v62 = vld [vmem:[#allocation5 + $0x224] sm:$0xf0] }
 0x247   :  { %v7282_v49 = vor.u32 %v8460_v62, %v7281_v61  ;;  %v8408_v62 = vld [vmem:[#allocation5 + $0x8c] sm:$0xf] }
 0x248   :  { %v2604_v50 = vpop.f32.mrf.mxu2  ;;  %v9729_v59 = vpop.f32.mrf.mxu0 }
 0x249   :  { %v2693_v1 = vpop.f32.mrf.mxu3  ;;  %v2605_v42 = vadd.f32 %v2604_v50, %v2516_v46  ;;  %v2517_v7 = vpop.f32.mrf.mxu1  ;;  %2849 = vmatpush.bf16.msrb.mxu1 %v7282_v49  ;;  %v13019_v49 = vld [vmem:[#allocation77_spill] sm:$0xff] }
 0x24a   :  { %v2518_v40 = vadd.f32 %v2517_v7, %v2429_v28  ;;  %v7123_v28 = vld [vmem:[#allocation5 + $0xe8] sm:$0xf0] }
 0x24b   :  { %v9731_v17 = vadd.f32 %v2693_v1, %v2605_v42  ;;  %v8416_v42 = vld [vmem:[#allocation5 + $0xcc] sm:$0xf] }
 0x24c   :  { %v7126_v61 = vor.u32 %v8416_v42, %v7123_v28  ;;  %v7091_v1 = vld [vmem:[#allocation5 + $0xa8] sm:$0xf0] }
 0x24d   :  { %13017 = vst [vmem:[#allocation75_spill] sm:$0xff] %v9731_v17  ;;  %v7059_v17 = vld [vmem:[#allocation5 + $0x68] sm:$0xf0] }
 0x24e   :  { %3113 = vmatpush.bf16.msrb.mxu0 %v7126_v61  ;;  %v8392_v61 = vld [vmem:[#allocation5 + $0xc] sm:$0xf] }
 0x250   :  { %v2606_v31 = vpop.f32.mrf.mxu2  ;;  %v9735_v55 = vpop.f32.mrf.mxu0 }
 0x251   :  { %v2695_v32 = vpop.f32.mrf.mxu3  ;;  %v2607_v46 = vadd.f32 %v2606_v31, %v2518_v40  ;;  %v2520_v50 = vpop.f32.mrf.mxu1  ;;  %v13020_v40 = vld [vmem:[#allocation78_spill] sm:$0xff] }
 0x252   :  { %v2521_v24 = vadd.f32 %v2520_v50, %v2432_v37 }
 0x253   :  { %v9737_v7 = vadd.f32 %v2695_v32, %v2607_v46  ;;  %2826 = vmatmul.bf16.gmra.mxu0 %v9130_v44  ;;  %v7094_v32 = vor.u32 %v8408_v62, %v7091_v1 }
 0x254   :  { %2559 = vmatmul.bf16.gmra.mxu1 %v9444_v45 }
 0x255   :  { %13018 = vst [vmem:[#allocation116_spill] sm:$0xff] %v9737_v7  ;;  %2648 = vmatmul.bf16.gmra.mxu2 %v13019_v49  ;;  %3114 = vmatpush.bf16.msrb.mxu0 %v7094_v32  ;;  %v7062_v7 = vor.u32 %v8400_v54, %v7059_v17  ;;  %v7763_v54 = vld [vmem:[#allocation5 + $0x5e8] sm:$0xf0] }
 0x256   :  { %2737 = vmatmul.bf16.gmra.mxu3 %v13020_v40  ;;  %v7027_v40 = vld [vmem:[#allocation5 + $0x28] sm:$0xf0] }
 0x257   :  { %v7030_v62 = vor.u32 %v8392_v61, %v7027_v40  ;;  %v8019_v32 = vld [vmem:[#allocation5 + $0x7e8] sm:$0xf0] }
 0x258   :  { %v2609_v37 = vpop.f32.mrf.mxu2  ;;  %v9747_v50 = vpop.f32.mrf.mxu0 }
 0x259   :  { %v2698_v31 = vpop.f32.mrf.mxu3  ;;  %v2610_v48 = vadd.f32 %v2609_v37, %v2521_v24  ;;  %v2522_v46 = vpop.f32.mrf.mxu1  ;;  %3115 = vmatpush.bf16.msrb.mxu0 %v7062_v7  ;;  %v8576_v7 = vld [vmem:[#allocation5 + $0x5cc] sm:$0xf] }
 0x25a   :  { %v2523_v42 = vadd.f32 %v2522_v46, %v2434_v8  ;;  %v7766_v40 = vor.u32 %v8576_v7, %v7763_v54  ;;  %v2442_v7 = vadd.f32 %v9490_v52, %v9641_v10  ;;  %v2444_v52 = vadd.f32 %v9505_v16, %v9641_v10 }
 0x25b   :  { %v9749_v28 = vadd.f32 %v2698_v31, %v2610_v48 }
 0x25c   :  { %3287 = vmatpush.bf16.msra.mxu2 %v7766_v40 }
 0x25d   :  { %13022 = vst [vmem:[#allocation80_spill] sm:$0xff] %v9749_v28  ;;  %3116 = vmatpush.bf16.msrb.mxu0 %v7030_v62  ;;  %v8512_v28 = vld [vmem:[#allocation5 + $0x3cc] sm:$0xf] }
 0x260   :  { %v2611_v49 = vpop.f32.mrf.mxu2  ;;  %v9753_v37 = vpop.f32.mrf.mxu0 }
 0x261   :  { %v2700_v44 = vpop.f32.mrf.mxu3  ;;  %v2612_v24 = vadd.f32 %v2611_v49, %v2523_v42  ;;  %v2525_v1 = vpop.f32.mrf.mxu1  ;;  %v8640_v49 = vld [vmem:[#allocation5 + $0x7cc] sm:$0xf] }
 0x262   :  { %v2526_v8 = vadd.f32 %v2525_v1, %v2437_v9  ;;  %v8022_v48 = vor.u32 %v8640_v49, %v8019_v32 }
 0x263   :  { %v9755_v31 = vadd.f32 %v2700_v44, %v2612_v24  ;;  %2831 = vmatmul.bf16.gmra.mxu0 %v9142_v30  ;;  %v13025_v44 = vld [vmem:[#allocation84_spill] sm:$0xff] }
 0x264   :  { %2564 = vmatmul.bf16.gmra.mxu1 %v9466_v14  ;;  %v2439_v46 = vadd.f32 %v13025_v44, %v9641_v10  ;;  %3376 = vmatpush.bf16.msra.mxu3 %v8022_v48 }
 0x265   :  { %13023 = vst [vmem:[#allocation117_spill] sm:$0xff] %v9755_v31  ;;  %2653 = vmatmul.bf16.gmra.mxu2 %v9470_v11  ;;  %v7507_v31 = vld [vmem:[#allocation5 + $0x3e8] sm:$0xf0] }
 0x266   :  { %2742 = vmatmul.bf16.gmra.mxu3 %v13024_v53  ;;  %v7510_v53 = vor.u32 %v8512_v28, %v7507_v31 }
 0x268   :  { %v2614_v42 = vpop.f32.mrf.mxu2  ;;  %v9765_v24 = vpop.f32.mrf.mxu0  ;;  %3198 = vmatpush.bf16.msra.mxu1 %v7510_v53 }
 0x269   :  { %v2703_v61 = vpop.f32.mrf.mxu3  ;;  %v2615_v9 = vadd.f32 %v2614_v42, %v2526_v8  ;;  %v2527_v62 = vpop.f32.mrf.mxu1 }
 0x26a   :  { %v2528_v1 = vadd.f32 %v2527_v62, %v2439_v46 }
 0x26b   :  { %v9767_v17 = vadd.f32 %v2703_v61, %v2615_v9 }
 0x26d   :  { %13026 = vst [vmem:[#allocation84_spill] sm:$0xff] %v9767_v17  ;;  %v7475_v17 = vld [vmem:[#allocation5 + $0x3a8] sm:$0xf0] }
 0x270   :  { %v2616_v54 = vpop.f32.mrf.mxu2  ;;  %v9771_v40 = vpop.f32.mrf.mxu0 }
 0x271   :  { %v2705_v49 = vpop.f32.mrf.mxu3  ;;  %v2617_v32 = vadd.f32 %v2616_v54, %v2528_v1  ;;  %v2530_v44 = vpop.f32.mrf.mxu1  ;;  %v2447_v1 = vadd.f32 %v9510_v15, %v9641_v10  ;;  %v8568_v15 = vld [vmem:[#allocation5 + $0x58c] sm:$0xf] }
 0x272   :  { %v2531_v8 = vadd.f32 %v2530_v44, %v2442_v7 }
 0x273   :  { %v9773_v42 = vadd.f32 %v2705_v49, %v2617_v32  ;;  %2836 = vmatmul.bf16.gmra.mxu0 %v9154_v60 }
 0x274   :  { %2569 = vmatmul.bf16.gmra.mxu1 %v9488_v13 }
 0x275   :  { %13027 = vst [vmem:[#allocation118_spill] sm:$0xff] %v9773_v42  ;;  %2658 = vmatmul.bf16.gmra.mxu2 %v9492_v39 }
 0x276   :  { %2747 = vmatmul.bf16.gmra.mxu3 %v9494_v51 }
 0x278   :  { %v2619_v31 = vpop.f32.mrf.mxu2  ;;  %v9783_v61 = vpop.f32.mrf.mxu0 }
 0x279   :  { %v2708_v53 = vpop.f32.mrf.mxu3  ;;  %v2620_v48 = vadd.f32 %v2619_v31, %v2531_v8  ;;  %v2532_v46 = vpop.f32.mrf.mxu1  ;;  %v8632_v31 = vld [vmem:[#allocation5 + $0x78c] sm:$0xf] }
 0x27a   :  { %v2533_v9 = vadd.f32 %v2532_v46, %v2444_v52  ;;  %v7731_v52 = vld [vmem:[#allocation5 + $0x5a8] sm:$0xf0] }
 0x27b   :  { %v9785_v62 = vadd.f32 %v2708_v53, %v2620_v48  ;;  %v7734_v53 = vor.u32 %v8568_v15, %v7731_v52  ;;  %v7987_v48 = vld [vmem:[#allocation5 + $0x7a8] sm:$0xf0]  ;;  %v2452_v15 = vadd.f32 %v9526_v26, %v9641_v10  ;;  %v2454_v26 = vadd.f32 %v9537_v2, %v9641_v10 }
 0x27c   :  { %v7990_v46 = vor.u32 %v8632_v31, %v7987_v48 }
 0x27d   :  { %13028 = vst [vmem:[#allocation119_spill] sm:$0xff] %v9785_v62  ;;  %3288 = vmatpush.bf16.msra.mxu2 %v7734_v53 }
 0x27e   :  { %3377 = vmatpush.bf16.msra.mxu3 %v7990_v46 }
 0x280   :  { %v2621_v7 = vpop.f32.mrf.mxu2  ;;  %v9789_v44 = vpop.f32.mrf.mxu0 }
 0x281   :  { %v2710_v54 = vpop.f32.mrf.mxu3  ;;  %v2622_v49 = vadd.f32 %v2621_v7, %v2533_v9  ;;  %v2535_v32 = vpop.f32.mrf.mxu1  ;;  %v2449_v9 = vadd.f32 %v9521_v12, %v9641_v10 }
 0x282   :  { %v2536_v28 = vadd.f32 %v2535_v32, %v2447_v1 }
 0x283   :  { %v9791_v16 = vadd.f32 %v2710_v54, %v2622_v49  ;;  %3117 = vmatmul.bf16.vlgmr.msrb.gmra.mxu0 %v9112_v41 }
 0x284   :  { %2850 = vmatmul.bf16.vlgmr.msrb.gmra.mxu1 %v9160_v3 }
 0x285   :  { %13029 = vst [vmem:[#allocation120_spill] sm:$0xff] %v9791_v16  ;;  %2939 = vmatmul.bf16.vlgmr.msrb.gmra.mxu2 %v9162_v4  ;;  %v8504_v16 = vld [vmem:[#allocation5 + $0x38c] sm:$0xf] }
 0x286   :  { %3028 = vmatmul.bf16.vlgmr.msrb.gmra.mxu3 %v9164_v5  ;;  %v7478_v42 = vor.u32 %v8504_v16, %v7475_v17 }
 0x288   :  { %v2624_v1 = vpop.f32.mrf.mxu2  ;;  %v9801_v32 = vpop.f32.mrf.mxu0  ;;  %3199 = vmatpush.bf16.msra.mxu1 %v7478_v42 }
 0x289   :  { %v2713_v7 = vpop.f32.mrf.mxu3  ;;  %v2625_v54 = vadd.f32 %v2624_v1, %v2536_v28  ;;  %v2537_v49 = vpop.f32.mrf.mxu1 }
 0x28a   :  { %v2538_v8 = vadd.f32 %v2537_v49, %v2449_v9  ;;  %v2457_v49 = vadd.f32 %v9542_v63, %v9641_v10  ;;  %v8560_v63 = vld [vmem:[#allocation5 + $0x54c] sm:$0xf] }
 0x28b   :  { %v9803_v62 = vadd.f32 %v2713_v7, %v2625_v54 }
 0x28d   :  { %13030 = vst [vmem:[#allocation121_spill] sm:$0xff] %v9803_v62  ;;  %v7443_v62 = vld [vmem:[#allocation5 + $0x368] sm:$0xf0] }
 0x290   :  { %v2626_v52 = vpop.f32.mrf.mxu2  ;;  %v9807_v53 = vpop.f32.mrf.mxu0 }
 0x291   :  { %v2715_v12 = vpop.f32.mrf.mxu3  ;;  %v2627_v31 = vadd.f32 %v2626_v52, %v2538_v8  ;;  %v2540_v48 = vpop.f32.mrf.mxu1 }
 0x292   :  { %v2541_v28 = vadd.f32 %v2540_v48, %v2452_v15 }
 0x293   :  { %v9809_v1 = vadd.f32 %v2715_v12, %v2627_v31  ;;  %3122 = vmatmul.bf16.gmra.mxu0 %v9124_v36 }
 0x294   :  { %2855 = vmatmul.bf16.gmra.mxu1 %v9170_v21 }
 0x295   :  { %13031 = vst [vmem:[#allocation122_spill] sm:$0xff] %v9809_v1  ;;  %2944 = vmatmul.bf16.gmra.mxu2 %v9172_v22 }
 0x296   :  { %3033 = vmatmul.bf16.gmra.mxu3 %v9174_v23 }
 0x298   :  { %v2629_v42 = vpop.f32.mrf.mxu2  ;;  %v9819_v9 = vpop.f32.mrf.mxu0 }
 0x299   :  { %v2718_v16 = vpop.f32.mrf.mxu3  ;;  %v2630_v8 = vadd.f32 %v2629_v42, %v2541_v28  ;;  %v2542_v46 = vpop.f32.mrf.mxu1  ;;  %v8624_v42 = vld [vmem:[#allocation5 + $0x74c] sm:$0xf] }
 0x29a   :  { %v2543_v7 = vadd.f32 %v2542_v46, %v2454_v26  ;;  %v7699_v26 = vld [vmem:[#allocation5 + $0x568] sm:$0xf0] }
 0x29b   :  { %v9821_v54 = vadd.f32 %v2718_v16, %v2630_v8  ;;  %v7702_v16 = vor.u32 %v8560_v63, %v7699_v26  ;;  %v7955_v8 = vld [vmem:[#allocation5 + $0x768] sm:$0xf0]  ;;  %v2462_v63 = vadd.f32 %v9558_v20, %v9641_v10  ;;  %v13040_v20 = vld [vmem:[#allocation95_spill] sm:$0xff] }
 0x29c   :  { %v7958_v46 = vor.u32 %v8624_v42, %v7955_v8 }
 0x29d   :  { %13032 = vst [vmem:[#allocation123_spill] sm:$0xff] %v9821_v54  ;;  %3289 = vmatpush.bf16.msra.mxu2 %v7702_v16 }
 0x29e   :  { %3378 = vmatpush.bf16.msra.mxu3 %v7958_v46  ;;  %v13037_v46 = vld [vmem:[#allocation23_spill] sm:$0xff] }
 0x2a0   :  { %v2631_v15 = vpop.f32.mrf.mxu2  ;;  %v9825_v48 = vpop.f32.mrf.mxu0 }
 0x2a1   :  { %v2720_v52 = vpop.f32.mrf.mxu3  ;;  %v2632_v12 = vadd.f32 %v2631_v15, %v2543_v7  ;;  %v2545_v31 = vpop.f32.mrf.mxu1  ;;  %v2459_v7 = vadd.f32 %v9553_v47, %v9641_v10 }
 0x2a2   :  { %v2546_v17 = vadd.f32 %v2545_v31, %v2457_v49 }
 0x2a3   :  { %v9827_v2 = vadd.f32 %v2720_v52, %v2632_v12  ;;  %3127 = vmatmul.bf16.gmra.mxu0 %v9136_v27 }
 0x2a4   :  { %2860 = vmatmul.bf16.gmra.mxu1 %v9180_v34 }
 0x2a5   :  { %13033 = vst [vmem:[#allocation124_spill] sm:$0xff] %v9827_v2  ;;  %2949 = vmatmul.bf16.gmra.mxu2 %v9182_v35  ;;  %v8496_v2 = vld [vmem:[#allocation5 + $0x34c] sm:$0xf] }
 0x2a6   :  { %3038 = vmatmul.bf16.gmra.mxu3 %v9184_v38  ;;  %v7446_v1 = vor.u32 %v8496_v2, %v7443_v62  ;;  %v13039_v2 = vld [vmem:[#allocation30_spill] sm:$0xff] }
 0x2a8   :  { %v2634_v49 = vpop.f32.mrf.mxu2  ;;  %v9837_v31 = vpop.f32.mrf.mxu0  ;;  %3200 = vmatpush.bf16.msra.mxu1 %v7446_v1  ;;  %v13038_v1 = vld [vmem:[#allocation29_spill] sm:$0xff] }
 0x2a9   :  { %v2723_v15 = vpop.f32.mrf.mxu3  ;;  %v2635_v52 = vadd.f32 %v2634_v49, %v2546_v17  ;;  %v2547_v12 = vpop.f32.mrf.mxu1 }
 0x2aa   :  { %v2548_v28 = vadd.f32 %v2547_v12, %v2459_v7 }
 0x2ab   :  { %v9839_v54 = vadd.f32 %v2723_v15, %v2635_v52 }
 0x2ad   :  { %13034 = vst [vmem:[#allocation125_spill] sm:$0xff] %v9839_v54 }
 0x2b0   :  { %v2636_v26 = vpop.f32.mrf.mxu2  ;;  %v9843_v16 = vpop.f32.mrf.mxu0 }
 0x2b1   :  { %v2725_v47 = vpop.f32.mrf.mxu3  ;;  %v2637_v42 = vadd.f32 %v2636_v26, %v2548_v28  ;;  %v2550_v8 = vpop.f32.mrf.mxu1  ;;  %13035 = vst [vmem:[#allocation126_spill] sm:$0xff] %v9843_v16  ;;  %v2464_v28 = vadd.f32 %v13040_v20, %v9641_v10 }
 0x2b2   :  { %v2551_v17 = vadd.f32 %v2550_v8, %v2462_v63 }
 0x2b3   :  { %v9845_v49 = vadd.f32 %v2725_v47, %v2637_v42  ;;  %3132 = vmatmul.bf16.gmra.mxu0 %v13037_v46  ;;  %v13043_v42 = vld [vmem:[#allocation96_spill] sm:$0xff] }
 0x2b4   :  { %2865 = vmatmul.bf16.gmra.mxu1 %v9190_v0  ;;  %v2467_v8 = vadd.f32 %v13043_v42, %v9641_v10  ;;  %v13046_v0 = vld [vmem:[#allocation31_spill] sm:$0xff]  ;;  %v7923_v42 = vld [vmem:[#allocation5 + $0x728] sm:$0xf0] }
 0x2b5   :  { %13036 = vst [vmem:[#allocation127_spill] sm:$0xff] %v9845_v49  ;;  %2954 = vmatmul.bf16.gmra.mxu2 %v13038_v1 }
 0x2b6   :  { %3043 = vmatmul.bf16.gmra.mxu3 %v13039_v2 }
 0x2b8   :  { %v2639_v7 = vpop.f32.mrf.mxu2  ;;  %v9855_v63 = vpop.f32.mrf.mxu0 }
 0x2b9   :  { %v2728_v15 = vpop.f32.mrf.mxu3  ;;  %v2640_v52 = vadd.f32 %v2639_v7, %v2551_v17  ;;  %v2552_v12 = vpop.f32.mrf.mxu1  ;;  %13041 = vst [vmem:[#allocation95_spill] sm:$0xff] %v9855_v63  ;;  %v13047_v17 = vld [vmem:[#allocation16_spill] sm:$0xff] }
 0x2ba   :  { %v2553_v26 = vadd.f32 %v2552_v12, %v2464_v28  ;;  %v13048_v7 = vld [vmem:[#allocation32_spill] sm:$0xff] }
 0x2bb   :  { %v9857_v47 = vadd.f32 %v2728_v15, %v2640_v52  ;;  %v13049_v15 = vld [vmem:[#allocation33_spill] sm:$0xff]  ;;  %v8552_v52 = vld [vmem:[#allocation5 + $0x50c] sm:$0xf] }
 0x2bc   :  { %v7667_v12 = vld [vmem:[#allocation5 + $0x528] sm:$0xf0] }
 0x2bd   :  { %13042 = vst [vmem:[#allocation128_spill] sm:$0xff] %v9857_v47 }
 0x2c0   :  { %v2641_v62 = vpop.f32.mrf.mxu2  ;;  %v9861_v2 = vpop.f32.mrf.mxu0 }
 0x2c1   :  { %v2730_v54 = vpop.f32.mrf.mxu3  ;;  %v2642_v49 = vadd.f32 %v2641_v62, %v2553_v26  ;;  %v2555_v1 = vpop.f32.mrf.mxu1  ;;  %13044 = vst [vmem:[#allocation96_spill] sm:$0xff] %v9861_v2  ;;  %v8616_v62 = vld [vmem:[#allocation5 + $0x70c] sm:$0xf]  ;;  %v7670_v26 = vor.u32 %v8552_v52, %v7667_v12  ;;  %v13053_v52 = vld [vmem:[#allocation98_spill] sm:$0xff] }
 0x2c2   :  { %v2556_v46 = vadd.f32 %v2555_v1, %v2467_v8  ;;  %v7926_v2 = vor.u32 %v8616_v62, %v7923_v42  ;;  %v2472_v12 = vadd.f32 %v13053_v52, %v9641_v10 }
 0x2c3   :  { %v9863_v20 = vadd.f32 %v2730_v54, %v2642_v49  ;;  %3137 = vmatmul.bf16.gmra.mxu0 %v13047_v17  ;;  %v13050_v54 = vld [vmem:[#allocation97_spill] sm:$0xff]  ;;  %3290 = vmatpush.bf16.msra.mxu2 %v7670_v26 }
 0x2c4   :  { %2870 = vmatmul.bf16.gmra.mxu1 %v13046_v0  ;;  %v2469_v49 = vadd.f32 %v13050_v54, %v9641_v10  ;;  %3379 = vmatpush.bf16.msra.mxu3 %v7926_v2  ;;  %v13056_v2 = vld [vmem:[#allocation35_spill] sm:$0xff] }
 0x2c5   :  { %13045 = vst [vmem:[#allocation129_spill] sm:$0xff] %v9863_v20  ;;  %2959 = vmatmul.bf16.gmra.mxu2 %v13048_v7  ;;  %v8488_v20 = vld [vmem:[#allocation5 + $0x30c] sm:$0xf] }
 0x2c6   :  { %3048 = vmatmul.bf16.gmra.mxu3 %v13049_v15  ;;  %v7411_v15 = vld [vmem:[#allocation5 + $0x328] sm:$0xf0] }
 0x2c7   :  { %v7414_v7 = vor.u32 %v8488_v20, %v7411_v15  ;;  %v13060_v15 = vld [vmem:[#allocation99_spill] sm:$0xff] }
 0x2c8   :  { %v2644_v1 = vpop.f32.mrf.mxu2  ;;  %v9873_v63 = vpop.f32.mrf.mxu0 }
 0x2c9   :  { %v2733_v8 = vpop.f32.mrf.mxu3  ;;  %v2645_v17 = vadd.f32 %v2644_v1, %v2556_v46  ;;  %v2557_v0 = vpop.f32.mrf.mxu1  ;;  %13051 = vst [vmem:[#allocation97_spill] sm:$0xff] %v9873_v63  ;;  %3201 = vmatpush.bf16.msra.mxu1 %v7414_v7  ;;  %v13059_v7 = vld [vmem:[#allocation38_spill] sm:$0xff] }
 0x2ca   :  { %v2558_v28 = vadd.f32 %v2557_v0, %v2469_v49  ;;  %v13057_v0 = vld [vmem:[#allocation19_spill] sm:$0xff] }
 0x2cb   :  { %v9875_v47 = vadd.f32 %v2733_v8, %v2645_v17  ;;  %v13058_v17 = vld [vmem:[#allocation37_spill] sm:$0xff] }
 0x2cd   :  { %13052 = vst [vmem:[#allocation130_spill] sm:$0xff] %v9875_v47 }
 0x2d0   :  { %v2646_v62 = vpop.f32.mrf.mxu2  ;;  %v9879_v26 = vpop.f32.mrf.mxu0 }
 0x2d1   :  { %v2735_v42 = vpop.f32.mrf.mxu3  ;;  %v2647_v54 = vadd.f32 %v2646_v62, %v2558_v28  ;;  %v2560_v16 = vpop.f32.mrf.mxu1  ;;  %13054 = vst [vmem:[#allocation98_spill] sm:$0xff] %v9879_v26  ;;  %v2474_v28 = vadd.f32 %v13060_v15, %v9641_v10  ;;  %v13066_v26 = vld [vmem:[#allocation40_spill] sm:$0xff] }
 0x2d2   :  { %v2561_v46 = vadd.f32 %v2560_v16, %v2472_v12 }
 0x2d3   :  { %v9881_v1 = vadd.f32 %v2735_v42, %v2647_v54  ;;  %3142 = vmatmul.bf16.gmra.mxu0 %v13057_v0  ;;  %v13063_v54 = vld [vmem:[#allocation100_spill] sm:$0xff] }
 0x2d4   :  { %2875 = vmatmul.bf16.gmra.mxu1 %v13056_v2  ;;  %v2477_v0 = vadd.f32 %v13063_v54, %v9641_v10  ;;  %v7891_v54 = vld [vmem:[#allocation5 + $0x6e8] sm:$0xf0] }
 0x2d5   :  { %13055 = vst [vmem:[#allocation131_spill] sm:$0xff] %v9881_v1  ;;  %2964 = vmatmul.bf16.gmra.mxu2 %v13058_v17 }
 0x2d6   :  { %3053 = vmatmul.bf16.gmra.mxu3 %v13059_v7 }
 0x2d8   :  { %v2649_v49 = vpop.f32.mrf.mxu2  ;;  %v9891_v12 = vpop.f32.mrf.mxu0 }
 0x2d9   :  { %v2738_v8 = vpop.f32.mrf.mxu3  ;;  %v2650_v52 = vadd.f32 %v2649_v49, %v2561_v46  ;;  %v2562_v16 = vpop.f32.mrf.mxu1  ;;  %13061 = vst [vmem:[#allocation99_spill] sm:$0xff] %v9891_v12  ;;  %v13067_v46 = vld [vmem:[#allocation21_spill] sm:$0xff]  ;;  %v13068_v49 = vld [vmem:[#allocation42_spill] sm:$0xff] }
 0x2da   :  { %v2563_v62 = vadd.f32 %v2562_v16, %v2474_v28  ;;  %v7635_v16 = vld [vmem:[#allocation5 + $0x4e8] sm:$0xf0] }
 0x2db   :  { %v9893_v42 = vadd.f32 %v2738_v8, %v2650_v52  ;;  %v13069_v8 = vld [vmem:[#allocation43_spill] sm:$0xff]  ;;  %v8544_v52 = vld [vmem:[#allocation5 + $0x4cc] sm:$0xf] }
 0x2dd   :  { %13062 = vst [vmem:[#allocation132_spill] sm:$0xff] %v9893_v42 }
 0x2e0   :  { %v2651_v20 = vpop.f32.mrf.mxu2  ;;  %v9897_v7 = vpop.f32.mrf.mxu0 }
 0x2e1   :  { %v2740_v47 = vpop.f32.mrf.mxu3  ;;  %v2652_v1 = vadd.f32 %v2651_v20, %v2563_v62  ;;  %v2565_v17 = vpop.f32.mrf.mxu1  ;;  %13064 = vst [vmem:[#allocation100_spill] sm:$0xff] %v9897_v7  ;;  %v7638_v20 = vor.u32 %v8544_v52, %v7635_v16  ;;  %v8608_v62 = vld [vmem:[#allocation5 + $0x6cc] sm:$0xf]  ;;  %v13072_v16 = vld [vmem:[#allocation102_spill] sm:$0xff] }
 0x2e2   :  { %v2566_v2 = vadd.f32 %v2565_v17, %v2477_v0  ;;  %v7894_v7 = vor.u32 %v8608_v62, %v7891_v54  ;;  %v2482_v62 = vadd.f32 %v13072_v16, %v9641_v10 }
 0x2e3   :  { %v9899_v15 = vadd.f32 %v2740_v47, %v2652_v1  ;;  %3147 = vmatmul.bf16.gmra.mxu0 %v13067_v46  ;;  %v13070_v47 = vld [vmem:[#allocation101_spill] sm:$0xff]  ;;  %3291 = vmatpush.bf16.msra.mxu2 %v7638_v20 }
 0x2e4   :  { %2880 = vmatmul.bf16.gmra.mxu1 %v13066_v26  ;;  %v2479_v1 = vadd.f32 %v13070_v47, %v9641_v10  ;;  %3380 = vmatpush.bf16.msra.mxu3 %v7894_v7  ;;  %v13074_v7 = vld [vmem:[#allocation45_spill] sm:$0xff] }
 0x2e5   :  { %13065 = vst [vmem:[#allocation133_spill] sm:$0xff] %v9899_v15  ;;  %2969 = vmatmul.bf16.gmra.mxu2 %v13068_v49  ;;  %v8480_v15 = vld [vmem:[#allocation5 + $0x2cc] sm:$0xf] }
 0x2e6   :  { %3058 = vmatmul.bf16.gmra.mxu3 %v13069_v8  ;;  %v7379_v8 = vld [vmem:[#allocation5 + $0x2e8] sm:$0xf0] }
 0x2e7   :  { %v7382_v52 = vor.u32 %v8480_v15, %v7379_v8  ;;  %v13077_v8 = vld [vmem:[#allocation48_spill] sm:$0xff] }
 0x2e8   :  { %v2654_v0 = vpop.f32.mrf.mxu2  ;;  %v9909_v12 = vpop.f32.mrf.mxu0  ;;  %v13081_v15 = vld [vmem:[#allocation104_spill] sm:$0xff] }
 0x2e9   :  { %v2743_v17 = vpop.f32.mrf.mxu3  ;;  %v2655_v46 = vadd.f32 %v2654_v0, %v2566_v2  ;;  %v2567_v26 = vpop.f32.mrf.mxu1  ;;  %3202 = vmatpush.bf16.msra.mxu1 %v7382_v52  ;;  %v13078_v52 = vld [vmem:[#allocation103_spill] sm:$0xff] }
 0x2ea   :  { %v2568_v28 = vadd.f32 %v2567_v26, %v2479_v1  ;;  %v13075_v26 = vld [vmem:[#allocation24_spill] sm:$0xff]  ;;  %v7257_v1 = vld [vmem:[#allocation5 + $0x1d0] sm:$0xf]  ;;  %v2484_v16 = vadd.f32 %v13078_v52, %v9641_v10 }
 0x2eb   :  { %v9911_v42 = vadd.f32 %v2743_v17, %v2655_v46  ;;  %v13076_v46 = vld [vmem:[#allocation47_spill] sm:$0xff]  ;;  %v8453_v17 = vld [vmem:[#allocation5 + $0x1ec] sm:$0xf0] }
 0x2ed   :  { %13071 = vst [vmem:[#allocation101_spill] sm:$0xff] %v9911_v42  ;;  %v9932_v42 = vperm.slane %v13081_v15, 2 }
 0x2f0   :  { %v2656_v54 = vpop.f32.mrf.mxu2  ;;  %v9915_v20 = vpop.f32.mrf.mxu0 }
 0x2f1   :  { %v2745_v47 = vpop.f32.mrf.mxu3  ;;  %v2657_v49 = vadd.f32 %v2656_v54, %v2568_v28  ;;  %v2570_v63 = vpop.f32.mrf.mxu1  ;;  %v7258_v28 = vor.u32 %v8453_v17, %v7257_v1 }
 0x2f2   :  { %v2571_v2 = vadd.f32 %v2570_v63, %v2482_v62 }
 0x2f3   :  { %v9917_v0 = vadd.f32 %v2745_v47, %v2657_v49  ;;  %3152 = vmatmul.bf16.gmra.mxu0 %v13075_v26 }
 0x2f4   :  { %2885 = vmatmul.bf16.gmra.mxu1 %v13074_v7  ;;  %3465 = vmatpush.bf16.msra.mxu0 %v7258_v28 }
 0x2f5   :  { %13073 = vst [vmem:[#allocation102_spill] sm:$0xff] %v9917_v0  ;;  %2974 = vmatmul.bf16.gmra.mxu2 %v13076_v46  ;;  %v13082_v0 = vld [vmem:[#allocation53_spill] sm:$0xff] }
 0x2f6   :  { %3063 = vmatmul.bf16.gmra.mxu3 %v13077_v8  ;;  %v2763_v8 = vadd.f32 %v13082_v0, %v9932_v42  ;;  %v8536_v0 = vld [vmem:[#allocation5 + $0x48c] sm:$0xf] }
 0x2f8   :  { %v2659_v63 = vpop.f32.mrf.mxu2  ;;  %v9927_v47 = vpop.f32.mrf.mxu0 }
 0x2f9   :  { %v2748_v49 = vpop.f32.mrf.mxu3  ;;  %v2660_v62 = vadd.f32 %v2659_v63, %v2571_v2  ;;  %v2572_v54 = vpop.f32.mrf.mxu1  ;;  %13079 = vst [vmem:[#allocation103_spill] sm:$0xff] %v9927_v47  ;;  %v13085_v63 = vld [vmem:[#allocation50_spill] sm:$0xff]  ;;  %v7859_v47 = vld [vmem:[#allocation5 + $0x6a8] sm:$0xf0] }
 0x2fa   :  { %v2573_v26 = vadd.f32 %v2572_v54, %v2484_v16  ;;  %v13086_v16 = vld [vmem:[#allocation17_spill] sm:$0xff]  ;;  %v7603_v54 = vld [vmem:[#allocation5 + $0x4a8] sm:$0xf0] }
 0x2fb   :  { %v9929_v7 = vadd.f32 %v2748_v49, %v2660_v62  ;;  %v13087_v49 = vld [vmem:[#allocation54_spill] sm:$0xff]  ;;  %v13088_v62 = vld [vmem:[#allocation55_spill] sm:$0xff] }
 0x2fd   :  { %13080 = vst [vmem:[#allocation134_spill] sm:$0xff] %v9929_v7 }
 0x300   :  { %v2661_v1 = vpop.f32.mrf.mxu2  ;;  %v9936_v52 = vpop.f32.mrf.mxu0 }
 0x301   :  { %v2750_v17 = vpop.f32.mrf.mxu3  ;;  %v2662_v46 = vadd.f32 %v2661_v1, %v2573_v26  ;;  %v2851_v10 = vpop.f32.mrf.mxu1  ;;  %13083 = vst [vmem:[#allocation104_spill] sm:$0xff] %v9936_v52  ;;  %v8600_v26 = vld [vmem:[#allocation5 + $0x68c] sm:$0xf]  ;;  %v7606_v1 = vor.u32 %v8536_v0, %v7603_v54 }
 0x302   :  { %v2852_v28 = vadd.f32 %v2851_v10, %v2763_v8  ;;  %v7862_v52 = vor.u32 %v8600_v26, %v7859_v47  ;;  %v2768_v47 = vadd.f32 %v9663_v58, %v9932_v42  ;;  %v7225_v58 = vld [vmem:[#allocation5 + $0x190] sm:$0xf] }
 0x303   :  { %v9938_v2 = vadd.f32 %v2750_v17, %v2662_v46  ;;  %3157 = vmatmul.bf16.gmra.mxu0 %v13086_v16  ;;  %v2765_v46 = vadd.f32 %v9657_v6, %v9932_v42  ;;  %3292 = vmatpush.bf16.msra.mxu2 %v7606_v1 }
 0x304   :  { %2890 = vmatmul.bf16.gmra.mxu1 %v13085_v63  ;;  %3381 = vmatpush.bf16.msra.mxu3 %v7862_v52 }
 0x305   :  { %13084 = vst [vmem:[#allocation53_spill] sm:$0xff] %v9938_v2  ;;  %2979 = vmatmul.bf16.gmra.mxu2 %v13087_v49  ;;  %v8472_v2 = vld [vmem:[#allocation5 + $0x28c] sm:$0xf] }
 0x306   :  { %3068 = vmatmul.bf16.gmra.mxu3 %v13088_v62  ;;  %v7347_v62 = vld [vmem:[#allocation5 + $0x2a8] sm:$0xf0] }
 0x307   :  { %v7350_v49 = vor.u32 %v8472_v2, %v7347_v62  ;;  %v13091_v2 = vld [vmem:[#allocation58_spill] sm:$0xff] }
 0x308   :  { %v2940_v8 = vpop.f32.mrf.mxu2  ;;  %v9948_v63 = vpop.f32.mrf.mxu0 }
 0x309   :  { %v3029_v17 = vpop.f32.mrf.mxu3  ;;  %v2941_v10 = vadd.f32 %v2940_v8, %v2852_v28  ;;  %v2853_v16 = vpop.f32.mrf.mxu1  ;;  %3203 = vmatpush.bf16.msra.mxu1 %v7350_v49  ;;  %v2770_v49 = vadd.f32 %v9675_v56, %v9932_v42 }
 0x30a   :  { %v2854_v15 = vadd.f32 %v2853_v16, %v2765_v46  ;;  %v8445_v16 = vld [vmem:[#allocation5 + $0x1ac] sm:$0xf0] }
 0x30b   :  { %v9950_v7 = vadd.f32 %v3029_v17, %v2941_v10 }
 0x30d   :  { %13089 = vst [vmem:[#allocation135_spill] sm:$0xff] %v9950_v7 }
 0x310   :  { %v2942_v0 = vpop.f32.mrf.mxu2  ;;  %v9954_v1 = vpop.f32.mrf.mxu0 }
 0x311   :  { %v3031_v6 = vpop.f32.mrf.mxu3  ;;  %v2943_v54 = vadd.f32 %v2942_v0, %v2854_v15  ;;  %v2856_v26 = vpop.f32.mrf.mxu1  ;;  %v7226_v15 = vor.u32 %v8445_v16, %v7225_v58 }
 0x312   :  { %v2857_v28 = vadd.f32 %v2856_v26, %v2768_v47 }
 0x313   :  { %v9956_v8 = vadd.f32 %v3031_v6, %v2943_v54  ;;  %3162 = vmatmul.bf16.gmra.mxu0 %v9128_v43  ;;  %v13093_v54 = vld [vmem:[#allocation108_spill] sm:$0xff] }
 0x314   :  { %2895 = vmatmul.bf16.gmra.mxu1 %v9352_v25  ;;  %3466 = vmatpush.bf16.msra.mxu0 %v7226_v15  ;;  %v2773_v26 = vadd.f32 %v13093_v54, %v9932_v42  ;;  %v13096_v15 = vld [vmem:[#allocation61_spill] sm:$0xff]  ;;  %v7827_v54 = vld [vmem:[#allocation5 + $0x668] sm:$0xf0] }
 0x315   :  { %13090 = vst [vmem:[#allocation136_spill] sm:$0xff] %v9956_v8  ;;  %2984 = vmatmul.bf16.gmra.mxu2 %v12995_v29 }
 0x316   :  { %3073 = vmatmul.bf16.gmra.mxu3 %v13091_v2 }
 0x318   :  { %v2945_v62 = vpop.f32.mrf.mxu2  ;;  %v9966_v47 = vpop.f32.mrf.mxu0 }
 0x319   :  { %v3034_v46 = vpop.f32.mrf.mxu3  ;;  %v2946_v17 = vadd.f32 %v2945_v62, %v2857_v28  ;;  %v2858_v10 = vpop.f32.mrf.mxu1  ;;  %v13097_v28 = vld [vmem:[#allocation22_spill] sm:$0xff] }
 0x31a   :  { %v2859_v0 = vadd.f32 %v2858_v10, %v2770_v49  ;;  %v13098_v62 = vld [vmem:[#allocation62_spill] sm:$0xff]  ;;  %v7571_v10 = vld [vmem:[#allocation5 + $0x468] sm:$0xf0] }
 0x31b   :  { %v9968_v6 = vadd.f32 %v3034_v46, %v2946_v17  ;;  %v13099_v46 = vld [vmem:[#allocation63_spill] sm:$0xff]  ;;  %v8528_v17 = vld [vmem:[#allocation5 + $0x44c] sm:$0xf] }
 0x31d   :  { %13092 = vst [vmem:[#allocation137_spill] sm:$0xff] %v9968_v6 }
 0x320   :  { %v2947_v52 = vpop.f32.mrf.mxu2  ;;  %v9972_v16 = vpop.f32.mrf.mxu0 }
 0x321   :  { %v3036_v7 = vpop.f32.mrf.mxu3  ;;  %v2948_v8 = vadd.f32 %v2947_v52, %v2859_v0  ;;  %v2861_v58 = vpop.f32.mrf.mxu1  ;;  %13094 = vst [vmem:[#allocation108_spill] sm:$0xff] %v9972_v16  ;;  %v8592_v52 = vld [vmem:[#allocation5 + $0x64c] sm:$0xf]  ;;  %v7574_v0 = vor.u32 %v8528_v17, %v7571_v10  ;;  %v2778_v17 = vadd.f32 %v9699_v57, %v9932_v42  ;;  %v7193_v57 = vld [vmem:[#allocation5 + $0x150] sm:$0xf] }
 0x322   :  { %v2862_v56 = vadd.f32 %v2861_v58, %v2773_v26  ;;  %v7830_v16 = vor.u32 %v8592_v52, %v7827_v54 }
 0x323   :  { %v9974_v2 = vadd.f32 %v3036_v7, %v2948_v8  ;;  %3167 = vmatmul.bf16.gmra.mxu0 %v13097_v28  ;;  %v2775_v7 = vadd.f32 %v9693_v18, %v9932_v42  ;;  %3293 = vmatpush.bf16.msra.mxu2 %v7574_v0 }
 0x324   :  { %2900 = vmatmul.bf16.gmra.mxu1 %v13096_v15  ;;  %3382 = vmatpush.bf16.msra.mxu3 %v7830_v16  ;;  %v13102_v16 = vld [vmem:[#allocation67_spill] sm:$0xff] }
 0x325   :  { %13095 = vst [vmem:[#allocation138_spill] sm:$0xff] %v9974_v2  ;;  %2989 = vmatmul.bf16.gmra.mxu2 %v13098_v62  ;;  %v8464_v2 = vld [vmem:[#allocation5 + $0x24c] sm:$0xf] }
 0x326   :  { %3078 = vmatmul.bf16.gmra.mxu3 %v13099_v46  ;;  %v7315_v46 = vld [vmem:[#allocation5 + $0x268] sm:$0xf0] }
 0x327   :  { %v7318_v62 = vor.u32 %v8464_v2, %v7315_v46  ;;  %v13104_v46 = vld [vmem:[#allocation112_spill] sm:$0xff]  ;;  %v13107_v2 = vld [vmem:[#allocation114_spill] sm:$0xff] }
 0x328   :  { %v2950_v8 = vpop.f32.mrf.mxu2  ;;  %v9984_v15 = vpop.f32.mrf.mxu0 }
 0x329   :  { %v3039_v26 = vpop.f32.mrf.mxu3  ;;  %v2951_v58 = vadd.f32 %v2950_v8, %v2862_v56  ;;  %v2863_v28 = vpop.f32.mrf.mxu1  ;;  %3204 = vmatpush.bf16.msra.mxu1 %v7318_v62  ;;  %v8437_v62 = vld [vmem:[#allocation5 + $0x16c] sm:$0xf0] }
 0x32a   :  { %v2864_v49 = vadd.f32 %v2863_v28, %v2775_v7  ;;  %v13103_v28 = vld [vmem:[#allocation68_spill] sm:$0xff]  ;;  %v2780_v7 = vadd.f32 %v13104_v46, %v9932_v42 }
 0x32b   :  { %v9986_v6 = vadd.f32 %v3039_v26, %v2951_v58 }
 0x32d   :  { %13100 = vst [vmem:[#allocation139_spill] sm:$0xff] %v9986_v6  ;;  %v2783_v6 = vadd.f32 %v13107_v2, %v9932_v42  ;;  %v8520_v2 = vld [vmem:[#allocation5 + $0x40c] sm:$0xf] }
 0x330   :  { %v2952_v10 = vpop.f32.mrf.mxu2  ;;  %v9990_v0 = vpop.f32.mrf.mxu0 }
 0x331   :  { %v3041_v18 = vpop.f32.mrf.mxu3  ;;  %v2953_v52 = vadd.f32 %v2952_v10, %v2864_v49  ;;  %v2866_v54 = vpop.f32.mrf.mxu1  ;;  %v7194_v49 = vor.u32 %v8437_v62, %v7193_v57 }
 0x332   :  { %v2867_v56 = vadd.f32 %v2866_v54, %v2778_v17 }
 0x333   :  { %v9992_v8 = vadd.f32 %v3041_v18, %v2953_v52  ;;  %3172 = vmatmul.bf16.gmra.mxu0 %v13006_v19 }
 0x334   :  { %2905 = vmatmul.bf16.gmra.mxu1 %v9400_v33  ;;  %3467 = vmatpush.bf16.msra.mxu0 %v7194_v49  ;;  %v13110_v49 = vld [vmem:[#allocation71_spill] sm:$0xff] }
 0x335   :  { %13101 = vst [vmem:[#allocation140_spill] sm:$0xff] %v9992_v8  ;;  %2994 = vmatmul.bf16.gmra.mxu2 %v13102_v16 }
 0x336   :  { %3083 = vmatmul.bf16.gmra.mxu3 %v13103_v28 }
 0x338   :  { %v2955_v26 = vpop.f32.mrf.mxu2  ;;  %v10002_v18 = vpop.f32.mrf.mxu0 }
 0x339   :  { %v3044_v58 = vpop.f32.mrf.mxu3  ;;  %v2956_v17 = vadd.f32 %v2955_v26, %v2867_v56  ;;  %v2868_v10 = vpop.f32.mrf.mxu1  ;;  %13105 = vst [vmem:[#allocation112_spill] sm:$0xff] %v10002_v18  ;;  %v13111_v56 = vld [vmem:[#allocation18_spill] sm:$0xff]  ;;  %v13112_v26 = vld [vmem:[#allocation72_spill] sm:$0xff] }
 0x33a   :  { %v2869_v52 = vadd.f32 %v2868_v10, %v2780_v7 }
 0x33b   :  { %v10004_v54 = vadd.f32 %v3044_v58, %v2956_v17  ;;  %v13113_v58 = vld [vmem:[#allocation73_spill] sm:$0xff]  ;;  %v7539_v17 = vld [vmem:[#allocation5 + $0x428] sm:$0xf0] }
 0x33c   :  { %v7542_v10 = vor.u32 %v8520_v2, %v7539_v17  ;;  %v7161_v2 = vld [vmem:[#allocation5 + $0x110] sm:$0xf] }
 0x33d   :  { %13106 = vst [vmem:[#allocation141_spill] sm:$0xff] %v10004_v54  ;;  %v8429_v17 = vld [vmem:[#allocation5 + $0x12c] sm:$0xf0] }
 0x33e   :  { %3294 = vmatpush.bf16.msra.mxu2 %v7542_v10  ;;  %v7162_v10 = vor.u32 %v8429_v17, %v7161_v2  ;;  %v8413_v2 = vld [vmem:[#allocation5 + $0xac] sm:$0xf0]  ;;  %v2790_v17 = vadd.f32 %v9747_v50, %v9932_v42  ;;  %v2793_v50 = vadd.f32 %v9753_v37, %v9932_v42  ;;  %v13121_v37 = vld [vmem:[#allocation82_spill] sm:$0xff] }
 0x340   :  { %v2957_v8 = vpop.f32.mrf.mxu2  ;;  %v10008_v62 = vpop.f32.mrf.mxu0  ;;  %3468 = vmatpush.bf16.msra.mxu0 %v7162_v10 }
 0x341   :  { %v3046_v28 = vpop.f32.mrf.mxu3  ;;  %v2958_v16 = vadd.f32 %v2957_v8, %v2869_v52  ;;  %v2871_v57 = vpop.f32.mrf.mxu1  ;;  %13108 = vst [vmem:[#allocation114_spill] sm:$0xff] %v10008_v62  ;;  %v8584_v8 = vld [vmem:[#allocation5 + $0x60c] sm:$0xf] }
 0x342   :  { %v2872_v46 = vadd.f32 %v2871_v57, %v2783_v6  ;;  %v7795_v52 = vld [vmem:[#allocation5 + $0x628] sm:$0xf0]  ;;  %v2785_v6 = vadd.f32 %v9729_v59, %v9932_v42  ;;  %v2788_v59 = vadd.f32 %v9735_v55, %v9932_v42  ;;  %v7065_v55 = vld [vmem:[#allocation5 + $0x50] sm:$0xf] }
 0x343   :  { %v10010_v19 = vadd.f32 %v3046_v28, %v2958_v16  ;;  %3177 = vmatmul.bf16.gmra.mxu0 %v13111_v56  ;;  %v7798_v62 = vor.u32 %v8584_v8, %v7795_v52 }
 0x344   :  { %2910 = vmatmul.bf16.gmra.mxu1 %v13110_v49 }
 0x345   :  { %13109 = vst [vmem:[#allocation142_spill] sm:$0xff] %v10010_v19  ;;  %2999 = vmatmul.bf16.gmra.mxu2 %v13112_v26  ;;  %3383 = vmatpush.bf16.msra.mxu3 %v7798_v62  ;;  %v8456_v19 = vld [vmem:[#allocation5 + $0x20c] sm:$0xf] }
 0x346   :  { %3088 = vmatmul.bf16.gmra.mxu3 %v13113_v58  ;;  %v7283_v58 = vld [vmem:[#allocation5 + $0x228] sm:$0xf0] }
 0x347   :  { %v7286_v26 = vor.u32 %v8456_v19, %v7283_v58  ;;  %v13116_v19 = vld [vmem:[#allocation20_spill] sm:$0xff]  ;;  %v13117_v58 = vld [vmem:[#allocation77_spill] sm:$0xff] }
 0x348   :  { %v2960_v16 = vpop.f32.mrf.mxu2  ;;  %v10020_v49 = vpop.f32.mrf.mxu0 }
 0x349   :  { %v3049_v28 = vpop.f32.mrf.mxu3  ;;  %v2961_v57 = vadd.f32 %v2960_v16, %v2872_v46  ;;  %v2873_v56 = vpop.f32.mrf.mxu1  ;;  %3205 = vmatpush.bf16.msra.mxu1 %v7286_v26 }
 0x34a   :  { %v2874_v7 = vadd.f32 %v2873_v56, %v2785_v6  ;;  %v7129_v6 = vld [vmem:[#allocation5 + $0xd0] sm:$0xf] }
 0x34b   :  { %v10022_v54 = vadd.f32 %v3049_v28, %v2961_v57  ;;  %v8421_v28 = vld [vmem:[#allocation5 + $0xec] sm:$0xf0] }
 0x34c   :  { %v7130_v26 = vor.u32 %v8421_v28, %v7129_v6  ;;  %v7097_v57 = vld [vmem:[#allocation5 + $0x90] sm:$0xf] }
 0x34d   :  { %13114 = vst [vmem:[#allocation143_spill] sm:$0xff] %v10022_v54  ;;  %v8405_v54 = vld [vmem:[#allocation5 + $0x6c] sm:$0xf0] }
 0x34e   :  { %3469 = vmatpush.bf16.msra.mxu0 %v7130_v26  ;;  %v7033_v26 = vld [vmem:[#allocation5 + $0x10] sm:$0xf] }
 0x350   :  { %v2962_v8 = vpop.f32.mrf.mxu2  ;;  %v10026_v18 = vpop.f32.mrf.mxu0 }
 0x351   :  { %v3051_v52 = vpop.f32.mrf.mxu3  ;;  %v2963_v46 = vadd.f32 %v2962_v8, %v2874_v7  ;;  %v2876_v16 = vpop.f32.mrf.mxu1  ;;  %v13118_v7 = vld [vmem:[#allocation78_spill] sm:$0xff] }
 0x352   :  { %v2877_v62 = vadd.f32 %v2876_v16, %v2788_v59 }
 0x353   :  { %v10028_v56 = vadd.f32 %v3051_v52, %v2963_v46  ;;  %3182 = vmatmul.bf16.gmra.mxu0 %v13116_v19  ;;  %v7098_v52 = vor.u32 %v8413_v2, %v7097_v57 }
 0x354   :  { %2915 = vmatmul.bf16.gmra.mxu1 %v9444_v45 }
 0x355   :  { %13115 = vst [vmem:[#allocation144_spill] sm:$0xff] %v10028_v56  ;;  %3004 = vmatmul.bf16.gmra.mxu2 %v13117_v58  ;;  %3470 = vmatpush.bf16.msra.mxu0 %v7098_v52  ;;  %v7066_v56 = vor.u32 %v8405_v54, %v7065_v55  ;;  %v8581_v55 = vld [vmem:[#allocation5 + $0x5ec] sm:$0xf0] }
 0x356   :  { %3093 = vmatmul.bf16.gmra.mxu3 %v13118_v7  ;;  %v8397_v7 = vld [vmem:[#allocation5 + $0x2c] sm:$0xf0] }
 0x357   :  { %v7034_v57 = vor.u32 %v8397_v7, %v7033_v26  ;;  %v8645_v52 = vld [vmem:[#allocation5 + $0x7ec] sm:$0xf0] }
 0x358   :  { %v2965_v59 = vpop.f32.mrf.mxu2  ;;  %v10038_v16 = vpop.f32.mrf.mxu0  ;;  %v7513_v54 = vld [vmem:[#allocation5 + $0x3d0] sm:$0xf] }
 0x359   :  { %v3054_v8 = vpop.f32.mrf.mxu3  ;;  %v2966_v10 = vadd.f32 %v2965_v59, %v2877_v62  ;;  %v2878_v46 = vpop.f32.mrf.mxu1  ;;  %3471 = vmatpush.bf16.msra.mxu0 %v7066_v56  ;;  %v7769_v56 = vld [vmem:[#allocation5 + $0x5d0] sm:$0xf] }
 0x35a   :  { %v2879_v6 = vadd.f32 %v2878_v46, %v2790_v17  ;;  %v7770_v7 = vor.u32 %v8581_v55, %v7769_v56  ;;  %v2798_v56 = vadd.f32 %v9771_v40, %v9932_v42  ;;  %v2800_v40 = vadd.f32 %v9783_v61, %v9932_v42 }
 0x35b   :  { %v10040_v28 = vadd.f32 %v3054_v8, %v2966_v10 }
 0x35c   :  { %3643 = vmatpush.bf16.msrb.mxu2 %v7770_v7 }
 0x35d   :  { %13119 = vst [vmem:[#allocation145_spill] sm:$0xff] %v10040_v28  ;;  %3472 = vmatpush.bf16.msra.mxu0 %v7034_v57  ;;  %v8517_v28 = vld [vmem:[#allocation5 + $0x3ec] sm:$0xf0] }
 0x360   :  { %v2967_v58 = vpop.f32.mrf.mxu2  ;;  %v10044_v59 = vpop.f32.mrf.mxu0 }
 0x361   :  { %v3056_v19 = vpop.f32.mrf.mxu3  ;;  %v2968_v62 = vadd.f32 %v2967_v58, %v2879_v6  ;;  %v2881_v2 = vpop.f32.mrf.mxu1  ;;  %v8025_v58 = vld [vmem:[#allocation5 + $0x7d0] sm:$0xf] }
 0x362   :  { %v2882_v17 = vadd.f32 %v2881_v2, %v2793_v50  ;;  %v8026_v10 = vor.u32 %v8645_v52, %v8025_v58 }
 0x363   :  { %v10046_v8 = vadd.f32 %v3056_v19, %v2968_v62  ;;  %3187 = vmatmul.bf16.gmra.mxu0 %v9142_v30  ;;  %v2795_v19 = vadd.f32 %v9765_v24, %v9932_v42 }
 0x364   :  { %2920 = vmatmul.bf16.gmra.mxu1 %v9466_v14  ;;  %3732 = vmatpush.bf16.msrb.mxu3 %v8026_v10 }
 0x365   :  { %13120 = vst [vmem:[#allocation146_spill] sm:$0xff] %v10046_v8  ;;  %3009 = vmatmul.bf16.gmra.mxu2 %v9470_v11  ;;  %v7514_v8 = vor.u32 %v8517_v28, %v7513_v54 }
 0x366   :  { %3098 = vmatmul.bf16.gmra.mxu3 %v13121_v37 }
 0x367   :  { %3554 = vmatpush.bf16.msrb.mxu1 %v7514_v8 }
 0x368   :  { %v2970_v46 = vpop.f32.mrf.mxu2  ;;  %v10056_v57 = vpop.f32.mrf.mxu0 }
 0x369   :  { %v3059_v6 = vpop.f32.mrf.mxu3  ;;  %v2971_v26 = vadd.f32 %v2970_v46, %v2882_v17  ;;  %v2883_v50 = vpop.f32.mrf.mxu1 }
 0x36a   :  { %v2884_v62 = vadd.f32 %v2883_v50, %v2795_v19 }
 0x36b   :  { %v10058_v2 = vadd.f32 %v3059_v6, %v2971_v26 }
 0x36d   :  { %13122 = vst [vmem:[#allocation82_spill] sm:$0xff] %v10058_v2  ;;  %v8509_v2 = vld [vmem:[#allocation5 + $0x3ac] sm:$0xf0] }
 0x370   :  { %v2972_v55 = vpop.f32.mrf.mxu2  ;;  %v10062_v7 = vpop.f32.mrf.mxu0 }
 0x371   :  { %v3061_v24 = vpop.f32.mrf.mxu3  ;;  %v2973_v58 = vadd.f32 %v2972_v55, %v2884_v62  ;;  %v2886_v52 = vpop.f32.mrf.mxu1  ;;  %v2803_v62 = vadd.f32 %v9789_v44, %v9932_v42  ;;  %v7737_v44 = vld [vmem:[#allocation5 + $0x590] sm:$0xf] }
 0x372   :  { %v2887_v17 = vadd.f32 %v2886_v52, %v2798_v56 }
 0x373   :  { %v10064_v46 = vadd.f32 %v3061_v24, %v2973_v58  ;;  %3192 = vmatmul.bf16.gmra.mxu0 %v9154_v60 }
 0x374   :  { %2925 = vmatmul.bf16.gmra.mxu1 %v9488_v13 }
 0x375   :  { %13123 = vst [vmem:[#allocation147_spill] sm:$0xff] %v10064_v46  ;;  %3014 = vmatmul.bf16.gmra.mxu2 %v9492_v39 }
 0x376   :  { %3103 = vmatmul.bf16.gmra.mxu3 %v9494_v51 }
 0x378   :  { %v2975_v8 = vpop.f32.mrf.mxu2  ;;  %v10074_v6 = vpop.f32.mrf.mxu0 }
 0x379   :  { %v3064_v54 = vpop.f32.mrf.mxu3  ;;  %v2976_v10 = vadd.f32 %v2975_v8, %v2887_v17  ;;  %v2888_v19 = vpop.f32.mrf.mxu1  ;;  %v7993_v8 = vld [vmem:[#allocation5 + $0x790] sm:$0xf] }
 0x37a   :  { %v2889_v26 = vadd.f32 %v2888_v19, %v2800_v40  ;;  %v8573_v40 = vld [vmem:[#allocation5 + $0x5ac] sm:$0xf0] }
 0x37b   :  { %v10076_v50 = vadd.f32 %v3064_v54, %v2976_v10  ;;  %v7738_v54 = vor.u32 %v8573_v40, %v7737_v44  ;;  %v8637_v10 = vld [vmem:[#allocation5 + $0x7ac] sm:$0xf0]  ;;  %v2808_v44 = vadd.f32 %v9807_v53, %v9932_v42  ;;  %v2810_v53 = vadd.f32 %v9819_v9, %v9932_v42 }
 0x37c   :  { %v7994_v19 = vor.u32 %v8637_v10, %v7993_v8 }
 0x37d   :  { %13124 = vst [vmem:[#allocation148_spill] sm:$0xff] %v10076_v50  ;;  %3644 = vmatpush.bf16.msrb.mxu2 %v7738_v54 }
 0x37e   :  { %3733 = vmatpush.bf16.msrb.mxu3 %v7994_v19 }
 0x380   :  { %v2977_v56 = vpop.f32.mrf.mxu2  ;;  %v10080_v52 = vpop.f32.mrf.mxu0 }
 0x381   :  { %v3066_v55 = vpop.f32.mrf.mxu3  ;;  %v2978_v24 = vadd.f32 %v2977_v56, %v2889_v26  ;;  %v2891_v58 = vpop.f32.mrf.mxu1  ;;  %v2805_v26 = vadd.f32 %v9801_v32, %v9932_v42 }
 0x382   :  { %v2892_v28 = vadd.f32 %v2891_v58, %v2803_v62 }
 0x383   :  { %v10082_v61 = vadd.f32 %v3066_v55, %v2978_v24  ;;  %3473 = vmatmul.bf16.vlgmr.msra.gmra.mxu0 %v9112_v41 }
 0x384   :  { %3206 = vmatmul.bf16.vlgmr.msra.gmra.mxu1 %v9160_v3 }
 0x385   :  { %13125 = vst [vmem:[#allocation149_spill] sm:$0xff] %v10082_v61  ;;  %3295 = vmatmul.bf16.vlgmr.msra.gmra.mxu2 %v9162_v4  ;;  %v7481_v61 = vld [vmem:[#allocation5 + $0x390] sm:$0xf] }
 0x386   :  { %3384 = vmatmul.bf16.vlgmr.msra.gmra.mxu3 %v9164_v5  ;;  %v7482_v46 = vor.u32 %v8509_v2, %v7481_v61 }
 0x388   :  { %v2980_v62 = vpop.f32.mrf.mxu2  ;;  %v10092_v58 = vpop.f32.mrf.mxu0  ;;  %3555 = vmatpush.bf16.msrb.mxu1 %v7482_v46 }
 0x389   :  { %v3069_v56 = vpop.f32.mrf.mxu3  ;;  %v2981_v55 = vadd.f32 %v2980_v62, %v2892_v28  ;;  %v2893_v24 = vpop.f32.mrf.mxu1 }
 0x38a   :  { %v2894_v17 = vadd.f32 %v2893_v24, %v2805_v26  ;;  %v2813_v24 = vadd.f32 %v9825_v48, %v9932_v42  ;;  %v7705_v48 = vld [vmem:[#allocation5 + $0x550] sm:$0xf] }
 0x38b   :  { %v10094_v50 = vadd.f32 %v3069_v56, %v2981_v55 }
 0x38d   :  { %13126 = vst [vmem:[#allocation150_spill] sm:$0xff] %v10094_v50  ;;  %v8501_v50 = vld [vmem:[#allocation5 + $0x36c] sm:$0xf0] }
 0x390   :  { %v2982_v40 = vpop.f32.mrf.mxu2  ;;  %v10098_v54 = vpop.f32.mrf.mxu0 }
 0x391   :  { %v3071_v32 = vpop.f32.mrf.mxu3  ;;  %v2983_v8 = vadd.f32 %v2982_v40, %v2894_v17  ;;  %v2896_v10 = vpop.f32.mrf.mxu1 }
 0x392   :  { %v2897_v28 = vadd.f32 %v2896_v10, %v2808_v44 }
 0x393   :  { %v10100_v62 = vadd.f32 %v3071_v32, %v2983_v8  ;;  %3478 = vmatmul.bf16.gmra.mxu0 %v9124_v36 }
 0x394   :  { %3211 = vmatmul.bf16.gmra.mxu1 %v9170_v21 }
 0x395   :  { %13127 = vst [vmem:[#allocation151_spill] sm:$0xff] %v10100_v62  ;;  %3300 = vmatmul.bf16.gmra.mxu2 %v9172_v22 }
 0x396   :  { %3389 = vmatmul.bf16.gmra.mxu3 %v9174_v23 }
 0x398   :  { %v2985_v46 = vpop.f32.mrf.mxu2  ;;  %v10110_v26 = vpop.f32.mrf.mxu0 }
 0x399   :  { %v3074_v61 = vpop.f32.mrf.mxu3  ;;  %v2986_v17 = vadd.f32 %v2985_v46, %v2897_v28  ;;  %v2898_v19 = vpop.f32.mrf.mxu1  ;;  %v7961_v46 = vld [vmem:[#allocation5 + $0x750] sm:$0xf] }
 0x39a   :  { %v2899_v56 = vadd.f32 %v2898_v19, %v2810_v53  ;;  %v8565_v53 = vld [vmem:[#allocation5 + $0x56c] sm:$0xf0] }
 0x39b   :  { %v10112_v55 = vadd.f32 %v3074_v61, %v2986_v17  ;;  %v7706_v61 = vor.u32 %v8565_v53, %v7705_v48  ;;  %v8629_v17 = vld [vmem:[#allocation5 + $0x76c] sm:$0xf0]  ;;  %v13132_v48 = vld [vmem:[#allocation126_spill] sm:$0xff] }
 0x39c   :  { %v7962_v19 = vor.u32 %v8629_v17, %v7961_v46  ;;  %v2818_v53 = vadd.f32 %v13132_v48, %v9932_v42 }
 0x39d   :  { %13128 = vst [vmem:[#allocation152_spill] sm:$0xff] %v10112_v55  ;;  %3645 = vmatpush.bf16.msrb.mxu2 %v7706_v61 }
 0x39e   :  { %3734 = vmatpush.bf16.msrb.mxu3 %v7962_v19  ;;  %v13135_v19 = vld [vmem:[#allocation28_spill] sm:$0xff] }
 0x3a0   :  { %v2987_v44 = vpop.f32.mrf.mxu2  ;;  %v10116_v10 = vpop.f32.mrf.mxu0 }
 0x3a1   :  { %v3076_v40 = vpop.f32.mrf.mxu3  ;;  %v2988_v32 = vadd.f32 %v2987_v44, %v2899_v56  ;;  %v2901_v8 = vpop.f32.mrf.mxu1  ;;  %v2815_v56 = vadd.f32 %v9837_v31, %v9932_v42 }
 0x3a2   :  { %v2902_v2 = vadd.f32 %v2901_v8, %v2813_v24 }
 0x3a3   :  { %v10118_v9 = vadd.f32 %v3076_v40, %v2988_v32  ;;  %3483 = vmatmul.bf16.gmra.mxu0 %v9136_v27 }
 0x3a4   :  { %3216 = vmatmul.bf16.gmra.mxu1 %v9180_v34 }
 0x3a5   :  { %13129 = vst [vmem:[#allocation153_spill] sm:$0xff] %v10118_v9  ;;  %3305 = vmatmul.bf16.gmra.mxu2 %v9182_v35  ;;  %v7449_v9 = vld [vmem:[#allocation5 + $0x350] sm:$0xf] }
 0x3a6   :  { %3394 = vmatmul.bf16.gmra.mxu3 %v9184_v38  ;;  %v7450_v62 = vor.u32 %v8501_v50, %v7449_v9  ;;  %v13138_v9 = vld [vmem:[#allocation30_spill] sm:$0xff] }
 0x3a8   :  { %v2990_v24 = vpop.f32.mrf.mxu2  ;;  %v10128_v8 = vpop.f32.mrf.mxu0  ;;  %3556 = vmatpush.bf16.msrb.mxu1 %v7450_v62  ;;  %v13137_v62 = vld [vmem:[#allocation29_spill] sm:$0xff] }
 0x3a9   :  { %v3079_v44 = vpop.f32.mrf.mxu3  ;;  %v2991_v40 = vadd.f32 %v2990_v24, %v2902_v2  ;;  %v2903_v32 = vpop.f32.mrf.mxu1  ;;  %13130 = vst [vmem:[#allocation154_spill] sm:$0xff] %v10128_v8 }
 0x3aa   :  { %v2904_v28 = vadd.f32 %v2903_v32, %v2815_v56  ;;  %v13136_v56 = vld [vmem:[#allocation23_spill] sm:$0xff] }
 0x3ab   :  { %v10130_v55 = vadd.f32 %v3079_v44, %v2991_v40  ;;  %v13139_v44 = vld [vmem:[#allocation95_spill] sm:$0xff] }
 0x3ad   :  { %13131 = vst [vmem:[#allocation155_spill] sm:$0xff] %v10130_v55 }
 0x3b0   :  { %v2992_v46 = vpop.f32.mrf.mxu2  ;;  %v10134_v61 = vpop.f32.mrf.mxu0 }
 0x3b1   :  { %v3081_v31 = vpop.f32.mrf.mxu3  ;;  %v2993_v17 = vadd.f32 %v2992_v46, %v2904_v28  ;;  %v2906_v38 = vpop.f32.mrf.mxu1  ;;  %13133 = vst [vmem:[#allocation126_spill] sm:$0xff] %v10134_v61  ;;  %v2820_v28 = vadd.f32 %v13139_v44, %v9932_v42  ;;  %v13145_v61 = vld [vmem:[#allocation31_spill] sm:$0xff] }
 0x3b2   :  { %v2907_v2 = vadd.f32 %v2906_v38, %v2818_v53 }
 0x3b3   :  { %v10136_v24 = vadd.f32 %v3081_v31, %v2993_v17  ;;  %3488 = vmatmul.bf16.gmra.mxu0 %v13136_v56  ;;  %v13142_v17 = vld [vmem:[#allocation96_spill] sm:$0xff] }
 0x3b4   :  { %3221 = vmatmul.bf16.gmra.mxu1 %v13135_v19  ;;  %v2823_v56 = vadd.f32 %v13142_v17, %v9932_v42  ;;  %v8621_v17 = vld [vmem:[#allocation5 + $0x72c] sm:$0xf0] }
 0x3b5   :  { %13134 = vst [vmem:[#allocation156_spill] sm:$0xff] %v10136_v24  ;;  %3310 = vmatmul.bf16.gmra.mxu2 %v13137_v62 }
 0x3b6   :  { %3399 = vmatmul.bf16.gmra.mxu3 %v13138_v9 }
 0x3b8   :  { %v2995_v40 = vpop.f32.mrf.mxu2  ;;  %v10146_v53 = vpop.f32.mrf.mxu0 }
 0x3b9   :  { %v3084_v32 = vpop.f32.mrf.mxu3  ;;  %v2996_v48 = vadd.f32 %v2995_v40, %v2907_v2  ;;  %v2908_v38 = vpop.f32.mrf.mxu1  ;;  %13140 = vst [vmem:[#allocation95_spill] sm:$0xff] %v10146_v53  ;;  %v13146_v2 = vld [vmem:[#allocation16_spill] sm:$0xff] }
 0x3ba   :  { %v2909_v46 = vadd.f32 %v2908_v38, %v2820_v28  ;;  %v13147_v40 = vld [vmem:[#allocation32_spill] sm:$0xff]  ;;  %v8557_v38 = vld [vmem:[#allocation5 + $0x52c] sm:$0xf0] }
 0x3bb   :  { %v10148_v31 = vadd.f32 %v3084_v32, %v2996_v48  ;;  %v13148_v32 = vld [vmem:[#allocation33_spill] sm:$0xff] }
 0x3bc   :  { %v7673_v48 = vld [vmem:[#allocation5 + $0x510] sm:$0xf] }
 0x3bd   :  { %13141 = vst [vmem:[#allocation157_spill] sm:$0xff] %v10148_v31 }
 0x3c0   :  { %v2997_v50 = vpop.f32.mrf.mxu2  ;;  %v10152_v9 = vpop.f32.mrf.mxu0 }
 0x3c1   :  { %v3086_v55 = vpop.f32.mrf.mxu3  ;;  %v2998_v24 = vadd.f32 %v2997_v50, %v2909_v46  ;;  %v2911_v62 = vpop.f32.mrf.mxu1  ;;  %13143 = vst [vmem:[#allocation96_spill] sm:$0xff] %v10152_v9  ;;  %v7929_v50 = vld [vmem:[#allocation5 + $0x710] sm:$0xf]  ;;  %v7674_v46 = vor.u32 %v8557_v38, %v7673_v48  ;;  %v13151_v48 = vld [vmem:[#allocation98_spill] sm:$0xff] }
 0x3c2   :  { %v2912_v19 = vadd.f32 %v2911_v62, %v2823_v56  ;;  %v7930_v9 = vor.u32 %v8621_v17, %v7929_v50  ;;  %v2828_v38 = vadd.f32 %v13151_v48, %v9932_v42 }
 0x3c3   :  { %v10154_v44 = vadd.f32 %v3086_v55, %v2998_v24  ;;  %3493 = vmatmul.bf16.gmra.mxu0 %v13146_v2  ;;  %v13149_v55 = vld [vmem:[#allocation97_spill] sm:$0xff]  ;;  %3646 = vmatpush.bf16.msrb.mxu2 %v7674_v46 }
 0x3c4   :  { %3226 = vmatmul.bf16.gmra.mxu1 %v13145_v61  ;;  %v2825_v24 = vadd.f32 %v13149_v55, %v9932_v42  ;;  %3735 = vmatpush.bf16.msrb.mxu3 %v7930_v9  ;;  %v13154_v9 = vld [vmem:[#allocation35_spill] sm:$0xff] }
 0x3c5   :  { %13144 = vst [vmem:[#allocation158_spill] sm:$0xff] %v10154_v44  ;;  %3315 = vmatmul.bf16.gmra.mxu2 %v13147_v40  ;;  %v7417_v44 = vld [vmem:[#allocation5 + $0x310] sm:$0xf] }
 0x3c6   :  { %3404 = vmatmul.bf16.gmra.mxu3 %v13148_v32  ;;  %v8493_v32 = vld [vmem:[#allocation5 + $0x32c] sm:$0xf0] }
 0x3c7   :  { %v7418_v40 = vor.u32 %v8493_v32, %v7417_v44  ;;  %v13158_v32 = vld [vmem:[#allocation99_spill] sm:$0xff] }
 0x3c8   :  { %v3000_v56 = vpop.f32.mrf.mxu2  ;;  %v10164_v53 = vpop.f32.mrf.mxu0 }
 0x3c9   :  { %v3089_v62 = vpop.f32.mrf.mxu3  ;;  %v3001_v2 = vadd.f32 %v3000_v56, %v2912_v19  ;;  %v2913_v61 = vpop.f32.mrf.mxu1  ;;  %3557 = vmatpush.bf16.msrb.mxu1 %v7418_v40  ;;  %v13157_v40 = vld [vmem:[#allocation38_spill] sm:$0xff] }
 0x3ca   :  { %v2914_v28 = vadd.f32 %v2913_v61, %v2825_v24  ;;  %v13155_v61 = vld [vmem:[#allocation19_spill] sm:$0xff] }
 0x3cb   :  { %v10166_v31 = vadd.f32 %v3089_v62, %v3001_v2  ;;  %v13156_v2 = vld [vmem:[#allocation37_spill] sm:$0xff] }
 0x3cd   :  { %13150 = vst [vmem:[#allocation97_spill] sm:$0xff] %v10166_v31 }
 0x3d0   :  { %v3002_v50 = vpop.f32.mrf.mxu2  ;;  %v10170_v46 = vpop.f32.mrf.mxu0 }
 0x3d1   :  { %v3091_v17 = vpop.f32.mrf.mxu3  ;;  %v3003_v55 = vadd.f32 %v3002_v50, %v2914_v28  ;;  %v2916_v8 = vpop.f32.mrf.mxu1  ;;  %13152 = vst [vmem:[#allocation98_spill] sm:$0xff] %v10170_v46  ;;  %v2830_v28 = vadd.f32 %v13158_v32, %v9932_v42  ;;  %v13163_v46 = vld [vmem:[#allocation40_spill] sm:$0xff] }
 0x3d2   :  { %v2917_v19 = vadd.f32 %v2916_v8, %v2828_v38 }
 0x3d3   :  { %v10172_v56 = vadd.f32 %v3091_v17, %v3003_v55  ;;  %3498 = vmatmul.bf16.gmra.mxu0 %v13155_v61  ;;  %v13160_v55 = vld [vmem:[#allocation100_spill] sm:$0xff] }
 0x3d4   :  { %3231 = vmatmul.bf16.gmra.mxu1 %v13154_v9  ;;  %v2833_v61 = vadd.f32 %v13160_v55, %v9932_v42  ;;  %v8613_v55 = vld [vmem:[#allocation5 + $0x6ec] sm:$0xf0] }
 0x3d5   :  { %13153 = vst [vmem:[#allocation159_spill] sm:$0xff] %v10172_v56  ;;  %3320 = vmatmul.bf16.gmra.mxu2 %v13156_v2 }
 0x3d6   :  { %3409 = vmatmul.bf16.gmra.mxu3 %v13157_v40 }
 0x3d8   :  { %v3005_v24 = vpop.f32.mrf.mxu2  ;;  %v10182_v38 = vpop.f32.mrf.mxu0 }
 0x3d9   :  { %v3094_v62 = vpop.f32.mrf.mxu3  ;;  %v3006_v48 = vadd.f32 %v3005_v24, %v2917_v19  ;;  %v2918_v8 = vpop.f32.mrf.mxu1  ;;  %v13164_v19 = vld [vmem:[#allocation21_spill] sm:$0xff]  ;;  %v13165_v24 = vld [vmem:[#allocation42_spill] sm:$0xff] }
 0x3da   :  { %v2919_v50 = vadd.f32 %v2918_v8, %v2830_v28  ;;  %v8549_v8 = vld [vmem:[#allocation5 + $0x4ec] sm:$0xf0] }
 0x3db   :  { %v10184_v17 = vadd.f32 %v3094_v62, %v3006_v48  ;;  %v13166_v62 = vld [vmem:[#allocation43_spill] sm:$0xff]  ;;  %v7641_v48 = vld [vmem:[#allocation5 + $0x4d0] sm:$0xf] }
 0x3dd   :  { %13159 = vst [vmem:[#allocation99_spill] sm:$0xff] %v10184_v17 }
 0x3e0   :  { %v3007_v44 = vpop.f32.mrf.mxu2  ;;  %v10188_v40 = vpop.f32.mrf.mxu0 }
 0x3e1   :  { %v3096_v31 = vpop.f32.mrf.mxu3  ;;  %v3008_v56 = vadd.f32 %v3007_v44, %v2919_v50  ;;  %v2921_v2 = vpop.f32.mrf.mxu1  ;;  %13161 = vst [vmem:[#allocation100_spill] sm:$0xff] %v10188_v40  ;;  %v7642_v44 = vor.u32 %v8549_v8, %v7641_v48  ;;  %v7897_v50 = vld [vmem:[#allocation5 + $0x6d0] sm:$0xf]  ;;  %v2838_v8 = vadd.f32 %v9915_v20, %v9932_v42  ;;  %v8449_v20 = vld [vmem:[#allocation5 + $0x1d4] sm:$0xf] }
 0x3e2   :  { %v2922_v9 = vadd.f32 %v2921_v2, %v2833_v61  ;;  %v7898_v40 = vor.u32 %v8613_v55, %v7897_v50 }
 0x3e3   :  { %v10190_v32 = vadd.f32 %v3096_v31, %v3008_v56  ;;  %3503 = vmatmul.bf16.gmra.mxu0 %v13164_v19  ;;  %v2835_v31 = vadd.f32 %v9909_v12, %v9932_v42  ;;  %3647 = vmatpush.bf16.msrb.mxu2 %v7642_v44 }
 0x3e4   :  { %3236 = vmatmul.bf16.gmra.mxu1 %v13163_v46  ;;  %3736 = vmatpush.bf16.msrb.mxu3 %v7898_v40  ;;  %v13169_v40 = vld [vmem:[#allocation45_spill] sm:$0xff] }
 0x3e5   :  { %13162 = vst [vmem:[#allocation160_spill] sm:$0xff] %v10190_v32  ;;  %3325 = vmatmul.bf16.gmra.mxu2 %v13165_v24  ;;  %v7385_v32 = vld [vmem:[#allocation5 + $0x2d0] sm:$0xf] }
 0x3e6   :  { %3414 = vmatmul.bf16.gmra.mxu3 %v13166_v62  ;;  %v8485_v62 = vld [vmem:[#allocation5 + $0x2ec] sm:$0xf0] }
 0x3e7   :  { %v7386_v48 = vor.u32 %v8485_v62, %v7385_v32  ;;  %v13171_v62 = vld [vmem:[#allocation47_spill] sm:$0xff] }
 0x3e8   :  { %v3010_v56 = vpop.f32.mrf.mxu2  ;;  %v10200_v46 = vpop.f32.mrf.mxu0  ;;  %v10222_v32 = vld [vmem:[#allocation7] sm:$0xff] }
 0x3e9   :  { %v3099_v61 = vpop.f32.mrf.mxu3  ;;  %v3011_v2 = vadd.f32 %v3010_v56, %v2922_v9  ;;  %v2923_v19 = vpop.f32.mrf.mxu1  ;;  %3558 = vmatpush.bf16.msrb.mxu1 %v7386_v48  ;;  %13176 = vst [vmem:[#allocation164_spill] sm:$0xff] %v10222_v32 }
 0x3ea   :  { %v2924_v28 = vadd.f32 %v2923_v19, %v2835_v31  ;;  %v13170_v19 = vld [vmem:[#allocation24_spill] sm:$0xff] }
 0x3eb   :  { %v10202_v17 = vadd.f32 %v3099_v61, %v3011_v2  ;;  %v13172_v31 = vld [vmem:[#allocation48_spill] sm:$0xff]  ;;  %v7259_v61 = vld [vmem:[#allocation5 + $0x1f0] sm:$0xf0]  ;;  %v13173_v2 = vld [vmem:[#allocation103_spill] sm:$0xff] }
 0x3ec   :  { %v2840_v48 = vadd.f32 %v13173_v2, %v9932_v42 }
 0x3ed   :  { %13167 = vst [vmem:[#allocation161_spill] sm:$0xff] %v10202_v17  ;;  %v10225_v17 = vperm.slane %v10222_v32, 3  ;;  %v13183_v32 = vld [vmem:[#allocation55_spill] sm:$0xff] }
 0x3f0   :  { %v3012_v50 = vpop.f32.mrf.mxu2  ;;  %v10206_v44 = vpop.f32.mrf.mxu0 }
 0x3f1   :  { %v3101_v12 = vpop.f32.mrf.mxu3  ;;  %v3013_v55 = vadd.f32 %v3012_v50, %v2924_v28  ;;  %v2926_v24 = vpop.f32.mrf.mxu1  ;;  %v7262_v28 = vor.u32 %v8449_v20, %v7259_v61  ;;  %v13177_v20 = vld [vmem:[#allocation104_spill] sm:$0xff] }
 0x3f2   :  { %v2927_v9 = vadd.f32 %v2926_v24, %v2838_v8  ;;  %v3119_v61 = vadd.f32 %v13177_v20, %v10225_v17  ;;  %v7609_v20 = vld [vmem:[#allocation5 + $0x490] sm:$0xf] }
 0x3f3   :  { %v10208_v56 = vadd.f32 %v3101_v12, %v3013_v55  ;;  %3508 = vmatmul.bf16.gmra.mxu0 %v13170_v19 }
 0x3f4   :  { %3241 = vmatmul.bf16.gmra.mxu1 %v13169_v40  ;;  %3821 = vmatpush.bf16.msrb.mxu0 %v7262_v28 }
 0x3f5   :  { %13168 = vst [vmem:[#allocation162_spill] sm:$0xff] %v10208_v56  ;;  %3330 = vmatmul.bf16.gmra.mxu2 %v13171_v62  ;;  %v8605_v62 = vld [vmem:[#allocation5 + $0x6ac] sm:$0xf0] }
 0x3f6   :  { %3419 = vmatmul.bf16.gmra.mxu3 %v13172_v31 }
 0x3f8   :  { %v3015_v24 = vpop.f32.mrf.mxu2  ;;  %v10218_v55 = vpop.f32.mrf.mxu0 }
 0x3f9   :  { %v3104_v8 = vpop.f32.mrf.mxu3  ;;  %v3016_v50 = vadd.f32 %v3015_v24, %v2927_v9  ;;  %v2928_v12 = vpop.f32.mrf.mxu1  ;;  %13174 = vst [vmem:[#allocation103_spill] sm:$0xff] %v10218_v55  ;;  %v8541_v55 = vld [vmem:[#allocation5 + $0x4ac] sm:$0xf0] }
 0x3fa   :  { %v2929_v19 = vadd.f32 %v2928_v12, %v2840_v48  ;;  %v13180_v48 = vld [vmem:[#allocation50_spill] sm:$0xff] }
 0x3fb   :  { %v10220_v40 = vadd.f32 %v3104_v8, %v3016_v50  ;;  %v13181_v8 = vld [vmem:[#allocation17_spill] sm:$0xff]  ;;  %v13182_v12 = vld [vmem:[#allocation54_spill] sm:$0xff] }
 0x3fd   :  { %13175 = vst [vmem:[#allocation163_spill] sm:$0xff] %v10220_v40 }
 0x400   :  { %v3017_v56 = vpop.f32.mrf.mxu2  ;;  %v10229_v28 = vpop.f32.mrf.mxu0 }
 0x401   :  { %v3106_v42 = vpop.f32.mrf.mxu3  ;;  %v3018_v2 = vadd.f32 %v3017_v56, %v2929_v19  ;;  %v3207_v31 = vpop.f32.mrf.mxu1  ;;  %13178 = vst [vmem:[#allocation104_spill] sm:$0xff] %v10229_v28  ;;  %v7865_v56 = vld [vmem:[#allocation5 + $0x690] sm:$0xf]  ;;  %v7610_v19 = vor.u32 %v8541_v55, %v7609_v20 }
 0x402   :  { %v3208_v9 = vadd.f32 %v3207_v31, %v3119_v61  ;;  %v7866_v28 = vor.u32 %v8605_v62, %v7865_v56  ;;  %v3121_v31 = vadd.f32 %v9948_v63, %v10225_v17  ;;  %v3124_v62 = vadd.f32 %v9954_v1, %v10225_v17  ;;  %v8441_v1 = vld [vmem:[#allocation5 + $0x194] sm:$0xf] }
 0x403   :  { %v10231_v24 = vadd.f32 %v3106_v42, %v3018_v2  ;;  %3513 = vmatmul.bf16.gmra.mxu0 %v13181_v8  ;;  %3648 = vmatpush.bf16.msrb.mxu2 %v7610_v19 }
 0x404   :  { %3246 = vmatmul.bf16.gmra.mxu1 %v13180_v48  ;;  %3737 = vmatpush.bf16.msrb.mxu3 %v7866_v28  ;;  %v13186_v28 = vld [vmem:[#allocation58_spill] sm:$0xff] }
 0x405   :  { %13179 = vst [vmem:[#allocation165_spill] sm:$0xff] %v10231_v24  ;;  %3335 = vmatmul.bf16.gmra.mxu2 %v13182_v12  ;;  %v7353_v24 = vld [vmem:[#allocation5 + $0x290] sm:$0xf] }
 0x406   :  { %3424 = vmatmul.bf16.gmra.mxu3 %v13183_v32  ;;  %v8477_v32 = vld [vmem:[#allocation5 + $0x2ac] sm:$0xf0] }
 0x407   :  { %v7354_v12 = vor.u32 %v8477_v32, %v7353_v24  ;;  %v7227_v24 = vld [vmem:[#allocation5 + $0x1b0] sm:$0xf0] }
 0x408   :  { %v3296_v61 = vpop.f32.mrf.mxu2  ;;  %v10241_v48 = vpop.f32.mrf.mxu0 }
 0x409   :  { %v3385_v42 = vpop.f32.mrf.mxu3  ;;  %v3297_v2 = vadd.f32 %v3296_v61, %v3208_v9  ;;  %v3209_v8 = vpop.f32.mrf.mxu1  ;;  %3559 = vmatpush.bf16.msrb.mxu1 %v7354_v12 }
 0x40a   :  { %v3210_v50 = vadd.f32 %v3209_v8, %v3121_v31  ;;  %v7230_v8 = vor.u32 %v8441_v1, %v7227_v24 }
 0x40b   :  { %v10243_v40 = vadd.f32 %v3385_v42, %v3297_v2 }
 0x40c   :  { %3822 = vmatpush.bf16.msrb.mxu0 %v7230_v8  ;;  %v13191_v8 = vld [vmem:[#allocation61_spill] sm:$0xff] }
 0x40d   :  { %13184 = vst [vmem:[#allocation166_spill] sm:$0xff] %v10243_v40 }
 0x410   :  { %v3298_v55 = vpop.f32.mrf.mxu2  ;;  %v10247_v19 = vpop.f32.mrf.mxu0 }
 0x411   :  { %v3387_v63 = vpop.f32.mrf.mxu3  ;;  %v3299_v20 = vadd.f32 %v3298_v55, %v3210_v50  ;;  %v3212_v56 = vpop.f32.mrf.mxu1  ;;  %v3126_v50 = vadd.f32 %v9966_v47, %v10225_v17 }
 0x412   :  { %v3213_v9 = vadd.f32 %v3212_v56, %v3124_v62 }
 0x413   :  { %v10249_v61 = vadd.f32 %v3387_v63, %v3299_v20  ;;  %3518 = vmatmul.bf16.gmra.mxu0 %v9128_v43  ;;  %v13188_v20 = vld [vmem:[#allocation108_spill] sm:$0xff] }
 0x414   :  { %3251 = vmatmul.bf16.gmra.mxu1 %v9352_v25  ;;  %v3129_v56 = vadd.f32 %v13188_v20, %v10225_v17  ;;  %v8597_v20 = vld [vmem:[#allocation5 + $0x66c] sm:$0xf0] }
 0x415   :  { %13185 = vst [vmem:[#allocation167_spill] sm:$0xff] %v10249_v61  ;;  %3340 = vmatmul.bf16.gmra.mxu2 %v12995_v29 }
 0x416   :  { %3429 = vmatmul.bf16.gmra.mxu3 %v13186_v28 }
 0x418   :  { %v3301_v12 = vpop.f32.mrf.mxu2  ;;  %v10259_v62 = vpop.f32.mrf.mxu0 }
 0x419   :  { %v3390_v31 = vpop.f32.mrf.mxu3  ;;  %v3302_v42 = vadd.f32 %v3301_v12, %v3213_v9  ;;  %v3214_v2 = vpop.f32.mrf.mxu1  ;;  %v13192_v9 = vld [vmem:[#allocation22_spill] sm:$0xff] }
 0x41a   :  { %v3215_v55 = vadd.f32 %v3214_v2, %v3126_v50  ;;  %v13193_v12 = vld [vmem:[#allocation62_spill] sm:$0xff]  ;;  %v8533_v2 = vld [vmem:[#allocation5 + $0x46c] sm:$0xf0] }
 0x41b   :  { %v10261_v63 = vadd.f32 %v3390_v31, %v3302_v42  ;;  %v13194_v31 = vld [vmem:[#allocation63_spill] sm:$0xff]  ;;  %v7577_v42 = vld [vmem:[#allocation5 + $0x450] sm:$0xf] }
 0x41d   :  { %13187 = vst [vmem:[#allocation168_spill] sm:$0xff] %v10261_v63 }
 0x420   :  { %v3303_v32 = vpop.f32.mrf.mxu2  ;;  %v10265_v24 = vpop.f32.mrf.mxu0 }
 0x421   :  { %v3392_v40 = vpop.f32.mrf.mxu3  ;;  %v3304_v61 = vadd.f32 %v3303_v32, %v3215_v55  ;;  %v3217_v1 = vpop.f32.mrf.mxu1  ;;  %13189 = vst [vmem:[#allocation108_spill] sm:$0xff] %v10265_v24  ;;  %v7833_v32 = vld [vmem:[#allocation5 + $0x650] sm:$0xf]  ;;  %v7578_v55 = vor.u32 %v8533_v2, %v7577_v42  ;;  %v3134_v42 = vadd.f32 %v9990_v0, %v10225_v17  ;;  %v8433_v0 = vld [vmem:[#allocation5 + $0x154] sm:$0xf] }
 0x422   :  { %v3218_v47 = vadd.f32 %v3217_v1, %v3129_v56  ;;  %v7834_v24 = vor.u32 %v8597_v20, %v7833_v32 }
 0x423   :  { %v10267_v28 = vadd.f32 %v3392_v40, %v3304_v61  ;;  %3523 = vmatmul.bf16.gmra.mxu0 %v13192_v9  ;;  %v3131_v40 = vadd.f32 %v9984_v15, %v10225_v17  ;;  %3649 = vmatpush.bf16.msrb.mxu2 %v7578_v55 }
 0x424   :  { %3256 = vmatmul.bf16.gmra.mxu1 %v13191_v8  ;;  %3738 = vmatpush.bf16.msrb.mxu3 %v7834_v24  ;;  %v13197_v24 = vld [vmem:[#allocation25_spill] sm:$0xff] }
 0x425   :  { %13190 = vst [vmem:[#allocation169_spill] sm:$0xff] %v10267_v28  ;;  %3345 = vmatmul.bf16.gmra.mxu2 %v13193_v12  ;;  %v7321_v28 = vld [vmem:[#allocation5 + $0x250] sm:$0xf] }
 0x426   :  { %3434 = vmatmul.bf16.gmra.mxu3 %v13194_v31  ;;  %v8469_v31 = vld [vmem:[#allocation5 + $0x26c] sm:$0xf0] }
 0x427   :  { %v7322_v12 = vor.u32 %v8469_v31, %v7321_v28  ;;  %v7195_v31 = vld [vmem:[#allocation5 + $0x170] sm:$0xf0]  ;;  %v13203_v28 = vld [vmem:[#allocation114_spill] sm:$0xff] }
 0x428   :  { %v3306_v61 = vpop.f32.mrf.mxu2  ;;  %v10277_v8 = vpop.f32.mrf.mxu0 }
 0x429   :  { %v3395_v56 = vpop.f32.mrf.mxu3  ;;  %v3307_v1 = vadd.f32 %v3306_v61, %v3218_v47  ;;  %v3219_v9 = vpop.f32.mrf.mxu1  ;;  %3560 = vmatpush.bf16.msrb.mxu1 %v7322_v12  ;;  %v13199_v12 = vld [vmem:[#allocation68_spill] sm:$0xff] }
 0x42a   :  { %v3220_v50 = vadd.f32 %v3219_v9, %v3131_v40  ;;  %v13198_v9 = vld [vmem:[#allocation67_spill] sm:$0xff]  ;;  %v13200_v40 = vld [vmem:[#allocation112_spill] sm:$0xff] }
 0x42b   :  { %v10279_v63 = vadd.f32 %v3395_v56, %v3307_v1  ;;  %v3136_v56 = vadd.f32 %v13200_v40, %v10225_v17 }
 0x42d   :  { %13195 = vst [vmem:[#allocation170_spill] sm:$0xff] %v10279_v63  ;;  %v3139_v63 = vadd.f32 %v13203_v28, %v10225_v17  ;;  %v7545_v28 = vld [vmem:[#allocation5 + $0x410] sm:$0xf] }
 0x430   :  { %v3308_v2 = vpop.f32.mrf.mxu2  ;;  %v10283_v55 = vpop.f32.mrf.mxu0 }
 0x431   :  { %v3397_v15 = vpop.f32.mrf.mxu3  ;;  %v3309_v32 = vadd.f32 %v3308_v2, %v3220_v50  ;;  %v3222_v20 = vpop.f32.mrf.mxu1  ;;  %v7198_v50 = vor.u32 %v8433_v0, %v7195_v31 }
 0x432   :  { %v3223_v47 = vadd.f32 %v3222_v20, %v3134_v42 }
 0x433   :  { %v10285_v61 = vadd.f32 %v3397_v15, %v3309_v32  ;;  %3528 = vmatmul.bf16.gmra.mxu0 %v13197_v24 }
 0x434   :  { %3261 = vmatmul.bf16.gmra.mxu1 %v9400_v33  ;;  %3823 = vmatpush.bf16.msrb.mxu0 %v7198_v50  ;;  %v13206_v50 = vld [vmem:[#allocation71_spill] sm:$0xff] }
 0x435   :  { %13196 = vst [vmem:[#allocation171_spill] sm:$0xff] %v10285_v61  ;;  %3350 = vmatmul.bf16.gmra.mxu2 %v13198_v9 }
 0x436   :  { %3439 = vmatmul.bf16.gmra.mxu3 %v13199_v12 }
 0x438   :  { %v3311_v1 = vpop.f32.mrf.mxu2  ;;  %v10295_v32 = vpop.f32.mrf.mxu0 }
 0x439   :  { %v3400_v42 = vpop.f32.mrf.mxu3  ;;  %v3312_v2 = vadd.f32 %v3311_v1, %v3223_v47  ;;  %v3224_v15 = vpop.f32.mrf.mxu1  ;;  %13201 = vst [vmem:[#allocation112_spill] sm:$0xff] %v10295_v32  ;;  %v13207_v47 = vld [vmem:[#allocation18_spill] sm:$0xff]  ;;  %v13208_v1 = vld [vmem:[#allocation72_spill] sm:$0xff] }
 0x43a   :  { %v3225_v20 = vadd.f32 %v3224_v15, %v3136_v56 }
 0x43b   :  { %v10297_v24 = vadd.f32 %v3400_v42, %v3312_v2  ;;  %v13209_v42 = vld [vmem:[#allocation73_spill] sm:$0xff] }
 0x43c   :  { %v8525_v2 = vld [vmem:[#allocation5 + $0x42c] sm:$0xf0] }
 0x43d   :  { %13202 = vst [vmem:[#allocation172_spill] sm:$0xff] %v10297_v24  ;;  %v7546_v15 = vor.u32 %v8525_v2, %v7545_v28  ;;  %v8425_v28 = vld [vmem:[#allocation5 + $0x114] sm:$0xf] }
 0x43e   :  { %v7163_v2 = vld [vmem:[#allocation5 + $0x130] sm:$0xf0] }
 0x43f   :  { %3650 = vmatpush.bf16.msrb.mxu2 %v7546_v15  ;;  %v7166_v15 = vor.u32 %v8425_v28, %v7163_v2  ;;  %v7099_v28 = vld [vmem:[#allocation5 + $0xb0] sm:$0xf0]  ;;  %v3146_v2 = vadd.f32 %v10038_v16, %v10225_v17  ;;  %v3149_v16 = vadd.f32 %v10044_v59, %v10225_v17 }
 0x440   :  { %v3313_v61 = vpop.f32.mrf.mxu2  ;;  %v10301_v31 = vpop.f32.mrf.mxu0  ;;  %v8577_v59 = vld [vmem:[#allocation5 + $0x5d4] sm:$0xf] }
 0x441   :  { %v3402_v12 = vpop.f32.mrf.mxu3  ;;  %v3314_v9 = vadd.f32 %v3313_v61, %v3225_v20  ;;  %v3227_v0 = vpop.f32.mrf.mxu1  ;;  %13204 = vst [vmem:[#allocation114_spill] sm:$0xff] %v10301_v31  ;;  %v7801_v61 = vld [vmem:[#allocation5 + $0x610] sm:$0xf]  ;;  %3824 = vmatpush.bf16.msrb.mxu0 %v7166_v15 }
 0x442   :  { %v3228_v40 = vadd.f32 %v3227_v0, %v3139_v63  ;;  %v8589_v20 = vld [vmem:[#allocation5 + $0x62c] sm:$0xf0]  ;;  %v3141_v63 = vadd.f32 %v10020_v49, %v10225_v17  ;;  %v3144_v49 = vadd.f32 %v10026_v18, %v10225_v17  ;;  %v8401_v18 = vld [vmem:[#allocation5 + $0x54] sm:$0xf] }
 0x443   :  { %v10303_v33 = vadd.f32 %v3402_v12, %v3314_v9  ;;  %3533 = vmatmul.bf16.gmra.mxu0 %v13207_v47  ;;  %v7802_v31 = vor.u32 %v8589_v20, %v7801_v61 }
 0x444   :  { %3266 = vmatmul.bf16.gmra.mxu1 %v13206_v50 }
 0x445   :  { %13205 = vst [vmem:[#allocation173_spill] sm:$0xff] %v10303_v33  ;;  %3355 = vmatmul.bf16.gmra.mxu2 %v13208_v1  ;;  %3739 = vmatpush.bf16.msrb.mxu3 %v7802_v31  ;;  %v7289_v33 = vld [vmem:[#allocation5 + $0x210] sm:$0xf] }
 0x446   :  { %3444 = vmatmul.bf16.gmra.mxu3 %v13209_v42  ;;  %v8461_v42 = vld [vmem:[#allocation5 + $0x22c] sm:$0xf0] }
 0x447   :  { %v7290_v1 = vor.u32 %v8461_v42, %v7289_v33  ;;  %v13212_v33 = vld [vmem:[#allocation20_spill] sm:$0xff]  ;;  %v13213_v42 = vld [vmem:[#allocation77_spill] sm:$0xff] }
 0x448   :  { %v3316_v9 = vpop.f32.mrf.mxu2  ;;  %v10313_v50 = vpop.f32.mrf.mxu0 }
 0x449   :  { %v3405_v12 = vpop.f32.mrf.mxu3  ;;  %v3317_v0 = vadd.f32 %v3316_v9, %v3228_v40  ;;  %v3229_v47 = vpop.f32.mrf.mxu1  ;;  %3561 = vmatpush.bf16.msrb.mxu1 %v7290_v1 }
 0x44a   :  { %v3230_v56 = vadd.f32 %v3229_v47, %v3141_v63  ;;  %v8417_v63 = vld [vmem:[#allocation5 + $0xd4] sm:$0xf] }
 0x44b   :  { %v10315_v24 = vadd.f32 %v3405_v12, %v3317_v0  ;;  %v7131_v12 = vld [vmem:[#allocation5 + $0xf0] sm:$0xf0] }
 0x44c   :  { %v7134_v1 = vor.u32 %v8417_v63, %v7131_v12  ;;  %v8409_v0 = vld [vmem:[#allocation5 + $0x94] sm:$0xf] }
 0x44d   :  { %13210 = vst [vmem:[#allocation174_spill] sm:$0xff] %v10315_v24  ;;  %v7067_v24 = vld [vmem:[#allocation5 + $0x70] sm:$0xf0] }
 0x44e   :  { %3825 = vmatpush.bf16.msrb.mxu0 %v7134_v1  ;;  %v8393_v1 = vld [vmem:[#allocation5 + $0x14] sm:$0xf] }
 0x450   :  { %v3318_v61 = vpop.f32.mrf.mxu2  ;;  %v10319_v32 = vpop.f32.mrf.mxu0 }
 0x451   :  { %v3407_v20 = vpop.f32.mrf.mxu3  ;;  %v3319_v40 = vadd.f32 %v3318_v61, %v3230_v56  ;;  %v3232_v9 = vpop.f32.mrf.mxu1  ;;  %v13214_v56 = vld [vmem:[#allocation78_spill] sm:$0xff] }
 0x452   :  { %v3233_v31 = vadd.f32 %v3232_v9, %v3144_v49 }
 0x453   :  { %v10321_v47 = vadd.f32 %v3407_v20, %v3319_v40  ;;  %3538 = vmatmul.bf16.gmra.mxu0 %v13212_v33  ;;  %v7102_v20 = vor.u32 %v8409_v0, %v7099_v28 }
 0x454   :  { %3271 = vmatmul.bf16.gmra.mxu1 %v9444_v45 }
 0x455   :  { %13211 = vst [vmem:[#allocation175_spill] sm:$0xff] %v10321_v47  ;;  %3360 = vmatmul.bf16.gmra.mxu2 %v13213_v42  ;;  %3826 = vmatpush.bf16.msrb.mxu0 %v7102_v20  ;;  %v7070_v47 = vor.u32 %v8401_v18, %v7067_v24  ;;  %v8641_v18 = vld [vmem:[#allocation5 + $0x7d4] sm:$0xf] }
 0x456   :  { %3449 = vmatmul.bf16.gmra.mxu3 %v13214_v56  ;;  %v7035_v56 = vld [vmem:[#allocation5 + $0x30] sm:$0xf0] }
 0x457   :  { %v7038_v0 = vor.u32 %v8393_v1, %v7035_v56  ;;  %v8027_v56 = vld [vmem:[#allocation5 + $0x7f0] sm:$0xf0] }
 0x458   :  { %v3321_v49 = vpop.f32.mrf.mxu2  ;;  %v10331_v9 = vpop.f32.mrf.mxu0  ;;  %v8030_v20 = vor.u32 %v8641_v18, %v8027_v56  ;;  %v7515_v24 = vld [vmem:[#allocation5 + $0x3f0] sm:$0xf0] }
 0x459   :  { %v3410_v61 = vpop.f32.mrf.mxu3  ;;  %v3322_v15 = vadd.f32 %v3321_v49, %v3233_v31  ;;  %v3234_v40 = vpop.f32.mrf.mxu1  ;;  %3827 = vmatpush.bf16.msrb.mxu0 %v7070_v47  ;;  %v7771_v47 = vld [vmem:[#allocation5 + $0x5f0] sm:$0xf0] }
 0x45a   :  { %v3235_v63 = vadd.f32 %v3234_v40, %v3146_v2  ;;  %4088 = vmatpush.bf16.msra.mxu3 %v8030_v20 }
 0x45b   :  { %v10333_v12 = vadd.f32 %v3410_v61, %v3322_v15 }
 0x45d   :  { %13215 = vst [vmem:[#allocation176_spill] sm:$0xff] %v10333_v12  ;;  %3828 = vmatpush.bf16.msrb.mxu0 %v7038_v0 }
 0x460   :  { %v3323_v42 = vpop.f32.mrf.mxu2  ;;  %v10337_v49 = vpop.f32.mrf.mxu0 }
 0x461   :  { %v3412_v33 = vpop.f32.mrf.mxu3  ;;  %v3324_v31 = vadd.f32 %v3323_v42, %v3235_v63  ;;  %v3237_v28 = vpop.f32.mrf.mxu1  ;;  %v7774_v42 = vor.u32 %v8577_v59, %v7771_v47  ;;  %v3154_v59 = vadd.f32 %v10062_v7, %v10225_v17  ;;  %v3156_v7 = vadd.f32 %v10074_v6, %v10225_v17 }
 0x462   :  { %v3238_v2 = vadd.f32 %v3237_v28, %v3149_v16  ;;  %v8513_v28 = vld [vmem:[#allocation5 + $0x3d4] sm:$0xf] }
 0x463   :  { %v10339_v61 = vadd.f32 %v3412_v33, %v3324_v31  ;;  %3543 = vmatmul.bf16.gmra.mxu0 %v9142_v30  ;;  %v3151_v33 = vadd.f32 %v10056_v57, %v10225_v17  ;;  %3999 = vmatpush.bf16.msra.mxu2 %v7774_v42  ;;  %v7518_v12 = vor.u32 %v8513_v28, %v7515_v24 }
 0x464   :  { %3276 = vmatmul.bf16.gmra.mxu1 %v9466_v14  ;;  %v3159_v28 = vadd.f32 %v10080_v52, %v10225_v17  ;;  %v8569_v52 = vld [vmem:[#allocation5 + $0x594] sm:$0xf] }
 0x465   :  { %13216 = vst [vmem:[#allocation177_spill] sm:$0xff] %v10339_v61  ;;  %3365 = vmatmul.bf16.gmra.mxu2 %v9470_v11  ;;  %3910 = vmatpush.bf16.msra.mxu1 %v7518_v12  ;;  %v7451_v61 = vld [vmem:[#allocation5 + $0x370] sm:$0xf0] }
 0x466   :  { %3454 = vmatmul.bf16.gmra.mxu3 %v13121_v37 }
 0x468   :  { %v3326_v15 = vpop.f32.mrf.mxu2  ;;  %v10349_v16 = vpop.f32.mrf.mxu0 }
 0x469   :  { %v3415_v40 = vpop.f32.mrf.mxu3  ;;  %v3327_v63 = vadd.f32 %v3326_v15, %v3238_v2  ;;  %v3239_v1 = vpop.f32.mrf.mxu1 }
 0x46a   :  { %v3240_v0 = vadd.f32 %v3239_v1, %v3151_v33 }
 0x46b   :  { %v10351_v31 = vadd.f32 %v3415_v40, %v3327_v63 }
 0x46d   :  { %13217 = vst [vmem:[#allocation178_spill] sm:$0xff] %v10351_v31  ;;  %v7483_v31 = vld [vmem:[#allocation5 + $0x3b0] sm:$0xf0] }
 0x470   :  { %v3328_v47 = vpop.f32.mrf.mxu2  ;;  %v10355_v42 = vpop.f32.mrf.mxu0 }
 0x471   :  { %v3417_v57 = vpop.f32.mrf.mxu3  ;;  %v3329_v18 = vadd.f32 %v3328_v47, %v3240_v0  ;;  %v3242_v56 = vpop.f32.mrf.mxu1 }
 0x472   :  { %v3243_v2 = vadd.f32 %v3242_v56, %v3154_v59 }
 0x473   :  { %v10357_v15 = vadd.f32 %v3417_v57, %v3329_v18  ;;  %3548 = vmatmul.bf16.gmra.mxu0 %v9154_v60 }
 0x474   :  { %3281 = vmatmul.bf16.gmra.mxu1 %v9488_v13 }
 0x475   :  { %13218 = vst [vmem:[#allocation179_spill] sm:$0xff] %v10357_v15  ;;  %3370 = vmatmul.bf16.gmra.mxu2 %v9492_v39 }
 0x476   :  { %3459 = vmatmul.bf16.gmra.mxu3 %v9494_v51 }
 0x478   :  { %v3331_v12 = vpop.f32.mrf.mxu2  ;;  %v10367_v63 = vpop.f32.mrf.mxu0 }
 0x479   :  { %v3420_v20 = vpop.f32.mrf.mxu3  ;;  %v3332_v33 = vadd.f32 %v3331_v12, %v3243_v2  ;;  %v3244_v40 = vpop.f32.mrf.mxu1  ;;  %v8633_v12 = vld [vmem:[#allocation5 + $0x794] sm:$0xf] }
 0x47a   :  { %v3245_v1 = vadd.f32 %v3244_v40, %v3156_v7  ;;  %v7739_v7 = vld [vmem:[#allocation5 + $0x5b0] sm:$0xf0] }
 0x47b   :  { %v10369_v0 = vadd.f32 %v3420_v20, %v3332_v33  ;;  %v7742_v20 = vor.u32 %v8569_v52, %v7739_v7  ;;  %v7995_v33 = vld [vmem:[#allocation5 + $0x7b0] sm:$0xf0]  ;;  %v3164_v52 = vadd.f32 %v10098_v54, %v10225_v17  ;;  %v3166_v54 = vadd.f32 %v10110_v26, %v10225_v17 }
 0x47c   :  { %v7998_v40 = vor.u32 %v8633_v12, %v7995_v33 }
 0x47d   :  { %13219 = vst [vmem:[#allocation180_spill] sm:$0xff] %v10369_v0  ;;  %4000 = vmatpush.bf16.msra.mxu2 %v7742_v20 }
 0x47e   :  { %4089 = vmatpush.bf16.msra.mxu3 %v7998_v40 }
 0x480   :  { %v3333_v59 = vpop.f32.mrf.mxu2  ;;  %v10373_v56 = vpop.f32.mrf.mxu0 }
 0x481   :  { %v3422_v47 = vpop.f32.mrf.mxu3  ;;  %v3334_v57 = vadd.f32 %v3333_v59, %v3245_v1  ;;  %v3247_v18 = vpop.f32.mrf.mxu1  ;;  %v3161_v1 = vadd.f32 %v10092_v58, %v10225_v17 }
 0x482   :  { %v3248_v24 = vadd.f32 %v3247_v18, %v3159_v28 }
 0x483   :  { %v10375_v6 = vadd.f32 %v3422_v47, %v3334_v57  ;;  %3829 = vmatmul.bf16.vlgmr.msrb.gmra.mxu0 %v9112_v41 }
 0x484   :  { %3562 = vmatmul.bf16.vlgmr.msrb.gmra.mxu1 %v9160_v3 }
 0x485   :  { %13220 = vst [vmem:[#allocation181_spill] sm:$0xff] %v10375_v6  ;;  %3651 = vmatmul.bf16.vlgmr.msrb.gmra.mxu2 %v9162_v4  ;;  %v8505_v6 = vld [vmem:[#allocation5 + $0x394] sm:$0xf] }
 0x486   :  { %3740 = vmatmul.bf16.vlgmr.msrb.gmra.mxu3 %v9164_v5  ;;  %v7486_v15 = vor.u32 %v8505_v6, %v7483_v31 }
 0x488   :  { %v3336_v28 = vpop.f32.mrf.mxu2  ;;  %v10385_v18 = vpop.f32.mrf.mxu0  ;;  %3911 = vmatpush.bf16.msra.mxu1 %v7486_v15 }
 0x489   :  { %v3425_v59 = vpop.f32.mrf.mxu3  ;;  %v3337_v47 = vadd.f32 %v3336_v28, %v3248_v24  ;;  %v3249_v57 = vpop.f32.mrf.mxu1 }
 0x48a   :  { %v3250_v2 = vadd.f32 %v3249_v57, %v3161_v1  ;;  %v3169_v57 = vadd.f32 %v10116_v10, %v10225_v17  ;;  %v8561_v10 = vld [vmem:[#allocation5 + $0x554] sm:$0xf] }
 0x48b   :  { %v10387_v0 = vadd.f32 %v3425_v59, %v3337_v47 }
 0x48d   :  { %13221 = vst [vmem:[#allocation182_spill] sm:$0xff] %v10387_v0 }
 0x490   :  { %v3338_v7 = vpop.f32.mrf.mxu2  ;;  %v10391_v20 = vpop.f32.mrf.mxu0 }
 0x491   :  { %v3427_v58 = vpop.f32.mrf.mxu3  ;;  %v3339_v12 = vadd.f32 %v3338_v7, %v3250_v2  ;;  %v3252_v33 = vpop.f32.mrf.mxu1 }
 0x492   :  { %v3253_v24 = vadd.f32 %v3252_v33, %v3164_v52 }
 0x493   :  { %v10393_v28 = vadd.f32 %v3427_v58, %v3339_v12  ;;  %3834 = vmatmul.bf16.gmra.mxu0 %v9124_v36 }
 0x494   :  { %3567 = vmatmul.bf16.gmra.mxu1 %v9170_v21 }
 0x495   :  { %13222 = vst [vmem:[#allocation183_spill] sm:$0xff] %v10393_v28  ;;  %3656 = vmatmul.bf16.gmra.mxu2 %v9172_v22 }
 0x496   :  { %3745 = vmatmul.bf16.gmra.mxu3 %v9174_v23 }
 0x498   :  { %v3341_v15 = vpop.f32.mrf.mxu2  ;;  %v10403_v1 = vpop.f32.mrf.mxu0 }
 0x499   :  { %v3430_v6 = vpop.f32.mrf.mxu3  ;;  %v3342_v2 = vadd.f32 %v3341_v15, %v3253_v24  ;;  %v3254_v40 = vpop.f32.mrf.mxu1  ;;  %v7707_v15 = vld [vmem:[#allocation5 + $0x570] sm:$0xf0] }
 0x49a   :  { %v3255_v59 = vadd.f32 %v3254_v40, %v3166_v54  ;;  %v13225_v54 = vld [vmem:[#allocation27_spill] sm:$0xff]  ;;  %v7963_v40 = vld [vmem:[#allocation5 + $0x770] sm:$0xf0] }
 0x49b   :  { %v10405_v47 = vadd.f32 %v3430_v6, %v3342_v2  ;;  %v8625_v6 = vld [vmem:[#allocation5 + $0x754] sm:$0xf]  ;;  %v7710_v2 = vor.u32 %v8561_v10, %v7707_v15  ;;  %v13228_v10 = vld [vmem:[#allocation126_spill] sm:$0xff] }
 0x49c   :  { %v3174_v15 = vadd.f32 %v13228_v10, %v10225_v17 }
 0x49d   :  { %13223 = vst [vmem:[#allocation184_spill] sm:$0xff] %v10405_v47  ;;  %4001 = vmatpush.bf16.msra.mxu2 %v7710_v2 }
 0x4a0   :  { %v3343_v52 = vpop.f32.mrf.mxu2  ;;  %v10409_v33 = vpop.f32.mrf.mxu0 }
 0x4a1   :  { %v3432_v7 = vpop.f32.mrf.mxu3  ;;  %v3344_v58 = vadd.f32 %v3343_v52, %v3255_v59  ;;  %v3257_v12 = vpop.f32.mrf.mxu1  ;;  %v7966_v59 = vor.u32 %v8625_v6, %v7963_v40 }
 0x4a2   :  { %v3258_v31 = vadd.f32 %v3257_v12, %v3169_v57  ;;  %v13226_v57 = vld [vmem:[#allocation154_spill] sm:$0xff] }
 0x4a3   :  { %v10411_v26 = vadd.f32 %v3432_v7, %v3344_v58  ;;  %3839 = vmatmul.bf16.gmra.mxu0 %v9136_v27  ;;  %v3171_v52 = vadd.f32 %v13226_v57, %v10225_v17  ;;  %4090 = vmatpush.bf16.msra.mxu3 %v7966_v59  ;;  %v13231_v59 = vld [vmem:[#allocation28_spill] sm:$0xff] }
 0x4a4   :  { %3572 = vmatmul.bf16.gmra.mxu1 %v9180_v34 }
 0x4a5   :  { %13224 = vst [vmem:[#allocation185_spill] sm:$0xff] %v10411_v26  ;;  %3661 = vmatmul.bf16.gmra.mxu2 %v9182_v35  ;;  %v8497_v26 = vld [vmem:[#allocation5 + $0x354] sm:$0xf] }
 0x4a6   :  { %3750 = vmatmul.bf16.gmra.mxu3 %v13225_v54  ;;  %v7454_v54 = vor.u32 %v8497_v26, %v7451_v61  ;;  %v13233_v26 = vld [vmem:[#allocation29_spill] sm:$0xff] }
 0x4a8   :  { %v3346_v7 = vpop.f32.mrf.mxu2  ;;  %v10421_v28 = vpop.f32.mrf.mxu0  ;;  %3912 = vmatpush.bf16.msra.mxu1 %v7454_v54  ;;  %v13234_v54 = vld [vmem:[#allocation30_spill] sm:$0xff] }
 0x4a9   :  { %v3435_v58 = vpop.f32.mrf.mxu3  ;;  %v3347_v12 = vadd.f32 %v3346_v7, %v3258_v31  ;;  %v3259_v0 = vpop.f32.mrf.mxu1 }
 0x4aa   :  { %v3260_v24 = vadd.f32 %v3259_v0, %v3171_v52  ;;  %v13232_v0 = vld [vmem:[#allocation23_spill] sm:$0xff] }
 0x4ab   :  { %v10423_v47 = vadd.f32 %v3435_v58, %v3347_v12  ;;  %v13235_v52 = vld [vmem:[#allocation95_spill] sm:$0xff] }
 0x4ad   :  { %13227 = vst [vmem:[#allocation154_spill] sm:$0xff] %v10423_v47 }
 0x4b0   :  { %v3348_v6 = vpop.f32.mrf.mxu2  ;;  %v10427_v2 = vpop.f32.mrf.mxu0 }
 0x4b1   :  { %v3437_v40 = vpop.f32.mrf.mxu3  ;;  %v3349_v57 = vadd.f32 %v3348_v6, %v3260_v24  ;;  %v3262_v35 = vpop.f32.mrf.mxu1  ;;  %13229 = vst [vmem:[#allocation126_spill] sm:$0xff] %v10427_v2  ;;  %v3176_v24 = vadd.f32 %v13235_v52, %v10225_v17  ;;  %v13241_v2 = vld [vmem:[#allocation31_spill] sm:$0xff] }
 0x4b2   :  { %v3263_v31 = vadd.f32 %v3262_v35, %v3174_v15 }
 0x4b3   :  { %v10429_v7 = vadd.f32 %v3437_v40, %v3349_v57  ;;  %3844 = vmatmul.bf16.gmra.mxu0 %v13232_v0  ;;  %v13238_v57 = vld [vmem:[#allocation96_spill] sm:$0xff] }
 0x4b4   :  { %3577 = vmatmul.bf16.gmra.mxu1 %v13231_v59  ;;  %v3179_v0 = vadd.f32 %v13238_v57, %v10225_v17  ;;  %v7931_v57 = vld [vmem:[#allocation5 + $0x730] sm:$0xf0] }
 0x4b5   :  { %13230 = vst [vmem:[#allocation186_spill] sm:$0xff] %v10429_v7  ;;  %3666 = vmatmul.bf16.gmra.mxu2 %v13233_v26 }
 0x4b6   :  { %3755 = vmatmul.bf16.gmra.mxu3 %v13234_v54 }
 0x4b8   :  { %v3351_v58 = vpop.f32.mrf.mxu2  ;;  %v10439_v15 = vpop.f32.mrf.mxu0 }
 0x4b9   :  { %v3440_v12 = vpop.f32.mrf.mxu3  ;;  %v3352_v10 = vadd.f32 %v3351_v58, %v3263_v31  ;;  %v3264_v35 = vpop.f32.mrf.mxu1  ;;  %13236 = vst [vmem:[#allocation95_spill] sm:$0xff] %v10439_v15  ;;  %v13242_v31 = vld [vmem:[#allocation16_spill] sm:$0xff] }
 0x4ba   :  { %v3265_v6 = vadd.f32 %v3264_v35, %v3176_v24  ;;  %v13243_v58 = vld [vmem:[#allocation32_spill] sm:$0xff]  ;;  %v7675_v35 = vld [vmem:[#allocation5 + $0x530] sm:$0xf0] }
 0x4bb   :  { %v10441_v40 = vadd.f32 %v3440_v12, %v3352_v10  ;;  %v13244_v12 = vld [vmem:[#allocation33_spill] sm:$0xff] }
 0x4bc   :  { %v8553_v10 = vld [vmem:[#allocation5 + $0x514] sm:$0xf] }
 0x4bd   :  { %13237 = vst [vmem:[#allocation187_spill] sm:$0xff] %v10441_v40 }
 0x4c0   :  { %v3353_v61 = vpop.f32.mrf.mxu2  ;;  %v10445_v54 = vpop.f32.mrf.mxu0 }
 0x4c1   :  { %v3442_v47 = vpop.f32.mrf.mxu3  ;;  %v3354_v7 = vadd.f32 %v3353_v61, %v3265_v6  ;;  %v3267_v26 = vpop.f32.mrf.mxu1  ;;  %13239 = vst [vmem:[#allocation96_spill] sm:$0xff] %v10445_v54  ;;  %v8617_v61 = vld [vmem:[#allocation5 + $0x714] sm:$0xf]  ;;  %v7678_v6 = vor.u32 %v8553_v10, %v7675_v35  ;;  %v13246_v10 = vld [vmem:[#allocation98_spill] sm:$0xff] }
 0x4c2   :  { %v3268_v59 = vadd.f32 %v3267_v26, %v3179_v0  ;;  %v7934_v54 = vor.u32 %v8617_v61, %v7931_v57  ;;  %v3184_v35 = vadd.f32 %v13246_v10, %v10225_v17 }
 0x4c3   :  { %v10447_v52 = vadd.f32 %v3442_v47, %v3354_v7  ;;  %3849 = vmatmul.bf16.gmra.mxu0 %v13242_v31  ;;  %v3181_v47 = vadd.f32 %v10164_v53, %v10225_v17  ;;  %4002 = vmatpush.bf16.msra.mxu2 %v7678_v6 }
 0x4c4   :  { %3582 = vmatmul.bf16.gmra.mxu1 %v13241_v2  ;;  %4091 = vmatpush.bf16.msra.mxu3 %v7934_v54  ;;  %v13248_v54 = vld [vmem:[#allocation35_spill] sm:$0xff] }
 0x4c5   :  { %13240 = vst [vmem:[#allocation188_spill] sm:$0xff] %v10447_v52  ;;  %3671 = vmatmul.bf16.gmra.mxu2 %v13243_v58  ;;  %v8489_v52 = vld [vmem:[#allocation5 + $0x314] sm:$0xf] }
 0x4c6   :  { %3760 = vmatmul.bf16.gmra.mxu3 %v13244_v12  ;;  %v7419_v12 = vld [vmem:[#allocation5 + $0x330] sm:$0xf0] }
 0x4c7   :  { %v7422_v58 = vor.u32 %v8489_v52, %v7419_v12  ;;  %v13251_v12 = vld [vmem:[#allocation38_spill] sm:$0xff] }
 0x4c8   :  { %v3356_v7 = vpop.f32.mrf.mxu2  ;;  %v10457_v2 = vpop.f32.mrf.mxu0 }
 0x4c9   :  { %v3445_v0 = vpop.f32.mrf.mxu3  ;;  %v3357_v26 = vadd.f32 %v3356_v7, %v3268_v59  ;;  %v3269_v31 = vpop.f32.mrf.mxu1  ;;  %3913 = vmatpush.bf16.msra.mxu1 %v7422_v58  ;;  %v13250_v58 = vld [vmem:[#allocation37_spill] sm:$0xff] }
 0x4ca   :  { %v3270_v24 = vadd.f32 %v3269_v31, %v3181_v47  ;;  %v13249_v31 = vld [vmem:[#allocation19_spill] sm:$0xff] }
 0x4cb   :  { %v10459_v40 = vadd.f32 %v3445_v0, %v3357_v26 }
 0x4cd   :  { %13245 = vst [vmem:[#allocation189_spill] sm:$0xff] %v10459_v40 }
 0x4d0   :  { %v3358_v61 = vpop.f32.mrf.mxu2  ;;  %v10463_v6 = vpop.f32.mrf.mxu0 }
 0x4d1   :  { %v3447_v53 = vpop.f32.mrf.mxu3  ;;  %v3359_v57 = vadd.f32 %v3358_v61, %v3270_v24  ;;  %v3272_v15 = vpop.f32.mrf.mxu1  ;;  %v3186_v24 = vadd.f32 %v10182_v38, %v10225_v17 }
 0x4d2   :  { %v3273_v59 = vadd.f32 %v3272_v15, %v3184_v35 }
 0x4d3   :  { %v10465_v7 = vadd.f32 %v3447_v53, %v3359_v57  ;;  %3854 = vmatmul.bf16.gmra.mxu0 %v13249_v31  ;;  %v13253_v53 = vld [vmem:[#allocation100_spill] sm:$0xff] }
 0x4d4   :  { %3587 = vmatmul.bf16.gmra.mxu1 %v13248_v54  ;;  %v3189_v57 = vadd.f32 %v13253_v53, %v10225_v17  ;;  %v13256_v54 = vld [vmem:[#allocation40_spill] sm:$0xff]  ;;  %v7899_v53 = vld [vmem:[#allocation5 + $0x6f0] sm:$0xf0] }
 0x4d5   :  { %13247 = vst [vmem:[#allocation98_spill] sm:$0xff] %v10465_v7  ;;  %3676 = vmatmul.bf16.gmra.mxu2 %v13250_v58 }
 0x4d6   :  { %3765 = vmatmul.bf16.gmra.mxu3 %v13251_v12 }
 0x4d8   :  { %v3361_v47 = vpop.f32.mrf.mxu2  ;;  %v10475_v10 = vpop.f32.mrf.mxu0 }
 0x4d9   :  { %v3450_v0 = vpop.f32.mrf.mxu3  ;;  %v3362_v26 = vadd.f32 %v3361_v47, %v3273_v59  ;;  %v3274_v15 = vpop.f32.mrf.mxu1  ;;  %v13257_v59 = vld [vmem:[#allocation21_spill] sm:$0xff]  ;;  %v13258_v47 = vld [vmem:[#allocation42_spill] sm:$0xff] }
 0x4da   :  { %v3275_v35 = vadd.f32 %v3274_v15, %v3186_v24  ;;  %v7643_v15 = vld [vmem:[#allocation5 + $0x4f0] sm:$0xf0] }
 0x4db   :  { %v10477_v61 = vadd.f32 %v3450_v0, %v3362_v26  ;;  %v13259_v0 = vld [vmem:[#allocation43_spill] sm:$0xff]  ;;  %v8545_v26 = vld [vmem:[#allocation5 + $0x4d4] sm:$0xf] }
 0x4dd   :  { %13252 = vst [vmem:[#allocation190_spill] sm:$0xff] %v10477_v61 }
 0x4e0   :  { %v3363_v52 = vpop.f32.mrf.mxu2  ;;  %v10481_v12 = vpop.f32.mrf.mxu0 }
 0x4e1   :  { %v3452_v40 = vpop.f32.mrf.mxu3  ;;  %v3364_v7 = vadd.f32 %v3363_v52, %v3275_v35  ;;  %v3277_v58 = vpop.f32.mrf.mxu1  ;;  %13254 = vst [vmem:[#allocation100_spill] sm:$0xff] %v10481_v12  ;;  %v7646_v52 = vor.u32 %v8545_v26, %v7643_v15  ;;  %v8609_v35 = vld [vmem:[#allocation5 + $0x6d4] sm:$0xf]  ;;  %v3194_v15 = vadd.f32 %v10206_v44, %v10225_v17  ;;  %v7265_v44 = vld [vmem:[#allocation5 + $0x1d8] sm:$0xf] }
 0x4e2   :  { %v3278_v31 = vadd.f32 %v3277_v58, %v3189_v57  ;;  %v7902_v12 = vor.u32 %v8609_v35, %v7899_v53 }
 0x4e3   :  { %v10483_v38 = vadd.f32 %v3452_v40, %v3364_v7  ;;  %3859 = vmatmul.bf16.gmra.mxu0 %v13257_v59  ;;  %v3191_v40 = vadd.f32 %v10200_v46, %v10225_v17  ;;  %4003 = vmatpush.bf16.msra.mxu2 %v7646_v52 }
 0x4e4   :  { %3592 = vmatmul.bf16.gmra.mxu1 %v13256_v54  ;;  %4092 = vmatpush.bf16.msra.mxu3 %v7902_v12  ;;  %v13262_v12 = vld [vmem:[#allocation45_spill] sm:$0xff] }
 0x4e5   :  { %13255 = vst [vmem:[#allocation191_spill] sm:$0xff] %v10483_v38  ;;  %3681 = vmatmul.bf16.gmra.mxu2 %v13258_v47  ;;  %v8481_v38 = vld [vmem:[#allocation5 + $0x2d4] sm:$0xf] }
 0x4e6   :  { %3770 = vmatmul.bf16.gmra.mxu3 %v13259_v0  ;;  %v7387_v0 = vld [vmem:[#allocation5 + $0x2f0] sm:$0xf0] }
 0x4e7   :  { %v7390_v26 = vor.u32 %v8481_v38, %v7387_v0  ;;  %v13264_v0 = vld [vmem:[#allocation47_spill] sm:$0xff]  ;;  %v13269_v38 = vld [vmem:[#allocation164_spill] sm:$0xff] }
 0x4e8   :  { %v3366_v7 = vpop.f32.mrf.mxu2  ;;  %v10493_v54 = vpop.f32.mrf.mxu0 }
 0x4e9   :  { %v3455_v58 = vpop.f32.mrf.mxu3  ;;  %v3367_v57 = vadd.f32 %v3366_v7, %v3278_v31  ;;  %v3279_v59 = vpop.f32.mrf.mxu1  ;;  %3914 = vmatpush.bf16.msra.mxu1 %v7390_v26 }
 0x4ea   :  { %v3280_v24 = vadd.f32 %v3279_v59, %v3191_v40  ;;  %v13263_v59 = vld [vmem:[#allocation24_spill] sm:$0xff] }
 0x4eb   :  { %v10495_v61 = vadd.f32 %v3455_v58, %v3367_v57  ;;  %v13265_v40 = vld [vmem:[#allocation48_spill] sm:$0xff]  ;;  %v8454_v58 = vld [vmem:[#allocation5 + $0x1f4] sm:$0xf0]  ;;  %v13266_v57 = vld [vmem:[#allocation103_spill] sm:$0xff] }
 0x4ec   :  { %v3196_v26 = vadd.f32 %v13266_v57, %v10225_v17 }
 0x4ed   :  { %13260 = vst [vmem:[#allocation192_spill] sm:$0xff] %v10495_v61  ;;  %v10516_v61 = vperm.slane %v13269_v38, 4 }
 0x4f0   :  { %v3368_v35 = vpop.f32.mrf.mxu2  ;;  %v10499_v52 = vpop.f32.mrf.mxu0 }
 0x4f1   :  { %v3457_v46 = vpop.f32.mrf.mxu3  ;;  %v3369_v53 = vadd.f32 %v3368_v35, %v3280_v24  ;;  %v3282_v47 = vpop.f32.mrf.mxu1  ;;  %v7266_v24 = vor.u32 %v8454_v58, %v7265_v44 }
 0x4f2   :  { %v3283_v31 = vadd.f32 %v3282_v47, %v3194_v15 }
 0x4f3   :  { %v10501_v7 = vadd.f32 %v3457_v46, %v3369_v53  ;;  %3864 = vmatmul.bf16.gmra.mxu0 %v13263_v59 }
 0x4f4   :  { %3597 = vmatmul.bf16.gmra.mxu1 %v13262_v12  ;;  %4177 = vmatpush.bf16.msra.mxu0 %v7266_v24 }
 0x4f5   :  { %13261 = vst [vmem:[#allocation193_spill] sm:$0xff] %v10501_v7  ;;  %3686 = vmatmul.bf16.gmra.mxu2 %v13264_v0  ;;  %v13270_v7 = vld [vmem:[#allocation104_spill] sm:$0xff] }
 0x4f6   :  { %3775 = vmatmul.bf16.gmra.mxu3 %v13265_v40  ;;  %v3475_v40 = vadd.f32 %v13270_v7, %v10516_v61  ;;  %v8537_v7 = vld [vmem:[#allocation5 + $0x494] sm:$0xf] }
 0x4f8   :  { %v3371_v47 = vpop.f32.mrf.mxu2  ;;  %v10511_v53 = vpop.f32.mrf.mxu0 }
 0x4f9   :  { %v3460_v15 = vpop.f32.mrf.mxu3  ;;  %v3372_v35 = vadd.f32 %v3371_v47, %v3283_v31  ;;  %v3284_v46 = vpop.f32.mrf.mxu1  ;;  %13267 = vst [vmem:[#allocation103_spill] sm:$0xff] %v10511_v53  ;;  %v13273_v47 = vld [vmem:[#allocation50_spill] sm:$0xff]  ;;  %v7867_v53 = vld [vmem:[#allocation5 + $0x6b0] sm:$0xf0] }
 0x4fa   :  { %v3285_v59 = vadd.f32 %v3284_v46, %v3196_v26  ;;  %v13274_v26 = vld [vmem:[#allocation17_spill] sm:$0xff] }
 0x4fb   :  { %v10513_v12 = vadd.f32 %v3460_v15, %v3372_v35  ;;  %v13275_v15 = vld [vmem:[#allocation54_spill] sm:$0xff]  ;;  %v13276_v35 = vld [vmem:[#allocation55_spill] sm:$0xff]  ;;  %v7611_v46 = vld [vmem:[#allocation5 + $0x4b0] sm:$0xf0] }
 0x4fd   :  { %13268 = vst [vmem:[#allocation194_spill] sm:$0xff] %v10513_v12 }
 0x500   :  { %v3373_v44 = vpop.f32.mrf.mxu2  ;;  %v10520_v57 = vpop.f32.mrf.mxu0 }
 0x501   :  { %v3462_v58 = vpop.f32.mrf.mxu3  ;;  %v3374_v0 = vadd.f32 %v3373_v44, %v3285_v59  ;;  %v3563_v17 = vpop.f32.mrf.mxu1  ;;  %13271 = vst [vmem:[#allocation164_spill] sm:$0xff] %v10520_v57  ;;  %v8601_v59 = vld [vmem:[#allocation5 + $0x694] sm:$0xf]  ;;  %v7614_v44 = vor.u32 %v8537_v7, %v7611_v46 }
 0x502   :  { %v3564_v24 = vadd.f32 %v3563_v17, %v3475_v40  ;;  %v7870_v57 = vor.u32 %v8601_v59, %v7867_v53  ;;  %v3480_v53 = vadd.f32 %v10247_v19, %v10516_v61  ;;  %v7233_v19 = vld [vmem:[#allocation5 + $0x198] sm:$0xf] }
 0x503   :  { %v10522_v31 = vadd.f32 %v3462_v58, %v3374_v0  ;;  %3869 = vmatmul.bf16.gmra.mxu0 %v13274_v26  ;;  %v3477_v0 = vadd.f32 %v10241_v48, %v10516_v61  ;;  %4004 = vmatpush.bf16.msra.mxu2 %v7614_v44 }
 0x504   :  { %3602 = vmatmul.bf16.gmra.mxu1 %v13273_v47  ;;  %4093 = vmatpush.bf16.msra.mxu3 %v7870_v57 }
 0x505   :  { %13272 = vst [vmem:[#allocation104_spill] sm:$0xff] %v10522_v31  ;;  %3691 = vmatmul.bf16.gmra.mxu2 %v13275_v15  ;;  %v8473_v31 = vld [vmem:[#allocation5 + $0x294] sm:$0xf] }
 0x506   :  { %3780 = vmatmul.bf16.gmra.mxu3 %v13276_v35  ;;  %v7355_v35 = vld [vmem:[#allocation5 + $0x2b0] sm:$0xf0] }
 0x507   :  { %v7358_v15 = vor.u32 %v8473_v31, %v7355_v35  ;;  %v13279_v31 = vld [vmem:[#allocation58_spill] sm:$0xff] }
 0x508   :  { %v3652_v40 = vpop.f32.mrf.mxu2  ;;  %v10532_v47 = vpop.f32.mrf.mxu0 }
 0x509   :  { %v3741_v58 = vpop.f32.mrf.mxu3  ;;  %v3653_v17 = vadd.f32 %v3652_v40, %v3564_v24  ;;  %v3565_v26 = vpop.f32.mrf.mxu1  ;;  %3915 = vmatpush.bf16.msra.mxu1 %v7358_v15  ;;  %v3482_v15 = vadd.f32 %v10259_v62, %v10516_v61 }
 0x50a   :  { %v3566_v38 = vadd.f32 %v3565_v26, %v3477_v0  ;;  %v8446_v26 = vld [vmem:[#allocation5 + $0x1b4] sm:$0xf0] }
 0x50b   :  { %v10534_v12 = vadd.f32 %v3741_v58, %v3653_v17 }
 0x50d   :  { %13277 = vst [vmem:[#allocation195_spill] sm:$0xff] %v10534_v12 }
 0x510   :  { %v3654_v7 = vpop.f32.mrf.mxu2  ;;  %v10538_v44 = vpop.f32.mrf.mxu0 }
 0x511   :  { %v3743_v48 = vpop.f32.mrf.mxu3  ;;  %v3655_v46 = vadd.f32 %v3654_v7, %v3566_v38  ;;  %v3568_v59 = vpop.f32.mrf.mxu1  ;;  %v7234_v38 = vor.u32 %v8446_v26, %v7233_v19 }
 0x512   :  { %v3569_v24 = vadd.f32 %v3568_v59, %v3480_v53 }
 0x513   :  { %v10540_v40 = vadd.f32 %v3743_v48, %v3655_v46  ;;  %3874 = vmatmul.bf16.gmra.mxu0 %v9128_v43  ;;  %v13281_v46 = vld [vmem:[#allocation108_spill] sm:$0xff] }
 0x514   :  { %3607 = vmatmul.bf16.gmra.mxu1 %v9352_v25  ;;  %4178 = vmatpush.bf16.msra.mxu0 %v7234_v38  ;;  %v3485_v59 = vadd.f32 %v13281_v46, %v10516_v61  ;;  %v13284_v38 = vld [vmem:[#allocation61_spill] sm:$0xff] }
 0x515   :  { %13278 = vst [vmem:[#allocation196_spill] sm:$0xff] %v10540_v40  ;;  %3696 = vmatmul.bf16.gmra.mxu2 %v12995_v29  ;;  %v7835_v46 = vld [vmem:[#allocation5 + $0x670] sm:$0xf0] }
 0x516   :  { %3785 = vmatmul.bf16.gmra.mxu3 %v13279_v31 }
 0x518   :  { %v3657_v35 = vpop.f32.mrf.mxu2  ;;  %v10550_v53 = vpop.f32.mrf.mxu0 }
 0x519   :  { %v3746_v0 = vpop.f32.mrf.mxu3  ;;  %v3658_v58 = vadd.f32 %v3657_v35, %v3569_v24  ;;  %v3570_v17 = vpop.f32.mrf.mxu1  ;;  %v13285_v24 = vld [vmem:[#allocation22_spill] sm:$0xff] }
 0x51a   :  { %v3571_v7 = vadd.f32 %v3570_v17, %v3482_v15  ;;  %v13286_v35 = vld [vmem:[#allocation62_spill] sm:$0xff]  ;;  %v7579_v17 = vld [vmem:[#allocation5 + $0x470] sm:$0xf0] }
 0x51b   :  { %v10552_v48 = vadd.f32 %v3746_v0, %v3658_v58  ;;  %v13287_v0 = vld [vmem:[#allocation63_spill] sm:$0xff]  ;;  %v8529_v58 = vld [vmem:[#allocation5 + $0x454] sm:$0xf] }
 0x51d   :  { %13280 = vst [vmem:[#allocation197_spill] sm:$0xff] %v10552_v48 }
 0x520   :  { %v3659_v57 = vpop.f32.mrf.mxu2  ;;  %v10556_v26 = vpop.f32.mrf.mxu0 }
 0x521   :  { %v3748_v12 = vpop.f32.mrf.mxu3  ;;  %v3660_v40 = vadd.f32 %v3659_v57, %v3571_v7  ;;  %v3573_v19 = vpop.f32.mrf.mxu1  ;;  %13282 = vst [vmem:[#allocation108_spill] sm:$0xff] %v10556_v26  ;;  %v8593_v57 = vld [vmem:[#allocation5 + $0x654] sm:$0xf]  ;;  %v7582_v7 = vor.u32 %v8529_v58, %v7579_v17  ;;  %v3490_v58 = vadd.f32 %v10283_v55, %v10516_v61  ;;  %v7201_v55 = vld [vmem:[#allocation5 + $0x158] sm:$0xf] }
 0x522   :  { %v3574_v62 = vadd.f32 %v3573_v19, %v3485_v59  ;;  %v7838_v26 = vor.u32 %v8593_v57, %v7835_v46 }
 0x523   :  { %v10558_v31 = vadd.f32 %v3748_v12, %v3660_v40  ;;  %3879 = vmatmul.bf16.gmra.mxu0 %v13285_v24  ;;  %v3487_v12 = vadd.f32 %v10277_v8, %v10516_v61  ;;  %4005 = vmatpush.bf16.msra.mxu2 %v7582_v7 }
 0x524   :  { %3612 = vmatmul.bf16.gmra.mxu1 %v13284_v38  ;;  %4094 = vmatpush.bf16.msra.mxu3 %v7838_v26  ;;  %v13291_v26 = vld [vmem:[#allocation66_spill] sm:$0xff] }
 0x525   :  { %13283 = vst [vmem:[#allocation198_spill] sm:$0xff] %v10558_v31  ;;  %3701 = vmatmul.bf16.gmra.mxu2 %v13286_v35  ;;  %v8465_v31 = vld [vmem:[#allocation5 + $0x254] sm:$0xf] }
 0x526   :  { %3790 = vmatmul.bf16.gmra.mxu3 %v13287_v0  ;;  %v7323_v0 = vld [vmem:[#allocation5 + $0x270] sm:$0xf0] }
 0x527   :  { %v7326_v35 = vor.u32 %v8465_v31, %v7323_v0  ;;  %v13294_v0 = vld [vmem:[#allocation68_spill] sm:$0xff]  ;;  %v13298_v31 = vld [vmem:[#allocation114_spill] sm:$0xff] }
 0x528   :  { %v3662_v40 = vpop.f32.mrf.mxu2  ;;  %v10568_v38 = vpop.f32.mrf.mxu0 }
 0x529   :  { %v3751_v59 = vpop.f32.mrf.mxu3  ;;  %v3663_v19 = vadd.f32 %v3662_v40, %v3574_v62  ;;  %v3575_v24 = vpop.f32.mrf.mxu1  ;;  %3916 = vmatpush.bf16.msra.mxu1 %v7326_v35  ;;  %v13293_v35 = vld [vmem:[#allocation67_spill] sm:$0xff] }
 0x52a   :  { %v3576_v15 = vadd.f32 %v3575_v24, %v3487_v12  ;;  %v13292_v24 = vld [vmem:[#allocation25_spill] sm:$0xff]  ;;  %v8438_v12 = vld [vmem:[#allocation5 + $0x174] sm:$0xf0] }
 0x52b   :  { %v10570_v48 = vadd.f32 %v3751_v59, %v3663_v19  ;;  %v13295_v59 = vld [vmem:[#allocation112_spill] sm:$0xff] }
 0x52c   :  { %v3492_v19 = vadd.f32 %v13295_v59, %v10516_v61 }
 0x52d   :  { %13288 = vst [vmem:[#allocation199_spill] sm:$0xff] %v10570_v48  ;;  %v3495_v48 = vadd.f32 %v13298_v31, %v10516_v61  ;;  %v8521_v31 = vld [vmem:[#allocation5 + $0x414] sm:$0xf] }
 0x530   :  { %v3664_v17 = vpop.f32.mrf.mxu2  ;;  %v10574_v7 = vpop.f32.mrf.mxu0 }
 0x531   :  { %v3753_v8 = vpop.f32.mrf.mxu3  ;;  %v3665_v57 = vadd.f32 %v3664_v17, %v3576_v15  ;;  %v3578_v46 = vpop.f32.mrf.mxu1  ;;  %13289 = vst [vmem:[#allocation200_spill] sm:$0xff] %v10574_v7  ;;  %v7202_v15 = vor.u32 %v8438_v12, %v7201_v55 }
 0x532   :  { %v3579_v62 = vadd.f32 %v3578_v46, %v3490_v58 }
 0x533   :  { %v10576_v40 = vadd.f32 %v3753_v8, %v3665_v57  ;;  %3884 = vmatmul.bf16.gmra.mxu0 %v13292_v24 }
 0x534   :  { %3617 = vmatmul.bf16.gmra.mxu1 %v13291_v26  ;;  %4179 = vmatpush.bf16.msra.mxu0 %v7202_v15  ;;  %v13301_v15 = vld [vmem:[#allocation71_spill] sm:$0xff] }
 0x535   :  { %13290 = vst [vmem:[#allocation201_spill] sm:$0xff] %v10576_v40  ;;  %3706 = vmatmul.bf16.gmra.mxu2 %v13293_v35 }
 0x536   :  { %3795 = vmatmul.bf16.gmra.mxu3 %v13294_v0 }
 0x538   :  { %v3667_v58 = vpop.f32.mrf.mxu2  ;;  %v10586_v46 = vpop.f32.mrf.mxu0 }
 0x539   :  { %v3756_v17 = vpop.f32.mrf.mxu3  ;;  %v3668_v8 = vadd.f32 %v3667_v58, %v3579_v62  ;;  %v3580_v57 = vpop.f32.mrf.mxu1  ;;  %13296 = vst [vmem:[#allocation112_spill] sm:$0xff] %v10586_v46  ;;  %v13302_v62 = vld [vmem:[#allocation18_spill] sm:$0xff]  ;;  %v13303_v58 = vld [vmem:[#allocation72_spill] sm:$0xff] }
 0x53a   :  { %v3581_v24 = vadd.f32 %v3580_v57, %v3492_v19  ;;  %v7803_v57 = vld [vmem:[#allocation5 + $0x630] sm:$0xf0] }
 0x53b   :  { %v10588_v26 = vadd.f32 %v3756_v17, %v3668_v8  ;;  %v13304_v17 = vld [vmem:[#allocation73_spill] sm:$0xff] }
 0x53c   :  { %v7547_v8 = vld [vmem:[#allocation5 + $0x430] sm:$0xf0] }
 0x53d   :  { %13297 = vst [vmem:[#allocation202_spill] sm:$0xff] %v10588_v26 }
 0x540   :  { %v3669_v40 = vpop.f32.mrf.mxu2  ;;  %v10592_v12 = vpop.f32.mrf.mxu0 }
 0x541   :  { %v3758_v0 = vpop.f32.mrf.mxu3  ;;  %v3670_v35 = vadd.f32 %v3669_v40, %v3581_v24  ;;  %v3583_v55 = vpop.f32.mrf.mxu1  ;;  %13299 = vst [vmem:[#allocation114_spill] sm:$0xff] %v10592_v12  ;;  %v8585_v40 = vld [vmem:[#allocation5 + $0x614] sm:$0xf]  ;;  %v7550_v24 = vor.u32 %v8521_v31, %v7547_v8  ;;  %v7169_v31 = vld [vmem:[#allocation5 + $0x118] sm:$0xf] }
 0x542   :  { %v3584_v59 = vadd.f32 %v3583_v55, %v3495_v48  ;;  %v7806_v12 = vor.u32 %v8585_v40, %v7803_v57  ;;  %v3497_v48 = vadd.f32 %v10313_v50, %v10516_v61  ;;  %v8430_v8 = vld [vmem:[#allocation5 + $0x134] sm:$0xf0]  ;;  %v3500_v50 = vadd.f32 %v10319_v32, %v10516_v61 }
 0x543   :  { %v10594_v7 = vadd.f32 %v3758_v0, %v3670_v35  ;;  %3889 = vmatmul.bf16.gmra.mxu0 %v13302_v62  ;;  %4006 = vmatpush.bf16.msra.mxu2 %v7550_v24  ;;  %v7170_v24 = vor.u32 %v8430_v8, %v7169_v31  ;;  %v8414_v31 = vld [vmem:[#allocation5 + $0xb4] sm:$0xf0]  ;;  %v3502_v8 = vadd.f32 %v10331_v9, %v10516_v61 }
 0x544   :  { %3622 = vmatmul.bf16.gmra.mxu1 %v13301_v15  ;;  %4095 = vmatpush.bf16.msra.mxu3 %v7806_v12  ;;  %v7073_v32 = vld [vmem:[#allocation5 + $0x58] sm:$0xf]  ;;  %v3505_v9 = vadd.f32 %v10337_v49, %v10516_v61 }
 0x545   :  { %13300 = vst [vmem:[#allocation203_spill] sm:$0xff] %v10594_v7  ;;  %3711 = vmatmul.bf16.gmra.mxu2 %v13303_v58  ;;  %v8457_v7 = vld [vmem:[#allocation5 + $0x214] sm:$0xf]  ;;  %4180 = vmatpush.bf16.msra.mxu0 %v7170_v24  ;;  %v7777_v49 = vld [vmem:[#allocation5 + $0x5d8] sm:$0xf] }
 0x546   :  { %3800 = vmatmul.bf16.gmra.mxu3 %v13304_v17  ;;  %v7291_v17 = vld [vmem:[#allocation5 + $0x230] sm:$0xf0] }
 0x547   :  { %v7294_v58 = vor.u32 %v8457_v7, %v7291_v17  ;;  %v13307_v7 = vld [vmem:[#allocation20_spill] sm:$0xff]  ;;  %v13308_v17 = vld [vmem:[#allocation77_spill] sm:$0xff] }
 0x548   :  { %v3672_v35 = vpop.f32.mrf.mxu2  ;;  %v10604_v15 = vpop.f32.mrf.mxu0 }
 0x549   :  { %v3761_v0 = vpop.f32.mrf.mxu3  ;;  %v3673_v55 = vadd.f32 %v3672_v35, %v3584_v59  ;;  %v3585_v62 = vpop.f32.mrf.mxu1  ;;  %3917 = vmatpush.bf16.msra.mxu1 %v7294_v58 }
 0x54a   :  { %v3586_v19 = vadd.f32 %v3585_v62, %v3497_v48  ;;  %v7137_v48 = vld [vmem:[#allocation5 + $0xd8] sm:$0xf] }
 0x54b   :  { %v10606_v26 = vadd.f32 %v3761_v0, %v3673_v55  ;;  %v8422_v0 = vld [vmem:[#allocation5 + $0xf4] sm:$0xf0] }
 0x54c   :  { %v7138_v58 = vor.u32 %v8422_v0, %v7137_v48  ;;  %v7105_v55 = vld [vmem:[#allocation5 + $0x98] sm:$0xf] }
 0x54d   :  { %13305 = vst [vmem:[#allocation204_spill] sm:$0xff] %v10606_v26  ;;  %v8406_v26 = vld [vmem:[#allocation5 + $0x74] sm:$0xf0] }
 0x54e   :  { %4181 = vmatpush.bf16.msra.mxu0 %v7138_v58  ;;  %v7041_v58 = vld [vmem:[#allocation5 + $0x18] sm:$0xf] }
 0x550   :  { %v3674_v40 = vpop.f32.mrf.mxu2  ;;  %v10610_v46 = vpop.f32.mrf.mxu0 }
 0x551   :  { %v3763_v57 = vpop.f32.mrf.mxu3  ;;  %v3675_v59 = vadd.f32 %v3674_v40, %v3586_v19  ;;  %v3588_v35 = vpop.f32.mrf.mxu1  ;;  %v13309_v19 = vld [vmem:[#allocation78_spill] sm:$0xff] }
 0x552   :  { %v3589_v12 = vadd.f32 %v3588_v35, %v3500_v50 }
 0x553   :  { %v10612_v62 = vadd.f32 %v3763_v57, %v3675_v59  ;;  %3894 = vmatmul.bf16.gmra.mxu0 %v13307_v7  ;;  %v7106_v57 = vor.u32 %v8414_v31, %v7105_v55 }
 0x554   :  { %3627 = vmatmul.bf16.gmra.mxu1 %v9444_v45 }
 0x555   :  { %13306 = vst [vmem:[#allocation205_spill] sm:$0xff] %v10612_v62  ;;  %3716 = vmatmul.bf16.gmra.mxu2 %v13308_v17  ;;  %4182 = vmatpush.bf16.msra.mxu0 %v7106_v57  ;;  %v7074_v62 = vor.u32 %v8406_v26, %v7073_v32  ;;  %v8033_v32 = vld [vmem:[#allocation5 + $0x7d8] sm:$0xf] }
 0x556   :  { %3805 = vmatmul.bf16.gmra.mxu3 %v13309_v19  ;;  %v8398_v19 = vld [vmem:[#allocation5 + $0x34] sm:$0xf0] }
 0x557   :  { %v7042_v55 = vor.u32 %v8398_v19, %v7041_v58  ;;  %v8646_v19 = vld [vmem:[#allocation5 + $0x7f4] sm:$0xf0] }
 0x558   :  { %v3677_v50 = vpop.f32.mrf.mxu2  ;;  %v10622_v35 = vpop.f32.mrf.mxu0  ;;  %v8034_v57 = vor.u32 %v8646_v19, %v8033_v32  ;;  %v8518_v26 = vld [vmem:[#allocation5 + $0x3f4] sm:$0xf0] }
 0x559   :  { %v3766_v40 = vpop.f32.mrf.mxu3  ;;  %v3678_v24 = vadd.f32 %v3677_v50, %v3589_v12  ;;  %v3590_v59 = vpop.f32.mrf.mxu1  ;;  %4183 = vmatpush.bf16.msra.mxu0 %v7074_v62  ;;  %v8582_v62 = vld [vmem:[#allocation5 + $0x5f4] sm:$0xf0] }
 0x55a   :  { %v3591_v48 = vadd.f32 %v3590_v59, %v3502_v8  ;;  %4444 = vmatpush.bf16.msrb.mxu3 %v8034_v57 }
 0x55b   :  { %v10624_v0 = vadd.f32 %v3766_v40, %v3678_v24 }
 0x55d   :  { %13310 = vst [vmem:[#allocation206_spill] sm:$0xff] %v10624_v0  ;;  %4184 = vmatpush.bf16.msra.mxu0 %v7042_v55 }
 0x560   :  { %v3679_v17 = vpop.f32.mrf.mxu2  ;;  %v10628_v50 = vpop.f32.mrf.mxu0 }
 0x561   :  { %v3768_v7 = vpop.f32.mrf.mxu3  ;;  %v3680_v12 = vadd.f32 %v3679_v17, %v3591_v48  ;;  %v3593_v31 = vpop.f32.mrf.mxu1  ;;  %v7778_v17 = vor.u32 %v8582_v62, %v7777_v49  ;;  %v3510_v49 = vadd.f32 %v10355_v42, %v10516_v61  ;;  %v3512_v42 = vadd.f32 %v10367_v63, %v10516_v61 }
 0x562   :  { %v3594_v8 = vadd.f32 %v3593_v31, %v3505_v9  ;;  %v7521_v31 = vld [vmem:[#allocation5 + $0x3d8] sm:$0xf] }
 0x563   :  { %v10630_v40 = vadd.f32 %v3768_v7, %v3680_v12  ;;  %3899 = vmatmul.bf16.gmra.mxu0 %v9142_v30  ;;  %v3507_v7 = vadd.f32 %v10349_v16, %v10516_v61  ;;  %4355 = vmatpush.bf16.msrb.mxu2 %v7778_v17  ;;  %v7522_v0 = vor.u32 %v8518_v26, %v7521_v31 }
 0x564   :  { %3632 = vmatmul.bf16.gmra.mxu1 %v9466_v14  ;;  %v3515_v31 = vadd.f32 %v10373_v56, %v10516_v61  ;;  %v7745_v56 = vld [vmem:[#allocation5 + $0x598] sm:$0xf] }
 0x565   :  { %13311 = vst [vmem:[#allocation207_spill] sm:$0xff] %v10630_v40  ;;  %3721 = vmatmul.bf16.gmra.mxu2 %v9470_v11  ;;  %4266 = vmatpush.bf16.msrb.mxu1 %v7522_v0  ;;  %v8502_v40 = vld [vmem:[#allocation5 + $0x374] sm:$0xf0] }
 0x566   :  { %3810 = vmatmul.bf16.gmra.mxu3 %v13121_v37 }
 0x568   :  { %v3682_v24 = vpop.f32.mrf.mxu2  ;;  %v10640_v9 = vpop.f32.mrf.mxu0 }
 0x569   :  { %v3771_v59 = vpop.f32.mrf.mxu3  ;;  %v3683_v48 = vadd.f32 %v3682_v24, %v3594_v8  ;;  %v3595_v58 = vpop.f32.mrf.mxu1 }
 0x56a   :  { %v3596_v55 = vadd.f32 %v3595_v58, %v3507_v7 }
 0x56b   :  { %v10642_v12 = vadd.f32 %v3771_v59, %v3683_v48 }
 0x56d   :  { %13312 = vst [vmem:[#allocation208_spill] sm:$0xff] %v10642_v12  ;;  %v8510_v12 = vld [vmem:[#allocation5 + $0x3b4] sm:$0xf0] }
 0x570   :  { %v3684_v62 = vpop.f32.mrf.mxu2  ;;  %v10646_v17 = vpop.f32.mrf.mxu0 }
 0x571   :  { %v3773_v16 = vpop.f32.mrf.mxu3  ;;  %v3685_v32 = vadd.f32 %v3684_v62, %v3596_v55  ;;  %v3598_v19 = vpop.f32.mrf.mxu1 }
 0x572   :  { %v3599_v8 = vadd.f32 %v3598_v19, %v3510_v49 }
 0x573   :  { %v10648_v24 = vadd.f32 %v3773_v16, %v3685_v32  ;;  %3904 = vmatmul.bf16.gmra.mxu0 %v9154_v60 }
 0x574   :  { %3637 = vmatmul.bf16.gmra.mxu1 %v9488_v13 }
 0x575   :  { %13313 = vst [vmem:[#allocation209_spill] sm:$0xff] %v10648_v24  ;;  %3726 = vmatmul.bf16.gmra.mxu2 %v9492_v39 }
 0x576   :  { %3815 = vmatmul.bf16.gmra.mxu3 %v9494_v51 }
 0x578   :  { %v3687_v0 = vpop.f32.mrf.mxu2  ;;  %v10658_v48 = vpop.f32.mrf.mxu0 }
 0x579   :  { %v3776_v57 = vpop.f32.mrf.mxu3  ;;  %v3688_v7 = vadd.f32 %v3687_v0, %v3599_v8  ;;  %v3600_v59 = vpop.f32.mrf.mxu1  ;;  %v8001_v0 = vld [vmem:[#allocation5 + $0x798] sm:$0xf] }
 0x57a   :  { %v3601_v58 = vadd.f32 %v3600_v59, %v3512_v42  ;;  %v8574_v42 = vld [vmem:[#allocation5 + $0x5b4] sm:$0xf0] }
 0x57b   :  { %v10660_v55 = vadd.f32 %v3776_v57, %v3688_v7  ;;  %v7746_v57 = vor.u32 %v8574_v42, %v7745_v56  ;;  %v8638_v7 = vld [vmem:[#allocation5 + $0x7b4] sm:$0xf0]  ;;  %v3520_v56 = vadd.f32 %v10391_v20, %v10516_v61  ;;  %v3522_v20 = vadd.f32 %v10403_v1, %v10516_v61 }
 0x57c   :  { %v8002_v59 = vor.u32 %v8638_v7, %v8001_v0 }
 0x57d   :  { %13314 = vst [vmem:[#allocation210_spill] sm:$0xff] %v10660_v55  ;;  %4356 = vmatpush.bf16.msrb.mxu2 %v7746_v57 }
 0x57e   :  { %4445 = vmatpush.bf16.msrb.mxu3 %v8002_v59 }
 0x580   :  { %v3689_v49 = vpop.f32.mrf.mxu2  ;;  %v10664_v19 = vpop.f32.mrf.mxu0 }
 0x581   :  { %v3778_v62 = vpop.f32.mrf.mxu3  ;;  %v3690_v16 = vadd.f32 %v3689_v49, %v3601_v58  ;;  %v3603_v32 = vpop.f32.mrf.mxu1  ;;  %v3517_v58 = vadd.f32 %v10385_v18, %v10516_v61 }
 0x582   :  { %v3604_v26 = vadd.f32 %v3603_v32, %v3515_v31 }
 0x583   :  { %v10666_v63 = vadd.f32 %v3778_v62, %v3690_v16  ;;  %4185 = vmatmul.bf16.vlgmr.msra.gmra.mxu0 %v9112_v41 }
 0x584   :  { %3918 = vmatmul.bf16.vlgmr.msra.gmra.mxu1 %v9160_v3 }
 0x585   :  { %13315 = vst [vmem:[#allocation211_spill] sm:$0xff] %v10666_v63  ;;  %4007 = vmatmul.bf16.vlgmr.msra.gmra.mxu2 %v9162_v4  ;;  %v7489_v63 = vld [vmem:[#allocation5 + $0x398] sm:$0xf] }
 0x586   :  { %4096 = vmatmul.bf16.vlgmr.msra.gmra.mxu3 %v9164_v5  ;;  %v7490_v24 = vor.u32 %v8510_v12, %v7489_v63 }
 0x588   :  { %v3692_v31 = vpop.f32.mrf.mxu2  ;;  %v10676_v32 = vpop.f32.mrf.mxu0  ;;  %4267 = vmatpush.bf16.msrb.mxu1 %v7490_v24 }
 0x589   :  { %v3781_v49 = vpop.f32.mrf.mxu3  ;;  %v3693_v62 = vadd.f32 %v3692_v31, %v3604_v26  ;;  %v3605_v16 = vpop.f32.mrf.mxu1 }
 0x58a   :  { %v3606_v8 = vadd.f32 %v3605_v16, %v3517_v58  ;;  %v3525_v16 = vadd.f32 %v10409_v33, %v10516_v61  ;;  %v7713_v33 = vld [vmem:[#allocation5 + $0x558] sm:$0xf] }
 0x58b   :  { %v10678_v55 = vadd.f32 %v3781_v49, %v3693_v62 }
 0x58d   :  { %13316 = vst [vmem:[#allocation212_spill] sm:$0xff] %v10678_v55 }
 0x590   :  { %v3694_v42 = vpop.f32.mrf.mxu2  ;;  %v10682_v57 = vpop.f32.mrf.mxu0 }
 0x591   :  { %v3783_v18 = vpop.f32.mrf.mxu3  ;;  %v3695_v0 = vadd.f32 %v3694_v42, %v3606_v8  ;;  %v3608_v7 = vpop.f32.mrf.mxu1 }
 0x592   :  { %v3609_v26 = vadd.f32 %v3608_v7, %v3520_v56 }
 0x593   :  { %v10684_v31 = vadd.f32 %v3783_v18, %v3695_v0  ;;  %4190 = vmatmul.bf16.gmra.mxu0 %v9124_v36 }
 0x594   :  { %3923 = vmatmul.bf16.gmra.mxu1 %v9170_v21 }
 0x595   :  { %13317 = vst [vmem:[#allocation213_spill] sm:$0xff] %v10684_v31  ;;  %4012 = vmatmul.bf16.gmra.mxu2 %v9172_v22 }
 0x596   :  { %4101 = vmatmul.bf16.gmra.mxu3 %v9174_v23 }
 0x598   :  { %v3697_v24 = vpop.f32.mrf.mxu2  ;;  %v10694_v58 = vpop.f32.mrf.mxu0 }
 0x599   :  { %v3786_v63 = vpop.f32.mrf.mxu3  ;;  %v3698_v8 = vadd.f32 %v3697_v24, %v3609_v26  ;;  %v3610_v59 = vpop.f32.mrf.mxu1  ;;  %v13321_v24 = vld [vmem:[#allocation27_spill] sm:$0xff] }
 0x59a   :  { %v3611_v49 = vadd.f32 %v3610_v59, %v3522_v20  ;;  %v13320_v20 = vld [vmem:[#allocation26_spill] sm:$0xff] }
 0x59b   :  { %v10696_v62 = vadd.f32 %v3786_v63, %v3698_v8  ;;  %v8566_v63 = vld [vmem:[#allocation5 + $0x574] sm:$0xf0] }
 0x59c   :  { %v7969_v8 = vld [vmem:[#allocation5 + $0x758] sm:$0xf]  ;;  %v7714_v59 = vor.u32 %v8566_v63, %v7713_v33 }
 0x59d   :  { %13318 = vst [vmem:[#allocation214_spill] sm:$0xff] %v10696_v62  ;;  %v13323_v33 = vld [vmem:[#allocation126_spill] sm:$0xff] }
 0x59e   :  { %4357 = vmatpush.bf16.msrb.mxu2 %v7714_v59  ;;  %v3530_v63 = vadd.f32 %v13323_v33, %v10516_v61 }
 0x5a0   :  { %v3699_v56 = vpop.f32.mrf.mxu2  ;;  %v10700_v7 = vpop.f32.mrf.mxu0 }
 0x5a1   :  { %v3788_v42 = vpop.f32.mrf.mxu3  ;;  %v3700_v18 = vadd.f32 %v3699_v56, %v3611_v49  ;;  %v3613_v0 = vpop.f32.mrf.mxu1  ;;  %v8630_v49 = vld [vmem:[#allocation5 + $0x774] sm:$0xf0] }
 0x5a2   :  { %v3614_v12 = vadd.f32 %v3613_v0, %v3525_v16  ;;  %v7970_v56 = vor.u32 %v8630_v49, %v7969_v8  ;;  %v3527_v16 = vadd.f32 %v10421_v28, %v10516_v61 }
 0x5a3   :  { %v10702_v1 = vadd.f32 %v3788_v42, %v3700_v18  ;;  %4195 = vmatmul.bf16.gmra.mxu0 %v9136_v27 }
 0x5a4   :  { %3928 = vmatmul.bf16.gmra.mxu1 %v9180_v34  ;;  %4446 = vmatpush.bf16.msrb.mxu3 %v7970_v56  ;;  %v13326_v56 = vld [vmem:[#allocation28_spill] sm:$0xff] }
 0x5a5   :  { %13319 = vst [vmem:[#allocation215_spill] sm:$0xff] %v10702_v1  ;;  %4017 = vmatmul.bf16.gmra.mxu2 %v13320_v20  ;;  %v7457_v1 = vld [vmem:[#allocation5 + $0x358] sm:$0xf] }
 0x5a6   :  { %4106 = vmatmul.bf16.gmra.mxu3 %v13321_v24  ;;  %v7458_v24 = vor.u32 %v8502_v40, %v7457_v1  ;;  %v13328_v1 = vld [vmem:[#allocation29_spill] sm:$0xff] }
 0x5a8   :  { %v3702_v42 = vpop.f32.mrf.mxu2  ;;  %v10712_v31 = vpop.f32.mrf.mxu0  ;;  %4268 = vmatpush.bf16.msrb.mxu1 %v7458_v24  ;;  %v13329_v24 = vld [vmem:[#allocation30_spill] sm:$0xff] }
 0x5a9   :  { %v3791_v18 = vpop.f32.mrf.mxu3  ;;  %v3703_v0 = vadd.f32 %v3702_v42, %v3614_v12  ;;  %v3615_v55 = vpop.f32.mrf.mxu1 }
 0x5aa   :  { %v3616_v26 = vadd.f32 %v3615_v55, %v3527_v16  ;;  %v13327_v55 = vld [vmem:[#allocation23_spill] sm:$0xff] }
 0x5ab   :  { %v10714_v62 = vadd.f32 %v3791_v18, %v3703_v0  ;;  %v13330_v16 = vld [vmem:[#allocation95_spill] sm:$0xff] }
 0x5ad   :  { %13322 = vst [vmem:[#allocation216_spill] sm:$0xff] %v10714_v62 }
 0x5b0   :  { %v3704_v8 = vpop.f32.mrf.mxu2  ;;  %v10718_v59 = vpop.f32.mrf.mxu0 }
 0x5b1   :  { %v3793_v28 = vpop.f32.mrf.mxu3  ;;  %v3705_v49 = vadd.f32 %v3704_v8, %v3616_v26  ;;  %v3618_v20 = vpop.f32.mrf.mxu1  ;;  %13324 = vst [vmem:[#allocation126_spill] sm:$0xff] %v10718_v59  ;;  %v3532_v26 = vadd.f32 %v13330_v16, %v10516_v61  ;;  %v13335_v59 = vld [vmem:[#allocation31_spill] sm:$0xff] }
 0x5b2   :  { %v3619_v12 = vadd.f32 %v3618_v20, %v3530_v63 }
 0x5b3   :  { %v10720_v42 = vadd.f32 %v3793_v28, %v3705_v49  ;;  %4200 = vmatmul.bf16.gmra.mxu0 %v13327_v55  ;;  %v13332_v49 = vld [vmem:[#allocation96_spill] sm:$0xff] }
 0x5b4   :  { %3933 = vmatmul.bf16.gmra.mxu1 %v13326_v56  ;;  %v3535_v55 = vadd.f32 %v13332_v49, %v10516_v61  ;;  %v8622_v49 = vld [vmem:[#allocation5 + $0x734] sm:$0xf0] }
 0x5b5   :  { %13325 = vst [vmem:[#allocation217_spill] sm:$0xff] %v10720_v42  ;;  %4022 = vmatmul.bf16.gmra.mxu2 %v13328_v1 }
 0x5b6   :  { %4111 = vmatmul.bf16.gmra.mxu3 %v13329_v24 }
 0x5b8   :  { %v3707_v18 = vpop.f32.mrf.mxu2  ;;  %v10730_v63 = vpop.f32.mrf.mxu0 }
 0x5b9   :  { %v3796_v0 = vpop.f32.mrf.mxu3  ;;  %v3708_v33 = vadd.f32 %v3707_v18, %v3619_v12  ;;  %v3620_v20 = vpop.f32.mrf.mxu1  ;;  %v13336_v12 = vld [vmem:[#allocation16_spill] sm:$0xff] }
 0x5ba   :  { %v3621_v8 = vadd.f32 %v3620_v20, %v3532_v26  ;;  %v13337_v18 = vld [vmem:[#allocation32_spill] sm:$0xff]  ;;  %v8558_v20 = vld [vmem:[#allocation5 + $0x534] sm:$0xf0] }
 0x5bb   :  { %v10732_v28 = vadd.f32 %v3796_v0, %v3708_v33  ;;  %v13338_v0 = vld [vmem:[#allocation33_spill] sm:$0xff]  ;;  %v7681_v33 = vld [vmem:[#allocation5 + $0x518] sm:$0xf] }
 0x5bd   :  { %13331 = vst [vmem:[#allocation95_spill] sm:$0xff] %v10732_v28 }
 0x5c0   :  { %v3709_v40 = vpop.f32.mrf.mxu2  ;;  %v10736_v24 = vpop.f32.mrf.mxu0 }
 0x5c1   :  { %v3798_v62 = vpop.f32.mrf.mxu3  ;;  %v3710_v42 = vadd.f32 %v3709_v40, %v3621_v8  ;;  %v3623_v1 = vpop.f32.mrf.mxu1  ;;  %13333 = vst [vmem:[#allocation96_spill] sm:$0xff] %v10736_v24  ;;  %v7937_v40 = vld [vmem:[#allocation5 + $0x718] sm:$0xf]  ;;  %v7682_v8 = vor.u32 %v8558_v20, %v7681_v33  ;;  %v3540_v33 = vadd.f32 %v10463_v6, %v10516_v61  ;;  %v3542_v6 = vadd.f32 %v10475_v10, %v10516_v61 }
 0x5c2   :  { %v3624_v56 = vadd.f32 %v3623_v1, %v3535_v55  ;;  %v7938_v24 = vor.u32 %v8622_v49, %v7937_v40 }
 0x5c3   :  { %v10738_v16 = vadd.f32 %v3798_v62, %v3710_v42  ;;  %4205 = vmatmul.bf16.gmra.mxu0 %v13336_v12  ;;  %v3537_v62 = vadd.f32 %v10457_v2, %v10516_v61  ;;  %4358 = vmatpush.bf16.msrb.mxu2 %v7682_v8 }
 0x5c4   :  { %3938 = vmatmul.bf16.gmra.mxu1 %v13335_v59  ;;  %4447 = vmatpush.bf16.msrb.mxu3 %v7938_v24  ;;  %v13341_v24 = vld [vmem:[#allocation35_spill] sm:$0xff] }
 0x5c5   :  { %13334 = vst [vmem:[#allocation218_spill] sm:$0xff] %v10738_v16  ;;  %4027 = vmatmul.bf16.gmra.mxu2 %v13337_v18  ;;  %v7425_v16 = vld [vmem:[#allocation5 + $0x318] sm:$0xf] }
 0x5c6   :  { %4116 = vmatmul.bf16.gmra.mxu3 %v13338_v0  ;;  %v8494_v0 = vld [vmem:[#allocation5 + $0x334] sm:$0xf0] }
 0x5c7   :  { %v7426_v18 = vor.u32 %v8494_v0, %v7425_v16  ;;  %v13344_v0 = vld [vmem:[#allocation38_spill] sm:$0xff] }
 0x5c8   :  { %v3712_v42 = vpop.f32.mrf.mxu2  ;;  %v10748_v59 = vpop.f32.mrf.mxu0 }
 0x5c9   :  { %v3801_v55 = vpop.f32.mrf.mxu3  ;;  %v3713_v1 = vadd.f32 %v3712_v42, %v3624_v56  ;;  %v3625_v12 = vpop.f32.mrf.mxu1  ;;  %4269 = vmatpush.bf16.msrb.mxu1 %v7426_v18  ;;  %v13343_v18 = vld [vmem:[#allocation37_spill] sm:$0xff] }
 0x5ca   :  { %v3626_v26 = vadd.f32 %v3625_v12, %v3537_v62  ;;  %v13342_v12 = vld [vmem:[#allocation19_spill] sm:$0xff] }
 0x5cb   :  { %v10750_v28 = vadd.f32 %v3801_v55, %v3713_v1 }
 0x5cd   :  { %13339 = vst [vmem:[#allocation219_spill] sm:$0xff] %v10750_v28 }
 0x5d0   :  { %v3714_v20 = vpop.f32.mrf.mxu2  ;;  %v10754_v8 = vpop.f32.mrf.mxu0 }
 0x5d1   :  { %v3803_v2 = vpop.f32.mrf.mxu3  ;;  %v3715_v40 = vadd.f32 %v3714_v20, %v3626_v26  ;;  %v3628_v49 = vpop.f32.mrf.mxu1 }
 0x5d2   :  { %v3629_v56 = vadd.f32 %v3628_v49, %v3540_v33 }
 0x5d3   :  { %v10756_v42 = vadd.f32 %v3803_v2, %v3715_v40  ;;  %4210 = vmatmul.bf16.gmra.mxu0 %v13342_v12  ;;  %v13346_v40 = vld [vmem:[#allocation100_spill] sm:$0xff] }
 0x5d4   :  { %3943 = vmatmul.bf16.gmra.mxu1 %v13341_v24  ;;  %v3545_v49 = vadd.f32 %v13346_v40, %v10516_v61  ;;  %v13349_v24 = vld [vmem:[#allocation40_spill] sm:$0xff]  ;;  %v8614_v40 = vld [vmem:[#allocation5 + $0x6f4] sm:$0xf0] }
 0x5d5   :  { %13340 = vst [vmem:[#allocation220_spill] sm:$0xff] %v10756_v42  ;;  %4032 = vmatmul.bf16.gmra.mxu2 %v13343_v18 }
 0x5d6   :  { %4121 = vmatmul.bf16.gmra.mxu3 %v13344_v0 }
 0x5d8   :  { %v3717_v26 = vpop.f32.mrf.mxu2  ;;  %v10766_v33 = vpop.f32.mrf.mxu0 }
 0x5d9   :  { %v3806_v62 = vpop.f32.mrf.mxu3  ;;  %v3718_v55 = vadd.f32 %v3717_v26, %v3629_v56  ;;  %v3630_v1 = vpop.f32.mrf.mxu1  ;;  %v13350_v56 = vld [vmem:[#allocation21_spill] sm:$0xff]  ;;  %v13351_v26 = vld [vmem:[#allocation42_spill] sm:$0xff] }
 0x5da   :  { %v3631_v20 = vadd.f32 %v3630_v1, %v3542_v6  ;;  %v8550_v1 = vld [vmem:[#allocation5 + $0x4f4] sm:$0xf0] }
 0x5db   :  { %v10768_v2 = vadd.f32 %v3806_v62, %v3718_v55  ;;  %v13352_v62 = vld [vmem:[#allocation43_spill] sm:$0xff]  ;;  %v7649_v55 = vld [vmem:[#allocation5 + $0x4d8] sm:$0xf] }
 0x5dd   :  { %13345 = vst [vmem:[#allocation221_spill] sm:$0xff] %v10768_v2 }
 0x5e0   :  { %v3719_v16 = vpop.f32.mrf.mxu2  ;;  %v10772_v0 = vpop.f32.mrf.mxu0 }
 0x5e1   :  { %v3808_v28 = vpop.f32.mrf.mxu3  ;;  %v3720_v42 = vadd.f32 %v3719_v16, %v3631_v20  ;;  %v3633_v18 = vpop.f32.mrf.mxu1  ;;  %13347 = vst [vmem:[#allocation100_spill] sm:$0xff] %v10772_v0  ;;  %v7650_v16 = vor.u32 %v8550_v1, %v7649_v55  ;;  %v7905_v20 = vld [vmem:[#allocation5 + $0x6d8] sm:$0xf]  ;;  %v3550_v1 = vadd.f32 %v10499_v52, %v10516_v61  ;;  %v8450_v52 = vld [vmem:[#allocation5 + $0x1dc] sm:$0xf] }
 0x5e2   :  { %v3634_v12 = vadd.f32 %v3633_v18, %v3545_v49  ;;  %v7906_v0 = vor.u32 %v8614_v40, %v7905_v20 }
 0x5e3   :  { %v10774_v10 = vadd.f32 %v3808_v28, %v3720_v42  ;;  %4215 = vmatmul.bf16.gmra.mxu0 %v13350_v56  ;;  %v3547_v28 = vadd.f32 %v10493_v54, %v10516_v61  ;;  %4359 = vmatpush.bf16.msrb.mxu2 %v7650_v16 }
 0x5e4   :  { %3948 = vmatmul.bf16.gmra.mxu1 %v13349_v24  ;;  %4448 = vmatpush.bf16.msrb.mxu3 %v7906_v0  ;;  %v13355_v0 = vld [vmem:[#allocation45_spill] sm:$0xff] }
 0x5e5   :  { %13348 = vst [vmem:[#allocation222_spill] sm:$0xff] %v10774_v10  ;;  %4037 = vmatmul.bf16.gmra.mxu2 %v13351_v26  ;;  %v7393_v10 = vld [vmem:[#allocation5 + $0x2d8] sm:$0xf] }
 0x5e6   :  { %4126 = vmatmul.bf16.gmra.mxu3 %v13352_v62  ;;  %v8486_v62 = vld [vmem:[#allocation5 + $0x2f4] sm:$0xf0] }
 0x5e7   :  { %v7394_v55 = vor.u32 %v8486_v62, %v7393_v10  ;;  %v13357_v62 = vld [vmem:[#allocation47_spill] sm:$0xff] }
 0x5e8   :  { %v3722_v42 = vpop.f32.mrf.mxu2  ;;  %v10784_v24 = vpop.f32.mrf.mxu0  ;;  %v10806_v10 = vld [vmem:[#allocation7] sm:$0xff] }
 0x5e9   :  { %v3811_v18 = vpop.f32.mrf.mxu3  ;;  %v3723_v49 = vadd.f32 %v3722_v42, %v3634_v12  ;;  %v3635_v56 = vpop.f32.mrf.mxu1  ;;  %4270 = vmatpush.bf16.msrb.mxu1 %v7394_v55  ;;  %13362 = vst [vmem:[#allocation226_spill] sm:$0xff] %v10806_v10 }
 0x5ea   :  { %v3636_v6 = vadd.f32 %v3635_v56, %v3547_v28  ;;  %v13356_v56 = vld [vmem:[#allocation24_spill] sm:$0xff] }
 0x5eb   :  { %v10786_v2 = vadd.f32 %v3811_v18, %v3723_v49  ;;  %v13358_v28 = vld [vmem:[#allocation48_spill] sm:$0xff]  ;;  %v7267_v18 = vld [vmem:[#allocation5 + $0x1f8] sm:$0xf0]  ;;  %v13359_v49 = vld [vmem:[#allocation103_spill] sm:$0xff] }
 0x5ec   :  { %v3552_v55 = vadd.f32 %v13359_v49, %v10516_v61 }
 0x5ed   :  { %13353 = vst [vmem:[#allocation223_spill] sm:$0xff] %v10786_v2  ;;  %v10809_v2 = vperm.slane %v10806_v10, 5  ;;  %v13369_v10 = vld [vmem:[#allocation55_spill] sm:$0xff] }
 0x5f0   :  { %v3724_v20 = vpop.f32.mrf.mxu2  ;;  %v10790_v16 = vpop.f32.mrf.mxu0 }
 0x5f1   :  { %v3813_v54 = vpop.f32.mrf.mxu3  ;;  %v3725_v40 = vadd.f32 %v3724_v20, %v3636_v6  ;;  %v3638_v26 = vpop.f32.mrf.mxu1  ;;  %v7270_v6 = vor.u32 %v8450_v52, %v7267_v18  ;;  %v13363_v52 = vld [vmem:[#allocation164_spill] sm:$0xff] }
 0x5f2   :  { %v3639_v12 = vadd.f32 %v3638_v26, %v3550_v1  ;;  %v3831_v18 = vadd.f32 %v13363_v52, %v10809_v2  ;;  %v7617_v52 = vld [vmem:[#allocation5 + $0x498] sm:$0xf] }
 0x5f3   :  { %v10792_v42 = vadd.f32 %v3813_v54, %v3725_v40  ;;  %4220 = vmatmul.bf16.gmra.mxu0 %v13356_v56 }
 0x5f4   :  { %3953 = vmatmul.bf16.gmra.mxu1 %v13355_v0  ;;  %4533 = vmatpush.bf16.msrb.mxu0 %v7270_v6 }
 0x5f5   :  { %13354 = vst [vmem:[#allocation224_spill] sm:$0xff] %v10792_v42  ;;  %4042 = vmatmul.bf16.gmra.mxu2 %v13357_v62  ;;  %v8606_v62 = vld [vmem:[#allocation5 + $0x6b4] sm:$0xf0] }
 0x5f6   :  { %4131 = vmatmul.bf16.gmra.mxu3 %v13358_v28 }
 0x5f8   :  { %v3727_v26 = vpop.f32.mrf.mxu2  ;;  %v10802_v40 = vpop.f32.mrf.mxu0 }
 0x5f9   :  { %v3816_v1 = vpop.f32.mrf.mxu3  ;;  %v3728_v20 = vadd.f32 %v3727_v26, %v3639_v12  ;;  %v3640_v54 = vpop.f32.mrf.mxu1  ;;  %13360 = vst [vmem:[#allocation103_spill] sm:$0xff] %v10802_v40  ;;  %v8542_v40 = vld [vmem:[#allocation5 + $0x4b4] sm:$0xf0] }
 0x5fa   :  { %v3641_v56 = vadd.f32 %v3640_v54, %v3552_v55  ;;  %v13366_v55 = vld [vmem:[#allocation50_spill] sm:$0xff] }
 0x5fb   :  { %v10804_v0 = vadd.f32 %v3816_v1, %v3728_v20  ;;  %v13367_v1 = vld [vmem:[#allocation17_spill] sm:$0xff]  ;;  %v13368_v54 = vld [vmem:[#allocation54_spill] sm:$0xff] }
 0x5fd   :  { %13361 = vst [vmem:[#allocation225_spill] sm:$0xff] %v10804_v0 }
 0x600   :  { %v3729_v42 = vpop.f32.mrf.mxu2  ;;  %v10813_v6 = vpop.f32.mrf.mxu0 }
 0x601   :  { %v3818_v61 = vpop.f32.mrf.mxu3  ;;  %v3730_v49 = vadd.f32 %v3729_v42, %v3641_v56  ;;  %v3919_v28 = vpop.f32.mrf.mxu1  ;;  %13364 = vst [vmem:[#allocation164_spill] sm:$0xff] %v10813_v6  ;;  %v7873_v42 = vld [vmem:[#allocation5 + $0x698] sm:$0xf]  ;;  %v7618_v56 = vor.u32 %v8542_v40, %v7617_v52 }
 0x602   :  { %v3920_v12 = vadd.f32 %v3919_v28, %v3831_v18  ;;  %v7874_v6 = vor.u32 %v8606_v62, %v7873_v42  ;;  %v3833_v28 = vadd.f32 %v10532_v47, %v10809_v2  ;;  %v3836_v62 = vadd.f32 %v10538_v44, %v10809_v2  ;;  %v8442_v44 = vld [vmem:[#allocation5 + $0x19c] sm:$0xf] }
 0x603   :  { %v10815_v26 = vadd.f32 %v3818_v61, %v3730_v49  ;;  %4225 = vmatmul.bf16.gmra.mxu0 %v13367_v1  ;;  %4360 = vmatpush.bf16.msrb.mxu2 %v7618_v56 }
 0x604   :  { %3958 = vmatmul.bf16.gmra.mxu1 %v13366_v55  ;;  %4449 = vmatpush.bf16.msrb.mxu3 %v7874_v6  ;;  %v13372_v6 = vld [vmem:[#allocation58_spill] sm:$0xff] }
 0x605   :  { %13365 = vst [vmem:[#allocation227_spill] sm:$0xff] %v10815_v26  ;;  %4047 = vmatmul.bf16.gmra.mxu2 %v13368_v54  ;;  %v7361_v26 = vld [vmem:[#allocation5 + $0x298] sm:$0xf] }
 0x606   :  { %4136 = vmatmul.bf16.gmra.mxu3 %v13369_v10  ;;  %v8478_v10 = vld [vmem:[#allocation5 + $0x2b4] sm:$0xf0] }
 0x607   :  { %v7362_v54 = vor.u32 %v8478_v10, %v7361_v26  ;;  %v7235_v26 = vld [vmem:[#allocation5 + $0x1b8] sm:$0xf0] }
 0x608   :  { %v4008_v18 = vpop.f32.mrf.mxu2  ;;  %v10825_v55 = vpop.f32.mrf.mxu0 }
 0x609   :  { %v4097_v61 = vpop.f32.mrf.mxu3  ;;  %v4009_v49 = vadd.f32 %v4008_v18, %v3920_v12  ;;  %v3921_v1 = vpop.f32.mrf.mxu1  ;;  %4271 = vmatpush.bf16.msrb.mxu1 %v7362_v54 }
 0x60a   :  { %v3922_v20 = vadd.f32 %v3921_v1, %v3833_v28  ;;  %v7238_v1 = vor.u32 %v8442_v44, %v7235_v26 }
 0x60b   :  { %v10827_v0 = vadd.f32 %v4097_v61, %v4009_v49 }
 0x60c   :  { %4534 = vmatpush.bf16.msrb.mxu0 %v7238_v1  ;;  %v13378_v1 = vld [vmem:[#allocation61_spill] sm:$0xff] }
 0x60d   :  { %13370 = vst [vmem:[#allocation228_spill] sm:$0xff] %v10827_v0 }
 0x610   :  { %v4010_v40 = vpop.f32.mrf.mxu2  ;;  %v10831_v56 = vpop.f32.mrf.mxu0 }
 0x611   :  { %v4099_v47 = vpop.f32.mrf.mxu3  ;;  %v4011_v52 = vadd.f32 %v4010_v40, %v3922_v20  ;;  %v3924_v42 = vpop.f32.mrf.mxu1  ;;  %v3838_v20 = vadd.f32 %v10550_v53, %v10809_v2 }
 0x612   :  { %v3925_v12 = vadd.f32 %v3924_v42, %v3836_v62 }
 0x613   :  { %v10833_v18 = vadd.f32 %v4099_v47, %v4011_v52  ;;  %4230 = vmatmul.bf16.gmra.mxu0 %v9128_v43  ;;  %v13375_v52 = vld [vmem:[#allocation108_spill] sm:$0xff] }
 0x614   :  { %3963 = vmatmul.bf16.gmra.mxu1 %v9352_v25  ;;  %v3841_v42 = vadd.f32 %v13375_v52, %v10809_v2  ;;  %v8598_v52 = vld [vmem:[#allocation5 + $0x674] sm:$0xf0] }
 0x615   :  { %13371 = vst [vmem:[#allocation229_spill] sm:$0xff] %v10833_v18  ;;  %4052 = vmatmul.bf16.gmra.mxu2 %v12995_v29 }
 0x616   :  { %4141 = vmatmul.bf16.gmra.mxu3 %v13372_v6 }
 0x618   :  { %v4013_v54 = vpop.f32.mrf.mxu2  ;;  %v10843_v62 = vpop.f32.mrf.mxu0 }
 0x619   :  { %v4102_v28 = vpop.f32.mrf.mxu3  ;;  %v4014_v61 = vadd.f32 %v4013_v54, %v3925_v12  ;;  %v3926_v49 = vpop.f32.mrf.mxu1  ;;  %13373 = vst [vmem:[#allocation230_spill] sm:$0xff] %v10843_v62  ;;  %v13379_v12 = vld [vmem:[#allocation22_spill] sm:$0xff] }
 0x61a   :  { %v3927_v40 = vadd.f32 %v3926_v49, %v3838_v20  ;;  %v13380_v54 = vld [vmem:[#allocation62_spill] sm:$0xff] }
 0x61b   :  { %v10845_v47 = vadd.f32 %v4102_v28, %v4014_v61  ;;  %v13381_v28 = vld [vmem:[#allocation63_spill] sm:$0xff]  ;;  %v7585_v61 = vld [vmem:[#allocation5 + $0x458] sm:$0xf] }
 0x61c   :  { %v8534_v49 = vld [vmem:[#allocation5 + $0x474] sm:$0xf0] }
 0x61d   :  { %13374 = vst [vmem:[#allocation231_spill] sm:$0xff] %v10845_v47 }
 0x620   :  { %v4015_v10 = vpop.f32.mrf.mxu2  ;;  %v10849_v26 = vpop.f32.mrf.mxu0 }
 0x621   :  { %v4104_v0 = vpop.f32.mrf.mxu3  ;;  %v4016_v18 = vadd.f32 %v4015_v10, %v3927_v40  ;;  %v3929_v44 = vpop.f32.mrf.mxu1  ;;  %13376 = vst [vmem:[#allocation108_spill] sm:$0xff] %v10849_v26  ;;  %v7841_v10 = vld [vmem:[#allocation5 + $0x658] sm:$0xf]  ;;  %v7586_v40 = vor.u32 %v8534_v49, %v7585_v61  ;;  %v13383_v61 = vld [vmem:[#allocation200_spill] sm:$0xff] }
 0x622   :  { %v3930_v53 = vadd.f32 %v3929_v44, %v3841_v42  ;;  %v7842_v26 = vor.u32 %v8598_v52, %v7841_v10  ;;  %v3846_v49 = vadd.f32 %v13383_v61, %v10809_v2 }
 0x623   :  { %v10851_v6 = vadd.f32 %v4104_v0, %v4016_v18  ;;  %4235 = vmatmul.bf16.gmra.mxu0 %v13379_v12  ;;  %v3843_v0 = vadd.f32 %v10568_v38, %v10809_v2  ;;  %4361 = vmatpush.bf16.msrb.mxu2 %v7586_v40 }
 0x624   :  { %3968 = vmatmul.bf16.gmra.mxu1 %v13378_v1  ;;  %4450 = vmatpush.bf16.msrb.mxu3 %v7842_v26  ;;  %v13386_v26 = vld [vmem:[#allocation66_spill] sm:$0xff] }
 0x625   :  { %13377 = vst [vmem:[#allocation232_spill] sm:$0xff] %v10851_v6  ;;  %4057 = vmatmul.bf16.gmra.mxu2 %v13380_v54  ;;  %v7329_v6 = vld [vmem:[#allocation5 + $0x258] sm:$0xf] }
 0x626   :  { %4146 = vmatmul.bf16.gmra.mxu3 %v13381_v28  ;;  %v8470_v28 = vld [vmem:[#allocation5 + $0x274] sm:$0xf0] }
 0x627   :  { %v7330_v54 = vor.u32 %v8470_v28, %v7329_v6  ;;  %v13389_v28 = vld [vmem:[#allocation68_spill] sm:$0xff]  ;;  %v13393_v6 = vld [vmem:[#allocation114_spill] sm:$0xff] }
 0x628   :  { %v4018_v18 = vpop.f32.mrf.mxu2  ;;  %v10861_v1 = vpop.f32.mrf.mxu0 }
 0x629   :  { %v4107_v42 = vpop.f32.mrf.mxu3  ;;  %v4019_v44 = vadd.f32 %v4018_v18, %v3930_v53  ;;  %v3931_v12 = vpop.f32.mrf.mxu1  ;;  %4272 = vmatpush.bf16.msrb.mxu1 %v7330_v54  ;;  %v13388_v54 = vld [vmem:[#allocation67_spill] sm:$0xff] }
 0x62a   :  { %v3932_v20 = vadd.f32 %v3931_v12, %v3843_v0  ;;  %v13387_v12 = vld [vmem:[#allocation25_spill] sm:$0xff]  ;;  %v8434_v0 = vld [vmem:[#allocation5 + $0x15c] sm:$0xf] }
 0x62b   :  { %v10863_v47 = vadd.f32 %v4107_v42, %v4019_v44  ;;  %v7203_v42 = vld [vmem:[#allocation5 + $0x178] sm:$0xf0]  ;;  %v13390_v44 = vld [vmem:[#allocation112_spill] sm:$0xff] }
 0x62c   :  { %v3848_v61 = vadd.f32 %v13390_v44, %v10809_v2 }
 0x62d   :  { %13382 = vst [vmem:[#allocation233_spill] sm:$0xff] %v10863_v47  ;;  %v3851_v47 = vadd.f32 %v13393_v6, %v10809_v2  ;;  %v7553_v6 = vld [vmem:[#allocation5 + $0x418] sm:$0xf] }
 0x630   :  { %v4020_v10 = vpop.f32.mrf.mxu2  ;;  %v10867_v40 = vpop.f32.mrf.mxu0 }
 0x631   :  { %v4109_v38 = vpop.f32.mrf.mxu3  ;;  %v4021_v52 = vadd.f32 %v4020_v10, %v3932_v20  ;;  %v3934_v62 = vpop.f32.mrf.mxu1  ;;  %13384 = vst [vmem:[#allocation200_spill] sm:$0xff] %v10867_v40  ;;  %v7206_v20 = vor.u32 %v8434_v0, %v7203_v42 }
 0x632   :  { %v3935_v53 = vadd.f32 %v3934_v62, %v3846_v49 }
 0x633   :  { %v10869_v18 = vadd.f32 %v4109_v38, %v4021_v52  ;;  %4240 = vmatmul.bf16.gmra.mxu0 %v13387_v12 }
 0x634   :  { %3973 = vmatmul.bf16.gmra.mxu1 %v13386_v26  ;;  %4535 = vmatpush.bf16.msrb.mxu0 %v7206_v20  ;;  %v13396_v20 = vld [vmem:[#allocation71_spill] sm:$0xff] }
 0x635   :  { %13385 = vst [vmem:[#allocation234_spill] sm:$0xff] %v10869_v18  ;;  %4062 = vmatmul.bf16.gmra.mxu2 %v13388_v54 }
 0x636   :  { %4151 = vmatmul.bf16.gmra.mxu3 %v13389_v28 }
 0x638   :  { %v4023_v62 = vpop.f32.mrf.mxu2  ;;  %v10879_v52 = vpop.f32.mrf.mxu0 }
 0x639   :  { %v4112_v49 = vpop.f32.mrf.mxu3  ;;  %v4024_v10 = vadd.f32 %v4023_v62, %v3935_v53  ;;  %v3936_v38 = vpop.f32.mrf.mxu1  ;;  %13391 = vst [vmem:[#allocation112_spill] sm:$0xff] %v10879_v52  ;;  %v13397_v53 = vld [vmem:[#allocation18_spill] sm:$0xff]  ;;  %v13398_v62 = vld [vmem:[#allocation72_spill] sm:$0xff] }
 0x63a   :  { %v3937_v12 = vadd.f32 %v3936_v38, %v3848_v61  ;;  %v8590_v38 = vld [vmem:[#allocation5 + $0x634] sm:$0xf0] }
 0x63b   :  { %v10881_v26 = vadd.f32 %v4112_v49, %v4024_v10  ;;  %v13399_v49 = vld [vmem:[#allocation73_spill] sm:$0xff]  ;;  %v8526_v10 = vld [vmem:[#allocation5 + $0x434] sm:$0xf0] }
 0x63d   :  { %13392 = vst [vmem:[#allocation235_spill] sm:$0xff] %v10881_v26 }
 0x640   :  { %v4025_v18 = vpop.f32.mrf.mxu2  ;;  %v10885_v42 = vpop.f32.mrf.mxu0 }
 0x641   :  { %v4114_v28 = vpop.f32.mrf.mxu3  ;;  %v4026_v54 = vadd.f32 %v4025_v18, %v3937_v12  ;;  %v3939_v0 = vpop.f32.mrf.mxu1  ;;  %13394 = vst [vmem:[#allocation114_spill] sm:$0xff] %v10885_v42  ;;  %v7809_v18 = vld [vmem:[#allocation5 + $0x618] sm:$0xf]  ;;  %v7554_v12 = vor.u32 %v8526_v10, %v7553_v6  ;;  %v8426_v6 = vld [vmem:[#allocation5 + $0x11c] sm:$0xf] }
 0x642   :  { %v3940_v44 = vadd.f32 %v3939_v0, %v3851_v47  ;;  %v7810_v42 = vor.u32 %v8590_v38, %v7809_v18  ;;  %v3853_v47 = vadd.f32 %v10604_v15, %v10809_v2  ;;  %v7171_v10 = vld [vmem:[#allocation5 + $0x138] sm:$0xf0]  ;;  %v3856_v15 = vadd.f32 %v10610_v46, %v10809_v2 }
 0x643   :  { %v10887_v40 = vadd.f32 %v4114_v28, %v4026_v54  ;;  %4245 = vmatmul.bf16.gmra.mxu0 %v13397_v53  ;;  %4362 = vmatpush.bf16.msrb.mxu2 %v7554_v12  ;;  %v7174_v12 = vor.u32 %v8426_v6, %v7171_v10  ;;  %v7107_v6 = vld [vmem:[#allocation5 + $0xb8] sm:$0xf0]  ;;  %v3858_v10 = vadd.f32 %v10622_v35, %v10809_v2 }
 0x644   :  { %3978 = vmatmul.bf16.gmra.mxu1 %v13396_v20  ;;  %4451 = vmatpush.bf16.msrb.mxu3 %v7810_v42  ;;  %v8402_v46 = vld [vmem:[#allocation5 + $0x5c] sm:$0xf]  ;;  %v3861_v35 = vadd.f32 %v10628_v50, %v10809_v2 }
 0x645   :  { %13395 = vst [vmem:[#allocation236_spill] sm:$0xff] %v10887_v40  ;;  %4067 = vmatmul.bf16.gmra.mxu2 %v13398_v62  ;;  %v7297_v40 = vld [vmem:[#allocation5 + $0x218] sm:$0xf]  ;;  %4536 = vmatpush.bf16.msrb.mxu0 %v7174_v12  ;;  %v8578_v50 = vld [vmem:[#allocation5 + $0x5dc] sm:$0xf] }
 0x646   :  { %4156 = vmatmul.bf16.gmra.mxu3 %v13399_v49  ;;  %v8462_v49 = vld [vmem:[#allocation5 + $0x234] sm:$0xf0] }
 0x647   :  { %v7298_v62 = vor.u32 %v8462_v49, %v7297_v40  ;;  %v13402_v40 = vld [vmem:[#allocation20_spill] sm:$0xff]  ;;  %v13403_v49 = vld [vmem:[#allocation77_spill] sm:$0xff] }
 0x648   :  { %v4028_v54 = vpop.f32.mrf.mxu2  ;;  %v10897_v20 = vpop.f32.mrf.mxu0 }
 0x649   :  { %v4117_v28 = vpop.f32.mrf.mxu3  ;;  %v4029_v0 = vadd.f32 %v4028_v54, %v3940_v44  ;;  %v3941_v53 = vpop.f32.mrf.mxu1  ;;  %4273 = vmatpush.bf16.msrb.mxu1 %v7298_v62 }
 0x64a   :  { %v3942_v61 = vadd.f32 %v3941_v53, %v3853_v47  ;;  %v8418_v47 = vld [vmem:[#allocation5 + $0xdc] sm:$0xf] }
 0x64b   :  { %v10899_v26 = vadd.f32 %v4117_v28, %v4029_v0  ;;  %v7139_v28 = vld [vmem:[#allocation5 + $0xf8] sm:$0xf0] }
 0x64c   :  { %v7142_v62 = vor.u32 %v8418_v47, %v7139_v28  ;;  %v8410_v0 = vld [vmem:[#allocation5 + $0x9c] sm:$0xf] }
 0x64d   :  { %13400 = vst [vmem:[#allocation237_spill] sm:$0xff] %v10899_v26  ;;  %v7075_v26 = vld [vmem:[#allocation5 + $0x78] sm:$0xf0] }
 0x64e   :  { %4537 = vmatpush.bf16.msrb.mxu0 %v7142_v62  ;;  %v8394_v62 = vld [vmem:[#allocation5 + $0x1c] sm:$0xf] }
 0x650   :  { %v4030_v18 = vpop.f32.mrf.mxu2  ;;  %v10903_v52 = vpop.f32.mrf.mxu0 }
 0x651   :  { %v4119_v38 = vpop.f32.mrf.mxu3  ;;  %v4031_v44 = vadd.f32 %v4030_v18, %v3942_v61  ;;  %v3944_v54 = vpop.f32.mrf.mxu1  ;;  %v13404_v61 = vld [vmem:[#allocation78_spill] sm:$0xff] }
 0x652   :  { %v3945_v42 = vadd.f32 %v3944_v54, %v3856_v15 }
 0x653   :  { %v10905_v53 = vadd.f32 %v4119_v38, %v4031_v44  ;;  %4250 = vmatmul.bf16.gmra.mxu0 %v13402_v40  ;;  %v7110_v38 = vor.u32 %v8410_v0, %v7107_v6 }
 0x654   :  { %3983 = vmatmul.bf16.gmra.mxu1 %v9444_v45 }
 0x655   :  { %13401 = vst [vmem:[#allocation238_spill] sm:$0xff] %v10905_v53  ;;  %4072 = vmatmul.bf16.gmra.mxu2 %v13403_v49  ;;  %4538 = vmatpush.bf16.msrb.mxu0 %v7110_v38  ;;  %v7078_v53 = vor.u32 %v8402_v46, %v7075_v26  ;;  %v8642_v46 = vld [vmem:[#allocation5 + $0x7dc] sm:$0xf] }
 0x656   :  { %4161 = vmatmul.bf16.gmra.mxu3 %v13404_v61  ;;  %v7043_v61 = vld [vmem:[#allocation5 + $0x38] sm:$0xf0] }
 0x657   :  { %v7046_v0 = vor.u32 %v8394_v62, %v7043_v61  ;;  %v8035_v61 = vld [vmem:[#allocation5 + $0x7f8] sm:$0xf0] }
 0x658   :  { %v4033_v15 = vpop.f32.mrf.mxu2  ;;  %v10915_v54 = vpop.f32.mrf.mxu0  ;;  %v8038_v38 = vor.u32 %v8642_v46, %v8035_v61  ;;  %v7523_v26 = vld [vmem:[#allocation5 + $0x3f8] sm:$0xf0] }
 0x659   :  { %v4122_v18 = vpop.f32.mrf.mxu3  ;;  %v4034_v12 = vadd.f32 %v4033_v15, %v3945_v42  ;;  %v3946_v44 = vpop.f32.mrf.mxu1  ;;  %4539 = vmatpush.bf16.msrb.mxu0 %v7078_v53  ;;  %v7779_v53 = vld [vmem:[#allocation5 + $0x5f8] sm:$0xf0] }
 0x65a   :  { %v3947_v47 = vadd.f32 %v3946_v44, %v3858_v10  ;;  %4800 = vmatpush.bf16.msra.mxu3 %v8038_v38 }
 0x65b   :  { %v10917_v28 = vadd.f32 %v4122_v18, %v4034_v12 }
 0x65d   :  { %13405 = vst [vmem:[#allocation239_spill] sm:$0xff] %v10917_v28  ;;  %4540 = vmatpush.bf16.msrb.mxu0 %v7046_v0 }
 0x660   :  { %v4035_v49 = vpop.f32.mrf.mxu2  ;;  %v10921_v15 = vpop.f32.mrf.mxu0 }
 0x661   :  { %v4124_v40 = vpop.f32.mrf.mxu3  ;;  %v4036_v42 = vadd.f32 %v4035_v49, %v3947_v47  ;;  %v3949_v6 = vpop.f32.mrf.mxu1  ;;  %v7782_v49 = vor.u32 %v8578_v50, %v7779_v53  ;;  %v3866_v50 = vadd.f32 %v10646_v17, %v10809_v2  ;;  %v3868_v17 = vadd.f32 %v10658_v48, %v10809_v2 }
 0x662   :  { %v3950_v10 = vadd.f32 %v3949_v6, %v3861_v35  ;;  %v8514_v6 = vld [vmem:[#allocation5 + $0x3dc] sm:$0xf] }
 0x663   :  { %v10923_v18 = vadd.f32 %v4124_v40, %v4036_v42  ;;  %4255 = vmatmul.bf16.gmra.mxu0 %v9142_v30  ;;  %v3863_v40 = vadd.f32 %v10640_v9, %v10809_v2  ;;  %4711 = vmatpush.bf16.msra.mxu2 %v7782_v49  ;;  %v7526_v28 = vor.u32 %v8514_v6, %v7523_v26 }
 0x664   :  { %3988 = vmatmul.bf16.gmra.mxu1 %v9466_v14  ;;  %v3871_v6 = vadd.f32 %v10664_v19, %v10809_v2  ;;  %v8570_v19 = vld [vmem:[#allocation5 + $0x59c] sm:$0xf] }
 0x665   :  { %13406 = vst [vmem:[#allocation240_spill] sm:$0xff] %v10923_v18  ;;  %4077 = vmatmul.bf16.gmra.mxu2 %v9470_v11  ;;  %4622 = vmatpush.bf16.msra.mxu1 %v7526_v28 }
 0x666   :  { %4166 = vmatmul.bf16.gmra.mxu3 %v13121_v37 }
 0x668   :  { %v4038_v12 = vpop.f32.mrf.mxu2  ;;  %v10933_v35 = vpop.f32.mrf.mxu0 }
 0x669   :  { %v4127_v44 = vpop.f32.mrf.mxu3  ;;  %v4039_v47 = vadd.f32 %v4038_v12, %v3950_v10  ;;  %v3951_v62 = vpop.f32.mrf.mxu1 }
 0x66a   :  { %v3952_v0 = vadd.f32 %v3951_v62, %v3863_v40 }
 0x66b   :  { %v10935_v42 = vadd.f32 %v4127_v44, %v4039_v47 }
 0x66d   :  { %13407 = vst [vmem:[#allocation241_spill] sm:$0xff] %v10935_v42 }
 0x670   :  { %v4040_v53 = vpop.f32.mrf.mxu2  ;;  %v10939_v49 = vpop.f32.mrf.mxu0 }
 0x671   :  { %v4129_v9 = vpop.f32.mrf.mxu3  ;;  %v4041_v46 = vadd.f32 %v4040_v53, %v3952_v0  ;;  %v3954_v61 = vpop.f32.mrf.mxu1 }
 0x672   :  { %v3955_v10 = vadd.f32 %v3954_v61, %v3866_v50 }
 0x673   :  { %v10941_v12 = vadd.f32 %v4129_v9, %v4041_v46  ;;  %4260 = vmatmul.bf16.gmra.mxu0 %v9154_v60 }
 0x674   :  { %3993 = vmatmul.bf16.gmra.mxu1 %v9488_v13 }
 0x675   :  { %13408 = vst [vmem:[#allocation242_spill] sm:$0xff] %v10941_v12  ;;  %4082 = vmatmul.bf16.gmra.mxu2 %v9492_v39 }
 0x676   :  { %4171 = vmatmul.bf16.gmra.mxu3 %v9494_v51 }
 0x678   :  { %v4043_v28 = vpop.f32.mrf.mxu2  ;;  %v10951_v47 = vpop.f32.mrf.mxu0 }
 0x679   :  { %v4132_v38 = vpop.f32.mrf.mxu3  ;;  %v4044_v40 = vadd.f32 %v4043_v28, %v3955_v10  ;;  %v3956_v44 = vpop.f32.mrf.mxu1  ;;  %v8634_v28 = vld [vmem:[#allocation5 + $0x79c] sm:$0xf] }
 0x67a   :  { %v3957_v62 = vadd.f32 %v3956_v44, %v3868_v17  ;;  %v7747_v17 = vld [vmem:[#allocation5 + $0x5b8] sm:$0xf0] }
 0x67b   :  { %v10953_v0 = vadd.f32 %v4132_v38, %v4044_v40  ;;  %v7750_v38 = vor.u32 %v8570_v19, %v7747_v17  ;;  %v8003_v40 = vld [vmem:[#allocation5 + $0x7b8] sm:$0xf0]  ;;  %v3876_v19 = vadd.f32 %v10682_v57, %v10809_v2  ;;  %v3878_v57 = vadd.f32 %v10694_v58, %v10809_v2 }
 0x67c   :  { %v8006_v44 = vor.u32 %v8634_v28, %v8003_v40 }
 0x67d   :  { %13409 = vst [vmem:[#allocation243_spill] sm:$0xff] %v10953_v0  ;;  %4712 = vmatpush.bf16.msra.mxu2 %v7750_v38  ;;  %v8506_v0 = vld [vmem:[#allocation5 + $0x39c] sm:$0xf] }
 0x67e   :  { %4801 = vmatpush.bf16.msra.mxu3 %v8006_v44 }
 0x680   :  { %v4045_v50 = vpop.f32.mrf.mxu2  ;;  %v10957_v61 = vpop.f32.mrf.mxu0 }
 0x681   :  { %v4134_v53 = vpop.f32.mrf.mxu3  ;;  %v4046_v9 = vadd.f32 %v4045_v50, %v3957_v62  ;;  %v3959_v46 = vpop.f32.mrf.mxu1  ;;  %v3873_v62 = vadd.f32 %v10676_v32, %v10809_v2 }
 0x682   :  { %v3960_v26 = vadd.f32 %v3959_v46, %v3871_v6 }
 0x683   :  { %v10959_v48 = vadd.f32 %v4134_v53, %v4046_v9  ;;  %4541 = vmatmul.bf16.vlgmr.msrb.gmra.mxu0 %v9112_v41 }
 0x684   :  { %4274 = vmatmul.bf16.vlgmr.msrb.gmra.mxu1 %v9160_v3 }
 0x685   :  { %13410 = vst [vmem:[#allocation244_spill] sm:$0xff] %v10959_v48  ;;  %4363 = vmatmul.bf16.vlgmr.msrb.gmra.mxu2 %v9162_v4  ;;  %v7491_v48 = vld [vmem:[#allocation5 + $0x3b8] sm:$0xf0] }
 0x686   :  { %4452 = vmatmul.bf16.vlgmr.msrb.gmra.mxu3 %v9164_v5  ;;  %v7494_v42 = vor.u32 %v8506_v0, %v7491_v48 }
 0x688   :  { %v4048_v6 = vpop.f32.mrf.mxu2  ;;  %v10969_v9 = vpop.f32.mrf.mxu0  ;;  %4623 = vmatpush.bf16.msra.mxu1 %v7494_v42 }
 0x689   :  { %v4137_v50 = vpop.f32.mrf.mxu3  ;;  %v4049_v41 = vadd.f32 %v4048_v6, %v3960_v26  ;;  %v3961_v53 = vpop.f32.mrf.mxu1 }
 0x68a   :  { %v3962_v46 = vadd.f32 %v3961_v53, %v3873_v62 }
 0x68b   :  { %v10971_v10 = vadd.f32 %v4137_v50, %v4049_v41 }
 0x68d   :  { %13411 = vst [vmem:[#allocation245_spill] sm:$0xff] %v10971_v10  ;;  %v7459_v10 = vld [vmem:[#allocation5 + $0x378] sm:$0xf0] }
 0x690   :  { %v4050_v17 = vpop.f32.mrf.mxu2  ;;  %v10975_v38 = vpop.f32.mrf.mxu0 }
 0x691   :  { %v4139_v32 = vpop.f32.mrf.mxu3  ;;  %v4051_v28 = vadd.f32 %v4050_v17, %v3962_v46  ;;  %v3964_v40 = vpop.f32.mrf.mxu1 }
 0x692   :  { %v3965_v26 = vadd.f32 %v3964_v40, %v3876_v19 }
 0x693   :  { %v10977_v6 = vadd.f32 %v4139_v32, %v4051_v28  ;;  %4546 = vmatmul.bf16.gmra.mxu0 %v9124_v36  ;;  %v3881_v36 = vadd.f32 %v10700_v7, %v10809_v2  ;;  %v8562_v7 = vld [vmem:[#allocation5 + $0x55c] sm:$0xf] }
 0x694   :  { %4279 = vmatmul.bf16.gmra.mxu1 %v9170_v21 }
 0x695   :  { %13412 = vst [vmem:[#allocation246_spill] sm:$0xff] %v10977_v6  ;;  %4368 = vmatmul.bf16.gmra.mxu2 %v9172_v22 }
 0x696   :  { %4457 = vmatmul.bf16.gmra.mxu3 %v9174_v23 }
 0x698   :  { %v4053_v42 = vpop.f32.mrf.mxu2  ;;  %v10987_v50 = vpop.f32.mrf.mxu0 }
 0x699   :  { %v4142_v48 = vpop.f32.mrf.mxu3  ;;  %v4054_v44 = vadd.f32 %v4053_v42, %v3965_v26  ;;  %v3966_v62 = vpop.f32.mrf.mxu1  ;;  %v13416_v42 = vld [vmem:[#allocation27_spill] sm:$0xff] }
 0x69a   :  { %v3967_v41 = vadd.f32 %v3966_v62, %v3878_v57  ;;  %v13415_v57 = vld [vmem:[#allocation26_spill] sm:$0xff] }
 0x69b   :  { %v10989_v53 = vadd.f32 %v4142_v48, %v4054_v44  ;;  %v7715_v48 = vld [vmem:[#allocation5 + $0x578] sm:$0xf0] }
 0x69c   :  { %v8626_v44 = vld [vmem:[#allocation5 + $0x75c] sm:$0xf]  ;;  %v7718_v62 = vor.u32 %v8562_v7, %v7715_v48 }
 0x69d   :  { %13413 = vst [vmem:[#allocation247_spill] sm:$0xff] %v10989_v53  ;;  %v13418_v7 = vld [vmem:[#allocation126_spill] sm:$0xff] }
 0x69e   :  { %4713 = vmatpush.bf16.msra.mxu2 %v7718_v62  ;;  %v3886_v48 = vadd.f32 %v13418_v7, %v10809_v2 }
 0x6a0   :  { %v4055_v46 = vpop.f32.mrf.mxu2  ;;  %v10993_v28 = vpop.f32.mrf.mxu0 }
 0x6a1   :  { %v4144_v19 = vpop.f32.mrf.mxu3  ;;  %v4056_v17 = vadd.f32 %v4055_v46, %v3967_v41  ;;  %v3969_v32 = vpop.f32.mrf.mxu1  ;;  %v7971_v41 = vld [vmem:[#allocation5 + $0x778] sm:$0xf0] }
 0x6a2   :  { %v3970_v40 = vadd.f32 %v3969_v32, %v3881_v36  ;;  %v7974_v46 = vor.u32 %v8626_v44, %v7971_v41  ;;  %v3883_v36 = vadd.f32 %v10712_v31, %v10809_v2 }
 0x6a3   :  { %v10995_v58 = vadd.f32 %v4144_v19, %v4056_v17  ;;  %4551 = vmatmul.bf16.gmra.mxu0 %v9136_v27 }
 0x6a4   :  { %4284 = vmatmul.bf16.gmra.mxu1 %v9180_v34  ;;  %4802 = vmatpush.bf16.msra.mxu3 %v7974_v46  ;;  %v13420_v46 = vld [vmem:[#allocation28_spill] sm:$0xff] }
 0x6a5   :  { %13414 = vst [vmem:[#allocation248_spill] sm:$0xff] %v10995_v58  ;;  %4373 = vmatmul.bf16.gmra.mxu2 %v13415_v57  ;;  %v8498_v58 = vld [vmem:[#allocation5 + $0x35c] sm:$0xf] }
 0x6a6   :  { %4462 = vmatmul.bf16.gmra.mxu3 %v13416_v42  ;;  %v7462_v6 = vor.u32 %v8498_v58, %v7459_v10  ;;  %v13423_v58 = vld [vmem:[#allocation30_spill] sm:$0xff] }
 0x6a8   :  { %v4058_v19 = vpop.f32.mrf.mxu2  ;;  %v11005_v0 = vpop.f32.mrf.mxu0  ;;  %4624 = vmatpush.bf16.msra.mxu1 %v7462_v6  ;;  %v13422_v6 = vld [vmem:[#allocation29_spill] sm:$0xff] }
 0x6a9   :  { %v4147_v17 = vpop.f32.mrf.mxu3  ;;  %v4059_v27 = vadd.f32 %v4058_v19, %v3970_v40  ;;  %v3971_v32 = vpop.f32.mrf.mxu1 }
 0x6aa   :  { %v3972_v26 = vadd.f32 %v3971_v32, %v3883_v36  ;;  %v13421_v36 = vld [vmem:[#allocation23_spill] sm:$0xff] }
 0x6ab   :  { %v11007_v53 = vadd.f32 %v4147_v17, %v4059_v27 }
 0x6ad   :  { %13417 = vst [vmem:[#allocation26_spill] sm:$0xff] %v11007_v53 }
 0x6b0   :  { %v4060_v44 = vpop.f32.mrf.mxu2  ;;  %v11011_v62 = vpop.f32.mrf.mxu0 }
 0x6b1   :  { %v4149_v31 = vpop.f32.mrf.mxu3  ;;  %v4061_v41 = vadd.f32 %v4060_v44, %v3972_v26  ;;  %v3974_v12 = vpop.f32.mrf.mxu1  ;;  %v3888_v26 = vadd.f32 %v10730_v63, %v10809_v2 }
 0x6b2   :  { %v3975_v40 = vadd.f32 %v3974_v12, %v3886_v48 }
 0x6b3   :  { %v11013_v19 = vadd.f32 %v4149_v31, %v4061_v41  ;;  %4556 = vmatmul.bf16.gmra.mxu0 %v13421_v36  ;;  %v13425_v31 = vld [vmem:[#allocation96_spill] sm:$0xff] }
 0x6b4   :  { %4289 = vmatmul.bf16.gmra.mxu1 %v13420_v46  ;;  %v3891_v41 = vadd.f32 %v13425_v31, %v10809_v2 }
 0x6b5   :  { %13419 = vst [vmem:[#allocation27_spill] sm:$0xff] %v11013_v19  ;;  %4378 = vmatmul.bf16.gmra.mxu2 %v13422_v6  ;;  %v13428_v6 = vld [vmem:[#allocation31_spill] sm:$0xff] }
 0x6b6   :  { %4467 = vmatmul.bf16.gmra.mxu3 %v13423_v58 }
 0x6b8   :  { %v4063_v17 = vpop.f32.mrf.mxu2  ;;  %v11023_v7 = vpop.f32.mrf.mxu0 }
 0x6b9   :  { %v4152_v27 = vpop.f32.mrf.mxu3  ;;  %v4064_v32 = vadd.f32 %v4063_v17, %v3975_v40  ;;  %v3976_v12 = vpop.f32.mrf.mxu1  ;;  %v13429_v40 = vld [vmem:[#allocation16_spill] sm:$0xff] }
 0x6ba   :  { %v3977_v48 = vadd.f32 %v3976_v12, %v3888_v26  ;;  %v13430_v17 = vld [vmem:[#allocation32_spill] sm:$0xff]  ;;  %v7683_v12 = vld [vmem:[#allocation5 + $0x538] sm:$0xf0] }
 0x6bb   :  { %v11025_v44 = vadd.f32 %v4152_v27, %v4064_v32  ;;  %v13431_v27 = vld [vmem:[#allocation33_spill] sm:$0xff]  ;;  %v8554_v32 = vld [vmem:[#allocation5 + $0x51c] sm:$0xf] }
 0x6bc   :  { %v7686_v31 = vor.u32 %v8554_v32, %v7683_v12  ;;  %v3896_v32 = vadd.f32 %v10754_v8, %v10809_v2  ;;  %v3898_v8 = vadd.f32 %v10766_v33, %v10809_v2 }
 0x6bd   :  { %13424 = vst [vmem:[#allocation126_spill] sm:$0xff] %v11025_v44 }
 0x6be   :  { %4714 = vmatpush.bf16.msra.mxu2 %v7686_v31 }
 0x6c0   :  { %v4065_v36 = vpop.f32.mrf.mxu2  ;;  %v11029_v18 = vpop.f32.mrf.mxu0 }
 0x6c1   :  { %v4154_v10 = vpop.f32.mrf.mxu3  ;;  %v4066_v53 = vadd.f32 %v4065_v36, %v3977_v48  ;;  %v3979_v19 = vpop.f32.mrf.mxu1  ;;  %13426 = vst [vmem:[#allocation28_spill] sm:$0xff] %v11029_v18  ;;  %v8618_v48 = vld [vmem:[#allocation5 + $0x71c] sm:$0xf] }
 0x6c2   :  { %v3980_v58 = vadd.f32 %v3979_v19, %v3891_v41  ;;  %v7939_v36 = vld [vmem:[#allocation5 + $0x738] sm:$0xf0] }
 0x6c3   :  { %v11031_v63 = vadd.f32 %v4154_v10, %v4066_v53  ;;  %4561 = vmatmul.bf16.gmra.mxu0 %v13429_v40  ;;  %v7942_v18 = vor.u32 %v8618_v48, %v7939_v36  ;;  %v3893_v53 = vadd.f32 %v10748_v59, %v10809_v2 }
 0x6c4   :  { %4294 = vmatmul.bf16.gmra.mxu1 %v13428_v6 }
 0x6c5   :  { %13427 = vst [vmem:[#allocation23_spill] sm:$0xff] %v11031_v63  ;;  %4383 = vmatmul.bf16.gmra.mxu2 %v13430_v17  ;;  %4803 = vmatpush.bf16.msra.mxu3 %v7942_v18  ;;  %v8490_v63 = vld [vmem:[#allocation5 + $0x31c] sm:$0xf]  ;;  %v13434_v18 = vld [vmem:[#allocation35_spill] sm:$0xff] }
 0x6c6   :  { %4472 = vmatmul.bf16.gmra.mxu3 %v13431_v27  ;;  %v7427_v27 = vld [vmem:[#allocation5 + $0x338] sm:$0xf0] }
 0x6c7   :  { %v7430_v17 = vor.u32 %v8490_v63, %v7427_v27  ;;  %v13437_v27 = vld [vmem:[#allocation38_spill] sm:$0xff] }
 0x6c8   :  { %v4068_v19 = vpop.f32.mrf.mxu2  ;;  %v11041_v6 = vpop.f32.mrf.mxu0 }
 0x6c9   :  { %v4157_v10 = vpop.f32.mrf.mxu3  ;;  %v4069_v41 = vadd.f32 %v4068_v19, %v3980_v58  ;;  %v3981_v40 = vpop.f32.mrf.mxu1  ;;  %4625 = vmatpush.bf16.msra.mxu1 %v7430_v17  ;;  %v13436_v17 = vld [vmem:[#allocation37_spill] sm:$0xff] }
 0x6ca   :  { %v3982_v26 = vadd.f32 %v3981_v40, %v3893_v53  ;;  %v13435_v53 = vld [vmem:[#allocation19_spill] sm:$0xff] }
 0x6cb   :  { %v11043_v44 = vadd.f32 %v4157_v10, %v4069_v41 }
 0x6cd   :  { %13432 = vst [vmem:[#allocation96_spill] sm:$0xff] %v11043_v44 }
 0x6d0   :  { %v4070_v12 = vpop.f32.mrf.mxu2  ;;  %v11047_v31 = vpop.f32.mrf.mxu0 }
 0x6d1   :  { %v4159_v59 = vpop.f32.mrf.mxu3  ;;  %v4071_v48 = vadd.f32 %v4070_v12, %v3982_v26  ;;  %v3984_v36 = vpop.f32.mrf.mxu1 }
 0x6d2   :  { %v3985_v58 = vadd.f32 %v3984_v36, %v3896_v32 }
 0x6d3   :  { %v11049_v19 = vadd.f32 %v4159_v59, %v4071_v48  ;;  %4566 = vmatmul.bf16.gmra.mxu0 %v13435_v53  ;;  %v13439_v48 = vld [vmem:[#allocation100_spill] sm:$0xff] }
 0x6d4   :  { %4299 = vmatmul.bf16.gmra.mxu1 %v13434_v18  ;;  %v3901_v36 = vadd.f32 %v13439_v48, %v10809_v2  ;;  %v13442_v18 = vld [vmem:[#allocation40_spill] sm:$0xff]  ;;  %v8610_v48 = vld [vmem:[#allocation5 + $0x6dc] sm:$0xf] }
 0x6d5   :  { %13433 = vst [vmem:[#allocation16_spill] sm:$0xff] %v11049_v19  ;;  %4388 = vmatmul.bf16.gmra.mxu2 %v13436_v17 }
 0x6d6   :  { %4477 = vmatmul.bf16.gmra.mxu3 %v13437_v27 }
 0x6d8   :  { %v4073_v26 = vpop.f32.mrf.mxu2  ;;  %v11059_v32 = vpop.f32.mrf.mxu0 }
 0x6d9   :  { %v4162_v10 = vpop.f32.mrf.mxu3  ;;  %v4074_v41 = vadd.f32 %v4073_v26, %v3985_v58  ;;  %v3986_v40 = vpop.f32.mrf.mxu1  ;;  %v13443_v58 = vld [vmem:[#allocation21_spill] sm:$0xff]  ;;  %v13444_v26 = vld [vmem:[#allocation42_spill] sm:$0xff] }
 0x6da   :  { %v3987_v12 = vadd.f32 %v3986_v40, %v3898_v8  ;;  %v7651_v40 = vld [vmem:[#allocation5 + $0x4f8] sm:$0xf0] }
 0x6db   :  { %v11061_v59 = vadd.f32 %v4162_v10, %v4074_v41  ;;  %v13445_v10 = vld [vmem:[#allocation43_spill] sm:$0xff]  ;;  %v8546_v41 = vld [vmem:[#allocation5 + $0x4dc] sm:$0xf] }
 0x6dd   :  { %13438 = vst [vmem:[#allocation19_spill] sm:$0xff] %v11061_v59 }
 0x6e0   :  { %v4075_v53 = vpop.f32.mrf.mxu2  ;;  %v11065_v27 = vpop.f32.mrf.mxu0 }
 0x6e1   :  { %v4164_v63 = vpop.f32.mrf.mxu3  ;;  %v4076_v44 = vadd.f32 %v4075_v53, %v3987_v12  ;;  %v3989_v19 = vpop.f32.mrf.mxu1  ;;  %13440 = vst [vmem:[#allocation100_spill] sm:$0xff] %v11065_v27  ;;  %v7654_v12 = vor.u32 %v8546_v41, %v7651_v40  ;;  %v7907_v53 = vld [vmem:[#allocation5 + $0x6f8] sm:$0xf0]  ;;  %v3906_v40 = vadd.f32 %v10790_v16, %v10809_v2  ;;  %v8654_v16 = vld [vmem:[#allocation8 + $0x38] sm:$0xff] }
 0x6e2   :  { %v3990_v17 = vadd.f32 %v3989_v19, %v3901_v36  ;;  %v7910_v27 = vor.u32 %v8610_v48, %v7907_v53  ;;  %5533 = vmatpush.bf16.msra.mxu0 %v8654_v16 }
 0x6e3   :  { %v11067_v33 = vadd.f32 %v4164_v63, %v4076_v44  ;;  %4571 = vmatmul.bf16.gmra.mxu0 %v13443_v58  ;;  %v3903_v44 = vadd.f32 %v10784_v24, %v10809_v2  ;;  %4715 = vmatpush.bf16.msra.mxu2 %v7654_v12 }
 0x6e4   :  { %4304 = vmatmul.bf16.gmra.mxu1 %v13442_v18  ;;  %4804 = vmatpush.bf16.msra.mxu3 %v7910_v27  ;;  %v13448_v27 = vld [vmem:[#allocation45_spill] sm:$0xff] }
 0x6e5   :  { %13441 = vst [vmem:[#allocation249_spill] sm:$0xff] %v11067_v33  ;;  %4393 = vmatmul.bf16.gmra.mxu2 %v13444_v26  ;;  %v8482_v33 = vld [vmem:[#allocation5 + $0x2dc] sm:$0xf] }
 0x6e6   :  { %4482 = vmatmul.bf16.gmra.mxu3 %v13445_v10  ;;  %v7395_v10 = vld [vmem:[#allocation5 + $0x2f8] sm:$0xf0] }
 0x6e7   :  { %v7398_v41 = vor.u32 %v8482_v33, %v7395_v10  ;;  %v13450_v10 = vld [vmem:[#allocation47_spill] sm:$0xff] }
 0x6e8   :  { %v4078_v19 = vpop.f32.mrf.mxu2  ;;  %v11077_v18 = vpop.f32.mrf.mxu0 }
 0x6e9   :  { %v4167_v63 = vpop.f32.mrf.mxu3  ;;  %v4079_v36 = vadd.f32 %v4078_v19, %v3990_v17  ;;  %v3991_v58 = vpop.f32.mrf.mxu1  ;;  %4626 = vmatpush.bf16.msra.mxu1 %v7398_v41 }
 0x6ea   :  { %v3992_v8 = vadd.f32 %v3991_v58, %v3903_v44  ;;  %v13449_v44 = vld [vmem:[#allocation24_spill] sm:$0xff] }
 0x6eb   :  { %v11079_v59 = vadd.f32 %v4167_v63, %v4079_v36  ;;  %v13451_v63 = vld [vmem:[#allocation48_spill] sm:$0xff] }
 0x6ed   :  { %13446 = vst [vmem:[#allocation21_spill] sm:$0xff] %v11079_v59  ;;  %v13456_v59 = vld [vmem:[#allocation164_spill] sm:$0xff] }
 0x6f0   :  { %v4080_v48 = vpop.f32.mrf.mxu2  ;;  %v11083_v12 = vpop.f32.mrf.mxu0 }
 0x6f1   :  { %v4169_v24 = vpop.f32.mrf.mxu3  ;;  %v4081_v53 = vadd.f32 %v4080_v48, %v3992_v8  ;;  %v3994_v26 = vpop.f32.mrf.mxu1  ;;  %v13452_v8 = vld [vmem:[#allocation103_spill] sm:$0xff] }
 0x6f2   :  { %v3995_v17 = vadd.f32 %v3994_v26, %v3906_v40  ;;  %v3908_v36 = vadd.f32 %v13452_v8, %v10809_v2 }
 0x6f3   :  { %v11085_v19 = vadd.f32 %v4169_v24, %v4081_v53  ;;  %4576 = vmatmul.bf16.gmra.mxu0 %v13449_v44  ;;  %v13455_v44 = vld [vmem:[#allocation226_spill] sm:$0xff] }
 0x6f4   :  { %4309 = vmatmul.bf16.gmra.mxu1 %v13448_v27  ;;  %v11100_v33 = vperm.slane %v13455_v44, 6  ;;  %v7619_v44 = vld [vmem:[#allocation5 + $0x4b8] sm:$0xf0] }
 0x6f5   :  { %13447 = vst [vmem:[#allocation250_spill] sm:$0xff] %v11085_v19  ;;  %4398 = vmatmul.bf16.gmra.mxu2 %v13450_v10 }
 0x6f6   :  { %4487 = vmatmul.bf16.gmra.mxu3 %v13451_v63  ;;  %v4187_v19 = vadd.f32 %v13456_v59, %v11100_v33  ;;  %v8538_v59 = vld [vmem:[#allocation5 + $0x49c] sm:$0xf] }
 0x6f8   :  { %v4083_v58 = vpop.f32.mrf.mxu2  ;;  %v11095_v48 = vpop.f32.mrf.mxu0 }
 0x6f9   :  { %v4172_v26 = vpop.f32.mrf.mxu3  ;;  %v4084_v41 = vadd.f32 %v4083_v58, %v3995_v17  ;;  %v3996_v40 = vpop.f32.mrf.mxu1  ;;  %13453 = vst [vmem:[#allocation24_spill] sm:$0xff] %v11095_v48  ;;  %v13459_v58 = vld [vmem:[#allocation50_spill] sm:$0xff] }
 0x6fa   :  { %v3997_v24 = vadd.f32 %v3996_v40, %v3908_v36  ;;  %v13460_v36 = vld [vmem:[#allocation17_spill] sm:$0xff]  ;;  %v13462_v40 = vld [vmem:[#allocation55_spill] sm:$0xff]  ;;  %v7875_v48 = vld [vmem:[#allocation5 + $0x6b8] sm:$0xf0] }
 0x6fb   :  { %v11097_v53 = vadd.f32 %v4172_v26, %v4084_v41  ;;  %v13461_v41 = vld [vmem:[#allocation54_spill] sm:$0xff] }
 0x6fd   :  { %13454 = vst [vmem:[#allocation103_spill] sm:$0xff] %v11097_v53 }
 0x700   :  { %v4085_v63 = vpop.f32.mrf.mxu2  ;;  %v11104_v2 = vpop.f32.mrf.mxu0 }
 0x701   :  { %v4174_v16 = vpop.f32.mrf.mxu3  ;;  %v4086_v10 = vadd.f32 %v4085_v63, %v3997_v24  ;;  %v4275_v27 = vpop.f32.mrf.mxu1  ;;  %13457 = vst [vmem:[#allocation226_spill] sm:$0xff] %v11104_v2  ;;  %v8602_v63 = vld [vmem:[#allocation5 + $0x69c] sm:$0xf]  ;;  %v7622_v24 = vor.u32 %v8538_v59, %v7619_v44 }
 0x702   :  { %v4276_v8 = vadd.f32 %v4275_v27, %v4187_v19  ;;  %v7878_v2 = vor.u32 %v8602_v63, %v7875_v48  ;;  %v4189_v19 = vadd.f32 %v10825_v55, %v11100_v33  ;;  %v4192_v48 = vadd.f32 %v10831_v56, %v11100_v33  ;;  %v8653_v56 = vld [vmem:[#allocation8 + $0x30] sm:$0xff] }
 0x703   :  { %v11106_v17 = vadd.f32 %v4174_v16, %v4086_v10  ;;  %4581 = vmatmul.bf16.gmra.mxu0 %v13460_v36  ;;  %4716 = vmatpush.bf16.msra.mxu2 %v7622_v24 }
 0x704   :  { %4314 = vmatmul.bf16.gmra.mxu1 %v13459_v58  ;;  %4805 = vmatpush.bf16.msra.mxu3 %v7878_v2 }
 0x705   :  { %13458 = vst [vmem:[#allocation164_spill] sm:$0xff] %v11106_v17  ;;  %4403 = vmatmul.bf16.gmra.mxu2 %v13461_v41  ;;  %v8474_v17 = vld [vmem:[#allocation5 + $0x29c] sm:$0xf]  ;;  %5534 = vmatpush.bf16.msra.mxu0 %v8653_v56 }
 0x706   :  { %4492 = vmatmul.bf16.gmra.mxu3 %v13462_v40  ;;  %v7363_v40 = vld [vmem:[#allocation5 + $0x2b8] sm:$0xf0] }
 0x707   :  { %v7366_v41 = vor.u32 %v8474_v17, %v7363_v40  ;;  %v13465_v17 = vld [vmem:[#allocation58_spill] sm:$0xff] }
 0x708   :  { %v4364_v27 = vpop.f32.mrf.mxu2  ;;  %v11116_v58 = vpop.f32.mrf.mxu0 }
 0x709   :  { %v4453_v10 = vpop.f32.mrf.mxu3  ;;  %v4365_v16 = vadd.f32 %v4364_v27, %v4276_v8  ;;  %v4277_v36 = vpop.f32.mrf.mxu1  ;;  %4627 = vmatpush.bf16.msra.mxu1 %v7366_v41 }
 0x70a   :  { %v4278_v26 = vadd.f32 %v4277_v36, %v4189_v19 }
 0x70b   :  { %v11118_v53 = vadd.f32 %v4453_v10, %v4365_v16 }
 0x70d   :  { %13463 = vst [vmem:[#allocation17_spill] sm:$0xff] %v11118_v53 }
 0x710   :  { %v4366_v59 = vpop.f32.mrf.mxu2  ;;  %v11122_v24 = vpop.f32.mrf.mxu0 }
 0x711   :  { %v4455_v55 = vpop.f32.mrf.mxu3  ;;  %v4367_v44 = vadd.f32 %v4366_v59, %v4278_v26  ;;  %v4280_v63 = vpop.f32.mrf.mxu1  ;;  %v13466_v26 = vld [vmem:[#allocation230_spill] sm:$0xff]  ;;  %v13469_v59 = vld [vmem:[#allocation108_spill] sm:$0xff] }
 0x712   :  { %v4281_v8 = vadd.f32 %v4280_v63, %v4192_v48  ;;  %v4194_v41 = vadd.f32 %v13466_v26, %v11100_v33 }
 0x713   :  { %v11124_v27 = vadd.f32 %v4455_v55, %v4367_v44  ;;  %4586 = vmatmul.bf16.gmra.mxu0 %v9128_v43  ;;  %v4197_v55 = vadd.f32 %v13469_v59, %v11100_v33 }
 0x714   :  { %4319 = vmatmul.bf16.gmra.mxu1 %v9352_v25 }
 0x715   :  { %13464 = vst [vmem:[#allocation251_spill] sm:$0xff] %v11124_v27  ;;  %4408 = vmatmul.bf16.gmra.mxu2 %v12995_v29 }
 0x716   :  { %4497 = vmatmul.bf16.gmra.mxu3 %v13465_v17  ;;  %v13472_v17 = vld [vmem:[#allocation61_spill] sm:$0xff] }
 0x718   :  { %v4369_v40 = vpop.f32.mrf.mxu2  ;;  %v11134_v36 = vpop.f32.mrf.mxu0 }
 0x719   :  { %v4458_v19 = vpop.f32.mrf.mxu3  ;;  %v4370_v10 = vadd.f32 %v4369_v40, %v4281_v8  ;;  %v4282_v16 = vpop.f32.mrf.mxu1  ;;  %13467 = vst [vmem:[#allocation230_spill] sm:$0xff] %v11134_v36  ;;  %v13473_v8 = vld [vmem:[#allocation22_spill] sm:$0xff] }
 0x71a   :  { %v4283_v48 = vadd.f32 %v4282_v16, %v4194_v41  ;;  %v13474_v40 = vld [vmem:[#allocation62_spill] sm:$0xff] }
 0x71b   :  { %v11136_v43 = vadd.f32 %v4458_v19, %v4370_v10  ;;  %v13475_v19 = vld [vmem:[#allocation63_spill] sm:$0xff]  ;;  %v8530_v10 = vld [vmem:[#allocation5 + $0x45c] sm:$0xf] }
 0x71c   :  { %v7587_v16 = vld [vmem:[#allocation5 + $0x478] sm:$0xf0] }
 0x71d   :  { %13468 = vst [vmem:[#allocation252_spill] sm:$0xff] %v11136_v43  ;;  %v7590_v59 = vor.u32 %v8530_v10, %v7587_v16  ;;  %v13477_v10 = vld [vmem:[#allocation200_spill] sm:$0xff] }
 0x71e   :  { %v4202_v16 = vadd.f32 %v13477_v10, %v11100_v33 }
 0x71f   :  { %4717 = vmatpush.bf16.msra.mxu2 %v7590_v59 }
 0x720   :  { %v4371_v44 = vpop.f32.mrf.mxu2  ;;  %v11140_v56 = vpop.f32.mrf.mxu0 }
 0x721   :  { %v4460_v63 = vpop.f32.mrf.mxu3  ;;  %v4372_v2 = vadd.f32 %v4371_v44, %v4283_v48  ;;  %v4285_v53 = vpop.f32.mrf.mxu1  ;;  %13470 = vst [vmem:[#allocation108_spill] sm:$0xff] %v11140_v56  ;;  %v8594_v48 = vld [vmem:[#allocation5 + $0x65c] sm:$0xf] }
 0x722   :  { %v4286_v27 = vadd.f32 %v4285_v53, %v4197_v55  ;;  %v7843_v44 = vld [vmem:[#allocation5 + $0x678] sm:$0xf0]  ;;  %v4199_v53 = vadd.f32 %v10861_v1, %v11100_v33 }
 0x723   :  { %v11142_v26 = vadd.f32 %v4460_v63, %v4372_v2  ;;  %4591 = vmatmul.bf16.gmra.mxu0 %v13473_v8  ;;  %v7846_v56 = vor.u32 %v8594_v48, %v7843_v44 }
 0x724   :  { %4324 = vmatmul.bf16.gmra.mxu1 %v13472_v17 }
 0x725   :  { %13471 = vst [vmem:[#allocation253_spill] sm:$0xff] %v11142_v26  ;;  %4413 = vmatmul.bf16.gmra.mxu2 %v13474_v40  ;;  %4806 = vmatpush.bf16.msra.mxu3 %v7846_v56  ;;  %v8466_v26 = vld [vmem:[#allocation5 + $0x25c] sm:$0xf] }
 0x726   :  { %4502 = vmatmul.bf16.gmra.mxu3 %v13475_v19  ;;  %v7331_v19 = vld [vmem:[#allocation5 + $0x278] sm:$0xf0] }
 0x727   :  { %v7334_v40 = vor.u32 %v8466_v26, %v7331_v19  ;;  %v13480_v56 = vld [vmem:[#allocation66_spill] sm:$0xff]  ;;  %v13483_v19 = vld [vmem:[#allocation68_spill] sm:$0xff] }
 0x728   :  { %v4374_v2 = vpop.f32.mrf.mxu2  ;;  %v11152_v17 = vpop.f32.mrf.mxu0 }
 0x729   :  { %v4463_v55 = vpop.f32.mrf.mxu3  ;;  %v4375_v63 = vadd.f32 %v4374_v2, %v4286_v27  ;;  %v4287_v8 = vpop.f32.mrf.mxu1  ;;  %4628 = vmatpush.bf16.msra.mxu1 %v7334_v40  ;;  %v13482_v40 = vld [vmem:[#allocation67_spill] sm:$0xff] }
 0x72a   :  { %v4288_v41 = vadd.f32 %v4287_v8, %v4199_v53  ;;  %v13481_v53 = vld [vmem:[#allocation25_spill] sm:$0xff] }
 0x72b   :  { %v11154_v43 = vadd.f32 %v4463_v55, %v4375_v63  ;;  %v8652_v55 = vld [vmem:[#allocation8 + $0x28] sm:$0xff] }
 0x72c   :  { %5535 = vmatpush.bf16.msra.mxu0 %v8652_v55 }
 0x72d   :  { %13476 = vst [vmem:[#allocation22_spill] sm:$0xff] %v11154_v43 }
 0x730   :  { %v4376_v48 = vpop.f32.mrf.mxu2  ;;  %v11158_v59 = vpop.f32.mrf.mxu0 }
 0x731   :  { %v4465_v1 = vpop.f32.mrf.mxu3  ;;  %v4377_v44 = vadd.f32 %v4376_v48, %v4288_v41  ;;  %v4290_v36 = vpop.f32.mrf.mxu1  ;;  %13478 = vst [vmem:[#allocation200_spill] sm:$0xff] %v11158_v59  ;;  %v13484_v41 = vld [vmem:[#allocation112_spill] sm:$0xff]  ;;  %v13489_v59 = vld [vmem:[#allocation71_spill] sm:$0xff] }
 0x732   :  { %v4291_v27 = vadd.f32 %v4290_v36, %v4202_v16  ;;  %v4204_v63 = vadd.f32 %v13484_v41, %v11100_v33 }
 0x733   :  { %v11160_v2 = vadd.f32 %v4465_v1, %v4377_v44  ;;  %4596 = vmatmul.bf16.gmra.mxu0 %v13481_v53  ;;  %v13486_v53 = vld [vmem:[#allocation114_spill] sm:$0xff] }
 0x734   :  { %4329 = vmatmul.bf16.gmra.mxu1 %v13480_v56  ;;  %v4207_v26 = vadd.f32 %v13486_v53, %v11100_v33  ;;  %v7811_v53 = vld [vmem:[#allocation5 + $0x638] sm:$0xf0] }
 0x735   :  { %13479 = vst [vmem:[#allocation254_spill] sm:$0xff] %v11160_v2  ;;  %4418 = vmatmul.bf16.gmra.mxu2 %v13482_v40 }
 0x736   :  { %4507 = vmatmul.bf16.gmra.mxu3 %v13483_v19 }
 0x738   :  { %v4379_v8 = vpop.f32.mrf.mxu2  ;;  %v11170_v48 = vpop.f32.mrf.mxu0 }
 0x739   :  { %v4468_v36 = vpop.f32.mrf.mxu3  ;;  %v4380_v10 = vadd.f32 %v4379_v8, %v4291_v27  ;;  %v4292_v16 = vpop.f32.mrf.mxu1  ;;  %v13490_v27 = vld [vmem:[#allocation18_spill] sm:$0xff]  ;;  %v13491_v8 = vld [vmem:[#allocation72_spill] sm:$0xff] }
 0x73a   :  { %v4293_v1 = vadd.f32 %v4292_v16, %v4204_v63  ;;  %v7555_v16 = vld [vmem:[#allocation5 + $0x438] sm:$0xf0] }
 0x73b   :  { %v11172_v44 = vadd.f32 %v4468_v36, %v4380_v10  ;;  %v13492_v36 = vld [vmem:[#allocation73_spill] sm:$0xff]  ;;  %v8522_v10 = vld [vmem:[#allocation5 + $0x41c] sm:$0xf] }
 0x73d   :  { %13485 = vst [vmem:[#allocation25_spill] sm:$0xff] %v11172_v44 }
 0x740   :  { %v4381_v43 = vpop.f32.mrf.mxu2  ;;  %v11176_v55 = vpop.f32.mrf.mxu0 }
 0x741   :  { %v4470_v2 = vpop.f32.mrf.mxu3  ;;  %v4382_v19 = vadd.f32 %v4381_v43, %v4293_v1  ;;  %v4295_v40 = vpop.f32.mrf.mxu1  ;;  %13487 = vst [vmem:[#allocation112_spill] sm:$0xff] %v11176_v55  ;;  %v8586_v43 = vld [vmem:[#allocation5 + $0x61c] sm:$0xf]  ;;  %v7558_v1 = vor.u32 %v8522_v10, %v7555_v16  ;;  %v4212_v10 = vadd.f32 %v10903_v52, %v11100_v33  ;;  %v13496_v52 = vld [vmem:[#allocation77_spill] sm:$0xff] }
 0x742   :  { %v4296_v56 = vadd.f32 %v4295_v40, %v4207_v26  ;;  %v7814_v55 = vor.u32 %v8586_v43, %v7811_v53  ;;  %v8651_v43 = vld [vmem:[#allocation8 + $0x20] sm:$0xff] }
 0x743   :  { %v11178_v41 = vadd.f32 %v4470_v2, %v4382_v19  ;;  %4601 = vmatmul.bf16.gmra.mxu0 %v13490_v27  ;;  %v4209_v2 = vadd.f32 %v10897_v20, %v11100_v33  ;;  %4718 = vmatpush.bf16.msra.mxu2 %v7558_v1 }
 0x744   :  { %4334 = vmatmul.bf16.gmra.mxu1 %v13489_v59  ;;  %4807 = vmatpush.bf16.msra.mxu3 %v7814_v55 }
 0x745   :  { %13488 = vst [vmem:[#allocation114_spill] sm:$0xff] %v11178_v41  ;;  %4423 = vmatmul.bf16.gmra.mxu2 %v13491_v8  ;;  %v8458_v41 = vld [vmem:[#allocation5 + $0x21c] sm:$0xf]  ;;  %5536 = vmatpush.bf16.msra.mxu0 %v8651_v43 }
 0x746   :  { %4512 = vmatmul.bf16.gmra.mxu3 %v13492_v36  ;;  %v7299_v36 = vld [vmem:[#allocation5 + $0x238] sm:$0xf0] }
 0x747   :  { %v7302_v8 = vor.u32 %v8458_v41, %v7299_v36  ;;  %v8650_v41 = vld [vmem:[#allocation8 + $0x18] sm:$0xff]  ;;  %v13497_v36 = vld [vmem:[#allocation78_spill] sm:$0xff] }
 0x748   :  { %v4384_v26 = vpop.f32.mrf.mxu2  ;;  %v11188_v59 = vpop.f32.mrf.mxu0 }
 0x749   :  { %v4473_v40 = vpop.f32.mrf.mxu3  ;;  %v4385_v19 = vadd.f32 %v4384_v26, %v4296_v56  ;;  %v4297_v27 = vpop.f32.mrf.mxu1  ;;  %4629 = vmatpush.bf16.msra.mxu1 %v7302_v8  ;;  %5537 = vmatpush.bf16.msra.mxu0 %v8650_v41 }
 0x74a   :  { %v4298_v63 = vadd.f32 %v4297_v27, %v4209_v2  ;;  %v13495_v2 = vld [vmem:[#allocation20_spill] sm:$0xff]  ;;  %v8649_v27 = vld [vmem:[#allocation8 + $0x10] sm:$0xff] }
 0x74b   :  { %v11190_v44 = vadd.f32 %v4473_v40, %v4385_v19 }
 0x74d   :  { %13493 = vst [vmem:[#allocation18_spill] sm:$0xff] %v11190_v44  ;;  %5538 = vmatpush.bf16.msra.mxu0 %v8649_v27  ;;  %v8647_v44 = vld [vmem:[#allocation8] sm:$0xff] }
 0x750   :  { %v4386_v16 = vpop.f32.mrf.mxu2  ;;  %v11194_v56 = vpop.f32.mrf.mxu0 }
 0x751   :  { %v4475_v20 = vpop.f32.mrf.mxu3  ;;  %v4387_v53 = vadd.f32 %v4386_v16, %v4298_v63  ;;  %v4300_v1 = vpop.f32.mrf.mxu1  ;;  %v4214_v63 = vadd.f32 %v10915_v54, %v11100_v33 }
 0x752   :  { %v4301_v26 = vadd.f32 %v4300_v1, %v4212_v10  ;;  %v8648_v1 = vld [vmem:[#allocation8 + $0x8] sm:$0xff] }
 0x753   :  { %v11196_v55 = vadd.f32 %v4475_v20, %v4387_v53  ;;  %4606 = vmatmul.bf16.gmra.mxu0 %v13495_v2  ;;  %v4217_v2 = vadd.f32 %v10921_v15, %v11100_v33  ;;  %v8670_v15 = vld [vmem:[#allocation8 + $0xb8] sm:$0xff] }
 0x754   :  { %4339 = vmatmul.bf16.gmra.mxu1 %v9444_v45  ;;  %5539 = vmatpush.bf16.msra.mxu0 %v8648_v1  ;;  %v8662_v1 = vld [vmem:[#allocation8 + $0x78] sm:$0xff] }
 0x755   :  { %13494 = vst [vmem:[#allocation255_spill] sm:$0xff] %v11196_v55  ;;  %4428 = vmatmul.bf16.gmra.mxu2 %v13496_v52  ;;  %5622 = vmatpush.bf16.msrb.mxu1 %v8662_v1 }
 0x756   :  { %4517 = vmatmul.bf16.gmra.mxu3 %v13497_v36  ;;  %5711 = vmatpush.bf16.msrb.mxu2 %v8670_v15 }
 0x758   :  { %v4389_v40 = vpop.f32.mrf.mxu2  ;;  %v11206_v20 = vpop.f32.mrf.mxu0  ;;  %5540 = vmatpush.bf16.msra.mxu0 %v8647_v44  ;;  %v4219_v44 = vadd.f32 %v10933_v35, %v11100_v33 }
 0x759   :  { %v4478_v19 = vpop.f32.mrf.mxu3  ;;  %v4390_v10 = vadd.f32 %v4389_v40, %v4301_v26  ;;  %v4302_v16 = vpop.f32.mrf.mxu1 }
 0x75a   :  { %v4303_v43 = vadd.f32 %v4302_v16, %v4214_v63 }
 0x75b   :  { %v11208_v53 = vadd.f32 %v4478_v19, %v4390_v10  ;;  %v8678_v19 = vld [vmem:[#allocation8 + $0xf8] sm:$0xff] }
 0x75c   :  { %5800 = vmatpush.bf16.msrb.mxu3 %v8678_v19 }
 0x75d   :  { %13498 = vst [vmem:[#allocation20_spill] sm:$0xff] %v11208_v53 }
 0x760   :  { %v4391_v41 = vpop.f32.mrf.mxu2  ;;  %v11212_v36 = vpop.f32.mrf.mxu0 }
 0x761   :  { %v4480_v8 = vpop.f32.mrf.mxu3  ;;  %v4392_v54 = vadd.f32 %v4391_v41, %v4303_v43  ;;  %v4305_v55 = vpop.f32.mrf.mxu1 }
 0x762   :  { %v4306_v26 = vadd.f32 %v4305_v55, %v4217_v2  ;;  %v4222_v2 = vadd.f32 %v10939_v49, %v11100_v33  ;;  %v4224_v49 = vadd.f32 %v10951_v47, %v11100_v33 }
 0x763   :  { %v11214_v40 = vadd.f32 %v4480_v8, %v4392_v54  ;;  %4611 = vmatmul.bf16.gmra.mxu0 %v9142_v30 }
 0x764   :  { %4344 = vmatmul.bf16.gmra.mxu1 %v9466_v14 }
 0x765   :  { %13499 = vst [vmem:[#allocation77_spill] sm:$0xff] %v11214_v40  ;;  %4433 = vmatmul.bf16.gmra.mxu2 %v9470_v11  ;;  %v13590_v40 = vld [vmem:[#allocation71_spill] sm:$0xff] }
 0x766   :  { %4522 = vmatmul.bf16.gmra.mxu3 %v13121_v37 }
 0x768   :  { %v4394_v55 = vpop.f32.mrf.mxu2  ;;  %v11224_v16 = vpop.f32.mrf.mxu0 }
 0x769   :  { %v4483_v8 = vpop.f32.mrf.mxu3  ;;  %v4395_v27 = vadd.f32 %v4394_v55, %v4306_v26  ;;  %v4307_v10 = vpop.f32.mrf.mxu1 }
 0x76a   :  { %v4308_v30 = vadd.f32 %v4307_v10, %v4219_v44 }
 0x76b   :  { %v11226_v43 = vadd.f32 %v4483_v8, %v4395_v27 }
 0x76d   :  { %13500 = vst [vmem:[#allocation256_spill] sm:$0xff] %v11226_v43 }
 0x770   :  { %v4396_v41 = vpop.f32.mrf.mxu2  ;;  %v11230_v63 = vpop.f32.mrf.mxu0 }
 0x771   :  { %v4485_v54 = vpop.f32.mrf.mxu3  ;;  %v4397_v15 = vadd.f32 %v4396_v41, %v4308_v30  ;;  %v4310_v19 = vpop.f32.mrf.mxu1 }
 0x772   :  { %v4311_v35 = vadd.f32 %v4310_v19, %v4222_v2 }
 0x773   :  { %v11232_v53 = vadd.f32 %v4485_v54, %v4397_v15  ;;  %4616 = vmatmul.bf16.gmra.mxu0 %v9154_v60  ;;  %v4227_v60 = vadd.f32 %v10957_v61, %v11100_v33  ;;  %v8669_v61 = vld [vmem:[#allocation8 + $0xb0] sm:$0xff] }
 0x774   :  { %4349 = vmatmul.bf16.gmra.mxu1 %v9488_v13  ;;  %5712 = vmatpush.bf16.msrb.mxu2 %v8669_v61 }
 0x775   :  { %13501 = vst [vmem:[#allocation257_spill] sm:$0xff] %v11232_v53  ;;  %4438 = vmatmul.bf16.gmra.mxu2 %v9492_v39 }
 0x776   :  { %4527 = vmatmul.bf16.gmra.mxu3 %v9494_v51 }
 0x778   :  { %v4399_v44 = vpop.f32.mrf.mxu2  ;;  %v11242_v10 = vpop.f32.mrf.mxu0 }
 0x779   :  { %v4488_v55 = vpop.f32.mrf.mxu3  ;;  %v4400_v8 = vadd.f32 %v4399_v44, %v4311_v35  ;;  %v4312_v27 = vpop.f32.mrf.mxu1  ;;  %v13504_v35 = vld [vmem:[#allocation59_spill] sm:$0xff]  ;;  %v13505_v44 = vld [vmem:[#allocation56_spill] sm:$0xff] }
 0x77a   :  { %v4313_v30 = vadd.f32 %v4312_v27, %v4224_v49  ;;  %v13506_v43 = vpack.c.bf16 %v13504_v35, %v13505_v44 }
 0x77b   :  { %v11244_v1 = vadd.f32 %v4488_v55, %v4400_v8  ;;  %v8677_v55 = vld [vmem:[#allocation8 + $0xf0] sm:$0xff]  ;;  %v4229_v8 = vadd.f32 %v10969_v9, %v11100_v33 }
 0x77c   :  { %5801 = vmatpush.bf16.msrb.mxu3 %v8677_v55 }
 0x77d   :  { %13502 = vst [vmem:[#allocation258_spill] sm:$0xff] %v11244_v1 }
 0x780   :  { %v4401_v2 = vpop.f32.mrf.mxu2  ;;  %v11248_v19 = vpop.f32.mrf.mxu0 }
 0x781   :  { %v4490_v41 = vpop.f32.mrf.mxu3  ;;  %v4402_v54 = vadd.f32 %v4401_v2, %v4313_v30  ;;  %v4315_v15 = vpop.f32.mrf.mxu1 }
 0x782   :  { %v4316_v26 = vadd.f32 %v4315_v15, %v4227_v60 }
 0x783   :  { %v11250_v47 = vadd.f32 %v4490_v41, %v4402_v54  ;;  %5541 = vmatmul.bf16.vlgmr.msra.gmra.mxu0 %v13506_v43  ;;  %v8661_v54 = vld [vmem:[#allocation8 + $0x70] sm:$0xff] }
 0x784   :  { %4630 = vmatmul.bf16.vlgmr.msra.gmra.mxu1 %v9160_v3 }
 0x785   :  { %13503 = vst [vmem:[#allocation259_spill] sm:$0xff] %v11250_v47  ;;  %4719 = vmatmul.bf16.vlgmr.msra.gmra.mxu2 %v9162_v4  ;;  %5623 = vmatpush.bf16.msrb.mxu1 %v8661_v54  ;;  %v4232_v4 = vadd.f32 %v10975_v38, %v11100_v33  ;;  %v4234_v38 = vadd.f32 %v10987_v50, %v11100_v33 }
 0x786   :  { %4808 = vmatmul.bf16.vlgmr.msra.gmra.mxu3 %v9164_v5 }
 0x788   :  { %v4404_v27 = vpop.f32.mrf.mxu2  ;;  %v11262_v2 = vpop.f32.mrf.mxu0 }
 0x789   :  { %v4493_v3 = vpop.f32.mrf.mxu3  ;;  %v4405_v30 = vadd.f32 %v4404_v27, %v4316_v26  ;;  %v4317_v60 = vpop.f32.mrf.mxu1  ;;  %v13509_v26 = vld [vmem:[#allocation64_spill] sm:$0xff] }
 0x78a   :  { %v4318_v43 = vadd.f32 %v4317_v60, %v4229_v8  ;;  %v13510_v8 = vld [vmem:[#allocation60_spill] sm:$0xff] }
 0x78b   :  { %v11264_v41 = vadd.f32 %v4493_v3, %v4405_v30  ;;  %v13511_v27 = vpack.c.bf16 %v13509_v26, %v13510_v8  ;;  %v13527_v3 = vld [vmem:[#allocation31_spill] sm:$0xff] }
 0x78d   :  { %13507 = vst [vmem:[#allocation59_spill] sm:$0xff] %v11264_v41 }
 0x790   :  { %v4406_v5 = vpop.f32.mrf.mxu2  ;;  %v11268_v61 = vpop.f32.mrf.mxu0 }
 0x791   :  { %v4495_v15 = vpop.f32.mrf.mxu3  ;;  %v4407_v35 = vadd.f32 %v4406_v5, %v4318_v43  ;;  %v4320_v44 = vpop.f32.mrf.mxu1 }
 0x792   :  { %v4321_v9 = vadd.f32 %v4320_v44, %v4232_v4 }
 0x793   :  { %v11270_v55 = vadd.f32 %v4495_v15, %v4407_v35  ;;  %5546 = vmatmul.bf16.gmra.mxu0 %v13511_v27  ;;  %v4237_v15 = vadd.f32 %v10993_v28, %v11100_v33  ;;  %v13515_v27 = vld [vmem:[#allocation65_spill] sm:$0xff] }
 0x794   :  { %4635 = vmatmul.bf16.gmra.mxu1 %v9170_v21  ;;  %v8668_v28 = vld [vmem:[#allocation8 + $0xa8] sm:$0xff] }
 0x795   :  { %13508 = vst [vmem:[#allocation56_spill] sm:$0xff] %v11270_v55  ;;  %4724 = vmatmul.bf16.gmra.mxu2 %v9172_v22 }
 0x796   :  { %4813 = vmatmul.bf16.gmra.mxu3 %v9174_v23  ;;  %5713 = vmatpush.bf16.msrb.mxu2 %v8668_v28 }
 0x798   :  { %v4409_v30 = vpop.f32.mrf.mxu2  ;;  %v11282_v4 = vpop.f32.mrf.mxu0 }
 0x799   :  { %v4498_v60 = vpop.f32.mrf.mxu3  ;;  %v4410_v43 = vadd.f32 %v4409_v30, %v4321_v9  ;;  %v4322_v54 = vpop.f32.mrf.mxu1  ;;  %v13514_v9 = vld [vmem:[#allocation69_spill] sm:$0xff] }
 0x79a   :  { %v4323_v21 = vadd.f32 %v4322_v54, %v4234_v38  ;;  %v13516_v30 = vpack.c.bf16 %v13514_v9, %v13515_v27 }
 0x79b   :  { %v11284_v5 = vadd.f32 %v4498_v60, %v4410_v43  ;;  %v8676_v60 = vld [vmem:[#allocation8 + $0xe8] sm:$0xff]  ;;  %v4239_v43 = vadd.f32 %v11005_v0, %v11100_v33 }
 0x79c   :  { %5802 = vmatpush.bf16.msrb.mxu3 %v8676_v60 }
 0x79d   :  { %13512 = vst [vmem:[#allocation64_spill] sm:$0xff] %v11284_v5 }
 0x7a0   :  { %v4411_v35 = vpop.f32.mrf.mxu2  ;;  %v11288_v23 = vpop.f32.mrf.mxu0 }
 0x7a1   :  { %v4500_v44 = vpop.f32.mrf.mxu3  ;;  %v4412_v22 = vadd.f32 %v4411_v35, %v4323_v21  ;;  %v4325_v26 = vpop.f32.mrf.mxu1 }
 0x7a2   :  { %v4326_v8 = vadd.f32 %v4325_v26, %v4237_v15  ;;  %v8660_v26 = vld [vmem:[#allocation8 + $0x68] sm:$0xff] }
 0x7a3   :  { %v11290_v50 = vadd.f32 %v4500_v44, %v4412_v22  ;;  %5551 = vmatmul.bf16.gmra.mxu0 %v13516_v30  ;;  %5624 = vmatpush.bf16.msrb.mxu1 %v8660_v26 }
 0x7a4   :  { %4640 = vmatmul.bf16.gmra.mxu1 %v9180_v34 }
 0x7a5   :  { %13513 = vst [vmem:[#allocation60_spill] sm:$0xff] %v11290_v50  ;;  %4729 = vmatmul.bf16.gmra.mxu2 %v13415_v57  ;;  %v4242_v57 = vadd.f32 %v11011_v62, %v11100_v33  ;;  %v13523_v62 = vld [vmem:[#allocation30_spill] sm:$0xff]  ;;  %v13574_v50 = vld [vmem:[#allocation61_spill] sm:$0xff] }
 0x7a6   :  { %4818 = vmatmul.bf16.gmra.mxu3 %v13416_v42 }
 0x7a8   :  { %v4414_v54 = vpop.f32.mrf.mxu2  ;;  %v11302_v35 = vpop.f32.mrf.mxu0 }
 0x7a9   :  { %v4503_v34 = vpop.f32.mrf.mxu3  ;;  %v4415_v21 = vadd.f32 %v4414_v54, %v4326_v8  ;;  %v4327_v15 = vpop.f32.mrf.mxu1  ;;  %v13519_v8 = vld [vmem:[#allocation74_spill] sm:$0xff] }
 0x7aa   :  { %v4328_v44 = vadd.f32 %v4327_v15, %v4239_v43  ;;  %v13520_v43 = vld [vmem:[#allocation70_spill] sm:$0xff]  ;;  %v4244_v15 = vadd.f32 %v11023_v7, %v11100_v33 }
 0x7ab   :  { %v11304_v22 = vadd.f32 %v4503_v34, %v4415_v21  ;;  %v13521_v54 = vpack.c.bf16 %v13519_v8, %v13520_v43  ;;  %v13522_v21 = vld [vmem:[#allocation29_spill] sm:$0xff] }
 0x7ad   :  { %13517 = vst [vmem:[#allocation69_spill] sm:$0xff] %v11304_v22 }
 0x7b0   :  { %v4416_v42 = vpop.f32.mrf.mxu2  ;;  %v11308_v28 = vpop.f32.mrf.mxu0 }
 0x7b1   :  { %v4505_v9 = vpop.f32.mrf.mxu3  ;;  %v4417_v27 = vadd.f32 %v4416_v42, %v4328_v44  ;;  %v4330_v30 = vpop.f32.mrf.mxu1 }
 0x7b2   :  { %v4331_v0 = vadd.f32 %v4330_v30, %v4242_v57  ;;  %v13525_v30 = vld [vmem:[#allocation28_spill] sm:$0xff] }
 0x7b3   :  { %v11310_v60 = vadd.f32 %v4505_v9, %v4417_v27  ;;  %5556 = vmatmul.bf16.gmra.mxu0 %v13521_v54  ;;  %v4247_v8 = vadd.f32 %v13525_v30, %v11100_v33 }
 0x7b4   :  { %4645 = vmatmul.bf16.gmra.mxu1 %v13420_v46 }
 0x7b5   :  { %13518 = vst [vmem:[#allocation65_spill] sm:$0xff] %v11310_v60  ;;  %4734 = vmatmul.bf16.gmra.mxu2 %v13522_v21 }
 0x7b6   :  { %4823 = vmatmul.bf16.gmra.mxu3 %v13523_v62 }
 0x7b8   :  { %v4419_v44 = vpop.f32.mrf.mxu2  ;;  %v11322_v9 = vpop.f32.mrf.mxu0 }
 0x7b9   :  { %v4508_v26 = vpop.f32.mrf.mxu3  ;;  %v4420_v57 = vadd.f32 %v4419_v44, %v4331_v0  ;;  %v4332_v42 = vpop.f32.mrf.mxu1  ;;  %v13528_v0 = vld [vmem:[#allocation79_spill] sm:$0xff]  ;;  %v13529_v44 = vld [vmem:[#allocation76_spill] sm:$0xff] }
 0x7ba   :  { %v4333_v46 = vadd.f32 %v4332_v42, %v4244_v15  ;;  %v13530_v49 = vpack.c.bf16 %v13528_v0, %v13529_v44  ;;  %v8667_v42 = vld [vmem:[#allocation8 + $0xa0] sm:$0xff]  ;;  %v4252_v44 = vadd.f32 %v11047_v31, %v11100_v33  ;;  %v13540_v31 = vld [vmem:[#allocation38_spill] sm:$0xff] }
 0x7bb   :  { %v11324_v27 = vadd.f32 %v4508_v26, %v4420_v57  ;;  %v13531_v26 = vld [vmem:[#allocation32_spill] sm:$0xff]  ;;  %v13532_v57 = vld [vmem:[#allocation33_spill] sm:$0xff]  ;;  %5714 = vmatpush.bf16.msrb.mxu2 %v8667_v42 }
 0x7bc   :  { %v8659_v0 = vld [vmem:[#allocation8 + $0x60] sm:$0xff] }
 0x7bd   :  { %13524 = vst [vmem:[#allocation74_spill] sm:$0xff] %v11324_v27  ;;  %5625 = vmatpush.bf16.msrb.mxu1 %v8659_v0 }
 0x7c0   :  { %v4421_v43 = vpop.f32.mrf.mxu2  ;;  %v11328_v62 = vpop.f32.mrf.mxu0 }
 0x7c1   :  { %v4510_v54 = vpop.f32.mrf.mxu3  ;;  %v4422_v21 = vadd.f32 %v4421_v43, %v4333_v46  ;;  %v4335_v34 = vpop.f32.mrf.mxu1  ;;  %v8675_v46 = vld [vmem:[#allocation8 + $0xe0] sm:$0xff] }
 0x7c2   :  { %v4336_v38 = vadd.f32 %v4335_v34, %v4247_v8  ;;  %5803 = vmatpush.bf16.msrb.mxu3 %v8675_v46  ;;  %v4249_v34 = vadd.f32 %v11041_v6, %v11100_v33 }
 0x7c3   :  { %v11330_v7 = vadd.f32 %v4510_v54, %v4422_v21  ;;  %5561 = vmatmul.bf16.gmra.mxu0 %v13530_v49 }
 0x7c4   :  { %4650 = vmatmul.bf16.gmra.mxu1 %v13527_v3 }
 0x7c5   :  { %13526 = vst [vmem:[#allocation70_spill] sm:$0xff] %v11330_v7  ;;  %4739 = vmatmul.bf16.gmra.mxu2 %v13531_v26  ;;  %v13544_v7 = vld [vmem:[#allocation40_spill] sm:$0xff] }
 0x7c6   :  { %4828 = vmatmul.bf16.gmra.mxu3 %v13532_v57 }
 0x7c8   :  { %v4424_v30 = vpop.f32.mrf.mxu2  ;;  %v11342_v54 = vpop.f32.mrf.mxu0 }
 0x7c9   :  { %v4513_v3 = vpop.f32.mrf.mxu3  ;;  %v4425_v8 = vadd.f32 %v4424_v30, %v4336_v38  ;;  %v4337_v43 = vpop.f32.mrf.mxu1  ;;  %v13535_v38 = vld [vmem:[#allocation35_spill] sm:$0xff] }
 0x7ca   :  { %v4338_v49 = vadd.f32 %v4337_v43, %v4249_v34  ;;  %v13536_v30 = vld [vmem:[#allocation83_spill] sm:$0xff]  ;;  %v13537_v34 = vld [vmem:[#allocation81_spill] sm:$0xff] }
 0x7cb   :  { %v11344_v21 = vadd.f32 %v4513_v3, %v4425_v8  ;;  %v13538_v3 = vpack.c.bf16 %v13536_v30, %v13537_v34  ;;  %v13539_v43 = vld [vmem:[#allocation37_spill] sm:$0xff]  ;;  %v13542_v30 = vld [vmem:[#allocation100_spill] sm:$0xff] }
 0x7cc   :  { %v4257_v34 = vadd.f32 %v13542_v30, %v11100_v33 }
 0x7cd   :  { %13533 = vst [vmem:[#allocation29_spill] sm:$0xff] %v11344_v21 }
 0x7d0   :  { %v4426_v26 = vpop.f32.mrf.mxu2  ;;  %v11348_v15 = vpop.f32.mrf.mxu0 }
 0x7d1   :  { %v4515_v57 = vpop.f32.mrf.mxu3  ;;  %v4427_v42 = vadd.f32 %v4426_v26, %v4338_v49  ;;  %v4340_v46 = vpop.f32.mrf.mxu1  ;;  %v4254_v49 = vadd.f32 %v11059_v32, %v11100_v33 }
 0x7d2   :  { %v4341_v6 = vadd.f32 %v4340_v46, %v4252_v44 }
 0x7d3   :  { %v11350_v27 = vadd.f32 %v4515_v57, %v4427_v42  ;;  %5566 = vmatmul.bf16.gmra.mxu0 %v13538_v3 }
 0x7d4   :  { %4655 = vmatmul.bf16.gmra.mxu1 %v13535_v38 }
 0x7d5   :  { %13534 = vst [vmem:[#allocation30_spill] sm:$0xff] %v11350_v27  ;;  %4744 = vmatmul.bf16.gmra.mxu2 %v13539_v43 }
 0x7d6   :  { %4833 = vmatmul.bf16.gmra.mxu3 %v13540_v31 }
 0x7d8   :  { %v4429_v0 = vpop.f32.mrf.mxu2  ;;  %v11362_v42 = vpop.f32.mrf.mxu0 }
 0x7d9   :  { %v4518_v44 = vpop.f32.mrf.mxu3  ;;  %v4430_v26 = vadd.f32 %v4429_v0, %v4341_v6  ;;  %v4342_v57 = vpop.f32.mrf.mxu1  ;;  %v13545_v6 = vld [vmem:[#allocation86_spill] sm:$0xff]  ;;  %v13546_v0 = vld [vmem:[#allocation85_spill] sm:$0xff] }
 0x7da   :  { %v4343_v46 = vadd.f32 %v4342_v57, %v4254_v49  ;;  %v13547_v22 = vpack.c.bf16 %v13545_v6, %v13546_v0  ;;  %v8666_v57 = vld [vmem:[#allocation8 + $0x98] sm:$0xff]  ;;  %v4262_v0 = vadd.f32 %v11083_v12, %v11100_v33  ;;  %v13557_v12 = vld [vmem:[#allocation48_spill] sm:$0xff] }
 0x7db   :  { %v11364_v38 = vadd.f32 %v4518_v44, %v4430_v26  ;;  %v13548_v44 = vld [vmem:[#allocation42_spill] sm:$0xff]  ;;  %v13549_v26 = vld [vmem:[#allocation43_spill] sm:$0xff]  ;;  %5715 = vmatpush.bf16.msrb.mxu2 %v8666_v57 }
 0x7dc   :  { %v8658_v6 = vld [vmem:[#allocation8 + $0x58] sm:$0xff] }
 0x7dd   :  { %13541 = vst [vmem:[#allocation28_spill] sm:$0xff] %v11364_v38  ;;  %5626 = vmatpush.bf16.msrb.mxu1 %v8658_v6  ;;  %v13558_v6 = vld [vmem:[#allocation24_spill] sm:$0xff] }
 0x7e0   :  { %v4431_v3 = vpop.f32.mrf.mxu2  ;;  %v11368_v31 = vpop.f32.mrf.mxu0 }
 0x7e1   :  { %v4520_v8 = vpop.f32.mrf.mxu3  ;;  %v4432_v43 = vadd.f32 %v4431_v3, %v4343_v46  ;;  %v4345_v21 = vpop.f32.mrf.mxu1  ;;  %v8674_v46 = vld [vmem:[#allocation8 + $0xd8] sm:$0xff] }
 0x7e2   :  { %v4346_v27 = vadd.f32 %v4345_v21, %v4257_v34  ;;  %5804 = vmatpush.bf16.msrb.mxu3 %v8674_v46  ;;  %v4259_v21 = vadd.f32 %v11077_v18, %v11100_v33 }
 0x7e3   :  { %v11370_v32 = vadd.f32 %v4520_v8, %v4432_v43  ;;  %5571 = vmatmul.bf16.gmra.mxu0 %v13547_v22 }
 0x7e4   :  { %4660 = vmatmul.bf16.gmra.mxu1 %v13544_v7 }
 0x7e5   :  { %13543 = vst [vmem:[#allocation31_spill] sm:$0xff] %v11370_v32  ;;  %4749 = vmatmul.bf16.gmra.mxu2 %v13548_v44 }
 0x7e6   :  { %4838 = vmatmul.bf16.gmra.mxu3 %v13549_v26 }
 0x7e8   :  { %v4434_v8 = vpop.f32.mrf.mxu2  ;;  %v11382_v3 = vpop.f32.mrf.mxu0 }
 0x7e9   :  { %v4523_v7 = vpop.f32.mrf.mxu3  ;;  %v4435_v30 = vadd.f32 %v4434_v8, %v4346_v27  ;;  %v4347_v34 = vpop.f32.mrf.mxu1  ;;  %v13552_v27 = vld [vmem:[#allocation45_spill] sm:$0xff]  ;;  %v13553_v8 = vld [vmem:[#allocation88_spill] sm:$0xff] }
 0x7ea   :  { %v4348_v22 = vadd.f32 %v4347_v34, %v4259_v21  ;;  %v13554_v21 = vld [vmem:[#allocation87_spill] sm:$0xff] }
 0x7eb   :  { %v11384_v43 = vadd.f32 %v4523_v7, %v4435_v30  ;;  %v13555_v7 = vpack.c.bf16 %v13553_v8, %v13554_v21  ;;  %v13556_v34 = vld [vmem:[#allocation47_spill] sm:$0xff] }
 0x7ed   :  { %13550 = vst [vmem:[#allocation79_spill] sm:$0xff] %v11384_v43 }
 0x7f0   :  { %v4436_v44 = vpop.f32.mrf.mxu2  ;;  %v11388_v49 = vpop.f32.mrf.mxu0 }
 0x7f1   :  { %v4525_v26 = vpop.f32.mrf.mxu3  ;;  %v4437_v57 = vadd.f32 %v4436_v44, %v4348_v22  ;;  %v4350_v46 = vpop.f32.mrf.mxu1  ;;  %v8686_v22 = vld [vmem:[#allocation8 + $0x138] sm:$0xff] }
 0x7f2   :  { %v4351_v18 = vadd.f32 %v4350_v46, %v4262_v0  ;;  %5889 = vmatpush.bf16.msrb.mxu0 %v8686_v22  ;;  %v4264_v0 = vadd.f32 %v13558_v6, %v11100_v33 }
 0x7f3   :  { %v11390_v38 = vadd.f32 %v4525_v26, %v4437_v57  ;;  %5576 = vmatmul.bf16.gmra.mxu0 %v13555_v7  ;;  %v8890_v7 = vld [vmem:[#allocation7] sm:$0xff] }
 0x7f4   :  { %4665 = vmatmul.bf16.gmra.mxu1 %v13552_v27  ;;  %v11406_v30 = vperm.slane %v8890_v7, 7  ;;  %v13566_v7 = vld [vmem:[#allocation54_spill] sm:$0xff] }
 0x7f5   :  { %13551 = vst [vmem:[#allocation76_spill] sm:$0xff] %v11390_v38  ;;  %4754 = vmatmul.bf16.gmra.mxu2 %v13556_v34  ;;  %v13560_v34 = vld [vmem:[#allocation226_spill] sm:$0xff] }
 0x7f6   :  { %4843 = vmatmul.bf16.gmra.mxu3 %v13557_v12  ;;  %v4543_v12 = vadd.f32 %v13560_v34, %v11406_v30  ;;  %v13567_v34 = vld [vmem:[#allocation55_spill] sm:$0xff] }
 0x7f8   :  { %v4439_v44 = vpop.f32.mrf.mxu2  ;;  %v11402_v27 = vpop.f32.mrf.mxu0 }
 0x7f9   :  { %v4528_v26 = vpop.f32.mrf.mxu3  ;;  %v4440_v57 = vadd.f32 %v4439_v44, %v4351_v18  ;;  %v4352_v46 = vpop.f32.mrf.mxu1  ;;  %v13562_v44 = vld [vmem:[#allocation50_spill] sm:$0xff] }
 0x7fa   :  { %v4353_v8 = vadd.f32 %v4352_v46, %v4264_v0  ;;  %v13563_v0 = vld [vmem:[#allocation90_spill] sm:$0xff] }
 0x7fb   :  { %v11404_v21 = vadd.f32 %v4528_v26, %v4440_v57  ;;  %v13564_v26 = vld [vmem:[#allocation89_spill] sm:$0xff]  ;;  %v8657_v46 = vld [vmem:[#allocation8 + $0x50] sm:$0xff] }
 0x7fc   :  { %v13565_v57 = vpack.c.bf16 %v13563_v0, %v13564_v26  ;;  %5627 = vmatpush.bf16.msrb.mxu1 %v8657_v46 }
 0x7fd   :  { %13559 = vst [vmem:[#allocation32_spill] sm:$0xff] %v11404_v21 }
 0x800   :  { %v4441_v43 = vpop.f32.mrf.mxu2  ;;  %v11410_v33 = vpop.f32.mrf.mxu0 }
 0x801   :  { %v4530_v22 = vpop.f32.mrf.mxu3  ;;  %v4442_v38 = vadd.f32 %v4441_v43, %v4353_v8  ;;  %v4631_v32 = vpop.f32.mrf.mxu1  ;;  %v8665_v43 = vld [vmem:[#allocation8 + $0x90] sm:$0xff] }
 0x802   :  { %v4632_v6 = vadd.f32 %v4631_v32, %v4543_v12  ;;  %v8673_v8 = vld [vmem:[#allocation8 + $0xd0] sm:$0xff]  ;;  %5716 = vmatpush.bf16.msrb.mxu2 %v8665_v43 }
 0x803   :  { %v11412_v18 = vadd.f32 %v4530_v22, %v4442_v38  ;;  %5581 = vmatmul.bf16.gmra.mxu0 %v13565_v57  ;;  %5805 = vmatpush.bf16.msrb.mxu3 %v8673_v8  ;;  %v4545_v38 = vadd.f32 %v11116_v58, %v11406_v30 }
 0x804   :  { %4670 = vmatmul.bf16.gmra.mxu1 %v13562_v44 }
 0x805   :  { %13561 = vst [vmem:[#allocation33_spill] sm:$0xff] %v11412_v18  ;;  %4759 = vmatmul.bf16.gmra.mxu2 %v13566_v7  ;;  %v4548_v7 = vadd.f32 %v11122_v24, %v11406_v30  ;;  %v13571_v24 = vld [vmem:[#allocation58_spill] sm:$0xff] }
 0x806   :  { %4848 = vmatmul.bf16.gmra.mxu3 %v13567_v34 }
 0x808   :  { %v4720_v32 = vpop.f32.mrf.mxu2  ;;  %v11424_v0 = vpop.f32.mrf.mxu0 }
 0x809   :  { %v4809_v12 = vpop.f32.mrf.mxu3  ;;  %v4721_v22 = vadd.f32 %v4720_v32, %v4632_v6  ;;  %v4633_v44 = vpop.f32.mrf.mxu1  ;;  %v13568_v6 = vld [vmem:[#allocation92_spill] sm:$0xff] }
 0x80a   :  { %v4634_v26 = vadd.f32 %v4633_v44, %v4545_v38  ;;  %v13569_v38 = vld [vmem:[#allocation91_spill] sm:$0xff] }
 0x80b   :  { %v11426_v57 = vadd.f32 %v4809_v12, %v4721_v22  ;;  %v13570_v32 = vpack.c.bf16 %v13568_v6, %v13569_v38  ;;  %v8685_v12 = vld [vmem:[#allocation8 + $0x130] sm:$0xff]  ;;  %v13573_v6 = vld [vmem:[#allocation108_spill] sm:$0xff] }
 0x80c   :  { %5890 = vmatpush.bf16.msrb.mxu0 %v8685_v12  ;;  %v13572_v22 = vld [vmem:[#allocation230_spill] sm:$0xff]  ;;  %v4553_v38 = vadd.f32 %v13573_v6, %v11406_v30 }
 0x810   :  { %v4722_v34 = vpop.f32.mrf.mxu2  ;;  %v11430_v18 = vpop.f32.mrf.mxu0 }
 0x811   :  { %v4811_v43 = vpop.f32.mrf.mxu3  ;;  %v4723_v8 = vadd.f32 %v4722_v34, %v4634_v26  ;;  %v4636_v21 = vpop.f32.mrf.mxu1 }
 0x812   :  { %v4637_v58 = vadd.f32 %v4636_v21, %v4548_v7  ;;  %v4550_v21 = vadd.f32 %v13572_v22, %v11406_v30 }
 0x813   :  { %v11432_v60 = vadd.f32 %v4811_v43, %v4723_v8  ;;  %5586 = vmatmul.bf16.gmra.mxu0 %v13570_v32 }
 0x814   :  { %4675 = vmatmul.bf16.gmra.mxu1 %v9352_v25 }
 0x815   :  { %4764 = vmatmul.bf16.gmra.mxu2 %v12995_v29 }
 0x816   :  { %4853 = vmatmul.bf16.gmra.mxu3 %v13571_v24 }
 0x818   :  { %v4725_v44 = vpop.f32.mrf.mxu2  ;;  %v11444_v34 = vpop.f32.mrf.mxu0 }
 0x819   :  { %v4814_v26 = vpop.f32.mrf.mxu3  ;;  %v4726_v7 = vadd.f32 %v4725_v44, %v4637_v58  ;;  %v4638_v25 = vpop.f32.mrf.mxu1  ;;  %v13575_v58 = vld [vmem:[#allocation94_spill] sm:$0xff]  ;;  %v13576_v44 = vld [vmem:[#allocation93_spill] sm:$0xff] }
 0x81a   :  { %v4639_v43 = vadd.f32 %v4638_v25, %v4550_v21  ;;  %v13577_v41 = vpack.c.bf16 %v13575_v58, %v13576_v44  ;;  %v8664_v25 = vld [vmem:[#allocation8 + $0x88] sm:$0xff]  ;;  %v13581_v44 = vld [vmem:[#allocation200_spill] sm:$0xff] }
 0x81b   :  { %v11446_v8 = vadd.f32 %v4814_v26, %v4726_v7  ;;  %v13578_v26 = vld [vmem:[#allocation62_spill] sm:$0xff]  ;;  %v13579_v7 = vld [vmem:[#allocation63_spill] sm:$0xff]  ;;  %5717 = vmatpush.bf16.msrb.mxu2 %v8664_v25  ;;  %v8656_v58 = vld [vmem:[#allocation8 + $0x48] sm:$0xff] }
 0x81c   :  { %5628 = vmatpush.bf16.msrb.mxu1 %v8656_v58  ;;  %v13587_v58 = vld [vmem:[#allocation68_spill] sm:$0xff] }
 0x820   :  { %v4727_v29 = vpop.f32.mrf.mxu2  ;;  %v11450_v12 = vpop.f32.mrf.mxu0 }
 0x821   :  { %v4816_v32 = vpop.f32.mrf.mxu3  ;;  %v4728_v24 = vadd.f32 %v4727_v29, %v4639_v43  ;;  %v4641_v46 = vpop.f32.mrf.mxu1  ;;  %v8672_v43 = vld [vmem:[#allocation8 + $0xc8] sm:$0xff] }
 0x822   :  { %v4642_v5 = vadd.f32 %v4641_v46, %v4553_v38  ;;  %5806 = vmatpush.bf16.msrb.mxu3 %v8672_v43  ;;  %v4555_v46 = vadd.f32 %v11152_v17, %v11406_v30 }
 0x823   :  { %v11452_v22 = vadd.f32 %v4816_v32, %v4728_v24  ;;  %5591 = vmatmul.bf16.gmra.mxu0 %v13577_v41 }
 0x824   :  { %4680 = vmatmul.bf16.gmra.mxu1 %v13574_v50 }
 0x825   :  { %4769 = vmatmul.bf16.gmra.mxu2 %v13578_v26  ;;  %v4558_v26 = vadd.f32 %v13581_v44, %v11406_v30 }
 0x826   :  { %4858 = vmatmul.bf16.gmra.mxu3 %v13579_v7 }
 0x828   :  { %v4730_v6 = vpop.f32.mrf.mxu2  ;;  %v11464_v32 = vpop.f32.mrf.mxu0 }
 0x829   :  { %v4819_v50 = vpop.f32.mrf.mxu3  ;;  %v4731_v38 = vadd.f32 %v4730_v6, %v4642_v5  ;;  %v4643_v29 = vpop.f32.mrf.mxu1  ;;  %v13582_v5 = vld [vmem:[#allocation66_spill] sm:$0xff] }
 0x82a   :  { %v4644_v41 = vadd.f32 %v4643_v29, %v4555_v46  ;;  %v13583_v6 = vld [vmem:[#allocation34_spill] sm:$0xff]  ;;  %v13584_v46 = vld [vmem:[#allocation51_spill] sm:$0xff] }
 0x82b   :  { %v11466_v24 = vadd.f32 %v4819_v50, %v4731_v38  ;;  %v13585_v50 = vpack.c.bf16 %v13583_v6, %v13584_v46  ;;  %v13586_v29 = vld [vmem:[#allocation67_spill] sm:$0xff]  ;;  %v13589_v46 = vld [vmem:[#allocation112_spill] sm:$0xff] }
 0x82d   :  { %13580 = vst [vmem:[#allocation35_spill] sm:$0xff] %v11466_v24 }
 0x830   :  { %v4732_v7 = vpop.f32.mrf.mxu2  ;;  %v11470_v55 = vpop.f32.mrf.mxu0 }
 0x831   :  { %v4821_v25 = vpop.f32.mrf.mxu3  ;;  %v4733_v43 = vadd.f32 %v4732_v7, %v4644_v41  ;;  %v4646_v21 = vpop.f32.mrf.mxu1  ;;  %v8684_v41 = vld [vmem:[#allocation8 + $0x128] sm:$0xff] }
 0x832   :  { %v4647_v17 = vadd.f32 %v4646_v21, %v4558_v26  ;;  %5891 = vmatpush.bf16.msrb.mxu0 %v8684_v41  ;;  %v4560_v21 = vadd.f32 %v11170_v48, %v11406_v30 }
 0x833   :  { %v11472_v1 = vadd.f32 %v4821_v25, %v4733_v43  ;;  %5596 = vmatmul.bf16.gmra.mxu0 %v13585_v50  ;;  %v4563_v50 = vadd.f32 %v13589_v46, %v11406_v30 }
 0x834   :  { %4685 = vmatmul.bf16.gmra.mxu1 %v13582_v5 }
 0x835   :  { %4774 = vmatmul.bf16.gmra.mxu2 %v13586_v29 }
 0x836   :  { %4863 = vmatmul.bf16.gmra.mxu3 %v13587_v58 }
 0x838   :  { %v4735_v44 = vpop.f32.mrf.mxu2  ;;  %v11484_v43 = vpop.f32.mrf.mxu0 }
 0x839   :  { %v4824_v26 = vpop.f32.mrf.mxu3  ;;  %v4736_v7 = vadd.f32 %v4735_v44, %v4647_v17  ;;  %v4648_v25 = vpop.f32.mrf.mxu1  ;;  %v13591_v17 = vld [vmem:[#allocation39_spill] sm:$0xff]  ;;  %v13592_v44 = vld [vmem:[#allocation36_spill] sm:$0xff] }
 0x83a   :  { %v4649_v5 = vadd.f32 %v4648_v25, %v4560_v21  ;;  %v13593_v24 = vpack.c.bf16 %v13591_v17, %v13592_v44  ;;  %v8663_v25 = vld [vmem:[#allocation8 + $0x80] sm:$0xff]  ;;  %v4568_v44 = vadd.f32 %v11194_v56, %v11406_v30 }
 0x83b   :  { %v11486_v6 = vadd.f32 %v4824_v26, %v4736_v7  ;;  %v13594_v26 = vld [vmem:[#allocation72_spill] sm:$0xff]  ;;  %v13595_v7 = vld [vmem:[#allocation73_spill] sm:$0xff]  ;;  %5718 = vmatpush.bf16.msrb.mxu2 %v8663_v25 }
 0x83c   :  { %v8655_v17 = vld [vmem:[#allocation8 + $0x40] sm:$0xff] }
 0x83d   :  { %13588 = vst [vmem:[#allocation83_spill] sm:$0xff] %v11486_v6  ;;  %5629 = vmatpush.bf16.msrb.mxu1 %v8655_v17  ;;  %v8683_v25 = vld [vmem:[#allocation8 + $0x120] sm:$0xff] }
 0x83e   :  { %5892 = vmatpush.bf16.msrb.mxu0 %v8683_v25 }
 0x840   :  { %v4737_v29 = vpop.f32.mrf.mxu2  ;;  %v11490_v41 = vpop.f32.mrf.mxu0 }
 0x841   :  { %v4826_v38 = vpop.f32.mrf.mxu3  ;;  %v4738_v58 = vadd.f32 %v4737_v29, %v4649_v5  ;;  %v4651_v47 = vpop.f32.mrf.mxu1  ;;  %v8671_v5 = vld [vmem:[#allocation8 + $0xc0] sm:$0xff] }
 0x842   :  { %v4652_v53 = vadd.f32 %v4651_v47, %v4563_v50  ;;  %5807 = vmatpush.bf16.msrb.mxu3 %v8671_v5  ;;  %v4565_v47 = vadd.f32 %v11188_v59, %v11406_v30 }
 0x843   :  { %v11492_v48 = vadd.f32 %v4826_v38, %v4738_v58  ;;  %5601 = vmatmul.bf16.gmra.mxu0 %v13593_v24 }
 0x844   :  { %4690 = vmatmul.bf16.gmra.mxu1 %v13590_v40 }
 0x845   :  { %4779 = vmatmul.bf16.gmra.mxu2 %v13594_v26 }
 0x846   :  { %4868 = vmatmul.bf16.gmra.mxu3 %v13595_v7 }
 0x848   :  { %v4740_v38 = vpop.f32.mrf.mxu2  ;;  %v11504_v29 = vpop.f32.mrf.mxu0 }
 0x849   :  { %v4829_v40 = vpop.f32.mrf.mxu3  ;;  %v4741_v46 = vadd.f32 %v4740_v38, %v4652_v53  ;;  %v4653_v50 = vpop.f32.mrf.mxu1  ;;  %v13597_v38 = vld [vmem:[#allocation41_spill] sm:$0xff] }
 0x84a   :  { %v4654_v24 = vadd.f32 %v4653_v50, %v4565_v47  ;;  %v13596_v47 = vld [vmem:[#allocation44_spill] sm:$0xff]  ;;  %v13599_v50 = vld [vmem:[#allocation78_spill] sm:$0xff] }
 0x84b   :  { %v11506_v58 = vadd.f32 %v4829_v40, %v4741_v46  ;;  %v13598_v40 = vpack.c.bf16 %v13596_v47, %v13597_v38  ;;  %v8682_v46 = vld [vmem:[#allocation8 + $0x118] sm:$0xff]  ;;  %v8680_v47 = vld [vmem:[#allocation8 + $0x108] sm:$0xff] }
 0x84c   :  { %5893 = vmatpush.bf16.msrb.mxu0 %v8682_v46  ;;  %v8679_v46 = vld [vmem:[#allocation8 + $0x100] sm:$0xff] }
 0x850   :  { %v4742_v26 = vpop.f32.mrf.mxu2  ;;  %v11510_v59 = vpop.f32.mrf.mxu0 }
 0x851   :  { %v4831_v7 = vpop.f32.mrf.mxu3  ;;  %v4743_v5 = vadd.f32 %v4742_v26, %v4654_v24  ;;  %v4656_v21 = vpop.f32.mrf.mxu1 }
 0x852   :  { %v4657_v6 = vadd.f32 %v4656_v21, %v4568_v44  ;;  %v4570_v21 = vadd.f32 %v11206_v20, %v11406_v30  ;;  %v8681_v44 = vld [vmem:[#allocation8 + $0x110] sm:$0xff] }
 0x853   :  { %v11512_v53 = vadd.f32 %v4831_v7, %v4743_v5  ;;  %5606 = vmatmul.bf16.gmra.mxu0 %v13598_v40 }
 0x854   :  { %4695 = vmatmul.bf16.gmra.mxu1 %v9444_v45  ;;  %5894 = vmatpush.bf16.msrb.mxu0 %v8681_v44 }
 0x855   :  { %4784 = vmatmul.bf16.gmra.mxu2 %v13496_v52  ;;  %v4573_v52 = vadd.f32 %v11212_v36, %v11406_v30  ;;  %v13618_v36 = vld [vmem:[#allocation166_spill] sm:$0xff] }
 0x856   :  { %4873 = vmatmul.bf16.gmra.mxu3 %v13599_v50 }
 0x858   :  { %v4745_v24 = vpop.f32.mrf.mxu2  ;;  %v11524_v7 = vpop.f32.mrf.mxu0  ;;  %5895 = vmatpush.bf16.msrb.mxu0 %v8680_v47 }
 0x859   :  { %v4834_v17 = vpop.f32.mrf.mxu3  ;;  %v4746_v45 = vadd.f32 %v4745_v24, %v4657_v6  ;;  %v4658_v26 = vpop.f32.mrf.mxu1 }
 0x85a   :  { %v4659_v25 = vadd.f32 %v4658_v26, %v4570_v21  ;;  %v13600_v21 = vld [vmem:[#allocation49_spill] sm:$0xff]  ;;  %v8710_v26 = vld [vmem:[#allocation8 + $0x1f8] sm:$0xff] }
 0x85b   :  { %v11526_v5 = vadd.f32 %v4834_v17, %v4746_v45  ;;  %v13601_v17 = vld [vmem:[#allocation46_spill] sm:$0xff]  ;;  %v8702_v45 = vld [vmem:[#allocation8 + $0x1b8] sm:$0xff]  ;;  %6156 = vmatpush.bf16.msra.mxu3 %v8710_v26 }
 0x85c   :  { %5896 = vmatpush.bf16.msrb.mxu0 %v8679_v46  ;;  %v13602_v44 = vpack.c.bf16 %v13600_v21, %v13601_v17  ;;  %6067 = vmatpush.bf16.msra.mxu2 %v8702_v45 }
 0x860   :  { %v4747_v38 = vpop.f32.mrf.mxu2  ;;  %v11530_v56 = vpop.f32.mrf.mxu0 }
 0x861   :  { %v4836_v40 = vpop.f32.mrf.mxu3  ;;  %v4748_v20 = vadd.f32 %v4747_v38, %v4659_v25  ;;  %v4661_v50 = vpop.f32.mrf.mxu1  ;;  %v4575_v25 = vadd.f32 %v11224_v16, %v11406_v30 }
 0x862   :  { %v4662_v6 = vadd.f32 %v4661_v50, %v4573_v52  ;;  %v8694_v50 = vld [vmem:[#allocation8 + $0x178] sm:$0xff] }
 0x863   :  { %v11532_v24 = vadd.f32 %v4836_v40, %v4748_v20  ;;  %5611 = vmatmul.bf16.gmra.mxu0 %v13602_v44  ;;  %5978 = vmatpush.bf16.msra.mxu1 %v8694_v50 }
 0x864   :  { %4700 = vmatmul.bf16.gmra.mxu1 %v9466_v14 }
 0x865   :  { %4789 = vmatmul.bf16.gmra.mxu2 %v9470_v11  ;;  %v4578_v11 = vadd.f32 %v11230_v63, %v11406_v30  ;;  %v4580_v63 = vadd.f32 %v11242_v10, %v11406_v30 }
 0x866   :  { %4878 = vmatmul.bf16.gmra.mxu3 %v13121_v37 }
 0x868   :  { %v4750_v47 = vpop.f32.mrf.mxu2  ;;  %v11544_v40 = vpop.f32.mrf.mxu0 }
 0x869   :  { %v4839_v14 = vpop.f32.mrf.mxu3  ;;  %v4751_v52 = vadd.f32 %v4750_v47, %v4662_v6  ;;  %v4663_v38 = vpop.f32.mrf.mxu1  ;;  %v13603_v6 = vld [vmem:[#allocation105_spill] sm:$0xff] }
 0x86a   :  { %v4664_v46 = vadd.f32 %v4663_v38, %v4575_v25  ;;  %v13604_v25 = vld [vmem:[#allocation52_spill] sm:$0xff] }
 0x86b   :  { %v11546_v20 = vadd.f32 %v4839_v14, %v4751_v52  ;;  %v13605_v47 = vpack.c.bf16 %v13603_v6, %v13604_v25  ;;  %v13611_v14 = vld [vmem:[#allocation196_spill] sm:$0xff] }
 0x870   :  { %v4752_v37 = vpop.f32.mrf.mxu2  ;;  %v11550_v45 = vpop.f32.mrf.mxu0 }
 0x871   :  { %v4841_v21 = vpop.f32.mrf.mxu3  ;;  %v4753_v17 = vadd.f32 %v4752_v37, %v4664_v46  ;;  %v4666_v44 = vpop.f32.mrf.mxu1 }
 0x872   :  { %v4667_v16 = vadd.f32 %v4666_v44, %v4578_v11 }
 0x873   :  { %v11552_v26 = vadd.f32 %v4841_v21, %v4753_v17  ;;  %5616 = vmatmul.bf16.gmra.mxu0 %v13605_v47  ;;  %v4583_v21 = vadd.f32 %v11248_v19, %v11406_v30  ;;  %v13608_v47 = vld [vmem:[#allocation107_spill] sm:$0xff] }
 0x874   :  { %4705 = vmatmul.bf16.gmra.mxu1 %v9488_v13 }
 0x875   :  { %4794 = vmatmul.bf16.gmra.mxu2 %v9492_v39 }
 0x876   :  { %4883 = vmatmul.bf16.gmra.mxu3 %v9494_v51 }
 0x878   :  { %v4755_v52 = vpop.f32.mrf.mxu2  ;;  %v11564_v11 = vpop.f32.mrf.mxu0 }
 0x879   :  { %v4844_v38 = vpop.f32.mrf.mxu3  ;;  %v4756_v46 = vadd.f32 %v4755_v52, %v4667_v16  ;;  %v4668_v50 = vpop.f32.mrf.mxu1  ;;  %v13609_v16 = vld [vmem:[#allocation106_spill] sm:$0xff] }
 0x87a   :  { %v4669_v13 = vadd.f32 %v4668_v50, %v4580_v63  ;;  %v13610_v52 = vpack.c.bf16 %v13608_v47, %v13609_v16  ;;  %v13612_v63 = vld [vmem:[#allocation195_spill] sm:$0xff] }
 0x87b   :  { %v11566_v37 = vadd.f32 %v4844_v38, %v4756_v46  ;;  %v13613_v38 = vpack.c.bf16 %v13611_v14, %v13612_v63  ;;  %v13614_v46 = vld [vmem:[#allocation136_spill] sm:$0xff]  ;;  %v13615_v50 = vld [vmem:[#allocation135_spill] sm:$0xff] }
 0x87d   :  { %13606 = vst [vmem:[#allocation81_spill] sm:$0xff] %v11566_v37 }
 0x880   :  { %v4757_v17 = vpop.f32.mrf.mxu2  ;;  %v11570_v51 = vpop.f32.mrf.mxu0 }
 0x881   :  { %v4846_v44 = vpop.f32.mrf.mxu3  ;;  %v4758_v39 = vadd.f32 %v4757_v17, %v4669_v13  ;;  %v4671_v6 = vpop.f32.mrf.mxu1  ;;  %v13616_v13 = vpack.c.bf16 %v13614_v46, %v13615_v50  ;;  %v13617_v17 = vld [vmem:[#allocation167_spill] sm:$0xff]  ;;  %v8693_v50 = vld [vmem:[#allocation8 + $0x170] sm:$0xff] }
 0x882   :  { %v4672_v25 = vadd.f32 %v4671_v6, %v4583_v21  ;;  %v13619_v21 = vpack.c.bf16 %v13617_v17, %v13618_v36  ;;  %v4585_v6 = vadd.f32 %v11262_v2, %v11406_v30  ;;  %5979 = vmatpush.bf16.msra.mxu1 %v8693_v50  ;;  %v4588_v36 = vadd.f32 %v11268_v61, %v11406_v30  ;;  %v13629_v50 = vld [vmem:[#allocation137_spill] sm:$0xff]  ;;  %v13636_v61 = vld [vmem:[#allocation111_spill] sm:$0xff] }
 0x883   :  { %v11572_v10 = vadd.f32 %v4846_v44, %v4758_v39  ;;  %5897 = vmatmul.bf16.vlgmr.msrb.gmra.mxu0 %v13613_v38  ;;  %v8701_v44 = vld [vmem:[#allocation8 + $0x1b0] sm:$0xff] }
 0x884   :  { %5630 = vmatmul.bf16.vlgmr.msrb.gmra.mxu1 %v13610_v52  ;;  %v8709_v39 = vld [vmem:[#allocation8 + $0x1f0] sm:$0xff]  ;;  %6068 = vmatpush.bf16.msra.mxu2 %v8701_v44 }
 0x885   :  { %13607 = vst [vmem:[#allocation37_spill] sm:$0xff] %v11572_v10  ;;  %5719 = vmatmul.bf16.vlgmr.msrb.gmra.mxu2 %v13616_v13  ;;  %6157 = vmatpush.bf16.msra.mxu3 %v8709_v39  ;;  %v13632_v10 = vld [vmem:[#allocation168_spill] sm:$0xff] }
 0x886   :  { %5808 = vmatmul.bf16.vlgmr.msrb.gmra.mxu3 %v13619_v21 }
 0x888   :  { %v4760_v14 = vpop.f32.mrf.mxu2  ;;  %v11590_v63 = vpop.f32.mrf.mxu0 }
 0x889   :  { %v4849_v47 = vpop.f32.mrf.mxu3  ;;  %v4761_v16 = vadd.f32 %v4760_v14, %v4672_v25  ;;  %v4673_v52 = vpop.f32.mrf.mxu1  ;;  %v13622_v25 = vld [vmem:[#allocation109_spill] sm:$0xff] }
 0x88a   :  { %v4674_v38 = vadd.f32 %v4673_v52, %v4585_v6  ;;  %v13623_v14 = vld [vmem:[#allocation57_spill] sm:$0xff]  ;;  %v13625_v6 = vld [vmem:[#allocation198_spill] sm:$0xff] }
 0x88b   :  { %v11592_v46 = vadd.f32 %v4849_v47, %v4761_v16  ;;  %v13624_v37 = vpack.c.bf16 %v13622_v25, %v13623_v14  ;;  %v13626_v47 = vld [vmem:[#allocation197_spill] sm:$0xff]  ;;  %v13628_v52 = vld [vmem:[#allocation138_spill] sm:$0xff] }
 0x88c   :  { %v13627_v16 = vpack.c.bf16 %v13625_v6, %v13626_v47 }
 0x88d   :  { %13620 = vst [vmem:[#allocation38_spill] sm:$0xff] %v11592_v46  ;;  %v13639_v46 = vld [vmem:[#allocation201_spill] sm:$0xff] }
 0x890   :  { %v4762_v13 = vpop.f32.mrf.mxu2  ;;  %v11596_v39 = vpop.f32.mrf.mxu0 }
 0x891   :  { %v4851_v17 = vpop.f32.mrf.mxu3  ;;  %v4763_v21 = vadd.f32 %v4762_v13, %v4674_v38  ;;  %v4676_v44 = vpop.f32.mrf.mxu1  ;;  %v13630_v38 = vpack.c.bf16 %v13628_v52, %v13629_v50  ;;  %v13631_v13 = vld [vmem:[#allocation169_spill] sm:$0xff] }
 0x892   :  { %v4677_v2 = vadd.f32 %v4676_v44, %v4588_v36  ;;  %v13633_v36 = vpack.c.bf16 %v13631_v13, %v13632_v10 }
 0x893   :  { %v11598_v19 = vadd.f32 %v4851_v17, %v4763_v21  ;;  %5902 = vmatmul.bf16.gmra.mxu0 %v13627_v16  ;;  %v4590_v17 = vadd.f32 %v11282_v4, %v11406_v30  ;;  %v4593_v16 = vadd.f32 %v11288_v23, %v11406_v30 }
 0x894   :  { %5635 = vmatmul.bf16.gmra.mxu1 %v13624_v37 }
 0x895   :  { %13621 = vst [vmem:[#allocation100_spill] sm:$0xff] %v11598_v19  ;;  %5724 = vmatmul.bf16.gmra.mxu2 %v13630_v38  ;;  %v13646_v19 = vld [vmem:[#allocation170_spill] sm:$0xff] }
 0x896   :  { %5813 = vmatmul.bf16.gmra.mxu3 %v13633_v36 }
 0x898   :  { %v4765_v21 = vpop.f32.mrf.mxu2  ;;  %v11616_v14 = vpop.f32.mrf.mxu0 }
 0x899   :  { %v4854_v37 = vpop.f32.mrf.mxu3  ;;  %v4766_v44 = vadd.f32 %v4765_v21, %v4677_v2  ;;  %v4678_v25 = vpop.f32.mrf.mxu1  ;;  %v13637_v2 = vld [vmem:[#allocation110_spill] sm:$0xff] }
 0x89a   :  { %v4679_v6 = vadd.f32 %v4678_v25, %v4590_v17  ;;  %v13638_v21 = vpack.c.bf16 %v13636_v61, %v13637_v2  ;;  %v13640_v17 = vld [vmem:[#allocation199_spill] sm:$0xff]  ;;  %v4595_v61 = vadd.f32 %v11302_v35, %v11406_v30 }
 0x89b   :  { %v11618_v47 = vadd.f32 %v4854_v37, %v4766_v44  ;;  %v13641_v37 = vpack.c.bf16 %v13639_v46, %v13640_v17  ;;  %v13642_v44 = vld [vmem:[#allocation140_spill] sm:$0xff]  ;;  %v13643_v25 = vld [vmem:[#allocation139_spill] sm:$0xff] }
 0x89d   :  { %13634 = vst [vmem:[#allocation40_spill] sm:$0xff] %v11618_v47 }
 0x8a0   :  { %v4767_v52 = vpop.f32.mrf.mxu2  ;;  %v11622_v13 = vpop.f32.mrf.mxu0 }
 0x8a1   :  { %v4856_v50 = vpop.f32.mrf.mxu3  ;;  %v4768_v38 = vadd.f32 %v4767_v52, %v4679_v6  ;;  %v4681_v10 = vpop.f32.mrf.mxu1  ;;  %v13644_v6 = vpack.c.bf16 %v13642_v44, %v13643_v25  ;;  %v13645_v52 = vld [vmem:[#allocation171_spill] sm:$0xff]  ;;  %v8692_v25 = vld [vmem:[#allocation8 + $0x168] sm:$0xff] }
 0x8a2   :  { %v4682_v36 = vadd.f32 %v4681_v10, %v4593_v16  ;;  %v13647_v16 = vpack.c.bf16 %v13645_v52, %v13646_v19  ;;  %5980 = vmatpush.bf16.msra.mxu1 %v8692_v25  ;;  %v4598_v19 = vadd.f32 %v11308_v28, %v11406_v30  ;;  %v13657_v25 = vld [vmem:[#allocation141_spill] sm:$0xff]  ;;  %v13664_v28 = vld [vmem:[#allocation116_spill] sm:$0xff] }
 0x8a3   :  { %v11624_v4 = vadd.f32 %v4856_v50, %v4768_v38  ;;  %5907 = vmatmul.bf16.gmra.mxu0 %v13641_v37  ;;  %v8700_v50 = vld [vmem:[#allocation8 + $0x1a8] sm:$0xff] }
 0x8a4   :  { %5640 = vmatmul.bf16.gmra.mxu1 %v13638_v21  ;;  %v8708_v38 = vld [vmem:[#allocation8 + $0x1e8] sm:$0xff]  ;;  %6069 = vmatpush.bf16.msra.mxu2 %v8700_v50 }
 0x8a5   :  { %13635 = vst [vmem:[#allocation86_spill] sm:$0xff] %v11624_v4  ;;  %5729 = vmatmul.bf16.gmra.mxu2 %v13644_v6  ;;  %6158 = vmatpush.bf16.msra.mxu3 %v8708_v38  ;;  %v13660_v4 = vld [vmem:[#allocation172_spill] sm:$0xff] }
 0x8a6   :  { %5818 = vmatmul.bf16.gmra.mxu3 %v13647_v16 }
 0x8a8   :  { %v4770_v46 = vpop.f32.mrf.mxu2  ;;  %v11642_v17 = vpop.f32.mrf.mxu0 }
 0x8a9   :  { %v4859_v10 = vpop.f32.mrf.mxu3  ;;  %v4771_v2 = vadd.f32 %v4770_v46, %v4682_v36  ;;  %v4683_v21 = vpop.f32.mrf.mxu1  ;;  %v13650_v36 = vld [vmem:[#allocation115_spill] sm:$0xff]  ;;  %v13651_v46 = vld [vmem:[#allocation113_spill] sm:$0xff] }
 0x8aa   :  { %v4684_v37 = vadd.f32 %v4683_v21, %v4595_v61  ;;  %v13652_v47 = vpack.c.bf16 %v13650_v36, %v13651_v46  ;;  %v13653_v61 = vld [vmem:[#allocation203_spill] sm:$0xff]  ;;  %v13656_v21 = vld [vmem:[#allocation142_spill] sm:$0xff] }
 0x8ab   :  { %v11644_v44 = vadd.f32 %v4859_v10, %v4771_v2  ;;  %v13654_v10 = vld [vmem:[#allocation202_spill] sm:$0xff] }
 0x8ac   :  { %v13655_v2 = vpack.c.bf16 %v13653_v61, %v13654_v10 }
 0x8ad   :  { %13648 = vst [vmem:[#allocation85_spill] sm:$0xff] %v11644_v44  ;;  %v13667_v44 = vld [vmem:[#allocation205_spill] sm:$0xff] }
 0x8b0   :  { %v4772_v6 = vpop.f32.mrf.mxu2  ;;  %v11648_v38 = vpop.f32.mrf.mxu0 }
 0x8b1   :  { %v4861_v52 = vpop.f32.mrf.mxu3  ;;  %v4773_v16 = vadd.f32 %v4772_v6, %v4684_v37  ;;  %v4686_v50 = vpop.f32.mrf.mxu1  ;;  %v13658_v37 = vpack.c.bf16 %v13656_v21, %v13657_v25  ;;  %v13659_v6 = vld [vmem:[#allocation173_spill] sm:$0xff] }
 0x8b2   :  { %v4687_v35 = vadd.f32 %v4686_v50, %v4598_v19  ;;  %v13661_v19 = vpack.c.bf16 %v13659_v6, %v13660_v4 }
 0x8b3   :  { %v11650_v23 = vadd.f32 %v4861_v52, %v4773_v16  ;;  %5912 = vmatmul.bf16.gmra.mxu0 %v13655_v2  ;;  %v4600_v52 = vadd.f32 %v11322_v9, %v11406_v30  ;;  %v4603_v2 = vadd.f32 %v11328_v62, %v11406_v30 }
 0x8b4   :  { %5645 = vmatmul.bf16.gmra.mxu1 %v13652_v47 }
 0x8b5   :  { %13649 = vst [vmem:[#allocation42_spill] sm:$0xff] %v11650_v23  ;;  %5734 = vmatmul.bf16.gmra.mxu2 %v13658_v37  ;;  %v13674_v23 = vld [vmem:[#allocation174_spill] sm:$0xff] }
 0x8b6   :  { %5823 = vmatmul.bf16.gmra.mxu3 %v13661_v19 }
 0x8b8   :  { %v4775_v16 = vpop.f32.mrf.mxu2  ;;  %v11668_v46 = vpop.f32.mrf.mxu0 }
 0x8b9   :  { %v4864_v47 = vpop.f32.mrf.mxu3  ;;  %v4776_v50 = vadd.f32 %v4775_v16, %v4687_v35  ;;  %v4688_v36 = vpop.f32.mrf.mxu1  ;;  %v13665_v35 = vld [vmem:[#allocation75_spill] sm:$0xff] }
 0x8ba   :  { %v4689_v61 = vadd.f32 %v4688_v36, %v4600_v52  ;;  %v13666_v16 = vpack.c.bf16 %v13664_v28, %v13665_v35  ;;  %v13668_v52 = vld [vmem:[#allocation204_spill] sm:$0xff]  ;;  %v13671_v36 = vld [vmem:[#allocation143_spill] sm:$0xff]  ;;  %v4605_v28 = vadd.f32 %v11342_v54, %v11406_v30 }
 0x8bb   :  { %v11670_v10 = vadd.f32 %v4864_v47, %v4776_v50  ;;  %v13669_v47 = vpack.c.bf16 %v13667_v44, %v13668_v52  ;;  %v13670_v50 = vld [vmem:[#allocation144_spill] sm:$0xff] }
 0x8bd   :  { %13662 = vst [vmem:[#allocation43_spill] sm:$0xff] %v11670_v10 }
 0x8c0   :  { %v4777_v21 = vpop.f32.mrf.mxu2  ;;  %v11674_v6 = vpop.f32.mrf.mxu0 }
 0x8c1   :  { %v4866_v25 = vpop.f32.mrf.mxu3  ;;  %v4778_v37 = vadd.f32 %v4777_v21, %v4689_v61  ;;  %v4691_v4 = vpop.f32.mrf.mxu1  ;;  %v13672_v61 = vpack.c.bf16 %v13670_v50, %v13671_v36  ;;  %v13673_v21 = vld [vmem:[#allocation175_spill] sm:$0xff]  ;;  %v8691_v36 = vld [vmem:[#allocation8 + $0x160] sm:$0xff] }
 0x8c2   :  { %v4692_v19 = vadd.f32 %v4691_v4, %v4603_v2  ;;  %v13675_v2 = vpack.c.bf16 %v13673_v21, %v13674_v23  ;;  %5981 = vmatpush.bf16.msra.mxu1 %v8691_v36  ;;  %v4608_v23 = vadd.f32 %v11348_v15, %v11406_v30  ;;  %v13685_v36 = vld [vmem:[#allocation145_spill] sm:$0xff]  ;;  %v13692_v15 = vld [vmem:[#allocation118_spill] sm:$0xff] }
 0x8c3   :  { %v11676_v9 = vadd.f32 %v4866_v25, %v4778_v37  ;;  %5917 = vmatmul.bf16.gmra.mxu0 %v13669_v47  ;;  %v8699_v25 = vld [vmem:[#allocation8 + $0x1a0] sm:$0xff] }
 0x8c4   :  { %5650 = vmatmul.bf16.gmra.mxu1 %v13666_v16  ;;  %v8707_v37 = vld [vmem:[#allocation8 + $0x1e0] sm:$0xff]  ;;  %6070 = vmatpush.bf16.msra.mxu2 %v8699_v25 }
 0x8c5   :  { %13663 = vst [vmem:[#allocation45_spill] sm:$0xff] %v11676_v9  ;;  %5739 = vmatmul.bf16.gmra.mxu2 %v13672_v61  ;;  %6159 = vmatpush.bf16.msra.mxu3 %v8707_v37  ;;  %v13688_v9 = vld [vmem:[#allocation176_spill] sm:$0xff] }
 0x8c6   :  { %5828 = vmatmul.bf16.gmra.mxu3 %v13675_v2 }
 0x8c8   :  { %v4780_v44 = vpop.f32.mrf.mxu2  ;;  %v11694_v52 = vpop.f32.mrf.mxu0 }
 0x8c9   :  { %v4869_v4 = vpop.f32.mrf.mxu3  ;;  %v4781_v35 = vadd.f32 %v4780_v44, %v4692_v19  ;;  %v4693_v16 = vpop.f32.mrf.mxu1  ;;  %v13678_v19 = vld [vmem:[#allocation117_spill] sm:$0xff]  ;;  %v13679_v44 = vld [vmem:[#allocation80_spill] sm:$0xff] }
 0x8ca   :  { %v4694_v47 = vadd.f32 %v4693_v16, %v4605_v28  ;;  %v13680_v10 = vpack.c.bf16 %v13678_v19, %v13679_v44  ;;  %v13681_v28 = vld [vmem:[#allocation207_spill] sm:$0xff]  ;;  %v13684_v16 = vld [vmem:[#allocation146_spill] sm:$0xff] }
 0x8cb   :  { %v11696_v50 = vadd.f32 %v4869_v4, %v4781_v35  ;;  %v13682_v4 = vld [vmem:[#allocation206_spill] sm:$0xff] }
 0x8cc   :  { %v13683_v35 = vpack.c.bf16 %v13681_v28, %v13682_v4 }
 0x8cd   :  { %13676 = vst [vmem:[#allocation88_spill] sm:$0xff] %v11696_v50  ;;  %v13695_v50 = vld [vmem:[#allocation209_spill] sm:$0xff] }
 0x8d0   :  { %v4782_v61 = vpop.f32.mrf.mxu2  ;;  %v11700_v37 = vpop.f32.mrf.mxu0 }
 0x8d1   :  { %v4871_v21 = vpop.f32.mrf.mxu3  ;;  %v4783_v2 = vadd.f32 %v4782_v61, %v4694_v47  ;;  %v4696_v25 = vpop.f32.mrf.mxu1  ;;  %v13686_v47 = vpack.c.bf16 %v13684_v16, %v13685_v36  ;;  %v13687_v61 = vld [vmem:[#allocation177_spill] sm:$0xff] }
 0x8d2   :  { %v4697_v54 = vadd.f32 %v4696_v25, %v4608_v23  ;;  %v13689_v23 = vpack.c.bf16 %v13687_v61, %v13688_v9 }
 0x8d3   :  { %v11702_v62 = vadd.f32 %v4871_v21, %v4783_v2  ;;  %5922 = vmatmul.bf16.gmra.mxu0 %v13683_v35  ;;  %v4610_v21 = vadd.f32 %v11362_v42, %v11406_v30  ;;  %v4613_v35 = vadd.f32 %v11368_v31, %v11406_v30 }
 0x8d4   :  { %5655 = vmatmul.bf16.gmra.mxu1 %v13680_v10 }
 0x8d5   :  { %13677 = vst [vmem:[#allocation87_spill] sm:$0xff] %v11702_v62  ;;  %5744 = vmatmul.bf16.gmra.mxu2 %v13686_v47  ;;  %v13702_v62 = vld [vmem:[#allocation178_spill] sm:$0xff] }
 0x8d6   :  { %5833 = vmatmul.bf16.gmra.mxu3 %v13689_v23 }
 0x8d8   :  { %v4785_v2 = vpop.f32.mrf.mxu2  ;;  %v11720_v44 = vpop.f32.mrf.mxu0 }
 0x8d9   :  { %v4874_v10 = vpop.f32.mrf.mxu3  ;;  %v4786_v25 = vadd.f32 %v4785_v2, %v4697_v54  ;;  %v4698_v19 = vpop.f32.mrf.mxu1  ;;  %v13693_v54 = vld [vmem:[#allocation84_spill] sm:$0xff] }
 0x8da   :  { %v4699_v28 = vadd.f32 %v4698_v19, %v4610_v21  ;;  %v13694_v2 = vpack.c.bf16 %v13692_v15, %v13693_v54  ;;  %v13696_v21 = vld [vmem:[#allocation208_spill] sm:$0xff]  ;;  %v13699_v19 = vld [vmem:[#allocation82_spill] sm:$0xff]  ;;  %v4615_v15 = vadd.f32 %v11382_v3, %v11406_v30 }
 0x8db   :  { %v11722_v4 = vadd.f32 %v4874_v10, %v4786_v25  ;;  %v13697_v10 = vpack.c.bf16 %v13695_v50, %v13696_v21  ;;  %v13698_v25 = vld [vmem:[#allocation147_spill] sm:$0xff] }
 0x8dd   :  { %13690 = vst [vmem:[#allocation47_spill] sm:$0xff] %v11722_v4 }
 0x8e0   :  { %v4787_v16 = vpop.f32.mrf.mxu2  ;;  %v11726_v61 = vpop.f32.mrf.mxu0 }
 0x8e1   :  { %v4876_v36 = vpop.f32.mrf.mxu3  ;;  %v4788_v47 = vadd.f32 %v4787_v16, %v4699_v28  ;;  %v4701_v9 = vpop.f32.mrf.mxu1  ;;  %v13700_v28 = vpack.c.bf16 %v13698_v25, %v13699_v19  ;;  %v13701_v16 = vld [vmem:[#allocation179_spill] sm:$0xff] }
 0x8e2   :  { %v4702_v23 = vadd.f32 %v4701_v9, %v4613_v35  ;;  %v13703_v35 = vpack.c.bf16 %v13701_v16, %v13702_v62  ;;  %v8690_v19 = vld [vmem:[#allocation8 + $0x158] sm:$0xff]  ;;  %v4618_v62 = vadd.f32 %v11388_v49, %v11406_v30 }
 0x8e3   :  { %v11728_v42 = vadd.f32 %v4876_v36, %v4788_v47  ;;  %5927 = vmatmul.bf16.gmra.mxu0 %v13697_v10  ;;  %v8698_v36 = vld [vmem:[#allocation8 + $0x198] sm:$0xff]  ;;  %5982 = vmatpush.bf16.msra.mxu1 %v8690_v19  ;;  %v13713_v19 = vld [vmem:[#allocation148_spill] sm:$0xff] }
 0x8e4   :  { %5660 = vmatmul.bf16.gmra.mxu1 %v13694_v2  ;;  %v8706_v47 = vld [vmem:[#allocation8 + $0x1d8] sm:$0xff]  ;;  %6071 = vmatpush.bf16.msra.mxu2 %v8698_v36 }
 0x8e5   :  { %13691 = vst [vmem:[#allocation48_spill] sm:$0xff] %v11728_v42  ;;  %5749 = vmatmul.bf16.gmra.mxu2 %v13700_v28  ;;  %6160 = vmatpush.bf16.msra.mxu3 %v8706_v47  ;;  %v13716_v42 = vld [vmem:[#allocation180_spill] sm:$0xff] }
 0x8e6   :  { %5838 = vmatmul.bf16.gmra.mxu3 %v13703_v35 }
 0x8e8   :  { %v4790_v50 = vpop.f32.mrf.mxu2  ;;  %v11746_v21 = vpop.f32.mrf.mxu0 }
 0x8e9   :  { %v4879_v9 = vpop.f32.mrf.mxu3  ;;  %v4791_v54 = vadd.f32 %v4790_v50, %v4702_v23  ;;  %v4703_v2 = vpop.f32.mrf.mxu1  ;;  %v13706_v23 = vld [vmem:[#allocation120_spill] sm:$0xff]  ;;  %v13707_v50 = vld [vmem:[#allocation119_spill] sm:$0xff] }
 0x8ea   :  { %v4704_v10 = vadd.f32 %v4703_v2, %v4615_v15  ;;  %v13708_v4 = vpack.c.bf16 %v13706_v23, %v13707_v50  ;;  %v13709_v15 = vld [vmem:[#allocation211_spill] sm:$0xff]  ;;  %v13712_v2 = vld [vmem:[#allocation149_spill] sm:$0xff] }
 0x8eb   :  { %v11748_v25 = vadd.f32 %v4879_v9, %v4791_v54  ;;  %v13710_v9 = vld [vmem:[#allocation210_spill] sm:$0xff] }
 0x8ec   :  { %v13711_v54 = vpack.c.bf16 %v13709_v15, %v13710_v9 }
 0x8ed   :  { %13704 = vst [vmem:[#allocation24_spill] sm:$0xff] %v11748_v25  ;;  %v13727_v25 = vld [vmem:[#allocation150_spill] sm:$0xff] }
 0x8f0   :  { %v4792_v28 = vpop.f32.mrf.mxu2  ;;  %v11752_v47 = vpop.f32.mrf.mxu0 }
 0x8f1   :  { %v4881_v16 = vpop.f32.mrf.mxu3  ;;  %v4793_v35 = vadd.f32 %v4792_v28, %v4704_v10  ;;  %v4706_v36 = vpop.f32.mrf.mxu1  ;;  %v13714_v10 = vpack.c.bf16 %v13712_v2, %v13713_v19  ;;  %v13715_v28 = vld [vmem:[#allocation181_spill] sm:$0xff]  ;;  %v11779_v2 = vld [vmem:[%s12521_s4] ss:$0 sm:$0xff] }
 0x8f2   :  { %v4707_v3 = vadd.f32 %v4706_v36, %v4618_v62  ;;  %v13717_v62 = vpack.c.bf16 %v13715_v28, %v13716_v42  ;;  %v5543_v42 = vadd.f32 %v11779_v2, %v11410_v33  ;;  %v13726_v33 = vld [vmem:[#allocation151_spill] sm:$0xff] }
 0x8f3   :  { %v11754_v31 = vadd.f32 %v4881_v16, %v4793_v35  ;;  %5932 = vmatmul.bf16.gmra.mxu0 %v13711_v54  ;;  %v8718_v16 = vld [vmem:[#allocation10 + $0x38] sm:$0xff] }
 0x8f4   :  { %5665 = vmatmul.bf16.gmra.mxu1 %v13708_v4  ;;  %6329 = vmatpush.bf16.msra.mxu0 %v8718_v16  ;;  %v4620_v4 = vadd.f32 %v11402_v27, %v11406_v30  ;;  %v13720_v16 = vld [vmem:[#allocation122_spill] sm:$0xff] }
 0x8f5   :  { %13705 = vst [vmem:[#allocation226_spill] sm:$0xff] %v11754_v31  ;;  %5754 = vmatmul.bf16.gmra.mxu2 %v13714_v10  ;;  %v13728_v31 = vpack.c.bf16 %v13726_v33, %v13727_v25  ;;  %v8689_v25 = vld [vmem:[#allocation8 + $0x150] sm:$0xff]  ;;  %v5548_v33 = vadd.f32 %v11779_v2, %v11430_v18  ;;  %v13742_v18 = vld [vmem:[#allocation185_spill] sm:$0xff] }
 0x8f6   :  { %5843 = vmatmul.bf16.gmra.mxu3 %v13717_v62  ;;  %5983 = vmatpush.bf16.msra.mxu1 %v8689_v25  ;;  %v13743_v25 = vld [vmem:[#allocation184_spill] sm:$0xff] }
 0x8f8   :  { %v4795_v35 = vpop.f32.mrf.mxu2  ;;  %v11772_v15 = vpop.f32.mrf.mxu0 }
 0x8f9   :  { %v4884_v36 = vpop.f32.mrf.mxu3  ;;  %v4796_v23 = vadd.f32 %v4795_v35, %v4707_v3  ;;  %v4708_v50 = vpop.f32.mrf.mxu1 }
 0x8fa   :  { %v4709_v9 = vadd.f32 %v4708_v50, %v4620_v4  ;;  %v13721_v4 = vld [vmem:[#allocation121_spill] sm:$0xff] }
 0x8fb   :  { %v11774_v54 = vadd.f32 %v4884_v36, %v4796_v23  ;;  %v13722_v35 = vpack.c.bf16 %v13720_v16, %v13721_v4  ;;  %v13723_v36 = vld [vmem:[#allocation213_spill] sm:$0xff]  ;;  %v13724_v23 = vld [vmem:[#allocation212_spill] sm:$0xff] }
 0x8fc   :  { %v13725_v50 = vpack.c.bf16 %v13723_v36, %v13724_v23 }
 0x8fd   :  { %13718 = vst [vmem:[#allocation50_spill] sm:$0xff] %v11774_v54 }
 0x900   :  { %v4797_v19 = vpop.f32.mrf.mxu2  ;;  %v5898_v28 = vpop.f32.mrf.mxu0 }
 0x901   :  { %v4886_v10 = vpop.f32.mrf.mxu3  ;;  %v4798_v30 = vadd.f32 %v4797_v19, %v4709_v9  ;;  %v5631_v27 = vpop.f32.mrf.mxu1  ;;  %v13729_v9 = vld [vmem:[#allocation183_spill] sm:$0xff]  ;;  %v13730_v19 = vld [vmem:[#allocation182_spill] sm:$0xff] }
 0x902   :  { %v5632_v3 = vadd.f32 %v5631_v27, %v5543_v42  ;;  %v13731_v42 = vpack.c.bf16 %v13729_v9, %v13730_v19  ;;  %v5545_v27 = vadd.f32 %v11779_v2, %v11424_v0 }
 0x903   :  { %v11783_v62 = vadd.f32 %v4886_v10, %v4798_v30  ;;  %5937 = vmatmul.bf16.gmra.mxu0 %v13725_v50  ;;  %v8697_v10 = vld [vmem:[#allocation8 + $0x190] sm:$0xff] }
 0x904   :  { %5670 = vmatmul.bf16.gmra.mxu1 %v13722_v35  ;;  %v8705_v30 = vld [vmem:[#allocation8 + $0x1d0] sm:$0xff]  ;;  %6072 = vmatpush.bf16.msra.mxu2 %v8697_v10 }
 0x905   :  { %13719 = vst [vmem:[#allocation90_spill] sm:$0xff] %v11783_v62  ;;  %5759 = vmatmul.bf16.gmra.mxu2 %v13728_v31  ;;  %6161 = vmatpush.bf16.msra.mxu3 %v8705_v30  ;;  %v13733_v62 = vld [vmem:[#allocation124_spill] sm:$0xff] }
 0x906   :  { %5848 = vmatmul.bf16.gmra.mxu3 %v13731_v42 }
 0x908   :  { %v5720_v16 = vpop.f32.mrf.mxu2  ;;  %v5900_v23 = vpop.f32.mrf.mxu0 }
 0x909   :  { %v5809_v4 = vpop.f32.mrf.mxu3  ;;  %v5721_v35 = vadd.f32 %v5720_v16, %v5632_v3  ;;  %v5633_v36 = vpop.f32.mrf.mxu1  ;;  %v13734_v3 = vld [vmem:[#allocation123_spill] sm:$0xff] }
 0x90a   :  { %v5634_v50 = vadd.f32 %v5633_v36, %v5545_v27  ;;  %v13735_v16 = vpack.c.bf16 %v13733_v62, %v13734_v3  ;;  %v13736_v27 = vld [vmem:[#allocation215_spill] sm:$0xff]  ;;  %v5550_v62 = vadd.f32 %v11779_v2, %v11444_v34 }
 0x90b   :  { %v5810_v49 = vadd.f32 %v5809_v4, %v5721_v35  ;;  %v13737_v4 = vld [vmem:[#allocation214_spill] sm:$0xff]  ;;  %v13745_v34 = vld [vmem:[#allocation127_spill] sm:$0xff] }
 0x90c   :  { %v13738_v35 = vpack.c.bf16 %v13736_v27, %v13737_v4 }
 0x90d   :  { %v11801_v31 = vadd.f32 %v5898_v28, %v5810_v49  ;;  %v13739_v49 = vld [vmem:[#allocation153_spill] sm:$0xff]  ;;  %v13740_v28 = vld [vmem:[#allocation152_spill] sm:$0xff] }
 0x90e   :  { %v13741_v36 = vpack.c.bf16 %v13739_v49, %v13740_v28 }
 0x90f   :  { %13732 = vst [vmem:[#allocation89_spill] sm:$0xff] %v11801_v31  ;;  %v13744_v31 = vpack.c.bf16 %v13742_v18, %v13743_v25  ;;  %v13746_v25 = vld [vmem:[#allocation125_spill] sm:$0xff] }
 0x910   :  { %v5722_v9 = vpop.f32.mrf.mxu2  ;;  %v5903_v30 = vpop.f32.mrf.mxu0 }
 0x911   :  { %v5811_v19 = vpop.f32.mrf.mxu3  ;;  %v5723_v42 = vadd.f32 %v5722_v9, %v5634_v50  ;;  %v5636_v10 = vpop.f32.mrf.mxu1  ;;  %v8717_v50 = vld [vmem:[#allocation10 + $0x30] sm:$0xff] }
 0x912   :  { %v5637_v0 = vadd.f32 %v5636_v10, %v5548_v33  ;;  %6330 = vmatpush.bf16.msra.mxu0 %v8717_v50  ;;  %v13747_v50 = vpack.c.bf16 %v13745_v34, %v13746_v25 }
 0x913   :  { %v5812_v54 = vadd.f32 %v5811_v19, %v5723_v42  ;;  %5942 = vmatmul.bf16.gmra.mxu0 %v13738_v35  ;;  %v5553_v35 = vadd.f32 %v11779_v2, %v11450_v12  ;;  %v13754_v12 = vld [vmem:[#allocation186_spill] sm:$0xff] }
 0x914   :  { %5675 = vmatmul.bf16.gmra.mxu1 %v13735_v16 }
 0x915   :  { %5764 = vmatmul.bf16.gmra.mxu2 %v13741_v36  ;;  %v11817_v9 = vadd.f32 %v5900_v23, %v5812_v54 }
 0x916   :  { %5853 = vmatmul.bf16.gmra.mxu3 %v13744_v31 }
 0x918   :  { %v5725_v33 = vpop.f32.mrf.mxu2  ;;  %v5905_v3 = vpop.f32.mrf.mxu0 }
 0x919   :  { %v5814_v19 = vpop.f32.mrf.mxu3  ;;  %v5726_v42 = vadd.f32 %v5725_v33, %v5637_v0  ;;  %v5638_v10 = vpop.f32.mrf.mxu1  ;;  %v13748_v0 = vld [vmem:[#allocation217_spill] sm:$0xff]  ;;  %v13749_v33 = vld [vmem:[#allocation216_spill] sm:$0xff] }
 0x91a   :  { %v5639_v16 = vadd.f32 %v5638_v10, %v5550_v62  ;;  %v13750_v62 = vpack.c.bf16 %v13748_v0, %v13749_v33  ;;  %v13755_v10 = vld [vmem:[#allocation154_spill] sm:$0xff] }
 0x91b   :  { %v5815_v27 = vadd.f32 %v5814_v19, %v5726_v42  ;;  %v13752_v19 = vld [vmem:[#allocation155_spill] sm:$0xff] }
 0x91d   :  { %v11821_v4 = vadd.f32 %v5903_v30, %v5815_v27  ;;  %v13751_v30 = vld [vmem:[#allocation156_spill] sm:$0xff]  ;;  %v13756_v27 = vpack.c.bf16 %v13754_v12, %v13755_v10 }
 0x91e   :  { %v13753_v42 = vpack.c.bf16 %v13751_v30, %v13752_v19 }
 0x920   :  { %v5727_v31 = vpop.f32.mrf.mxu2  ;;  %v5908_v28 = vpop.f32.mrf.mxu0 }
 0x921   :  { %v5816_v49 = vpop.f32.mrf.mxu3  ;;  %v5728_v54 = vadd.f32 %v5727_v31, %v5639_v16  ;;  %v5641_v23 = vpop.f32.mrf.mxu1  ;;  %v8696_v16 = vld [vmem:[#allocation8 + $0x188] sm:$0xff] }
 0x922   :  { %v5642_v36 = vadd.f32 %v5641_v23, %v5553_v35  ;;  %v8704_v31 = vld [vmem:[#allocation8 + $0x1c8] sm:$0xff]  ;;  %6073 = vmatpush.bf16.msra.mxu2 %v8696_v16 }
 0x923   :  { %v5817_v18 = vadd.f32 %v5816_v49, %v5728_v54  ;;  %5947 = vmatmul.bf16.gmra.mxu0 %v13750_v62  ;;  %6162 = vmatpush.bf16.msra.mxu3 %v8704_v31  ;;  %v5555_v49 = vadd.f32 %v11779_v2, %v11464_v32  ;;  %v8688_v62 = vld [vmem:[#allocation8 + $0x148] sm:$0xff] }
 0x924   :  { %5680 = vmatmul.bf16.gmra.mxu1 %v13747_v50  ;;  %v13757_v16 = vld [vmem:[#allocation129_spill] sm:$0xff] }
 0x925   :  { %5769 = vmatmul.bf16.gmra.mxu2 %v13753_v42  ;;  %v11837_v35 = vadd.f32 %v5905_v3, %v5817_v18  ;;  %5984 = vmatpush.bf16.msra.mxu1 %v8688_v62  ;;  %v5558_v3 = vadd.f32 %v11779_v2, %v11470_v55  ;;  %v13766_v55 = vld [vmem:[#allocation188_spill] sm:$0xff] }
 0x926   :  { %5858 = vmatmul.bf16.gmra.mxu3 %v13756_v27 }
 0x928   :  { %v5730_v54 = vpop.f32.mrf.mxu2  ;;  %v5910_v50 = vpop.f32.mrf.mxu0 }
 0x929   :  { %v5819_v23 = vpop.f32.mrf.mxu3  ;;  %v5731_v34 = vadd.f32 %v5730_v54, %v5642_v36  ;;  %v5643_v25 = vpop.f32.mrf.mxu1  ;;  %v13758_v36 = vld [vmem:[#allocation128_spill] sm:$0xff]  ;;  %v13761_v54 = vld [vmem:[#allocation95_spill] sm:$0xff] }
 0x92a   :  { %v5644_v0 = vadd.f32 %v5643_v25, %v5555_v49  ;;  %v13759_v31 = vpack.c.bf16 %v13757_v16, %v13758_v36  ;;  %v13760_v49 = vld [vmem:[#allocation218_spill] sm:$0xff] }
 0x92b   :  { %v5820_v33 = vadd.f32 %v5819_v23, %v5731_v34  ;;  %v13762_v23 = vpack.c.bf16 %v13760_v49, %v13761_v54  ;;  %v13764_v34 = vld [vmem:[#allocation157_spill] sm:$0xff] }
 0x92d   :  { %v11841_v30 = vadd.f32 %v5908_v28, %v5820_v33  ;;  %v13763_v28 = vld [vmem:[#allocation158_spill] sm:$0xff]  ;;  %v13767_v33 = vld [vmem:[#allocation187_spill] sm:$0xff] }
 0x92e   :  { %v13765_v25 = vpack.c.bf16 %v13763_v28, %v13764_v34  ;;  %v13768_v62 = vpack.c.bf16 %v13766_v55, %v13767_v33 }
 0x930   :  { %v5732_v18 = vpop.f32.mrf.mxu2  ;;  %v5913_v10 = vpop.f32.mrf.mxu0 }
 0x931   :  { %v5821_v19 = vpop.f32.mrf.mxu3  ;;  %v5733_v42 = vadd.f32 %v5732_v18, %v5644_v0  ;;  %v5646_v12 = vpop.f32.mrf.mxu1  ;;  %v8716_v0 = vld [vmem:[#allocation10 + $0x28] sm:$0xff] }
 0x932   :  { %v5647_v32 = vadd.f32 %v5646_v12, %v5558_v3  ;;  %6331 = vmatpush.bf16.msra.mxu0 %v8716_v0  ;;  %v5560_v3 = vadd.f32 %v11779_v2, %v11484_v43  ;;  %v13769_v43 = vld [vmem:[#allocation131_spill] sm:$0xff] }
 0x933   :  { %v5822_v27 = vadd.f32 %v5821_v19, %v5733_v42  ;;  %5952 = vmatmul.bf16.gmra.mxu0 %v13762_v23  ;;  %v5563_v23 = vadd.f32 %v11779_v2, %v11490_v41  ;;  %v13778_v41 = vld [vmem:[#allocation98_spill] sm:$0xff] }
 0x934   :  { %5685 = vmatmul.bf16.gmra.mxu1 %v13759_v31 }
 0x935   :  { %5774 = vmatmul.bf16.gmra.mxu2 %v13765_v25  ;;  %v11857_v18 = vadd.f32 %v5910_v50, %v5822_v27 }
 0x936   :  { %5863 = vmatmul.bf16.gmra.mxu3 %v13768_v62  ;;  %v13770_v62 = vld [vmem:[#allocation130_spill] sm:$0xff] }
 0x937   :  { %v13771_v0 = vpack.c.bf16 %v13769_v43, %v13770_v62 }
 0x938   :  { %v5735_v19 = vpop.f32.mrf.mxu2  ;;  %v5915_v36 = vpop.f32.mrf.mxu0 }
 0x939   :  { %v5824_v42 = vpop.f32.mrf.mxu3  ;;  %v5736_v12 = vadd.f32 %v5735_v19, %v5647_v32  ;;  %v5648_v16 = vpop.f32.mrf.mxu1  ;;  %v13772_v32 = vld [vmem:[#allocation220_spill] sm:$0xff]  ;;  %v13773_v19 = vld [vmem:[#allocation219_spill] sm:$0xff] }
 0x93a   :  { %v5649_v31 = vadd.f32 %v5648_v16, %v5560_v3  ;;  %v13774_v3 = vpack.c.bf16 %v13772_v32, %v13773_v19  ;;  %v13779_v16 = vld [vmem:[#allocation189_spill] sm:$0xff] }
 0x93b   :  { %v5825_v49 = vadd.f32 %v5824_v42, %v5736_v12  ;;  %v13776_v42 = vld [vmem:[#allocation97_spill] sm:$0xff] }
 0x93d   :  { %v11861_v54 = vadd.f32 %v5913_v10, %v5825_v49  ;;  %v13775_v10 = vld [vmem:[#allocation159_spill] sm:$0xff]  ;;  %v13780_v49 = vpack.c.bf16 %v13778_v41, %v13779_v16 }
 0x93e   :  { %v13777_v12 = vpack.c.bf16 %v13775_v10, %v13776_v42 }
 0x940   :  { %v5737_v28 = vpop.f32.mrf.mxu2  ;;  %v5918_v25 = vpop.f32.mrf.mxu0 }
 0x941   :  { %v5826_v34 = vpop.f32.mrf.mxu3  ;;  %v5738_v50 = vadd.f32 %v5737_v28, %v5649_v31  ;;  %v5651_v27 = vpop.f32.mrf.mxu1  ;;  %v8695_v31 = vld [vmem:[#allocation8 + $0x180] sm:$0xff] }
 0x942   :  { %v5652_v55 = vadd.f32 %v5651_v27, %v5563_v23  ;;  %v8703_v28 = vld [vmem:[#allocation8 + $0x1c0] sm:$0xff]  ;;  %6074 = vmatpush.bf16.msra.mxu2 %v8695_v31 }
 0x943   :  { %v5827_v33 = vadd.f32 %v5826_v34, %v5738_v50  ;;  %5957 = vmatmul.bf16.gmra.mxu0 %v13774_v3  ;;  %6163 = vmatpush.bf16.msra.mxu3 %v8703_v28  ;;  %v5565_v34 = vadd.f32 %v11779_v2, %v11504_v29  ;;  %v8687_v3 = vld [vmem:[#allocation8 + $0x140] sm:$0xff] }
 0x944   :  { %5690 = vmatmul.bf16.gmra.mxu1 %v13771_v0  ;;  %v13782_v31 = vld [vmem:[#allocation132_spill] sm:$0xff] }
 0x945   :  { %5779 = vmatmul.bf16.gmra.mxu2 %v13777_v12  ;;  %v11877_v23 = vadd.f32 %v5915_v36, %v5827_v33  ;;  %5985 = vmatpush.bf16.msra.mxu1 %v8687_v3  ;;  %v5568_v36 = vadd.f32 %v11779_v2, %v11510_v59  ;;  %v13790_v59 = vld [vmem:[#allocation191_spill] sm:$0xff]  ;;  %v8715_v3 = vld [vmem:[#allocation10 + $0x20] sm:$0xff] }
 0x946   :  { %5868 = vmatmul.bf16.gmra.mxu3 %v13780_v49  ;;  %6332 = vmatpush.bf16.msra.mxu0 %v8715_v3 }
 0x948   :  { %v5740_v50 = vpop.f32.mrf.mxu2  ;;  %v11881_v0 = vpop.f32.mrf.mxu0 }
 0x949   :  { %v5829_v27 = vpop.f32.mrf.mxu3  ;;  %v5741_v43 = vadd.f32 %v5740_v50, %v5652_v55  ;;  %v5653_v62 = vpop.f32.mrf.mxu1  ;;  %v13781_v55 = vld [vmem:[#allocation133_spill] sm:$0xff] }
 0x94a   :  { %v5654_v32 = vadd.f32 %v5653_v62, %v5565_v34  ;;  %v13783_v28 = vpack.c.bf16 %v13781_v55, %v13782_v31  ;;  %v13784_v34 = vld [vmem:[#allocation222_spill] sm:$0xff]  ;;  %v13785_v50 = vld [vmem:[#allocation221_spill] sm:$0xff] }
 0x94b   :  { %v5830_v19 = vadd.f32 %v5829_v27, %v5741_v43  ;;  %v13786_v27 = vpack.c.bf16 %v13784_v34, %v13785_v50  ;;  %v13788_v43 = vld [vmem:[#allocation99_spill] sm:$0xff]  ;;  %v5573_v50 = vadd.f32 %v11779_v2, %v11530_v56  ;;  %v13802_v56 = vld [vmem:[#allocation193_spill] sm:$0xff] }
 0x94d   :  { %v11883_v10 = vadd.f32 %v5918_v25, %v5830_v19  ;;  %v13787_v25 = vld [vmem:[#allocation160_spill] sm:$0xff]  ;;  %v13791_v19 = vld [vmem:[#allocation190_spill] sm:$0xff] }
 0x94e   :  { %v13789_v62 = vpack.c.bf16 %v13787_v25, %v13788_v43 }
 0x950   :  { %v5742_v33 = vpop.f32.mrf.mxu2  ;;  %v5923_v29 = vpop.f32.mrf.mxu0 }
 0x951   :  { %v5831_v42 = vpop.f32.mrf.mxu3  ;;  %v5743_v12 = vadd.f32 %v5742_v33, %v5654_v32  ;;  %v5656_v41 = vpop.f32.mrf.mxu1  ;;  %v13792_v32 = vpack.c.bf16 %v13790_v59, %v13791_v19 }
 0x952   :  { %v5657_v16 = vadd.f32 %v5656_v41, %v5568_v36  ;;  %v5570_v36 = vadd.f32 %v11779_v2, %v11524_v7 }
 0x953   :  { %v11887_v49 = vadd.f32 %v5831_v42, %v5743_v12  ;;  %5962 = vmatmul.bf16.gmra.mxu0 %v13786_v27 }
 0x954   :  { %5695 = vmatmul.bf16.gmra.mxu1 %v13783_v28 }
 0x955   :  { %5784 = vmatmul.bf16.gmra.mxu2 %v13789_v62 }
 0x956   :  { %5873 = vmatmul.bf16.gmra.mxu3 %v13792_v32  ;;  %v13793_v32 = vld [vmem:[#allocation102_spill] sm:$0xff] }
 0x958   :  { %v5745_v33 = vpop.f32.mrf.mxu2  ;;  %v11903_v55 = vpop.f32.mrf.mxu0 }
 0x959   :  { %v5834_v42 = vpop.f32.mrf.mxu3  ;;  %v5746_v12 = vadd.f32 %v5745_v33, %v5657_v16  ;;  %v5658_v41 = vpop.f32.mrf.mxu1  ;;  %v13794_v16 = vld [vmem:[#allocation101_spill] sm:$0xff]  ;;  %v13796_v33 = vld [vmem:[#allocation224_spill] sm:$0xff] }
 0x95a   :  { %v5659_v31 = vadd.f32 %v5658_v41, %v5570_v36  ;;  %v13795_v3 = vpack.c.bf16 %v13793_v32, %v13794_v16  ;;  %v13797_v36 = vld [vmem:[#allocation223_spill] sm:$0xff] }
 0x95b   :  { %v5835_v28 = vadd.f32 %v5834_v42, %v5746_v12  ;;  %v13798_v42 = vpack.c.bf16 %v13796_v33, %v13797_v36  ;;  %v13800_v12 = vld [vmem:[#allocation161_spill] sm:$0xff]  ;;  %v5578_v36 = vadd.f32 %v11779_v2, %v11550_v45  ;;  %v13815_v45 = vld [vmem:[#allocation104_spill] sm:$0xff] }
 0x95d   :  { %v11905_v34 = vadd.f32 %v5923_v29, %v5835_v28  ;;  %v13799_v29 = vld [vmem:[#allocation162_spill] sm:$0xff]  ;;  %v13803_v28 = vld [vmem:[#allocation192_spill] sm:$0xff] }
 0x95e   :  { %v13801_v41 = vpack.c.bf16 %v13799_v29, %v13800_v12 }
 0x960   :  { %v5747_v27 = vpop.f32.mrf.mxu2  ;;  %v5928_v59 = vpop.f32.mrf.mxu0 }
 0x961   :  { %v5836_v25 = vpop.f32.mrf.mxu3  ;;  %v5748_v43 = vadd.f32 %v5747_v27, %v5659_v31  ;;  %v5661_v62 = vpop.f32.mrf.mxu1  ;;  %v13804_v31 = vpack.c.bf16 %v13802_v56, %v13803_v28 }
 0x962   :  { %v5662_v19 = vadd.f32 %v5661_v62, %v5573_v50  ;;  %v5575_v50 = vadd.f32 %v11779_v2, %v11544_v40 }
 0x963   :  { %v11909_v7 = vadd.f32 %v5836_v25, %v5748_v43  ;;  %5967 = vmatmul.bf16.gmra.mxu0 %v13798_v42 }
 0x964   :  { %5700 = vmatmul.bf16.gmra.mxu1 %v13795_v3 }
 0x965   :  { %5789 = vmatmul.bf16.gmra.mxu2 %v13801_v41 }
 0x966   :  { %5878 = vmatmul.bf16.gmra.mxu3 %v13804_v31  ;;  %v13806_v31 = vld [vmem:[#allocation53_spill] sm:$0xff] }
 0x968   :  { %v5750_v27 = vpop.f32.mrf.mxu2  ;;  %v11925_v32 = vpop.f32.mrf.mxu0 }
 0x969   :  { %v5839_v25 = vpop.f32.mrf.mxu3  ;;  %v5751_v43 = vadd.f32 %v5750_v27, %v5662_v19  ;;  %v5663_v62 = vpop.f32.mrf.mxu1  ;;  %13805 = vst [vmem:[#allocation54_spill] sm:$0xff] %v11925_v32  ;;  %v13807_v19 = vld [vmem:[#allocation134_spill] sm:$0xff]  ;;  %v13809_v32 = vld [vmem:[#allocation227_spill] sm:$0xff] }
 0x96a   :  { %v5664_v16 = vadd.f32 %v5663_v62, %v5575_v50  ;;  %v13808_v27 = vpack.c.bf16 %v13806_v31, %v13807_v19  ;;  %v13810_v50 = vld [vmem:[#allocation225_spill] sm:$0xff] }
 0x96b   :  { %v5840_v3 = vadd.f32 %v5839_v25, %v5751_v43  ;;  %v13811_v25 = vpack.c.bf16 %v13809_v32, %v13810_v50  ;;  %v13813_v43 = vld [vmem:[#allocation163_spill] sm:$0xff] }
 0x96d   :  { %v11927_v33 = vadd.f32 %v5928_v59, %v5840_v3  ;;  %v13812_v59 = vld [vmem:[#allocation165_spill] sm:$0xff]  ;;  %v13816_v3 = vld [vmem:[#allocation194_spill] sm:$0xff] }
 0x96e   :  { %v13814_v62 = vpack.c.bf16 %v13812_v59, %v13813_v43 }
 0x970   :  { %v5752_v42 = vpop.f32.mrf.mxu2  ;;  %v5933_v56 = vpop.f32.mrf.mxu0 }
 0x971   :  { %v5841_v29 = vpop.f32.mrf.mxu3  ;;  %v5753_v12 = vadd.f32 %v5752_v42, %v5664_v16  ;;  %v5666_v41 = vpop.f32.mrf.mxu1  ;;  %v13817_v16 = vpack.c.bf16 %v13815_v45, %v13816_v3  ;;  %v8714_v42 = vld [vmem:[#allocation10 + $0x18] sm:$0xff] }
 0x972   :  { %v5667_v28 = vadd.f32 %v5666_v41, %v5578_v36  ;;  %6333 = vmatpush.bf16.msra.mxu0 %v8714_v42  ;;  %v5580_v36 = vadd.f32 %v11779_v2, %v11564_v11  ;;  %v13819_v42 = vld [vmem:[#allocation229_spill] sm:$0xff] }
 0x973   :  { %v11931_v40 = vadd.f32 %v5841_v29, %v5753_v12  ;;  %5972 = vmatmul.bf16.gmra.mxu0 %v13811_v25  ;;  %v5583_v25 = vadd.f32 %v11779_v2, %v11570_v51  ;;  %v5585_v51 = vadd.f32 %v11779_v2, %v11590_v63 }
 0x974   :  { %5705 = vmatmul.bf16.gmra.mxu1 %v13808_v27 }
 0x975   :  { %5794 = vmatmul.bf16.gmra.mxu2 %v13814_v62 }
 0x976   :  { %5883 = vmatmul.bf16.gmra.mxu3 %v13817_v16 }
 0x978   :  { %v5755_v29 = vpop.f32.mrf.mxu2  ;;  %v11947_v19 = vpop.f32.mrf.mxu0 }
 0x979   :  { %v5844_v12 = vpop.f32.mrf.mxu3  ;;  %v5756_v41 = vadd.f32 %v5755_v29, %v5667_v28  ;;  %v5668_v31 = vpop.f32.mrf.mxu1  ;;  %13818 = vst [vmem:[#allocation55_spill] sm:$0xff] %v11947_v19  ;;  %v13820_v28 = vld [vmem:[#allocation228_spill] sm:$0xff]  ;;  %v13822_v19 = vld [vmem:[#allocation251_spill] sm:$0xff] }
 0x97a   :  { %v5669_v32 = vadd.f32 %v5668_v31, %v5580_v36  ;;  %v13821_v29 = vpack.c.bf16 %v13819_v42, %v13820_v28  ;;  %v13823_v36 = vld [vmem:[#allocation17_spill] sm:$0xff] }
 0x97b   :  { %v5845_v27 = vadd.f32 %v5844_v12, %v5756_v41  ;;  %v13824_v12 = vpack.c.bf16 %v13822_v19, %v13823_v36  ;;  %v5588_v19 = vadd.f32 %v11779_v2, %v11596_v39  ;;  %v13826_v36 = vld [vmem:[#allocation232_spill] sm:$0xff]  ;;  %v8713_v39 = vld [vmem:[#allocation10 + $0x10] sm:$0xff] }
 0x97c   :  { %6334 = vmatpush.bf16.msra.mxu0 %v8713_v39  ;;  %v13837_v39 = vld [vmem:[#allocation22_spill] sm:$0xff] }
 0x97d   :  { %v11949_v50 = vadd.f32 %v5933_v56, %v5845_v27  ;;  %v13825_v56 = vpack.c.bf16 %v11432_v60, %v11426_v57 }
 0x980   :  { %v5757_v59 = vpop.f32.mrf.mxu2  ;;  %v5938_v3 = vpop.f32.mrf.mxu0 }
 0x981   :  { %v5846_v43 = vpop.f32.mrf.mxu3  ;;  %v5758_v62 = vadd.f32 %v5757_v59, %v5669_v32  ;;  %v5671_v45 = vpop.f32.mrf.mxu1 }
 0x982   :  { %v5672_v16 = vadd.f32 %v5671_v45, %v5583_v25 }
 0x983   :  { %v11953_v11 = vadd.f32 %v5846_v43, %v5758_v62 }
 0x984   :  { %5986 = vmatmul.bf16.vlgmr.msra.gmra.mxu1 %v13821_v29 }
 0x985   :  { %6075 = vmatmul.bf16.vlgmr.msra.gmra.mxu2 %v13824_v12 }
 0x986   :  { %6164 = vmatmul.bf16.vlgmr.msra.gmra.mxu3 %v13825_v56  ;;  %v13829_v56 = vld [vmem:[#allocation253_spill] sm:$0xff] }
 0x988   :  { %v5760_v41 = vpop.f32.mrf.mxu2  ;;  %v11966_v25 = vpop.f32.mrf.mxu0 }
 0x989   :  { %v5849_v31 = vpop.f32.mrf.mxu3  ;;  %v5761_v32 = vadd.f32 %v5760_v41, %v5672_v16  ;;  %v5673_v27 = vpop.f32.mrf.mxu1  ;;  %v13827_v16 = vld [vmem:[#allocation231_spill] sm:$0xff] }
 0x98a   :  { %v5674_v59 = vadd.f32 %v5673_v27, %v5585_v51  ;;  %v13828_v12 = vpack.c.bf16 %v13826_v36, %v13827_v16  ;;  %v13830_v51 = vld [vmem:[#allocation252_spill] sm:$0xff] }
 0x98b   :  { %v5850_v43 = vadd.f32 %v5849_v31, %v5761_v32  ;;  %v13831_v41 = vpack.c.bf16 %v13829_v56, %v13830_v51  ;;  %v5590_v31 = vadd.f32 %v11779_v2, %v11616_v14  ;;  %v13833_v51 = vld [vmem:[#allocation234_spill] sm:$0xff] }
 0x98d   :  { %v11968_v62 = vadd.f32 %v5938_v3, %v5850_v43  ;;  %v13832_v3 = vpack.c.bf16 %v11452_v22, %v11446_v8 }
 0x990   :  { %v5762_v45 = vpop.f32.mrf.mxu2  ;;  %v5943_v28 = vpop.f32.mrf.mxu0 }
 0x991   :  { %v5851_v42 = vpop.f32.mrf.mxu3  ;;  %v5763_v60 = vadd.f32 %v5762_v45, %v5674_v59  ;;  %v5676_v57 = vpop.f32.mrf.mxu1 }
 0x992   :  { %v5677_v29 = vadd.f32 %v5676_v57, %v5588_v19  ;;  %v5593_v57 = vadd.f32 %v11779_v2, %v11622_v13  ;;  %v5595_v13 = vadd.f32 %v11779_v2, %v11642_v17 }
 0x993   :  { %v11972_v63 = vadd.f32 %v5851_v42, %v5763_v60 }
 0x994   :  { %5991 = vmatmul.bf16.gmra.mxu1 %v13828_v12 }
 0x995   :  { %6080 = vmatmul.bf16.gmra.mxu2 %v13831_v41 }
 0x996   :  { %6169 = vmatmul.bf16.gmra.mxu3 %v13832_v3  ;;  %v13836_v3 = vld [vmem:[#allocation254_spill] sm:$0xff] }
 0x998   :  { %v5765_v32 = vpop.f32.mrf.mxu2  ;;  %v11985_v19 = vpop.f32.mrf.mxu0 }
 0x999   :  { %v5854_v27 = vpop.f32.mrf.mxu3  ;;  %v5766_v59 = vadd.f32 %v5765_v32, %v5677_v29  ;;  %v5678_v43 = vpop.f32.mrf.mxu1  ;;  %v13834_v29 = vld [vmem:[#allocation233_spill] sm:$0xff] }
 0x99a   :  { %v5679_v45 = vadd.f32 %v5678_v43, %v5590_v31  ;;  %v13835_v41 = vpack.c.bf16 %v13833_v51, %v13834_v29  ;;  %v13838_v31 = vpack.c.bf16 %v13836_v3, %v13837_v39  ;;  %v13841_v39 = vld [vmem:[#allocation236_spill] sm:$0xff] }
 0x99b   :  { %v5855_v42 = vadd.f32 %v5854_v27, %v5766_v59 }
 0x99d   :  { %v11987_v60 = vadd.f32 %v5943_v28, %v5855_v42  ;;  %v13839_v28 = vld [vmem:[#allocation35_spill] sm:$0xff] }
 0x99e   :  { %v13840_v32 = vpack.c.bf16 %v11472_v1, %v13839_v28  ;;  %v13844_v28 = vld [vmem:[#allocation114_spill] sm:$0xff] }
 0x9a0   :  { %v5767_v8 = vpop.f32.mrf.mxu2  ;;  %v5948_v12 = vpop.f32.mrf.mxu0 }
 0x9a1   :  { %v5856_v22 = vpop.f32.mrf.mxu3  ;;  %v5768_v36 = vadd.f32 %v5767_v8, %v5679_v45  ;;  %v5681_v16 = vpop.f32.mrf.mxu1 }
 0x9a2   :  { %v5682_v56 = vadd.f32 %v5681_v16, %v5593_v57 }
 0x9a3   :  { %v11991_v14 = vadd.f32 %v5856_v22, %v5768_v36  ;;  %v5598_v36 = vadd.f32 %v11779_v2, %v11648_v38  ;;  %v8712_v38 = vld [vmem:[#allocation10 + $0x8] sm:$0xff] }
 0x9a4   :  { %5996 = vmatmul.bf16.gmra.mxu1 %v13835_v41  ;;  %6335 = vmatpush.bf16.msra.mxu0 %v8712_v38  ;;  %v13853_v38 = vld [vmem:[#allocation18_spill] sm:$0xff] }
 0x9a5   :  { %6085 = vmatmul.bf16.gmra.mxu2 %v13838_v31 }
 0x9a6   :  { %6174 = vmatmul.bf16.gmra.mxu3 %v13840_v32  ;;  %v13845_v32 = vld [vmem:[#allocation25_spill] sm:$0xff] }
 0x9a8   :  { %v5770_v27 = vpop.f32.mrf.mxu2  ;;  %v12004_v42 = vpop.f32.mrf.mxu0 }
 0x9a9   :  { %v5859_v59 = vpop.f32.mrf.mxu3  ;;  %v5771_v43 = vadd.f32 %v5770_v27, %v5682_v56  ;;  %v5683_v45 = vpop.f32.mrf.mxu1  ;;  %v13842_v56 = vld [vmem:[#allocation235_spill] sm:$0xff] }
 0x9aa   :  { %v5684_v57 = vadd.f32 %v5683_v45, %v5595_v13  ;;  %v13843_v31 = vpack.c.bf16 %v13841_v39, %v13842_v56  ;;  %v13846_v13 = vpack.c.bf16 %v13844_v28, %v13845_v32 }
 0x9ab   :  { %v5860_v8 = vadd.f32 %v5859_v59, %v5771_v43  ;;  %v5600_v59 = vadd.f32 %v11779_v2, %v11668_v46 }
 0x9ad   :  { %v12006_v22 = vadd.f32 %v5948_v12, %v5860_v8  ;;  %v13847_v12 = vld [vmem:[#allocation83_spill] sm:$0xff] }
 0x9ae   :  { %v13848_v27 = vpack.c.bf16 %v11492_v48, %v13847_v12 }
 0x9b0   :  { %v5772_v16 = vpop.f32.mrf.mxu2  ;;  %v5953_v41 = vpop.f32.mrf.mxu0 }
 0x9b1   :  { %v5861_v51 = vpop.f32.mrf.mxu3  ;;  %v5773_v1 = vadd.f32 %v5772_v16, %v5684_v57  ;;  %v5686_v29 = vpop.f32.mrf.mxu1 }
 0x9b2   :  { %v5687_v3 = vadd.f32 %v5686_v29, %v5598_v36  ;;  %v5603_v29 = vadd.f32 %v11779_v2, %v11674_v6  ;;  %v5605_v6 = vadd.f32 %v11779_v2, %v11694_v52 }
 0x9b3   :  { %v12010_v17 = vadd.f32 %v5861_v51, %v5773_v1 }
 0x9b4   :  { %6001 = vmatmul.bf16.gmra.mxu1 %v13843_v31 }
 0x9b5   :  { %6090 = vmatmul.bf16.gmra.mxu2 %v13846_v13  ;;  %v13849_v13 = vld [vmem:[#allocation238_spill] sm:$0xff] }
 0x9b6   :  { %6179 = vmatmul.bf16.gmra.mxu3 %v13848_v27  ;;  %v13852_v27 = vld [vmem:[#allocation255_spill] sm:$0xff] }
 0x9b8   :  { %v5775_v43 = vpop.f32.mrf.mxu2  ;;  %v12023_v36 = vpop.f32.mrf.mxu0 }
 0x9b9   :  { %v5864_v45 = vpop.f32.mrf.mxu3  ;;  %v5776_v57 = vadd.f32 %v5775_v43, %v5687_v3  ;;  %v5688_v8 = vpop.f32.mrf.mxu1  ;;  %v13850_v3 = vld [vmem:[#allocation237_spill] sm:$0xff] }
 0x9ba   :  { %v5689_v16 = vadd.f32 %v5688_v8, %v5600_v59  ;;  %v13851_v12 = vpack.c.bf16 %v13849_v13, %v13850_v3  ;;  %v13854_v59 = vpack.c.bf16 %v13852_v27, %v13853_v38  ;;  %v13859_v38 = vld [vmem:[#allocation77_spill] sm:$0xff] }
 0x9bb   :  { %v5865_v51 = vadd.f32 %v5864_v45, %v5776_v57 }
 0x9bd   :  { %v12025_v1 = vadd.f32 %v5953_v41, %v5865_v51  ;;  %v13855_v41 = vpack.c.bf16 %v11512_v53, %v11506_v58 }
 0x9c0   :  { %v5777_v48 = vpop.f32.mrf.mxu2  ;;  %v5958_v28 = vpop.f32.mrf.mxu0 }
 0x9c1   :  { %v5866_v39 = vpop.f32.mrf.mxu3  ;;  %v5778_v56 = vadd.f32 %v5777_v48, %v5689_v16  ;;  %v5691_v31 = vpop.f32.mrf.mxu1 }
 0x9c2   :  { %v5692_v32 = vadd.f32 %v5691_v31, %v5603_v29 }
 0x9c3   :  { %v12029_v46 = vadd.f32 %v5866_v39, %v5778_v56  ;;  %v5608_v39 = vadd.f32 %v11779_v2, %v11700_v37  ;;  %v8711_v37 = vld [vmem:[#allocation10] sm:$0xff] }
 0x9c4   :  { %6006 = vmatmul.bf16.gmra.mxu1 %v13851_v12  ;;  %v13856_v12 = vld [vmem:[#allocation240_spill] sm:$0xff]  ;;  %6336 = vmatpush.bf16.msra.mxu0 %v8711_v37 }
 0x9c5   :  { %6095 = vmatmul.bf16.gmra.mxu2 %v13854_v59  ;;  %v13860_v59 = vld [vmem:[#allocation20_spill] sm:$0xff] }
 0x9c6   :  { %6184 = vmatmul.bf16.gmra.mxu3 %v13855_v41  ;;  %v13861_v41 = vpack.c.bf16 %v13859_v38, %v13860_v59  ;;  %v13866_v38 = vld [vmem:[#allocation257_spill] sm:$0xff]  ;;  %v13867_v59 = vld [vmem:[#allocation256_spill] sm:$0xff] }
 0x9c8   :  { %v5780_v43 = vpop.f32.mrf.mxu2  ;;  %v12042_v16 = vpop.f32.mrf.mxu0 }
 0x9c9   :  { %v5869_v45 = vpop.f32.mrf.mxu3  ;;  %v5781_v57 = vadd.f32 %v5780_v43, %v5692_v32  ;;  %v5693_v8 = vpop.f32.mrf.mxu1  ;;  %v13857_v32 = vld [vmem:[#allocation239_spill] sm:$0xff] }
 0x9ca   :  { %v5694_v51 = vadd.f32 %v5693_v8, %v5605_v6  ;;  %v13858_v27 = vpack.c.bf16 %v13856_v12, %v13857_v32  ;;  %v5610_v6 = vadd.f32 %v11779_v2, %v11720_v44  ;;  %v13863_v44 = vld [vmem:[#allocation242_spill] sm:$0xff] }
 0x9cb   :  { %v5870_v29 = vadd.f32 %v5869_v45, %v5781_v57 }
 0x9cd   :  { %v12044_v48 = vadd.f32 %v5958_v28, %v5870_v29  ;;  %v13862_v28 = vpack.c.bf16 %v11532_v24, %v11526_v5 }
 0x9d0   :  { %v5782_v56 = vpop.f32.mrf.mxu2  ;;  %v5963_v52 = vpop.f32.mrf.mxu0 }
 0x9d1   :  { %v5871_v31 = vpop.f32.mrf.mxu3  ;;  %v5783_v58 = vadd.f32 %v5782_v56, %v5694_v51  ;;  %v5696_v53 = vpop.f32.mrf.mxu1 }
 0x9d2   :  { %v5697_v13 = vadd.f32 %v5696_v53, %v5608_v39 }
 0x9d3   :  { %v12048_v3 = vadd.f32 %v5871_v31, %v5783_v58  ;;  %v5613_v31 = vadd.f32 %v11779_v2, %v11726_v61 }
 0x9d4   :  { %6011 = vmatmul.bf16.gmra.mxu1 %v13858_v27  ;;  %v13864_v27 = vld [vmem:[#allocation241_spill] sm:$0xff] }
 0x9d5   :  { %6100 = vmatmul.bf16.gmra.mxu2 %v13861_v41  ;;  %v13868_v41 = vpack.c.bf16 %v13866_v38, %v13867_v59  ;;  %v13876_v59 = vld [vmem:[#allocation37_spill] sm:$0xff] }
 0x9d6   :  { %6189 = vmatmul.bf16.gmra.mxu3 %v13862_v28  ;;  %v5615_v28 = vadd.f32 %v11779_v2, %v11746_v21  ;;  %v13870_v21 = vld [vmem:[#allocation244_spill] sm:$0xff] }
 0x9d8   :  { %v5785_v43 = vpop.f32.mrf.mxu2  ;;  %v12061_v39 = vpop.f32.mrf.mxu0 }
 0x9d9   :  { %v5874_v45 = vpop.f32.mrf.mxu3  ;;  %v5786_v57 = vadd.f32 %v5785_v43, %v5697_v13  ;;  %v5698_v8 = vpop.f32.mrf.mxu1  ;;  %v13865_v13 = vpack.c.bf16 %v13863_v44, %v13864_v27  ;;  %v13871_v44 = vld [vmem:[#allocation243_spill] sm:$0xff] }
 0x9da   :  { %v5699_v51 = vadd.f32 %v5698_v8, %v5610_v6  ;;  %v13873_v27 = vld [vmem:[#allocation259_spill] sm:$0xff] }
 0x9db   :  { %v5875_v29 = vadd.f32 %v5874_v45, %v5786_v57 }
 0x9dd   :  { %v12063_v56 = vadd.f32 %v5963_v52, %v5875_v29  ;;  %v13869_v52 = vpack.c.bf16 %v11552_v26, %v11546_v20  ;;  %v5618_v29 = vadd.f32 %v11779_v2, %v11752_v47 }
 0x9e0   :  { %v5787_v5 = vpop.f32.mrf.mxu2  ;;  %v5968_v61 = vpop.f32.mrf.mxu0 }
 0x9e1   :  { %v5876_v24 = vpop.f32.mrf.mxu3  ;;  %v5788_v58 = vadd.f32 %v5787_v5, %v5699_v51  ;;  %v5701_v53 = vpop.f32.mrf.mxu1 }
 0x9e2   :  { %v5702_v12 = vadd.f32 %v5701_v53, %v5613_v31 }
 0x9e3   :  { %v12067_v32 = vadd.f32 %v5876_v24, %v5788_v58 }
 0x9e4   :  { %6016 = vmatmul.bf16.gmra.mxu1 %v13865_v13  ;;  %v13874_v13 = vld [vmem:[#allocation258_spill] sm:$0xff] }
 0x9e5   :  { %6105 = vmatmul.bf16.gmra.mxu2 %v13868_v41  ;;  %v13875_v38 = vpack.c.bf16 %v13873_v27, %v13874_v13  ;;  %v13877_v41 = vld [vmem:[#allocation81_spill] sm:$0xff]  ;;  %v13886_v13 = vld [vmem:[#allocation38_spill] sm:$0xff] }
 0x9e6   :  { %6194 = vmatmul.bf16.gmra.mxu3 %v13869_v52  ;;  %v13878_v47 = vpack.c.bf16 %v13876_v59, %v13877_v41  ;;  %v5620_v52 = vadd.f32 %v11779_v2, %v11772_v15  ;;  %v13882_v15 = vld [vmem:[#allocation56_spill] sm:$0xff]  ;;  %v13883_v2 = vld [vmem:[#allocation59_spill] sm:$0xff] }
 0x9e7   :  { %v13884_v27 = vpack.c.bf16 %v13882_v15, %v13883_v2  ;;  %v13892_v15 = vld [vmem:[#allocation60_spill] sm:$0xff] }
 0x9e8   :  { %v5790_v37 = vpop.f32.mrf.mxu2  ;;  %v12084_v26 = vpop.f32.mrf.mxu0  ;;  %v13893_v2 = vld [vmem:[#allocation64_spill] sm:$0xff] }
 0x9e9   :  { %v5879_v6 = vpop.f32.mrf.mxu3  ;;  %v5791_v43 = vadd.f32 %v5790_v37, %v5702_v12  ;;  %v5703_v45 = vpop.f32.mrf.mxu1  ;;  %v13872_v12 = vpack.c.bf16 %v13870_v21, %v13871_v44  ;;  %v13879_v21 = vld [vmem:[#allocation246_spill] sm:$0xff]  ;;  %v13880_v44 = vld [vmem:[#allocation245_spill] sm:$0xff] }
 0x9ea   :  { %v5704_v57 = vadd.f32 %v5703_v45, %v5615_v28 }
 0x9eb   :  { %v5880_v8 = vadd.f32 %v5879_v6, %v5791_v43 }
 0x9ed   :  { %v12080_v51 = vadd.f32 %v5968_v61, %v5880_v8 }
 0x9f0   :  { %v5792_v31 = vpop.f32.mrf.mxu2 }
 0x9f1   :  { %v5881_v5 = vpop.f32.mrf.mxu3  ;;  %v5793_v24 = vadd.f32 %v5792_v31, %v5704_v57  ;;  %v5706_v20 = vpop.f32.mrf.mxu1 }
 0x9f2   :  { %v5707_v58 = vadd.f32 %v5706_v20, %v5618_v29  ;;  %v5973_v57 = vpop.f32.mrf.mxu0 }
 0x9f3   :  { %v12086_v53 = vadd.f32 %v5881_v5, %v5793_v24 }
 0x9f4   :  { %6021 = vmatmul.bf16.gmra.mxu1 %v13872_v12  ;;  %v13881_v12 = vpack.c.bf16 %v13879_v21, %v13880_v44  ;;  %v13890_v21 = vld [vmem:[#allocation247_spill] sm:$0xff] }
 0x9f5   :  { %6110 = vmatmul.bf16.gmra.mxu2 %v13875_v38 }
 0x9f6   :  { %6199 = vmatmul.bf16.gmra.mxu3 %v13878_v47 }
 0x9f8   :  { %v5795_v61 = vpop.f32.mrf.mxu2 }
 0x9f9   :  { %v5884_v28 = vpop.f32.mrf.mxu3  ;;  %v5796_v37 = vadd.f32 %v5795_v61, %v5707_v58  ;;  %v5708_v6 = vpop.f32.mrf.mxu1  ;;  %v13885_v58 = vld [vmem:[#allocation100_spill] sm:$0xff] }
 0x9fa   :  { %v5709_v43 = vadd.f32 %v5708_v6, %v5620_v52  ;;  %v13887_v38 = vpack.c.bf16 %v13885_v58, %v13886_v13  ;;  %v13888_v52 = vld [vmem:[#allocation89_spill] sm:$0xff]  ;;  %v13895_v58 = vld [vmem:[#allocation86_spill] sm:$0xff] }
 0x9fb   :  { %v5885_v45 = vadd.f32 %v5884_v28, %v5796_v37 }
 0x9fd   :  { %v12099_v8 = vadd.f32 %v5973_v57, %v5885_v45 }
 0xa00   :  { %v5797_v29 = vpop.f32.mrf.mxu2 }
 0xa01   :  { %v5886_v31 = vpop.f32.mrf.mxu3  ;;  %v5798_v5 = vadd.f32 %v5797_v29, %v5709_v43  ;;  %v5987_v24 = vpop.f32.mrf.mxu1 }
 0xa02   :  { %v5988_v61 = vadd.f32 %v5987_v24, %v13888_v52  ;;  %v13896_v24 = vld [vmem:[#allocation40_spill] sm:$0xff] }
 0xa03   :  { %v12101_v20 = vadd.f32 %v5886_v31, %v5798_v5  ;;  %v13889_v5 = vld [vmem:[#allocation248_spill] sm:$0xff]  ;;  %v13897_v13 = vpack.c.bf16 %v13895_v58, %v13896_v24 }
 0xa04   :  { %6026 = vmatmul.bf16.gmra.mxu1 %v13881_v12  ;;  %v13891_v44 = vpack.c.bf16 %v13889_v5, %v13890_v21 }
 0xa05   :  { %6115 = vmatmul.bf16.gmra.mxu2 %v13884_v27  ;;  %v13894_v27 = vpack.c.bf16 %v13892_v15, %v13893_v2  ;;  %v13904_v2 = vld [vmem:[#allocation42_spill] sm:$0xff] }
 0xa06   :  { %6204 = vmatmul.bf16.gmra.mxu3 %v13887_v38 }
 0xa08   :  { %v6076_v59 = vpop.f32.mrf.mxu2 }
 0xa09   :  { %v6165_v41 = vpop.f32.mrf.mxu3  ;;  %v5989_v47 = vpop.f32.mrf.mxu1  ;;  %v6077_v28 = vadd.f32 %v6076_v59, %v5988_v61 }
 0xa0a   :  { %v5990_v37 = vadd.f32 %v5989_v47, %v11817_v9 }
 0xa0b   :  { %v6166_v29 = vadd.f32 %v6165_v41, %v6077_v28 }
 0xa10   :  { %v6078_v6 = vpop.f32.mrf.mxu2 }
 0xa11   :  { %v6167_v43 = vpop.f32.mrf.mxu3  ;;  %v6079_v45 = vadd.f32 %v6078_v6, %v5990_v37  ;;  %v5992_v57 = vpop.f32.mrf.mxu1 }
 0xa12   :  { %v5993_v41 = vadd.f32 %v5992_v57, %v11821_v4  ;;  %v13905_v4 = vld [vmem:[#allocation85_spill] sm:$0xff] }
 0xa13   :  { %v6168_v31 = vadd.f32 %v6167_v43, %v6079_v45  ;;  %v13906_v57 = vpack.c.bf16 %v13904_v2, %v13905_v4 }
 0xa14   :  { %6031 = vmatmul.bf16.gmra.mxu1 %v13891_v44  ;;  %v13901_v44 = vld [vmem:[#allocation65_spill] sm:$0xff] }
 0xa15   :  { %v6245_v12 = vpack.c.bf16 %v6168_v31, %v6166_v29  ;;  %6120 = vmatmul.bf16.gmra.mxu2 %v13894_v27  ;;  %v13898_v29 = vld [vmem:[#allocation27_spill] sm:$0xff]  ;;  %v13899_v31 = vld [vmem:[#allocation26_spill] sm:$0xff] }
 0xa16   :  { %6209 = vmatmul.bf16.gmra.mxu3 %v13897_v13  ;;  %v13900_v5 = vpack.c.bf16 %v13898_v29, %v13899_v31  ;;  %v13910_v29 = vld [vmem:[#allocation70_spill] sm:$0xff] }
 0xa17   :  { %6337 = vmatmul.bf16.vlgmr.msra.gmra.mxu0 %v6245_v12  ;;  %v13902_v12 = vld [vmem:[#allocation69_spill] sm:$0xff]  ;;  %v13911_v31 = vld [vmem:[#allocation74_spill] sm:$0xff] }
 0xa18   :  { %v6081_v9 = vpop.f32.mrf.mxu2  ;;  %v13903_v15 = vpack.c.bf16 %v13901_v44, %v13902_v12 }
 0xa19   :  { %v6170_v38 = vpop.f32.mrf.mxu3  ;;  %v5994_v59 = vpop.f32.mrf.mxu1  ;;  %v6082_v47 = vadd.f32 %v6081_v9, %v5993_v41 }
 0xa1a   :  { %v5995_v52 = vadd.f32 %v5994_v59, %v11837_v35 }
 0xa1b   :  { %v6171_v43 = vadd.f32 %v6170_v38, %v6082_v47 }
 0xa20   :  { %v6083_v61 = vpop.f32.mrf.mxu2 }
 0xa21   :  { %v6172_v28 = vpop.f32.mrf.mxu3  ;;  %v6084_v37 = vadd.f32 %v6083_v61, %v5995_v52  ;;  %v5997_v6 = vpop.f32.mrf.mxu1 }
 0xa22   :  { %v5998_v24 = vadd.f32 %v5997_v6, %v11841_v30  ;;  %v13914_v30 = vld [vmem:[#allocation43_spill] sm:$0xff] }
 0xa23   :  { %v6173_v45 = vadd.f32 %v6172_v28, %v6084_v37  ;;  %v13907_v28 = vld [vmem:[#allocation23_spill] sm:$0xff]  ;;  %v13908_v37 = vld [vmem:[#allocation126_spill] sm:$0xff] }
 0xa24   :  { %6036 = vmatmul.bf16.gmra.mxu1 %v13900_v5  ;;  %v13912_v5 = vpack.c.bf16 %v13910_v29, %v13911_v31  ;;  %v5921_v31 = vadd.f32 %v11881_v0, %v11887_v49 }
 0xa25   :  { %v6246_v21 = vpack.c.bf16 %v6173_v45, %v6171_v43  ;;  %6125 = vmatmul.bf16.gmra.mxu2 %v13903_v15  ;;  %v13909_v43 = vpack.c.bf16 %v13907_v28, %v13908_v37  ;;  %v13922_v37 = vld [vmem:[#allocation87_spill] sm:$0xff] }
 0xa26   :  { %6214 = vmatmul.bf16.gmra.mxu3 %v13906_v57 }
 0xa27   :  { %6342 = vmatmul.bf16.gmra.mxu0 %v6246_v21  ;;  %v13913_v21 = vld [vmem:[#allocation45_spill] sm:$0xff] }
 0xa28   :  { %v6086_v35 = vpop.f32.mrf.mxu2  ;;  %v13915_v6 = vpack.c.bf16 %v13913_v21, %v13914_v30 }
 0xa29   :  { %v6175_v27 = vpop.f32.mrf.mxu3  ;;  %v5999_v58 = vpop.f32.mrf.mxu1  ;;  %v6087_v13 = vadd.f32 %v6086_v35, %v5998_v24 }
 0xa2a   :  { %v6000_v9 = vadd.f32 %v5999_v58, %v11857_v18 }
 0xa2b   :  { %v6176_v52 = vadd.f32 %v6175_v27, %v6087_v13 }
 0xa30   :  { %v6088_v38 = vpop.f32.mrf.mxu2 }
 0xa31   :  { %v6177_v59 = vpop.f32.mrf.mxu3  ;;  %v6089_v41 = vadd.f32 %v6088_v38, %v6000_v9  ;;  %v6002_v47 = vpop.f32.mrf.mxu1  ;;  %v13916_v9 = vld [vmem:[#allocation16_spill] sm:$0xff] }
 0xa32   :  { %v6003_v15 = vadd.f32 %v6002_v47, %v11861_v54  ;;  %v13917_v38 = vld [vmem:[#allocation96_spill] sm:$0xff] }
 0xa33   :  { %v6178_v61 = vadd.f32 %v6177_v59, %v6089_v41  ;;  %v13918_v59 = vpack.c.bf16 %v13916_v9, %v13917_v38  ;;  %v13923_v54 = vld [vmem:[#allocation88_spill] sm:$0xff] }
 0xa34   :  { %6041 = vmatmul.bf16.gmra.mxu1 %v13909_v43  ;;  %v13924_v47 = vpack.c.bf16 %v13922_v37, %v13923_v54 }
 0xa35   :  { %v6247_v45 = vpack.c.bf16 %v6178_v61, %v6176_v52  ;;  %6130 = vmatmul.bf16.gmra.mxu2 %v13912_v5  ;;  %v13919_v52 = vld [vmem:[#allocation30_spill] sm:$0xff]  ;;  %v13920_v61 = vld [vmem:[#allocation29_spill] sm:$0xff] }
 0xa36   :  { %6219 = vmatmul.bf16.gmra.mxu3 %v13915_v6  ;;  %v13921_v28 = vpack.c.bf16 %v13919_v52, %v13920_v61 }
 0xa37   :  { %6347 = vmatmul.bf16.gmra.mxu0 %v6247_v45 }
 0xa38   :  { %v6091_v18 = vpop.f32.mrf.mxu2 }
 0xa39   :  { %v6180_v44 = vpop.f32.mrf.mxu3  ;;  %v6004_v12 = vpop.f32.mrf.mxu1  ;;  %v6092_v2 = vadd.f32 %v6091_v18, %v6003_v15 }
 0xa3a   :  { %v6005_v4 = vadd.f32 %v6004_v12, %v11877_v23 }
 0xa3b   :  { %v6181_v24 = vadd.f32 %v6180_v44, %v6092_v2  ;;  %v13925_v2 = vld [vmem:[#allocation249_spill] sm:$0xff] }
 0xa40   :  { %v6093_v57 = vpop.f32.mrf.mxu2 }
 0xa41   :  { %v6182_v35 = vpop.f32.mrf.mxu3  ;;  %v6094_v27 = vadd.f32 %v6093_v57, %v6005_v4  ;;  %v6007_v58 = vpop.f32.mrf.mxu1  ;;  %v13926_v4 = vld [vmem:[#allocation19_spill] sm:$0xff] }
 0xa42   :  { %v6008_v29 = vadd.f32 %v6007_v58, %v11883_v10  ;;  %v13927_v57 = vpack.c.bf16 %v13925_v2, %v13926_v4  ;;  %v13931_v10 = vld [vmem:[#allocation48_spill] sm:$0xff]  ;;  %v13932_v58 = vld [vmem:[#allocation47_spill] sm:$0xff]  ;;  %v13943_v2 = vld [vmem:[#allocation54_spill] sm:$0xff] }
 0xa43   :  { %v6183_v13 = vadd.f32 %v6182_v35, %v6094_v27  ;;  %v13928_v27 = vld [vmem:[#allocation31_spill] sm:$0xff]  ;;  %v13933_v0 = vpack.c.bf16 %v13931_v10, %v13932_v58  ;;  %v5931_v4 = vadd.f32 %v13943_v2, %v11931_v40 }
 0xa44   :  { %6046 = vmatmul.bf16.gmra.mxu1 %v13918_v59 }
 0xa45   :  { %v6248_v41 = vpack.c.bf16 %v6183_v13, %v6181_v24  ;;  %6135 = vmatmul.bf16.gmra.mxu2 %v13921_v28  ;;  %v13929_v24 = vld [vmem:[#allocation28_spill] sm:$0xff] }
 0xa46   :  { %6224 = vmatmul.bf16.gmra.mxu3 %v13924_v47  ;;  %v13930_v13 = vpack.c.bf16 %v13928_v27, %v13929_v24 }
 0xa47   :  { %6352 = vmatmul.bf16.gmra.mxu0 %v6248_v41  ;;  %v5926_v41 = vadd.f32 %v11903_v55, %v11909_v7 }
 0xa48   :  { %v6096_v23 = vpop.f32.mrf.mxu2 }
 0xa49   :  { %v6185_v43 = vpop.f32.mrf.mxu3  ;;  %v6009_v45 = vpop.f32.mrf.mxu1  ;;  %v6097_v5 = vadd.f32 %v6096_v23, %v6008_v29  ;;  %v13935_v29 = vld [vmem:[#allocation21_spill] sm:$0xff] }
 0xa4a   :  { %v6010_v21 = vadd.f32 %v6009_v45, %v5921_v31  ;;  %v13934_v45 = vld [vmem:[#allocation250_spill] sm:$0xff] }
 0xa4b   :  { %v6186_v12 = vadd.f32 %v6185_v43, %v6097_v5  ;;  %v13936_v31 = vpack.c.bf16 %v13934_v45, %v13935_v29 }
 0xa50   :  { %v6098_v30 = vpop.f32.mrf.mxu2 }
 0xa51   :  { %v6187_v6 = vpop.f32.mrf.mxu3  ;;  %v6099_v18 = vadd.f32 %v6098_v30, %v6010_v21  ;;  %v6012_v44 = vpop.f32.mrf.mxu1  ;;  %v13937_v21 = vld [vmem:[#allocation76_spill] sm:$0xff]  ;;  %v13938_v30 = vld [vmem:[#allocation79_spill] sm:$0xff] }
 0xa52   :  { %v6013_v59 = vadd.f32 %v6012_v44, %v11905_v34  ;;  %v13940_v34 = vld [vmem:[#allocation226_spill] sm:$0xff] }
 0xa53   :  { %v6188_v15 = vadd.f32 %v6187_v6, %v6099_v18  ;;  %v13939_v6 = vpack.c.bf16 %v13937_v21, %v13938_v30  ;;  %v13941_v18 = vld [vmem:[#allocation24_spill] sm:$0xff] }
 0xa54   :  { %6051 = vmatmul.bf16.gmra.mxu1 %v13927_v57  ;;  %v13942_v55 = vpack.c.bf16 %v13940_v34, %v13941_v18 }
 0xa55   :  { %v6249_v35 = vpack.c.bf16 %v6188_v15, %v6186_v12  ;;  %6140 = vmatmul.bf16.gmra.mxu2 %v13930_v13 }
 0xa56   :  { %6229 = vmatmul.bf16.gmra.mxu3 %v13933_v0 }
 0xa57   :  { %6357 = vmatmul.bf16.gmra.mxu0 %v6249_v35 }
 0xa58   :  { %v6101_v49 = vpop.f32.mrf.mxu2 }
 0xa59   :  { %v6190_v9 = vpop.f32.mrf.mxu3  ;;  %v6014_v38 = vpop.f32.mrf.mxu1  ;;  %v6102_v52 = vadd.f32 %v6101_v49, %v6013_v59  ;;  %v13944_v49 = vld [vmem:[#allocation164_spill] sm:$0xff] }
 0xa5a   :  { %v6015_v61 = vadd.f32 %v6014_v38, %v5926_v41  ;;  %v13947_v41 = vld [vmem:[#allocation33_spill] sm:$0xff] }
 0xa5b   :  { %v6191_v23 = vadd.f32 %v6190_v9, %v6102_v52  ;;  %v13945_v9 = vld [vmem:[#allocation103_spill] sm:$0xff]  ;;  %v13948_v52 = vld [vmem:[#allocation32_spill] sm:$0xff] }
 0xa5c   :  { %v13946_v38 = vpack.c.bf16 %v13944_v49, %v13945_v9 }
 0xa60   :  { %v6103_v28 = vpop.f32.mrf.mxu2 }
 0xa61   :  { %v6192_v37 = vpop.f32.mrf.mxu3  ;;  %v6104_v54 = vadd.f32 %v6103_v28, %v6015_v61  ;;  %v6017_v47 = vpop.f32.mrf.mxu1  ;;  %v13949_v61 = vpack.c.bf16 %v13947_v41, %v13948_v52  ;;  %v13951_v28 = vld [vmem:[#allocation50_spill] sm:$0xff]  ;;  %v5946_v41 = vadd.f32 %v11985_v19, %v11991_v14 }
 0xa62   :  { %v6018_v15 = vadd.f32 %v6017_v47, %v11927_v33  ;;  %v13950_v33 = vld [vmem:[#allocation90_spill] sm:$0xff] }
 0xa63   :  { %v6193_v43 = vadd.f32 %v6192_v37, %v6104_v54  ;;  %v13952_v40 = vpack.c.bf16 %v13950_v33, %v13951_v28 }
 0xa64   :  { %6056 = vmatmul.bf16.gmra.mxu1 %v13936_v31 }
 0xa65   :  { %v6250_v5 = vpack.c.bf16 %v6193_v43, %v6191_v23  ;;  %6145 = vmatmul.bf16.gmra.mxu2 %v13939_v6  ;;  %v13953_v43 = vld [vmem:[#allocation55_spill] sm:$0xff] }
 0xa66   :  { %6234 = vmatmul.bf16.gmra.mxu3 %v13942_v55  ;;  %v5936_v45 = vadd.f32 %v13953_v43, %v11953_v11  ;;  %v5941_v11 = vadd.f32 %v11966_v25, %v11972_v63 }
 0xa67   :  { %6362 = vmatmul.bf16.gmra.mxu0 %v6250_v5 }
 0xa68   :  { %v6106_v7 = vpop.f32.mrf.mxu2 }
 0xa69   :  { %v6195_v44 = vpop.f32.mrf.mxu3  ;;  %v6019_v12 = vpop.f32.mrf.mxu1  ;;  %v6107_v57 = vadd.f32 %v6106_v7, %v6018_v15 }
 0xa6a   :  { %v6020_v35 = vadd.f32 %v6019_v12, %v5931_v4  ;;  %v12195_v15 = vpop.f32.mrf.mxu0 }
 0xa6b   :  { %v6196_v58 = vadd.f32 %v6195_v44, %v6107_v57 }
 0xa70   :  { %v6108_v27 = vpop.f32.mrf.mxu2 }
 0xa71   :  { %v6197_v24 = vpop.f32.mrf.mxu3  ;;  %v6109_v13 = vadd.f32 %v6108_v27, %v6020_v35  ;;  %v6022_v10 = vpop.f32.mrf.mxu1 }
 0xa72   :  { %v6023_v23 = vadd.f32 %v6022_v10, %v11949_v50 }
 0xa73   :  { %v6198_v0 = vadd.f32 %v6197_v24, %v6109_v13  ;;  %v12203_v13 = vld [vmem:[%s12523_s6] ss:$0 sm:$0xff]  ;;  %s9054_s6 = smov [#allocation11]  }
 0xa74   :  { %6061 = vmatmul.bf16.gmra.mxu1 %v13946_v38  ;;  %s6742_s30 = sshll.u32 %s9054_s6, 4  ;;  %s6743_s30 = int_to_ptr.vmem [resolvable:$true] %s6742_s30 }
 0xa75   :  { %v6251_v59 = vpack.c.bf16 %v6198_v0, %v6196_v58  ;;  %6150 = vmatmul.bf16.gmra.mxu2 %v13949_v61 }
 0xa76   :  { %6239 = vmatmul.bf16.gmra.mxu3 %v13952_v40 }
 0xa77   :  { %6367 = vmatmul.bf16.gmra.mxu0 %v6251_v59 }
 0xa78   :  { %v6111_v37 = vpop.f32.mrf.mxu2 }
 0xa79   :  { %v6200_v54 = vpop.f32.mrf.mxu3  ;;  %v6024_v47 = vpop.f32.mrf.mxu1  ;;  %v6112_v29 = vadd.f32 %v6111_v37, %v6023_v23 }
 0xa7a   :  { %v6025_v31 = vadd.f32 %v6024_v47, %v5936_v45 }
 0xa7b   :  { %v6201_v34 = vadd.f32 %v6200_v54, %v6112_v29 }
 0xa80   :  { %v6113_v5 = vpop.f32.mrf.mxu2 }
 0xa81   :  { %v6202_v21 = vpop.f32.mrf.mxu3  ;;  %v6114_v30 = vadd.f32 %v6113_v5, %v6025_v31  ;;  %v6027_v6 = vpop.f32.mrf.mxu1 }
 0xa82   :  { %v6028_v50 = vadd.f32 %v6027_v6, %v11968_v62 }
 0xa83   :  { %v6203_v18 = vadd.f32 %v6202_v21, %v6114_v30  ;;  %v5951_v21 = vadd.f32 %v12004_v42, %v12010_v17 }
 0xa85   :  { %v6252_v55 = vpack.c.bf16 %v6203_v18, %v6201_v34 }
 0xa87   :  { %6372 = vmatmul.bf16.gmra.mxu0 %v6252_v55 }
 0xa88   :  { %v6116_v7 = vpop.f32.mrf.mxu2 }
 0xa89   :  { %v6205_v44 = vpop.f32.mrf.mxu3  ;;  %v6029_v12 = vpop.f32.mrf.mxu1  ;;  %v6117_v2 = vadd.f32 %v6116_v7, %v6028_v50 }
 0xa8a   :  { %v6030_v4 = vadd.f32 %v6029_v12, %v5941_v11 }
 0xa8b   :  { %v6206_v10 = vadd.f32 %v6205_v44, %v6117_v2 }
 0xa90   :  { %v6118_v57 = vpop.f32.mrf.mxu2 }
 0xa91   :  { %v6207_v35 = vpop.f32.mrf.mxu3  ;;  %v6119_v27 = vadd.f32 %v6118_v57, %v6030_v4  ;;  %v6032_v24 = vpop.f32.mrf.mxu1 }
 0xa92   :  { %v6033_v59 = vadd.f32 %v6032_v24, %v11987_v60 }
 0xa93   :  { %v6208_v58 = vadd.f32 %v6207_v35, %v6119_v27  ;;  %v5956_v27 = vadd.f32 %v12023_v36, %v12029_v46 }
 0xa94   :  { %v6338_v0 = vpop.f32.mrf.mxu0 }
 0xa95   :  { %v6253_v49 = vpack.c.bf16 %v6208_v58, %v6206_v10  ;;  %v12206_v62 = vadd.f32 %v12203_v13, %v6338_v0 }
 0xa97   :  { %6377 = vmatmul.bf16.gmra.mxu0 %v6253_v49  ;;  %6418 = vmax.xlane.f32.xlu0 %v12206_v62 }
 0xa98   :  { %v6121_v25 = vpop.f32.mrf.mxu2 }
 0xa99   :  { %v6210_v63 = vpop.f32.mrf.mxu3  ;;  %v6034_v9 = vpop.f32.mrf.mxu1  ;;  %v6122_v61 = vadd.f32 %v6121_v25, %v6033_v59 }
 0xa9a   :  { %v6035_v33 = vadd.f32 %v6034_v9, %v5946_v41 }
 0xa9b   :  { %v6211_v47 = vadd.f32 %v6210_v63, %v6122_v61 }
 0xa9c   :  { %v6340_v38 = vpop.f32.mrf.mxu0 }
 0xa9d   :  { %v12213_v52 = vadd.f32 %v12203_v13, %v6340_v38 }
 0xa9f   :  { %6420 = vmax.xlane.f32.xlu0 %v12213_v52 }
 0xaa0   :  { %v6123_v28 = vpop.f32.mrf.mxu2 }
 0xaa1   :  { %v6212_v40 = vpop.f32.mrf.mxu3  ;;  %v6124_v37 = vadd.f32 %v6123_v28, %v6035_v33  ;;  %v6037_v54 = vpop.f32.mrf.mxu1 }
 0xaa2   :  { %v6038_v5 = vadd.f32 %v6037_v54, %v12006_v22 }
 0xaa3   :  { %v6213_v23 = vadd.f32 %v6212_v40, %v6124_v37  ;;  %v5961_v40 = vadd.f32 %v12042_v16, %v12048_v3 }
 0xaa4   :  { %v6343_v43 = vpop.f32.mrf.mxu0 }
 0xaa5   :  { %v6254_v45 = vpack.c.bf16 %v6213_v23, %v6211_v47  ;;  %v12217_v60 = vadd.f32 %v12203_v13, %v6343_v43 }
 0xaa7   :  { %6382 = vmatmul.bf16.gmra.mxu0 %v6254_v45  ;;  %6422 = vmax.xlane.f32.xlu1 %v12217_v60 }
 0xaa8   :  { %v6126_v19 = vpop.f32.mrf.mxu2 }
 0xaa9   :  { %v6215_v14 = vpop.f32.mrf.mxu3  ;;  %v6039_v29 = vpop.f32.mrf.mxu1  ;;  %v6127_v6 = vadd.f32 %v6126_v19, %v6038_v5 }
 0xaaa   :  { %v6040_v34 = vadd.f32 %v6039_v29, %v5951_v21 }
 0xaab   :  { %v6216_v12 = vadd.f32 %v6215_v14, %v6127_v6 }
 0xaac   :  { %v6345_v31 = vpop.f32.mrf.mxu0 }
 0xaad   :  { %v12224_v30 = vadd.f32 %v12203_v13, %v6345_v31 }
 0xaaf   :  { %6424 = vmax.xlane.f32.xlu1 %v12224_v30 }
 0xab0   :  { %v6128_v18 = vpop.f32.mrf.mxu2 }
 0xab1   :  { %v6217_v55 = vpop.f32.mrf.mxu3  ;;  %v6129_v7 = vadd.f32 %v6128_v18, %v6040_v34  ;;  %v6042_v44 = vpop.f32.mrf.mxu1  ;;  %v5966_v18 = vadd.f32 %v12061_v39, %v12067_v32 }
 0xab2   :  { %v6043_v35 = vadd.f32 %v6042_v44, %v12025_v1 }
 0xab3   :  { %v6218_v50 = vadd.f32 %v6217_v55, %v6129_v7 }
 0xab4   :  { %v6348_v11 = vpop.f32.mrf.mxu0 }
 0xab5   :  { %v6255_v2 = vpack.c.bf16 %v6218_v50, %v6216_v12  ;;  %v12228_v22 = vadd.f32 %v12203_v13, %v6348_v11 }
 0xab7   :  { %6387 = vmatmul.bf16.gmra.mxu0 %v6255_v2  ;;  %6426 = vmax.xlane.f32.xlu2 %v12228_v22 }
 0xab8   :  { %v6131_v42 = vpop.f32.mrf.mxu2 }
 0xab9   :  { %v6220_v17 = vpop.f32.mrf.mxu3  ;;  %v6044_v4 = vpop.f32.mrf.mxu1  ;;  %v6132_v10 = vadd.f32 %v6131_v42, %v6043_v35 }
 0xaba   :  { %v6045_v58 = vadd.f32 %v6044_v4, %v5956_v27 }
 0xabb   :  { %v6221_v9 = vadd.f32 %v6220_v17, %v6132_v10 }
 0xabc   :  { %v6350_v57 = vpop.f32.mrf.mxu0 }
 0xabd   :  { %v12235_v24 = vadd.f32 %v12203_v13, %v6350_v57 }
 0xabf   :  { %6428 = vmax.xlane.f32.xlu2 %v12235_v24 }
 0xac0   :  { %v6133_v0 = vpop.f32.mrf.mxu2 }
 0xac1   :  { %v6222_v49 = vpop.f32.mrf.mxu3  ;;  %v6134_v25 = vadd.f32 %v6133_v0, %v6045_v58  ;;  %v6047_v63 = vpop.f32.mrf.mxu1  ;;  %v5971_v58 = vadd.f32 %v12084_v26, %v12086_v53 }
 0xac2   :  { %v6048_v28 = vadd.f32 %v6047_v63, %v12044_v48 }
 0xac3   :  { %v6223_v38 = vadd.f32 %v6222_v49, %v6134_v25 }
 0xac4   :  { %v6353_v59 = vpop.f32.mrf.mxu0 }
 0xac5   :  { %v6256_v41 = vpack.c.bf16 %v6223_v38, %v6221_v9  ;;  %v12239_v1 = vadd.f32 %v12203_v13, %v6353_v59 }
 0xac7   :  { %6392 = vmatmul.bf16.gmra.mxu0 %v6256_v41  ;;  %6430 = vmax.xlane.f32.xlu0 %v12239_v1 }
 0xac8   :  { %v6136_v36 = vpop.f32.mrf.mxu2 }
 0xac9   :  { %v6225_v46 = vpop.f32.mrf.mxu3  ;;  %v6049_v61 = vpop.f32.mrf.mxu1  ;;  %v6137_v54 = vadd.f32 %v6136_v36, %v6048_v28 }
 0xaca   :  { %v6050_v47 = vadd.f32 %v6049_v61, %v5961_v40 }
 0xacb   :  { %v6226_v14 = vadd.f32 %v6225_v46, %v6137_v54  ;;  %v5976_v54 = vadd.f32 %v12195_v15, %v12101_v20 }
 0xacc   :  { %v6355_v33 = vpop.f32.mrf.mxu0 }
 0xacd   :  { %v12246_v37 = vadd.f32 %v12203_v13, %v6355_v33 }
 0xacf   :  { %6432 = vmax.xlane.f32.xlu1 %v12246_v37 }
 0xad0   :  { %v6138_v23 = vpop.f32.mrf.mxu2 }
 0xad1   :  { %v6227_v43 = vpop.f32.mrf.mxu3  ;;  %v6139_v45 = vadd.f32 %v6138_v23, %v6050_v47  ;;  %v6052_v19 = vpop.f32.mrf.mxu1 }
 0xad2   :  { %v6053_v34 = vadd.f32 %v6052_v19, %v12063_v56 }
 0xad3   :  { %v6228_v29 = vadd.f32 %v6227_v43, %v6139_v45 }
 0xad4   :  { %v6358_v31 = vpop.f32.mrf.mxu0 }
 0xad5   :  { %v6257_v5 = vpack.c.bf16 %v6228_v29, %v6226_v14  ;;  %v12250_v48 = vadd.f32 %v12203_v13, %v6358_v31 }
 0xad7   :  { %6397 = vmatmul.bf16.gmra.mxu0 %v6257_v5  ;;  %6434 = vmax.xlane.f32.xlu2 %v12250_v48 }
 0xad8   :  { %v6141_v16 = vpop.f32.mrf.mxu2 }
 0xad9   :  { %v6230_v3 = vpop.f32.mrf.mxu3  ;;  %v6054_v21 = vpop.f32.mrf.mxu1  ;;  %v6142_v7 = vadd.f32 %v6141_v16, %v6053_v34 }
 0xada   :  { %v6055_v44 = vadd.f32 %v6054_v21, %v5966_v18 }
 0xadb   :  { %v6231_v42 = vadd.f32 %v6230_v3, %v6142_v7 }
 0xadc   :  { %v6360_v6 = vpop.f32.mrf.mxu0 }
 0xadd   :  { %v12257_v55 = vadd.f32 %v12203_v13, %v6360_v6 }
 0xadf   :  { %6436 = vmax.xlane.f32.xlu0 %v12257_v55 }
 0xae0   :  { %v6143_v12 = vpop.f32.mrf.mxu2 }
 0xae1   :  { %v6232_v50 = vpop.f32.mrf.mxu3  ;;  %v6144_v11 = vadd.f32 %v6143_v12, %v6055_v44  ;;  %v6057_v2 = vpop.f32.mrf.mxu1 }
 0xae2   :  { %v6058_v10 = vadd.f32 %v6057_v2, %v12080_v51 }
 0xae3   :  { %v6233_v17 = vadd.f32 %v6232_v50, %v6144_v11 }
 0xae4   :  { %v6363_v4 = vpop.f32.mrf.mxu0 }
 0xae5   :  { %v6258_v57 = vpack.c.bf16 %v6233_v17, %v6231_v42  ;;  %v12261_v56 = vadd.f32 %v12203_v13, %v6363_v4 }
 0xae7   :  { %6402 = vmatmul.bf16.gmra.mxu0 %v6258_v57  ;;  %6438 = vmax.xlane.f32.xlu1 %v12261_v56 }
 0xae8   :  { %v6146_v39 = vpop.f32.mrf.mxu2 }
 0xae9   :  { %v6235_v32 = vpop.f32.mrf.mxu3  ;;  %v6059_v35 = vpop.f32.mrf.mxu1  ;;  %v6147_v49 = vadd.f32 %v6146_v39, %v6058_v10 }
 0xaea   :  { %v6060_v25 = vadd.f32 %v6059_v35, %v5971_v58 }
 0xaeb   :  { %v6236_v41 = vadd.f32 %v6235_v32, %v6147_v49 }
 0xaec   :  { %v6365_v27 = vpop.f32.mrf.mxu0 }
 0xaed   :  { %v12268_v0 = vadd.f32 %v12203_v13, %v6365_v27 }
 0xaef   :  { %6440 = vmax.xlane.f32.xlu2 %v12268_v0 }
 0xaf0   :  { %v6148_v63 = vpop.f32.mrf.mxu2 }
 0xaf1   :  { %v6237_v9 = vpop.f32.mrf.mxu3  ;;  %v6149_v38 = vadd.f32 %v6148_v63, %v6060_v25  ;;  %v6062_v59 = vpop.f32.mrf.mxu1 }
 0xaf2   :  { %v6063_v40 = vadd.f32 %v6062_v59, %v12099_v8 }
 0xaf3   :  { %v6238_v36 = vadd.f32 %v6237_v9, %v6149_v38 }
 0xaf4   :  { %v6368_v46 = vpop.f32.mrf.mxu0 }
 0xaf5   :  { %v6259_v61 = vpack.c.bf16 %v6238_v36, %v6236_v41  ;;  %v12272_v51 = vadd.f32 %v12203_v13, %v6368_v46 }
 0xaf7   :  { %6407 = vmatmul.bf16.gmra.mxu0 %v6259_v61  ;;  %6442 = vmax.xlane.f32.xlu0 %v12272_v51 }
 0xaf8   :  { %v6151_v26 = vpop.f32.mrf.mxu2 }
 0xaf9   :  { %v6240_v53 = vpop.f32.mrf.mxu3  ;;  %v6064_v33 = vpop.f32.mrf.mxu1  ;;  %v6152_v23 = vadd.f32 %v6151_v26, %v6063_v40 }
 0xafa   :  { %v6065_v43 = vadd.f32 %v6064_v33, %v5976_v54 }
 0xafb   :  { %v6241_v29 = vadd.f32 %v6240_v53, %v6152_v23 }
 0xafc   :  { %v6370_v28 = vpop.f32.mrf.mxu0 }
 0xafd   :  { %v12279_v47 = vadd.f32 %v12203_v13, %v6370_v28 }
 0xaff   :  { %6444 = vmax.xlane.f32.xlu1 %v12279_v47 }
 0xb00   :  { %v6153_v45 = vpop.f32.mrf.mxu2 }
 0xb01   :  { %v6154_v19 = vadd.f32 %v6153_v45, %v6065_v43  ;;  %v6242_v14 = vpop.f32.mrf.mxu3 }
 0xb03   :  { %v6243_v31 = vadd.f32 %v6242_v14, %v6154_v19 }
 0xb04   :  { %v6373_v5 = vpop.f32.mrf.mxu0 }
 0xb05   :  { %v6260_v16 = vpack.c.bf16 %v6243_v31, %v6241_v29  ;;  %v12283_v3 = vadd.f32 %v12203_v13, %v6373_v5 }
 0xb07   :  { %6412 = vmatmul.bf16.gmra.mxu0 %v6260_v16  ;;  %6446 = vmax.xlane.f32.xlu2 %v12283_v3 }
 0xb0a   :  { %v6419_v8 = vpop.xlane.xlu0 %6418 }
 0xb0b   :  { %v6482_v20 = vsub.f32 %v12206_v62, %v6419_v8 }
 0xb0c   :  { %v6375_v15 = vpop.f32.mrf.mxu0 }
 0xb0d   :  { %v6514_v21 = vmul.f32 1.442695, %v6482_v20  ;;  %v12288_v6 = vadd.f32 %v12203_v13, %v6375_v15 }
 0xb0f   :  { %8759 = vpow2.f32 %v6514_v21  ;;  %6448 = vmax.xlane.f32.xlu0 %v12288_v6 }
 0xb12   :  { %v6421_v34 = vpop.xlane.xlu0 %6420 }
 0xb13   :  { %v6483_v18 = vsub.f32 %v12213_v52, %v6421_v34 }
 0xb14   :  { %v6378_v7 = vpop.f32.mrf.mxu0 }
 0xb15   :  { %v12292_v44 = vpop.eup %8759  ;;  %v6516_v12 = vmul.f32 1.442695, %v6483_v18  ;;  %v12295_v50 = vadd.f32 %v12203_v13, %v6378_v7 }
 0xb16   :  { %6578 = vadd.xlane.f32.xlu2 %v12292_v44 }
 0xb17   :  { %8761 = vpow2.f32 %v6516_v12  ;;  %6450 = vmax.xlane.f32.xlu1 %v12295_v50 }
 0xb1a   :  { %v6423_v62 = vpop.xlane.xlu1 %6422 }
 0xb1b   :  { %v6484_v11 = vsub.f32 %v12217_v60, %v6423_v62 }
 0xb1c   :  { %v6380_v2 = vpop.f32.mrf.mxu0 }
 0xb1d   :  { %v12300_v42 = vpop.eup %8761  ;;  %v6518_v17 = vmul.f32 1.442695, %v6484_v11  ;;  %v12303_v52 = vadd.f32 %v12203_v13, %v6380_v2 }
 0xb1e   :  { %6580 = vadd.xlane.f32.xlu0 %v12300_v42 }
 0xb1f   :  { %8763 = vpow2.f32 %v6518_v17  ;;  %6452 = vmax.xlane.f32.xlu2 %v12303_v52 }
 0xb22   :  { %v6425_v4 = vpop.xlane.xlu1 %6424 }
 0xb23   :  { %v6485_v57 = vsub.f32 %v12224_v30, %v6425_v4 }
 0xb24   :  { %v6383_v39 = vpop.f32.mrf.mxu0 }
 0xb25   :  { %v12308_v32 = vpop.eup %8763  ;;  %v6520_v35 = vmul.f32 1.442695, %v6485_v57  ;;  %v12311_v60 = vadd.f32 %v12203_v13, %v6383_v39 }
 0xb26   :  { %6582 = vadd.xlane.f32.xlu1 %v12308_v32 }
 0xb27   :  { %8765 = vpow2.f32 %v6520_v35  ;;  %6454 = vmax.xlane.f32.xlu0 %v12311_v60 }
 0xb2a   :  { %v6427_v27 = vpop.xlane.xlu2 %6426 }
 0xb2b   :  { %v6486_v10 = vsub.f32 %v12228_v22, %v6427_v27 }
 0xb2c   :  { %v6385_v58 = vpop.f32.mrf.mxu0 }
 0xb2d   :  { %v12316_v49 = vpop.eup %8765  ;;  %v6522_v25 = vmul.f32 1.442695, %v6486_v10  ;;  %v12319_v30 = vadd.f32 %v12203_v13, %v6385_v58 }
 0xb2e   :  { %6584 = vadd.xlane.f32.xlu2 %v12316_v49 }
 0xb2f   :  { %8767 = vpow2.f32 %v6522_v25  ;;  %6456 = vmax.xlane.f32.xlu1 %v12319_v30 }
 0xb32   :  { %v6429_v63 = vpop.xlane.xlu2 %6428 }
 0xb33   :  { %v6487_v9 = vsub.f32 %v12235_v24, %v6429_v63 }
 0xb34   :  { %v6388_v38 = vpop.f32.mrf.mxu0 }
 0xb35   :  { %v12324_v59 = vpop.eup %8767  ;;  %v6524_v41 = vmul.f32 1.442695, %v6487_v9  ;;  %v12327_v22 = vadd.f32 %v12203_v13, %v6388_v38 }
 0xb36   :  { %6586 = vadd.xlane.f32.xlu0 %v12324_v59 }
 0xb37   :  { %8769 = vpow2.f32 %v6524_v41  ;;  %6458 = vmax.xlane.f32.xlu2 %v12327_v22 }
 0xb3a   :  { %v6431_v36 = vpop.xlane.xlu0 %6430 }
 0xb3b   :  { %v6488_v46 = vsub.f32 %v12239_v1, %v6431_v36 }
 0xb3c   :  { %v6390_v61 = vpop.f32.mrf.mxu0 }
 0xb3d   :  { %v12332_v26 = vpop.eup %8769  ;;  %v6526_v53 = vmul.f32 1.442695, %v6488_v46  ;;  %v12335_v24 = vadd.f32 %v12203_v13, %v6390_v61 }
 0xb3e   :  { %6588 = vadd.xlane.f32.xlu1 %v12332_v26 }
 0xb3f   :  { %8771 = vpow2.f32 %v6526_v53  ;;  %6460 = vmax.xlane.f32.xlu0 %v12335_v24 }
 0xb42   :  { %v6433_v33 = vpop.xlane.xlu1 %6432 }
 0xb43   :  { %v6489_v28 = vsub.f32 %v12246_v37, %v6433_v33 }
 0xb44   :  { %v6393_v40 = vpop.f32.mrf.mxu0 }
 0xb45   :  { %v12340_v54 = vpop.eup %8771  ;;  %v6528_v23 = vmul.f32 1.442695, %v6489_v28  ;;  %v12343_v1 = vadd.f32 %v12203_v13, %v6393_v40 }
 0xb46   :  { %6590 = vadd.xlane.f32.xlu2 %v12340_v54 }
 0xb47   :  { %8773 = vpow2.f32 %v6528_v23  ;;  %6462 = vmax.xlane.f32.xlu1 %v12343_v1 }
 0xb4a   :  { %v6435_v43 = vpop.xlane.xlu2 %6434 }
 0xb4b   :  { %v6490_v45 = vsub.f32 %v12250_v48, %v6435_v43 }
 0xb4c   :  { %v6395_v19 = vpop.f32.mrf.mxu0 }
 0xb4d   :  { %v12348_v14 = vpop.eup %8773  ;;  %v6530_v29 = vmul.f32 1.442695, %v6490_v45  ;;  %v12351_v37 = vadd.f32 %v12203_v13, %v6395_v19 }
 0xb4e   :  { %6592 = vadd.xlane.f32.xlu0 %v12348_v14 }
 0xb4f   :  { %8775 = vpow2.f32 %v6530_v29  ;;  %6464 = vmax.xlane.f32.xlu2 %v12351_v37 }
 0xb52   :  { %v6437_v31 = vpop.xlane.xlu0 %6436 }
 0xb53   :  { %v6491_v5 = vsub.f32 %v12257_v55, %v6437_v31 }
 0xb54   :  { %v6398_v16 = vpop.f32.mrf.mxu0 }
 0xb55   :  { %v12356_v8 = vpop.eup %8775  ;;  %v6532_v20 = vmul.f32 1.442695, %v6491_v5  ;;  %v12359_v48 = vadd.f32 %v12203_v13, %v6398_v16 }
 0xb56   :  { %6594 = vadd.xlane.f32.xlu1 %v12356_v8 }
 0xb57   :  { %8777 = vpow2.f32 %v6532_v20  ;;  %6466 = vmax.xlane.f32.xlu0 %v12359_v48 }
 0xb5a   :  { %v6439_v15 = vpop.xlane.xlu1 %6438 }
 0xb5b   :  { %v6492_v21 = vsub.f32 %v12261_v56, %v6439_v15 }
 0xb5c   :  { %v6400_v34 = vpop.f32.mrf.mxu0 }
 0xb5d   :  { %v12364_v18 = vpop.eup %8777  ;;  %v6534_v7 = vmul.f32 1.442695, %v6492_v21  ;;  %v12367_v55 = vadd.f32 %v12203_v13, %v6400_v34 }
 0xb5e   :  { %6596 = vadd.xlane.f32.xlu2 %v12364_v18 }
 0xb5f   :  { %8779 = vpow2.f32 %v6534_v7  ;;  %6468 = vmax.xlane.f32.xlu1 %v12367_v55 }
 0xb62   :  { %v6441_v35 = vpop.xlane.xlu2 %6440 }
 0xb63   :  { %v6493_v33 = vsub.f32 %v12268_v0, %v6441_v35 }
 0xb64   :  { %v6403_v12 = vpop.f32.mrf.mxu0 }
 0xb65   :  { %v12371_v62 = vpop.eup %8779  ;;  %v12374_v11 = vadd.f32 %v12203_v13, %v6403_v12  ;;  %v6536_v40 = vmul.f32 1.442695, %v6493_v33 }
 0xb66   :  { %6598 = vadd.xlane.f32.xlu0 %v12371_v62 }
 0xb67   :  { %6470 = vmax.xlane.f32.xlu2 %v12374_v11 }
 0xb6a   :  { %v6443_v4 = vpop.xlane.xlu0 %6442 }
 0xb6b   :  { %v6494_v39 = vsub.f32 %v12272_v51, %v6443_v4 }
 0xb6c   :  { %v6405_v56 = vpop.f32.mrf.mxu0 }
 0xb6d   :  { %v12379_v2 = vadd.f32 %v12203_v13, %v6405_v56  ;;  %v6538_v27 = vmul.f32 1.442695, %v6494_v39 }
 0xb6f   :  { %6472 = vmax.xlane.f32.xlu0 %v12379_v2  ;;  %8781 = vpow2.f32 %v6538_v27 }
 0xb72   :  { %v6445_v58 = vpop.xlane.xlu1 %6444 }
 0xb73   :  { %v6495_v63 = vsub.f32 %v12279_v47, %v6445_v58 }
 0xb74   :  { %v6408_v17 = vpop.f32.mrf.mxu0 }
 0xb75   :  { %v12383_v57 = vadd.f32 %v12203_v13, %v6408_v17  ;;  %v6540_v36 = vmul.f32 1.442695, %v6495_v63  ;;  %v12396_v53 = vpop.eup %8781 }
 0xb77   :  { %6474 = vmax.xlane.f32.xlu1 %v12383_v57 }
 0xb7a   :  { %v6447_v9 = vpop.xlane.xlu2 %6446 }
 0xb7b   :  { %v6496_v31 = vsub.f32 %v12283_v3, %v6447_v9 }
 0xb7c   :  { %v6410_v10 = vpop.f32.mrf.mxu0 }
 0xb7d   :  { %v12388_v25 = vadd.f32 %v12203_v13, %v6410_v10 }
 0xb7f   :  { %6476 = vmax.xlane.f32.xlu2 %v12388_v25 }
 0xb82   :  { %v6449_v38 = vpop.xlane.xlu0 %6448 }
 0xb83   :  { %v6497_v41 = vsub.f32 %v12288_v6, %v6449_v38 }
 0xb84   :  { %v6413_v46 = vpop.f32.mrf.mxu0 }
 0xb85   :  { %v6544_v61 = vmul.f32 1.442695, %v6497_v41  ;;  %v12394_v51 = vadd.f32 %v12203_v13, %v6413_v46 }
 0xb87   :  { %8783 = vpow2.f32 %v6544_v61  ;;  %6478 = vmax.xlane.f32.xlu0 %v12394_v51  ;;  %6602 = vadd.xlane.f32.xlu2 %v12396_v53 }
 0xb88   :  { %8785 = vpow2.f32 %v6540_v36 }
 0xb89   :  { %v6579_v47 = vpop.xlane.xlu2 %6578 }
 0xb8a   :  { %8787 = vrcp.f32 %v6579_v47  ;;  %v6451_v28 = vpop.xlane.xlu1 %6450 }
 0xb8b   :  { %v6498_v6 = vsub.f32 %v12295_v50, %v6451_v28 }
 0xb8c   :  { %v6415_v23 = vpop.f32.mrf.mxu0 }
 0xb8d   :  { %v12402_v43 = vpop.eup %8783  ;;  %v6546_v45 = vmul.f32 1.442695, %v6498_v6  ;;  %v12405_v19 = vadd.f32 %v12203_v13, %v6415_v23  ;;  %v6542_v13 = vmul.f32 1.442695, %v6496_v31 }
 0xb8e   :  { %v12407_v29 = vpop.eup %8785 }
 0xb8f   :  { %8789 = vpow2.f32 %v6546_v45  ;;  %6480 = vmax.xlane.f32.xlu1 %v12405_v19  ;;  %6604 = vadd.xlane.f32.xlu0 %v12407_v29 }
 0xb90   :  { %v8788_v0 = vpop.eup %8787  ;;  %8791 = vpow2.f32 %v6536_v40  ;;  %6608 = vadd.xlane.f32.xlu2 %v12402_v43 }
 0xb91   :  { %v6674_v50 = vmul.f32 %v8788_v0, %v12292_v44  ;;  %v6581_v5 = vpop.xlane.xlu0 %6580 }
 0xb92   :  { %8793 = vrcp.f32 %v6581_v5  ;;  %v6453_v20 = vpop.xlane.xlu2 %6452 }
 0xb93   :  { %6706 = vst [vmem:[#allocation11] sm:$0xff] %v6674_v50  ;;  %8795 = vpow2.f32 %v6542_v13  ;;  %v6499_v3 = vsub.f32 %v12303_v52, %v6453_v20 }
 0xb95   :  { %v12414_v16 = vpop.eup %8789  ;;  %v6548_v56 = vmul.f32 1.442695, %v6499_v3 }
 0xb96   :  { %v12416_v15 = vpop.eup %8791 }
 0xb97   :  { %6600 = vadd.xlane.f32.xlu1 %v12416_v15  ;;  %6610 = vadd.xlane.f32.xlu0 %v12414_v16 }
 0xb98   :  { %v8794_v21 = vpop.eup %8793 }
 0xb99   :  { %v6675_v34 = vmul.f32 %v8794_v21, %v12300_v42  ;;  %v6583_v44 = vpop.xlane.xlu1 %6582  ;;  %v12423_v4 = vpop.eup %8795 }
 0xb9a   :  { %8797 = vrcp.f32 %v6583_v44  ;;  %v6455_v7 = vpop.xlane.xlu0 %6454 }
 0xb9b   :  { %6707 = vst [vmem:[#allocation11 + $0x8] sm:$0xff] %v6675_v34  ;;  %v6500_v12 = vsub.f32 %v12311_v60, %v6455_v7 }
 0xb9d   :  { %v6550_v17 = vmul.f32 1.442695, %v6500_v12 }
 0xb9f   :  { %8799 = vpow2.f32 %v6550_v17  ;;  %6606 = vadd.xlane.f32.xlu1 %v12423_v4 }
 0xba0   :  { %v8798_v39 = vpop.eup %8797  ;;  %8801 = vpow2.f32 %v6548_v56 }
 0xba1   :  { %v6676_v35 = vmul.f32 %v8798_v39, %v12308_v32  ;;  %v6585_v52 = vpop.xlane.xlu2 %6584 }
 0xba2   :  { %8803 = vrcp.f32 %v6585_v52  ;;  %v6457_v42 = vpop.xlane.xlu1 %6456 }
 0xba3   :  { %6708 = vst [vmem:[#allocation11 + $0x10] sm:$0xff] %v6676_v35  ;;  %v6501_v27 = vsub.f32 %v12319_v30, %v6457_v42 }
 0xba5   :  { %v12428_v10 = vpop.eup %8799  ;;  %v6552_v60 = vmul.f32 1.442695, %v6501_v27 }
 0xba6   :  { %v12430_v58 = vpop.eup %8801  ;;  %6614 = vadd.xlane.f32.xlu2 %v12428_v10 }
 0xba7   :  { %8805 = vpow2.f32 %v6552_v60  ;;  %6612 = vadd.xlane.f32.xlu1 %v12430_v58 }
 0xba8   :  { %v8804_v63 = vpop.eup %8803 }
 0xba9   :  { %v6677_v9 = vmul.f32 %v8804_v63, %v12316_v49  ;;  %v6587_v32 = vpop.xlane.xlu0 %6586 }
 0xbaa   :  { %8807 = vrcp.f32 %v6587_v32  ;;  %v6459_v38 = vpop.xlane.xlu2 %6458 }
 0xbab   :  { %6709 = vst [vmem:[#allocation11 + $0x18] sm:$0xff] %v6677_v9  ;;  %v6502_v41 = vsub.f32 %v12327_v22, %v6459_v38 }
 0xbad   :  { %v12436_v30 = vpop.eup %8805  ;;  %v6554_v36 = vmul.f32 1.442695, %v6502_v41 }
 0xbae   :  { %6616 = vadd.xlane.f32.xlu0 %v12436_v30 }
 0xbaf   :  { %8809 = vpow2.f32 %v6554_v36 }
 0xbb0   :  { %v8808_v46 = vpop.eup %8807 }
 0xbb1   :  { %v6678_v61 = vmul.f32 %v8808_v46, %v12324_v59  ;;  %v6589_v33 = vpop.xlane.xlu1 %6588 }
 0xbb2   :  { %8811 = vrcp.f32 %v6589_v33  ;;  %v6461_v47 = vpop.xlane.xlu0 %6460 }
 0xbb3   :  { %6710 = vst [vmem:[#allocation11 + $0x20] sm:$0xff] %v6678_v61  ;;  %v6503_v49 = vsub.f32 %v12335_v24, %v6461_v47 }
 0xbb5   :  { %v12441_v28 = vpop.eup %8809  ;;  %v6556_v6 = vmul.f32 1.442695, %v6503_v49 }
 0xbb6   :  { %6618 = vadd.xlane.f32.xlu1 %v12441_v28 }
 0xbb7   :  { %8813 = vpow2.f32 %v6556_v6 }
 0xbb8   :  { %v8812_v22 = vpop.eup %8811 }
 0xbb9   :  { %v6679_v40 = vmul.f32 %v8812_v22, %v12332_v26  ;;  %v6591_v23 = vpop.xlane.xlu2 %6590 }
 0xbba   :  { %8815 = vrcp.f32 %v6591_v23  ;;  %v6463_v45 = vpop.xlane.xlu1 %6462 }
 0xbbb   :  { %6711 = vst [vmem:[#allocation11 + $0x28] sm:$0xff] %v6679_v40  ;;  %v6504_v59 = vsub.f32 %v12343_v1, %v6463_v45 }
 0xbbd   :  { %v12446_v0 = vpop.eup %8813  ;;  %v6558_v31 = vmul.f32 1.442695, %v6504_v59 }
 0xbbe   :  { %6620 = vadd.xlane.f32.xlu2 %v12446_v0 }
 0xbbf   :  { %8817 = vpow2.f32 %v6558_v31 }
 0xbc0   :  { %v8816_v24 = vpop.eup %8815 }
 0xbc1   :  { %v6680_v50 = vmul.f32 %v8816_v24, %v12340_v54  ;;  %v6593_v5 = vpop.xlane.xlu0 %6592 }
 0xbc2   :  { %8819 = vrcp.f32 %v6593_v5  ;;  %v6465_v13 = vpop.xlane.xlu2 %6464 }
 0xbc3   :  { %6712 = vst [vmem:[#allocation11 + $0x30] sm:$0xff] %v6680_v50  ;;  %v6505_v26 = vsub.f32 %v12351_v37, %v6465_v13 }
 0xbc5   :  { %v12451_v20 = vpop.eup %8817  ;;  %v6560_v21 = vmul.f32 1.442695, %v6505_v26 }
 0xbc6   :  { %6622 = vadd.xlane.f32.xlu0 %v12451_v20 }
 0xbc7   :  { %8821 = vpow2.f32 %v6560_v21 }
 0xbc8   :  { %v8820_v1 = vpop.eup %8819 }
 0xbc9   :  { %v6681_v3 = vmul.f32 %v8820_v1, %v12348_v14  ;;  %v6595_v34 = vpop.xlane.xlu1 %6594 }
 0xbca   :  { %8823 = vrcp.f32 %v6595_v34  ;;  %v6467_v44 = vpop.xlane.xlu0 %6466 }
 0xbcb   :  { %6713 = vst [vmem:[#allocation11 + $0x38] sm:$0xff] %v6681_v3  ;;  %v6506_v54 = vsub.f32 %v12359_v48, %v6467_v44 }
 0xbcd   :  { %v12456_v7 = vpop.eup %8821  ;;  %v6562_v12 = vmul.f32 1.442695, %v6506_v54 }
 0xbce   :  { %6624 = vadd.xlane.f32.xlu1 %v12456_v7 }
 0xbcf   :  { %8825 = vpow2.f32 %v6562_v12 }
 0xbd0   :  { %v8824_v37 = vpop.eup %8823 }
 0xbd1   :  { %v6682_v56 = vmul.f32 %v8824_v37, %v12356_v8  ;;  %v6597_v17 = vpop.xlane.xlu2 %6596 }
 0xbd2   :  { %8827 = vrcp.f32 %v6597_v17  ;;  %v6469_v39 = vpop.xlane.xlu1 %6468 }
 0xbd3   :  { %6714 = vst [vmem:[#allocation11 + $0x40] sm:$0xff] %v6682_v56  ;;  %v6507_v14 = vsub.f32 %v12367_v55, %v6469_v39 }
 0xbd5   :  { %v12461_v35 = vpop.eup %8825  ;;  %v6564_v52 = vmul.f32 1.442695, %v6507_v14 }
 0xbd6   :  { %6626 = vadd.xlane.f32.xlu2 %v12461_v35 }
 0xbd7   :  { %8829 = vpow2.f32 %v6564_v52 }
 0xbd8   :  { %v8828_v48 = vpop.eup %8827 }
 0xbd9   :  { %v6683_v42 = vmul.f32 %v8828_v48, %v12364_v18  ;;  %v6599_v27 = vpop.xlane.xlu0 %6598 }
 0xbda   :  { %8831 = vrcp.f32 %v6599_v27  ;;  %v6471_v60 = vpop.xlane.xlu2 %6470 }
 0xbdb   :  { %6715 = vst [vmem:[#allocation11 + $0x48] sm:$0xff] %v6683_v42  ;;  %v6508_v8 = vsub.f32 %v12374_v11, %v6471_v60 }
 0xbdd   :  { %v12466_v63 = vpop.eup %8829  ;;  %v6566_v9 = vmul.f32 1.442695, %v6508_v8 }
 0xbde   :  { %6628 = vadd.xlane.f32.xlu0 %v12466_v63 }
 0xbdf   :  { %8833 = vpow2.f32 %v6566_v9 }
 0xbe0   :  { %v8832_v55 = vpop.eup %8831 }
 0xbe1   :  { %v6684_v32 = vmul.f32 %v8832_v55, %v12371_v62 }
 0xbe2   :  { %v6473_v38 = vpop.xlane.xlu0 %6472 }
 0xbe3   :  { %6716 = vst [vmem:[#allocation11 + $0x50] sm:$0xff] %v6684_v32  ;;  %v6509_v41 = vsub.f32 %v12379_v2, %v6473_v38 }
 0xbe5   :  { %v12471_v18 = vpop.eup %8833  ;;  %v6568_v36 = vmul.f32 1.442695, %v6509_v41 }
 0xbe6   :  { %6630 = vadd.xlane.f32.xlu1 %v12471_v18 }
 0xbe7   :  { %8835 = vpow2.f32 %v6568_v36 }
 0xbea   :  { %v6475_v11 = vpop.xlane.xlu1 %6474 }
 0xbeb   :  { %v6510_v46 = vsub.f32 %v12383_v57, %v6475_v11 }
 0xbed   :  { %v12475_v61 = vpop.eup %8835  ;;  %v6570_v33 = vmul.f32 1.442695, %v6510_v46 }
 0xbee   :  { %6632 = vadd.xlane.f32.xlu2 %v12475_v61 }
 0xbef   :  { %8837 = vpow2.f32 %v6570_v33 }
 0xbf2   :  { %v6477_v62 = vpop.xlane.xlu2 %6476 }
 0xbf3   :  { %v6511_v47 = vsub.f32 %v12388_v25, %v6477_v62 }
 0xbf5   :  { %v12479_v49 = vpop.eup %8837  ;;  %v6572_v2 = vmul.f32 1.442695, %v6511_v47 }
 0xbf6   :  { %6634 = vadd.xlane.f32.xlu0 %v12479_v49 }
 0xbf7   :  { %8839 = vpow2.f32 %v6572_v2 }
 0xbfa   :  { %v6603_v6 = vpop.xlane.xlu2 %6602  ;;  %v6479_v22 = vpop.xlane.xlu0 %6478 }
 0xbfb   :  { %8841 = vrcp.f32 %v6603_v6  ;;  %v6512_v57 = vsub.f32 %v12394_v51, %v6479_v22 }
 0xbfd   :  { %v12483_v40 = vpop.eup %8839  ;;  %v6574_v23 = vmul.f32 1.442695, %v6512_v57 }
 0xbfe   :  { %6636 = vadd.xlane.f32.xlu1 %v12483_v40 }
 0xbff   :  { %8843 = vpow2.f32 %v6574_v23 }
 0xc01   :  { %v8842_v45 = vpop.eup %8841 }
 0xc02   :  { %v6686_v25 = vmul.f32 %v8842_v45, %v12396_v53  ;;  %v6481_v59 = vpop.xlane.xlu1 %6480  ;;  %v6605_v31 = vpop.xlane.xlu0 %6604 }
 0xc03   :  { %v6513_v24 = vsub.f32 %v12405_v19, %v6481_v59  ;;  %v6609_v50 = vpop.xlane.xlu2 %6608  ;;  %8845 = vrcp.f32 %v6605_v31 }
 0xc04   :  { %6718 = vst [vmem:[#allocation11 + $0x60] sm:$0xff] %v6686_v25  ;;  %8847 = vrcp.f32 %v6609_v50 }
 0xc05   :  { %v12488_v5 = vpop.eup %8843  ;;  %v6576_v51 = vmul.f32 1.442695, %v6513_v24 }
 0xc06   :  { %6638 = vadd.xlane.f32.xlu2 %v12488_v5 }
 0xc07   :  { %8849 = vpow2.f32 %v6576_v51 }
 0xc09   :  { %v8846_v13 = vpop.eup %8845 }
 0xc0a   :  { %v8848_v26 = vpop.eup %8847  ;;  %v6687_v21 = vmul.f32 %v8846_v13, %v12407_v29  ;;  %v6601_v1 = vpop.xlane.xlu1 %6600 }
 0xc0b   :  { %v6611_v53 = vpop.xlane.xlu0 %6610  ;;  %v6689_v3 = vmul.f32 %v8848_v26, %v12402_v43  ;;  %8851 = vrcp.f32 %v6601_v1 }
 0xc0c   :  { %6719 = vst [vmem:[#allocation11 + $0x68] sm:$0xff] %v6687_v21  ;;  %8853 = vrcp.f32 %v6611_v53 }
 0xc0d   :  { %v12493_v19 = vpop.eup %8849  ;;  %6721 = vst [vmem:[#allocation11 + $0x78] sm:$0xff] %v6689_v3 }
 0xc0e   :  { %6640 = vadd.xlane.f32.xlu0 %v12493_v19 }
 0xc11   :  { %v8852_v34 = vpop.eup %8851 }
 0xc12   :  { %v8854_v44 = vpop.eup %8853  ;;  %v6685_v54 = vmul.f32 %v8852_v34, %v12416_v15  ;;  %v6607_v12 = vpop.xlane.xlu1 %6606 }
 0xc13   :  { %v6690_v37 = vmul.f32 %v8854_v44, %v12414_v16  ;;  %8855 = vrcp.f32 %v6607_v12 }
 0xc14   :  { %6717 = vst [vmem:[#allocation11 + $0x58] sm:$0xff] %v6685_v54 }
 0xc15   :  { %6722 = vst [vmem:[#allocation11 + $0x80] sm:$0xff] %v6690_v37 }
 0xc19   :  { %v8856_v29 = vpop.eup %8855  ;;  %v6615_v43 = vpop.xlane.xlu2 %6614 }
 0xc1a   :  { %v6688_v56 = vmul.f32 %v8856_v29, %v12423_v4  ;;  %8857 = vrcp.f32 %v6615_v43  ;;  %v6613_v17 = vpop.xlane.xlu1 %6612 }
 0xc1b   :  { %8859 = vrcp.f32 %v6613_v17 }
 0xc1c   :  { %6720 = vst [vmem:[#allocation11 + $0x70] sm:$0xff] %v6688_v56 }
 0xc20   :  { %v8858_v39 = vpop.eup %8857 }
 0xc21   :  { %v8860_v14 = vpop.eup %8859  ;;  %v6692_v52 = vmul.f32 %v8858_v39, %v12428_v10  ;;  %v6617_v48 = vpop.xlane.xlu0 %6616 }
 0xc22   :  { %v6691_v15 = vmul.f32 %v8860_v14, %v12430_v58  ;;  %8861 = vrcp.f32 %v6617_v48 }
 0xc23   :  { %6724 = vst [vmem:[#allocation11 + $0x90] sm:$0xff] %v6692_v52 }
 0xc24   :  { %6723 = vst [vmem:[#allocation11 + $0x88] sm:$0xff] %v6691_v15 }
 0xc28   :  { %v8862_v16 = vpop.eup %8861 }
 0xc29   :  { %v6693_v42 = vmul.f32 %v8862_v16, %v12436_v30  ;;  %v6619_v27 = vpop.xlane.xlu1 %6618 }
 0xc2a   :  { %8863 = vrcp.f32 %v6619_v27 }
 0xc2b   :  { %6725 = vst [vmem:[#allocation11 + $0x98] sm:$0xff] %v6693_v42 }
 0xc30   :  { %v8864_v4 = vpop.eup %8863 }
 0xc31   :  { %v6694_v60 = vmul.f32 %v8864_v4, %v12441_v28  ;;  %v6621_v8 = vpop.xlane.xlu2 %6620 }
 0xc32   :  { %8865 = vrcp.f32 %v6621_v8 }
 0xc33   :  { %6726 = vst [vmem:[#allocation11 + $0xa0] sm:$0xff] %v6694_v60 }
 0xc38   :  { %v8866_v9 = vpop.eup %8865 }
 0xc39   :  { %v6695_v10 = vmul.f32 %v8866_v9, %v12446_v0  ;;  %v6623_v55 = vpop.xlane.xlu0 %6622 }
 0xc3a   :  { %8867 = vrcp.f32 %v6623_v55 }
 0xc3b   :  { %6727 = vst [vmem:[#allocation11 + $0xa8] sm:$0xff] %v6695_v10 }
 0xc40   :  { %v8868_v58 = vpop.eup %8867 }
 0xc41   :  { %v6696_v32 = vmul.f32 %v8868_v58, %v12451_v20  ;;  %v6625_v38 = vpop.xlane.xlu1 %6624 }
 0xc42   :  { %8869 = vrcp.f32 %v6625_v38 }
 0xc43   :  { %6728 = vst [vmem:[#allocation11 + $0xb0] sm:$0xff] %v6696_v32 }
 0xc48   :  { %v8870_v30 = vpop.eup %8869 }
 0xc49   :  { %v6697_v41 = vmul.f32 %v8870_v30, %v12456_v7  ;;  %v6627_v36 = vpop.xlane.xlu2 %6626 }
 0xc4a   :  { %8871 = vrcp.f32 %v6627_v36 }
 0xc4b   :  { %6729 = vst [vmem:[#allocation11 + $0xb8] sm:$0xff] %v6697_v41 }
 0xc50   :  { %v8872_v28 = vpop.eup %8871 }
 0xc51   :  { %v6698_v11 = vmul.f32 %v8872_v28, %v12461_v35  ;;  %v6629_v46 = vpop.xlane.xlu0 %6628 }
 0xc52   :  { %8873 = vrcp.f32 %v6629_v46 }
 0xc53   :  { %6730 = vst [vmem:[#allocation11 + $0xc0] sm:$0xff] %v6698_v11 }
 0xc58   :  { %v8874_v0 = vpop.eup %8873 }
 0xc59   :  { %v6699_v33 = vmul.f32 %v8874_v0, %v12466_v63  ;;  %v6631_v62 = vpop.xlane.xlu1 %6630 }
 0xc5a   :  { %8875 = vrcp.f32 %v6631_v62 }
 0xc5b   :  { %6731 = vst [vmem:[#allocation11 + $0xc8] sm:$0xff] %v6699_v33 }
 0xc60   :  { %v8876_v20 = vpop.eup %8875 }
 0xc61   :  { %v6700_v47 = vmul.f32 %v8876_v20, %v12471_v18  ;;  %v6633_v2 = vpop.xlane.xlu2 %6632 }
 0xc62   :  { %8877 = vrcp.f32 %v6633_v2 }
 0xc63   :  { %6732 = vst [vmem:[#allocation11 + $0xd0] sm:$0xff] %v6700_v47 }
 0xc68   :  { %v8878_v7 = vpop.eup %8877 }
 0xc69   :  { %v6701_v6 = vmul.f32 %v8878_v7, %v12475_v61  ;;  %v6635_v22 = vpop.xlane.xlu0 %6634 }
 0xc6a   :  { %8879 = vrcp.f32 %v6635_v22 }
 0xc6b   :  { %6733 = vst [vmem:[#allocation11 + $0xd8] sm:$0xff] %v6701_v6 }
 0xc70   :  { %v8880_v35 = vpop.eup %8879 }
 0xc71   :  { %v6702_v57 = vmul.f32 %v8880_v35, %v12479_v49  ;;  %v6637_v23 = vpop.xlane.xlu1 %6636 }
 0xc72   :  { %8881 = vrcp.f32 %v6637_v23 }
 0xc73   :  { %6734 = vst [vmem:[#allocation11 + $0xe0] sm:$0xff] %v6702_v57 }
 0xc78   :  { %v8882_v63 = vpop.eup %8881 }
 0xc79   :  { %v6703_v45 = vmul.f32 %v8882_v63, %v12483_v40  ;;  %v6639_v25 = vpop.xlane.xlu2 %6638 }
 0xc7a   :  { %8883 = vrcp.f32 %v6639_v25 }
 0xc7b   :  { %6735 = vst [vmem:[#allocation11 + $0xe8] sm:$0xff] %v6703_v45 }
 0xc80   :  { %v8884_v18 = vpop.eup %8883 }
 0xc81   :  { %v6704_v59 = vmul.f32 %v8884_v18, %v12488_v5  ;;  %v6641_v31 = vpop.xlane.xlu0 %6640 }
 0xc82   :  { %8885 = vrcp.f32 %v6641_v31 }
 0xc83   :  { %6736 = vst [vmem:[#allocation11 + $0xf0] sm:$0xff] %v6704_v59 }
 0xc88   :  { %v8886_v61 = vpop.eup %8885 }
 0xc89   :  { %v6705_v49 = vmul.f32 %v8886_v61, %v12493_v19 }
 0xc8b   :  { %6737 = vst [vmem:[#allocation11 + $0xf8] sm:$0xff] %v6705_v49 }
 0xc8c   :  { %6750 = dma.vmem_to_hbm [thread:$0]  %s6743_s30, 4096, %s6745_s10, [#allocation4], %s9055_s11, %s9055_s11, %s9056_s12  }
 0xc8d   :  { %9041 = dma.done.wait [#allocation4], 4096  }
 0xc8e   :  { %9042 = vsyncadd [#allocation4], 4294963200 }
 0xc8f   :  { %6755 = vsyncpa [#allocation3], 1 }
 0xc90   :  { %6756 = vsyncpa [#allocation6], 1 }
 0xc91   :  { %6757 = vsyncpa [#allocation9], 1 }
 0xc92   :  { %6758 = vsyncpa [#allocation4], 1 }

</bundles_post_ra>
